<compile_context>
chip_gen: v6e
topology: v6e:2x2x1
jax: 0.10.0
libtpu: 0.0.40
codegen_flags: <defaults>
</compile_context>

<pallas_src>
import functools
from types import SimpleNamespace

import jax
import jax.numpy as jnp
from jax.experimental import pallas as pl
from jax.experimental.pallas import tpu as pltpu

LEAKY_SLOPE = 0.1   # matches nn.LeakyReLU(negative_slope=0.1) in the spec
BN_EPS = 1e-5       # PyTorch BatchNorm default eps


def _round_up(x, m):
    return (x + m - 1) // m * m


# ----------------------------------------------------------------------------
# Epilogue helpers (traced inside the kernels)
# ----------------------------------------------------------------------------
def _apply_act(z, act):
    if act == "leaky":
        return jnp.where(z >= 0.0, z, LEAKY_SLOPE * z)
    if act == "sigmoid":
        return jax.nn.sigmoid(z)
    if act == "exp":
        return jnp.exp(z)
    return z  # "none"


def _apply_bn_leaky(z, g, be, *, m_valid, sigmoid_col0):
    # Training-mode BatchNorm: biased variance over the first m_valid rows.
    rows = jax.lax.broadcasted_iota(jnp.int32, z.shape, 0)
    valid = rows < m_valid
    inv_m = 1.0 / m_valid
    zv = jnp.where(valid, z, 0.0)
    mean = zv.sum(axis=0, keepdims=True) * inv_m
    d = jnp.where(valid, z - mean, 0.0)
    var = (d * d).sum(axis=0, keepdims=True) * inv_m
    inv_std = jax.lax.rsqrt(var + BN_EPS)
    bn = g * (z - mean) * inv_std + be
    out = jnp.where(bn >= 0.0, bn, LEAKY_SLOPE * bn)
    if sigmoid_col0:
        cols = jax.lax.broadcasted_iota(jnp.int32, z.shape, 1)
        out = jnp.where(cols == 0, jax.nn.sigmoid(z), out)
    return out


# ----------------------------------------------------------------------------
# Kernel 1: K-tiled matmul + bias + pointwise activation.
# Output block index_map is constant over k -> the output tile stays resident
# in VMEM across the whole K loop and is used directly as the accumulator.
# ----------------------------------------------------------------------------
def _gemm_bias_act_kernel(a_ref, w_ref, b_ref, o_ref, *, act, single_k):
    if single_k:
        z = jnp.dot(a_ref[...], w_ref[...],
                    preferred_element_type=jnp.float32) + b_ref[...]
        o_ref[...] = _apply_act(z, act)
        return

    k = pl.program_id(1)

    @pl.when(k == 0)
    def _():
        o_ref[...] = jnp.zeros_like(o_ref)

    o_ref[...] += jnp.dot(a_ref[...], w_ref[...],
                          preferred_element_type=jnp.float32)

    @pl.when(k == pl.num_programs(1) - 1)
    def _():
        o_ref[...] = _apply_act(o_ref[...] + b_ref[...], act)


# ----------------------------------------------------------------------------
# Kernel 2: matmul + bias + fused training-mode BatchNorm + LeakyReLU.
# If `sigmoid_col0`, output column 0 bypasses BN and gets sigmoid(z) instead
# (merged discriminator_head + Q_head).  Requires the full M extent in one
# block (nm == 1).
# ----------------------------------------------------------------------------
def _gemm_bias_bn_leaky_kernel(a_ref, w_ref, b_ref, g_ref, be_ref, o_ref, *,
                               m_valid, sigmoid_col0, single_k):
    if single_k:
        z = jnp.dot(a_ref[...], w_ref[...],
                    preferred_element_type=jnp.float32) + b_ref[...]
        o_ref[...] = _apply_bn_leaky(z, g_ref[...], be_ref[...],
                                     m_valid=m_valid, sigmoid_col0=sigmoid_col0)
        return

    k = pl.program_id(1)

    @pl.when(k == 0)
    def _():
        o_ref[...] = jnp.zeros_like(o_ref)

    o_ref[...] += jnp.dot(a_ref[...], w_ref[...],
                          preferred_element_type=jnp.float32)

    @pl.when(k == pl.num_programs(1) - 1)
    def _():
        z = o_ref[...] + b_ref[...]
        o_ref[...] = _apply_bn_leaky(z, g_ref[...], be_ref[...],
                                     m_valid=m_valid, sigmoid_col0=sigmoid_col0)


# ----------------------------------------------------------------------------
# Wrapper
# ----------------------------------------------------------------------------
def fused_gemm(a, w_p, b_p, *, gamma_p=None, beta_p=None, act="none",
               bn=False, sigmoid_col0=False, tk=None, m_split=1, n_out=None):
    """out = epilogue(a @ w_p + b_p).

    a:   (M, K) float; cast to bf16 here, M zero-padded (multiple of 16).
    w_p: (K, Np) bf16, pre-transposed & pre-padded at init (Np multiple of 128
         or equal to full extent).
    b_p / gamma_p / beta_p: (1, Np) f32.
    """
    M, K = a.shape
    Kp, Np = w_p.shape
    assert K == Kp, (K, Kp)

    if tk is None:
        tk = Kp
    assert Kp % tk == 0
    nk = Kp // tk
    single_k = (nk == 1)

    if (not bn) and m_split > 1:
        Mp = _round_up(M, 16 * m_split)
        tm = Mp // m_split          # "parallel" M axis -> both TCs on v7x
    else:
        Mp = _round_up(M, 16)
        tm = Mp
    nm = Mp // tm

    a_p = a.astype(jnp.bfloat16)
    if Mp != M:
        a_p = jnp.pad(a_p, ((0, Mp - M), (0, 0)))

    if bn:
        assert nm == 1, "fused BN needs the full M extent resident"
        kern = functools.partial(_gemm_bias_bn_leaky_kernel,
                                 m_valid=M, sigmoid_col0=sigmoid_col0,
                                 single_k=single_k)
        extra = (gamma_p, beta_p)
        extra_specs = [pl.BlockSpec((1, Np), lambda m, k: (0, 0)),
                       pl.BlockSpec((1, Np), lambda m, k: (0, 0))]
    else:
        kern = functools.partial(_gemm_bias_act_kernel, act=act,
                                 single_k=single_k)
        extra = ()
        extra_specs = []

    out = pl.pallas_call(
        kern,
        out_shape=jax.ShapeDtypeStruct((Mp, Np), jnp.float32),
        grid_spec=pltpu.PrefetchScalarGridSpec(
            num_scalar_prefetch=0,
            grid=(nm, nk),                                   # reduction axis last
            in_specs=[pl.BlockSpec((tm, tk), lambda m, k: (m, k)),
                      pl.BlockSpec((tk, Np), lambda m, k: (k, 0)),
                      pl.BlockSpec((1, Np), lambda m, k: (0, 0))] + extra_specs,
            out_specs=pl.BlockSpec((tm, Np), lambda m, k: (m, 0)),
        ),
        compiler_params=pltpu.CompilerParams(
            dimension_semantics=("parallel", "arbitrary")),
    )(a_p, w_p, b_p, *extra)

    if n_out is None:
        n_out = Np
    return out[:M, :n_out]


# ----------------------------------------------------------------------------
# Glue: channels-last im2col (feature order (kh, kw, C))
# ----------------------------------------------------------------------------
def im2col_nhwc(x, k=4, s=2, p=1):
    """x: (N, H, W, C) -> (N*Ho*Wo, k*k*C)."""
    N, H, W, C = x.shape
    Ho = (H + 2 * p - k) // s + 1
    Wo = (W + 2 * p - k) // s + 1
    xp = jnp.pad(x, ((0, 0), (p, p), (p, p), (0, 0)))
    cols = []
    for i in range(k):
        for j in range(k):
            cols.append(xp[:, i:i + s * Ho:s, j:j + s * Wo:s, :])   # (N,Ho,Wo,C)
    patches = jnp.stack(cols, axis=3)                               # (N,Ho,Wo,kk,C)
    return patches.reshape(N * Ho * Wo, k * k * C), Ho, Wo


# ----------------------------------------------------------------------------
# Parameter construction (PyTorch layouts) + one-time kernel-ready prep
# ----------------------------------------------------------------------------
def init_params(key, args):
    dv, cn, cv = args.discrete_var, args.category_number, args.continuous_var
    ks = jax.random.split(key, 12)
    s = 0.05

    def nrm(k, shape):
        return jax.random.normal(k, shape, jnp.float32) * s

    p = {}
    p["conv1_w"] = nrm(ks[0], (64, 1, 4, 4))
    p["conv1_b"] = nrm(ks[1], (64,))
    p["conv2_w"] = nrm(ks[2], (128, 64, 4, 4))
    p["conv2_b"] = nrm(ks[3], (128,))
    p["bn2d_g"] = jnp.ones((128,), jnp.float32)
    p["bn2d_b"] = jnp.zeros((128,), jnp.float32)
    p["fc1_w"] = nrm(ks[4], (1024, 128 * 7 * 7))
    p["fc1_b"] = nrm(ks[5], (1024,))
    p["bn1_g"] = jnp.ones((1024,), jnp.float32)
    p["bn1_b"] = jnp.zeros((1024,), jnp.float32)
    p["disc_w"] = nrm(ks[6], (1, 1024))
    p["disc_b"] = nrm(ks[7], (1,))
    p["q_w"] = nrm(ks[8], (128, 1024))
    p["q_b"] = nrm(ks[9], (128,))
    p["bnq_g"] = jnp.ones((128,), jnp.float32)
    p["bnq_b"] = jnp.zeros((128,), jnp.float32)
    p["ld_w"] = nrm(ks[10], (dv * cn, 128))
    p["ld_b"] = jnp.zeros((dv * cn,), jnp.float32)
    kmu, kvar = jax.random.split(ks[11])
    p["mu_w"] = nrm(kmu, (cv, 128))
    p["mu_b"] = jnp.zeros((cv,), jnp.float32)
    p["var_w"] = nrm(kvar, (cv, 128))
    p["var_b"] = jnp.zeros((cv,), jnp.float32)
    return p


def _row(v, n):
    v = jnp.asarray(v, jnp.float32)
    return jnp.pad(v, (0, n - v.shape[0])).reshape(1, n)


def _pad_w(w, rows, cols):
    return jnp.pad(w, ((0, rows - w.shape[0]), (0, cols - w.shape[1])))


def prepare_params(p, args):
    """One-time weight transpose / reorder / pad / bf16 cast (kernel-ready)."""
    q = {}

    # Conv weights: PyTorch (Cout,Cin,kh,kw) -> rows ordered (kh,kw,Cin), cols Cout
    w1 = p["conv1_w"].transpose(2, 3, 1, 0).reshape(16 * 1, 64)
    q["conv1_w"] = _pad_w(w1, 16, 128).astype(jnp.bfloat16)          # (16, 128)
    q["conv1_b"] = _row(p["conv1_b"], 128)

    w2 = p["conv2_w"].transpose(2, 3, 1, 0).reshape(16 * 64, 128)
    q["conv2_w"] = w2.astype(jnp.bfloat16)                           # (1024, 128)
    q["conv2_b"] = _row(p["conv2_b"], 128)
    q["bn2d_g"] = _row(p["bn2d_g"], 128)
    q["bn2d_b"] = _row(p["bn2d_b"], 128)

    # fc1: reorder input features from (C,h,w) (PyTorch NCHW flatten) to
    # (h,w,C) (our NHWC flatten), then transpose once.
    fw = p["fc1_w"].reshape(1024, 128, 7, 7).transpose(0, 2, 3, 1).reshape(1024, 6272)
    q["fc1_w"] = fw.T.astype(jnp.bfloat16)                           # (6272, 1024)
    q["fc1_b"] = _row(p["fc1_b"], 1024)
    q["bn1_g"] = _row(p["bn1_g"], 1024)
    q["bn1_b"] = _row(p["bn1_b"], 1024)

    # Merged head 1: [disc (1 col) | Q (128 cols)], padded to 256 lanes.
    h1 = jnp.concatenate([p["disc_w"], p["q_w"]], axis=0)            # (129, 1024)
    q["head1_w"] = _pad_w(h1.T, 1024, 256).astype(jnp.bfloat16)      # (1024, 256)
    q["head1_b"] = _row(jnp.concatenate([p["disc_b"], p["q_b"]]), 256)
    g = jnp.zeros((256,), jnp.float32).at[0].set(1.0).at[1:129].set(p["bnq_g"])
    be = jnp.zeros((256,), jnp.float32).at[1:129].set(p["bnq_b"])
    q["head1_g"] = g.reshape(1, 256)
    q["head1_be"] = be.reshape(1, 256)

    # Merged head 2: [latent_disc (dv*cn) | mu (cv) | var (cv)], padded to 128.
    h2 = jnp.concatenate([p["ld_w"], p["mu_w"], p["var_w"]], axis=0)  # (24, 128)
    q["head2_w"] = _pad_w(h2.T, 128, 128).astype(jnp.bfloat16)        # (128, 128)
    q["head2_b"] = _row(jnp.concatenate([p["ld_b"], p["mu_b"], p["var_b"]]), 128)
    return q


# ----------------------------------------------------------------------------
# Forward pass (mirrors Discriminator.forward)
# ----------------------------------------------------------------------------
def discriminator_forward(prep, x, args):
    N = x.shape[0]
    dv, cn, cv = args.discrete_var, args.category_number, args.continuous_var

    # --- module_shared (activations stay NHWC end-to-end) ---
    x_nhwc = jnp.transpose(x, (0, 2, 3, 1))                          # (N,28,28,1)

    # Conv1 (1->64, k4 s2 p1) + LeakyReLU(0.1): 28x28 -> 14x14
    a1, h1, w1 = im2col_nhwc(x_nhwc)                                 # (N*196, 16)
    y1 = fused_gemm(a1, prep["conv1_w"], prep["conv1_b"],
                    act="leaky", m_split=2, n_out=64)                # (N*196, 64)
    y1 = y1.reshape(N, h1, w1, 64)

    # Conv2 (64->128) + BatchNorm2d(128) + LeakyReLU (BN fused): 14x14 -> 7x7
    a2, h2, w2 = im2col_nhwc(y1)                                     # (N*49, 1024)
    y2 = fused_gemm(a2, prep["conv2_w"], prep["conv2_b"],
                    gamma_p=prep["bn2d_g"], beta_p=prep["bn2d_b"],
                    bn=True)                                         # (N*49, 128)

    # Reshape(-1, 128*7*7): fc1 weight columns were reordered at init so this
    # NHWC flatten matches PyTorch's NCHW flatten.
    y2 = y2.reshape(N, h2 * w2 * 128)

    # Linear(6272->1024) + BatchNorm1d + LeakyReLU (BN fused). tk=896 -> 7 K
    # steps, zero K padding, tiles fit comfortably in 64 MiB (v7x) VMEM.
    out = fused_gemm(y2, prep["fc1_w"], prep["fc1_b"],
                     gamma_p=prep["bn1_g"], beta_p=prep["bn1_b"],
                     bn=True, tk=896)                                # (N, 1024)

    # --- merged discriminator_head + Q_head (one GEMM) ---
    # col 0: Linear(1024->1)+Sigmoid; cols 1..128: Linear(1024->128)+BN+LeakyReLU
    h = fused_gemm(out, prep["head1_w"], prep["head1_b"],
                   gamma_p=prep["head1_g"], beta_p=prep["head1_be"],
                   bn=True, sigmoid_col0=True, n_out=129)            # (N, 129)
    # PyTorch does .squeeze() on the (N,1) disc output -> (N,) for N>1.
    dis_prob = h[:, 0]
    internal_q = h[:, 1:]                                            # (N, 128)

    # --- merged latent_disc | latent_cont_mu | latent_cont_var (one GEMM) ---
    lat = fused_gemm(internal_q, prep["head2_w"], prep["head2_b"],
                     act="none", n_out=dv * cn + 2 * cv)             # (N, 24)
    c_disc_logits = jax.nn.softmax(lat[:, :dv * cn].reshape(N, dv, cn), axis=2)
    c_cont_mu = lat[:, dv * cn:dv * cn + cv]
    c_cont_var = jnp.exp(lat[:, dv * cn + cv:])

    return dis_prob, c_disc_logits, c_cont_mu, c_cont_var


# ----------------------------------------------------------------------------
if __name__ == "__main__":
    args = SimpleNamespace(discrete_var=2, category_number=10, continuous_var=2)

    key = jax.random.PRNGKey(0)
    kx, kp = jax.random.split(key)

    # Input must be 28x28 (module hard-codes 128*7*7); batch > 1 for BatchNorm.
    x = jax.random.normal(kx, (4, 1, 28, 28), jnp.float32)
    params = init_params(kp, args)
    prep = prepare_params(params, args)   # one-time weight transpose/pad/bf16

    fwd = jax.jit(functools.partial(discriminator_forward, args=args))
    outs = jax.block_until_ready(fwd(prep, x))

    dis_prob, c_disc_logits, c_cont_mu, c_cont_var = outs
    assert dis_prob.shape == (4,)
    assert c_disc_logits.shape == (4, args.discrete_var, args.category_number)
    assert c_cont_mu.shape == (4, args.continuous_var)
    assert c_cont_var.shape == (4, args.continuous_var)
    assert bool(jnp.all(jnp.isfinite(dis_prob)))
    assert bool(jnp.all((dis_prob >= 0.0) & (dis_prob <= 1.0)))
    assert bool(jnp.all(jnp.isfinite(c_disc_logits)))
    assert bool(jnp.all(jnp.abs(jnp.sum(c_disc_logits, axis=2) - 1.0) < 1e-4))
    assert bool(jnp.all(jnp.isfinite(c_cont_mu)))
    assert bool(jnp.all(jnp.isfinite(c_cont_var)))
    assert bool(jnp.all(c_cont_var > 0.0))

    print("KERNEL_OK")
</pallas_src>

<mosaic_0001>
module attributes {stable_mosaic.version = 11 : i64} {
  func.func @_gemm_bias_act_kernel(%arg0: i32, %arg1: i32, %arg2: memref<400x16xbf16, #tpu.memory_space<vmem>>, %arg3: memref<16x128xbf16, #tpu.memory_space<vmem>>, %arg4: memref<1x128xf32, #tpu.memory_space<vmem>>, %arg5: memref<400x128xf32, #tpu.memory_space<vmem>>) attributes {dimension_semantics = [#tpu.dimension_semantics<parallel>, #tpu.dimension_semantics<arbitrary>], iteration_bounds = array<i64: 2, 1>, scalar_prefetch = 0 : i64, scratch_operands = 0 : i64, tpu.core_type = #tpu.core_type<tc>, window_params = [{transform_indices = @transform_0, window_bounds = array<i64: 400, 16>}, {transform_indices = @transform_1, window_bounds = array<i64: 16, 128>}, {pipeline_mode = #tpu.pipeline_mode<synchronous>, transform_indices = @transform_2, window_bounds = array<i64: 1, 128>}, {transform_indices = @transform_3, window_bounds = array<i64: 400, 128>}]} {
    %c0 = arith.constant 0 : index
    %c0_0 = arith.constant 0 : index
    %0 = vector.load %arg2[%c0, %c0_0] : memref<400x16xbf16, #tpu.memory_space<vmem>>, vector<400x16xbf16>
    %c0_1 = arith.constant 0 : index
    %c0_2 = arith.constant 0 : index
    %1 = vector.load %arg3[%c0_1, %c0_2] : memref<16x128xbf16, #tpu.memory_space<vmem>>, vector<16x128xbf16>
    %cst = arith.constant dense<0.000000e+00> : vector<400x128xf32>
    %2 = tpu.matmul %0, %1, %cst {dimension_numbers = #tpu.dot_dimension_numbers<[1], [0], [0], [1], [0, 0, 1, 1], [], []>} : vector<400x16xbf16>, vector<16x128xbf16>, vector<400x128xf32> -> vector<400x128xf32>
    %c0_3 = arith.constant 0 : index
    %c0_4 = arith.constant 0 : index
    %3 = vector.load %arg4[%c0_3, %c0_4] : memref<1x128xf32, #tpu.memory_space<vmem>>, vector<1x128xf32>
    %4 = vector.broadcast %3 : vector<1x128xf32> to vector<400x128xf32>
    %5 = arith.addf %2, %4 : vector<400x128xf32>
    %cst_5 = arith.constant 0.000000e+00 : f32
    %6 = vector.broadcast %cst_5 : f32 to vector<400x128xf32>
    %7 = arith.cmpf oge, %5, %6 : vector<400x128xf32>
    %cst_6 = arith.constant 1.000000e-01 : f32
    %8 = vector.broadcast %cst_6 : f32 to vector<400x128xf32>
    %9 = arith.mulf %8, %5 : vector<400x128xf32>
    %10 = arith.select %7, %5, %9 : vector<400x128xi1>, vector<400x128xf32>
    %c0_7 = arith.constant 0 : index
    %c0_8 = arith.constant 0 : index
    %11 = vector.load %arg5[%c0_7, %c0_8] : memref<400x128xf32, #tpu.memory_space<vmem>>, vector<400x128xf32>
    tpu.vector_store %arg5[%c0_7, %c0_8], %10 {strides = array<i32>} : memref<400x128xf32, #tpu.memory_space<vmem>>, vector<400x128xf32>,
    return
  }
  func.func @transform_0(%arg0: i32, %arg1: i32) -> (i32, i32) {
    %c0_i32 = arith.constant 0 : i32
    return %arg0, %arg1 : i32, i32
  }
  func.func @transform_1(%arg0: i32, %arg1: i32) -> (i32, i32) {
    %c0_i32 = arith.constant 0 : i32
    %c0_i32_0 = arith.constant 0 : i32
    return %arg1, %c0_i32 : i32, i32
  }
  func.func @transform_2(%arg0: i32, %arg1: i32) -> (i32, i32) {
    %c0_i32 = arith.constant 0 : i32
    %c0_i32_0 = arith.constant 0 : i32
    %c0_i32_1 = arith.constant 0 : i32
    return %c0_i32, %c0_i32_0 : i32, i32
  }
  func.func @transform_3(%arg0: i32, %arg1: i32) -> (i32, i32) {
    %c0_i32 = arith.constant 0 : i32
    %c0_i32_0 = arith.constant 0 : i32
    return %arg0, %c0_i32 : i32, i32
  }
}

module attributes {stable_mosaic.version = 11 : i64} {
  func.func @_gemm_bias_bn_leaky_kernel(%arg0: i32, %arg1: i32, %arg2: memref<208x1024xbf16, #tpu.memory_space<vmem>>, %arg3: memref<1024x128xbf16, #tpu.memory_space<vmem>>, %arg4: memref<1x128xf32, #tpu.memory_space<vmem>>, %arg5: memref<1x128xf32, #tpu.memory_space<vmem>>, %arg6: memref<1x128xf32, #tpu.memory_space<vmem>>, %arg7: memref<208x128xf32, #tpu.memory_space<vmem>>) attributes {dimension_semantics = [#tpu.dimension_semantics<parallel>, #tpu.dimension_semantics<arbitrary>], iteration_bounds = array<i64: 1, 1>, scalar_prefetch = 0 : i64, scratch_operands = 0 : i64, tpu.core_type = #tpu.core_type<tc>, window_params = [{transform_indices = @transform_0, window_bounds = array<i64: 208, 1024>}, {transform_indices = @transform_1, window_bounds = array<i64: 1024, 128>}, {pipeline_mode = #tpu.pipeline_mode<synchronous>, transform_indices = @transform_2, window_bounds = array<i64: 1, 128>}, {pipeline_mode = #tpu.pipeline_mode<synchronous>, transform_indices = @transform_3, window_bounds = array<i64: 1, 128>}, {pipeline_mode = #tpu.pipeline_mode<synchronous>, transform_indices = @transform_4, window_bounds = array<i64: 1, 128>}, {transform_indices = @transform_5, window_bounds = array<i64: 208, 128>}]} {
    %c0 = arith.constant 0 : index
    %c0_0 = arith.constant 0 : index
    %0 = vector.load %arg2[%c0, %c0_0] : memref<208x1024xbf16, #tpu.memory_space<vmem>>, vector<208x1024xbf16>
    %c0_1 = arith.constant 0 : index
    %c0_2 = arith.constant 0 : index
    %1 = vector.load %arg3[%c0_1, %c0_2] : memref<1024x128xbf16, #tpu.memory_space<vmem>>, vector<1024x128xbf16>
    %cst = arith.constant dense<0.000000e+00> : vector<208x128xf32>
    %2 = tpu.matmul %0, %1, %cst {dimension_numbers = #tpu.dot_dimension_numbers<[1], [0], [0], [1], [0, 0, 1, 1], [], []>} : vector<208x1024xbf16>, vector<1024x128xbf16>, vector<208x128xf32> -> vector<208x128xf32>
    %c0_3 = arith.constant 0 : index
    %c0_4 = arith.constant 0 : index
    %3 = vector.load %arg4[%c0_3, %c0_4] : memref<1x128xf32, #tpu.memory_space<vmem>>, vector<1x128xf32>
    %4 = vector.broadcast %3 : vector<1x128xf32> to vector<208x128xf32>
    %5 = arith.addf %2, %4 : vector<208x128xf32>
    %c0_5 = arith.constant 0 : index
    %c0_6 = arith.constant 0 : index
    %6 = vector.load %arg5[%c0_5, %c0_6] : memref<1x128xf32, #tpu.memory_space<vmem>>, vector<1x128xf32>
    %c0_7 = arith.constant 0 : index
    %c0_8 = arith.constant 0 : index
    %7 = vector.load %arg6[%c0_7, %c0_8] : memref<1x128xf32, #tpu.memory_space<vmem>>, vector<1x128xf32>
    %8 = tpu.iota {dimensions = array<i32: 0>} : vector<208x128xi32>
    %c196_i32 = arith.constant 196 : i32
    %9 = vector.broadcast %c196_i32 : i32 to vector<208x128xi32>
    %10 = arith.cmpi slt, %8, %9 : vector<208x128xi32>
    %cst_9 = arith.constant 0.000000e+00 : f32
    %11 = vector.broadcast %cst_9 : f32 to vector<208x128xf32>
    %12 = arith.select %10, %5, %11 : vector<208x128xi1>, vector<208x128xf32>
    %cst_10 = arith.constant dense<0.000000e+00> : vector<128xf32>
    %13 = vector.multi_reduction <add>, %12, %cst_10 [0] : vector<208x128xf32> to vector<128xf32>
    %14 = vector.shape_cast %13 : vector<128xf32> to vector<1x128xf32>
    %cst_11 = arith.constant 0.00510204071 : f32
    %15 = vector.broadcast %cst_11 : f32 to vector<1x128xf32>
    %16 = arith.mulf %14, %15 : vector<1x128xf32>
    %17 = vector.broadcast %16 : vector<1x128xf32> to vector<208x128xf32>
    %18 = arith.subf %5, %17 : vector<208x128xf32>
    %cst_12 = arith.constant 0.000000e+00 : f32
    %19 = vector.broadcast %cst_12 : f32 to vector<208x128xf32>
    %20 = arith.select %10, %18, %19 : vector<208x128xi1>, vector<208x128xf32>
    %21 = arith.mulf %20, %20 : vector<208x128xf32>
    %cst_13 = arith.constant dense<0.000000e+00> : vector<128xf32>
    %22 = vector.multi_reduction <add>, %21, %cst_13 [0] : vector<208x128xf32> to vector<128xf32>
    %23 = vector.shape_cast %22 : vector<128xf32> to vector<1x128xf32>
    %cst_14 = arith.constant 0.00510204071 : f32
    %24 = vector.broadcast %cst_14 : f32 to vector<1x128xf32>
    %25 = arith.mulf %23, %24 : vector<1x128xf32>
    %cst_15 = arith.constant 9.99999974E-6 : f32
    %26 = vector.broadcast %cst_15 : f32 to vector<1x128xf32>
    %27 = arith.addf %25, %26 : vector<1x128xf32>
    %28 = math.rsqrt %27 : vector<1x128xf32>
    %29 = vector.broadcast %16 : vector<1x128xf32> to vector<208x128xf32>
    %30 = arith.subf %5, %29 : vector<208x128xf32>
    %31 = vector.broadcast %6 : vector<1x128xf32> to vector<208x128xf32>
    %32 = arith.mulf %31, %30 : vector<208x128xf32>
    %33 = vector.broadcast %28 : vector<1x128xf32> to vector<208x128xf32>
    %34 = arith.mulf %32, %33 : vector<208x128xf32>
    %35 = vector.broadcast %7 : vector<1x128xf32> to vector<208x128xf32>
    %36 = arith.addf %34, %35 : vector<208x128xf32>
    %cst_16 = arith.constant 0.000000e+00 : f32
    %37 = vector.broadcast %cst_16 : f32 to vector<208x128xf32>
    %38 = arith.cmpf oge, %36, %37 : vector<208x128xf32>
    %cst_17 = arith.constant 1.000000e-01 : f32
    %39 = vector.broadcast %cst_17 : f32 to vector<208x128xf32>
    %40 = arith.mulf %39, %36 : vector<208x128xf32>
    %41 = arith.select %38, %36, %40 : vector<208x128xi1>, vector<208x128xf32>
    %c0_18 = arith.constant 0 : index
    %c0_19 = arith.constant 0 : index
    %42 = vector.load %arg7[%c0_18, %c0_19] : memref<208x128xf32, #tpu.memory_space<vmem>>, vector<208x128xf32>
    tpu.vector_store %arg7[%c0_18, %c0_19], %41 {strides = array<i32>} : memref<208x128xf32, #tpu.memory_space<vmem>>, vector<208x128xf32>,
    return
  }
  func.func @transform_0(%arg0: i32, %arg1: i32) -> (i32, i32) {
    %c0_i32 = arith.constant 0 : i32
    return %arg0, %arg1 : i32, i32
  }
  func.func @transform_1(%arg0: i32, %arg1: i32) -> (i32, i32) {
    %c0_i32 = arith.constant 0 : i32
    %c0_i32_0 = arith.constant 0 : i32
    return %arg1, %c0_i32 : i32, i32
  }
  func.func @transform_2(%arg0: i32, %arg1: i32) -> (i32, i32) {
    %c0_i32 = arith.constant 0 : i32
    %c0_i32_0 = arith.constant 0 : i32
    %c0_i32_1 = arith.constant 0 : i32
    return %c0_i32, %c0_i32_0 : i32, i32
  }
  func.func @transform_3(%arg0: i32, %arg1: i32) -> (i32, i32) {
    %c0_i32 = arith.constant 0 : i32
    %c0_i32_0 = arith.constant 0 : i32
    %c0_i32_1 = arith.constant 0 : i32
    return %c0_i32, %c0_i32_0 : i32, i32
  }
  func.func @transform_4(%arg0: i32, %arg1: i32) -> (i32, i32) {
    %c0_i32 = arith.constant 0 : i32
    %c0_i32_0 = arith.constant 0 : i32
    %c0_i32_1 = arith.constant 0 : i32
    return %c0_i32, %c0_i32_0 : i32, i32
  }
  func.func @transform_5(%arg0: i32, %arg1: i32) -> (i32, i32) {
    %c0_i32 = arith.constant 0 : i32
    %c0_i32_0 = arith.constant 0 : i32
    return %arg0, %c0_i32 : i32, i32
  }
}

module attributes {stable_mosaic.version = 11 : i64} {
  func.func @_gemm_bias_bn_leaky_kernel(%arg0: i32, %arg1: i32, %arg2: memref<16x896xbf16, #tpu.memory_space<vmem>>, %arg3: memref<896x1024xbf16, #tpu.memory_space<vmem>>, %arg4: memref<1x1024xf32, #tpu.memory_space<vmem>>, %arg5: memref<1x1024xf32, #tpu.memory_space<vmem>>, %arg6: memref<1x1024xf32, #tpu.memory_space<vmem>>, %arg7: memref<16x1024xf32, #tpu.memory_space<vmem>>) attributes {dimension_semantics = [#tpu.dimension_semantics<parallel>, #tpu.dimension_semantics<arbitrary>], iteration_bounds = array<i64: 1, 7>, scalar_prefetch = 0 : i64, scratch_operands = 0 : i64, tpu.core_type = #tpu.core_type<tc>, window_params = [{transform_indices = @transform_0, window_bounds = array<i64: 16, 896>}, {transform_indices = @transform_1, window_bounds = array<i64: 896, 1024>}, {pipeline_mode = #tpu.pipeline_mode<synchronous>, transform_indices = @transform_2, window_bounds = array<i64: 1, 1024>}, {pipeline_mode = #tpu.pipeline_mode<synchronous>, transform_indices = @transform_3, window_bounds = array<i64: 1, 1024>}, {pipeline_mode = #tpu.pipeline_mode<synchronous>, transform_indices = @transform_4, window_bounds = array<i64: 1, 1024>}, {transform_indices = @transform_5, window_bounds = array<i64: 16, 1024>}]} {
    %c0_i32 = arith.constant 0 : i32
    %0 = arith.cmpi eq, %arg1, %c0_i32 : i32
    %1 = arith.extui %0 : i1 to i32
    %c0_i32_0 = arith.constant 0 : i32
    %2 = arith.cmpi ne, %1, %c0_i32_0 : i32
    scf.if %2 {
      %cst_9 = arith.constant 0.000000e+00 : f32
      %12 = vector.broadcast %cst_9 : f32 to vector<16x1024xf32>
      %c0_10 = arith.constant 0 : index
      %c0_11 = arith.constant 0 : index
      %13 = vector.load %arg7[%c0_10, %c0_11] : memref<16x1024xf32, #tpu.memory_space<vmem>>, vector<16x1024xf32>
      tpu.vector_store %arg7[%c0_10, %c0_11], %12 {strides = array<i32>} : memref<16x1024xf32, #tpu.memory_space<vmem>>, vector<16x1024xf32>,
    } else {
    }
    %c0 = arith.constant 0 : index
    %c0_1 = arith.constant 0 : index
    %3 = vector.load %arg7[%c0, %c0_1] : memref<16x1024xf32, #tpu.memory_space<vmem>>, vector<16x1024xf32>
    %c0_2 = arith.constant 0 : index
    %c0_3 = arith.constant 0 : index
    %4 = vector.load %arg2[%c0_2, %c0_3] : memref<16x896xbf16, #tpu.memory_space<vmem>>, vector<16x896xbf16>
    %c0_4 = arith.constant 0 : index
    %c0_5 = arith.constant 0 : index
    %5 = vector.load %arg3[%c0_4, %c0_5] : memref<896x1024xbf16, #tpu.memory_space<vmem>>, vector<896x1024xbf16>
    %cst = arith.constant dense<0.000000e+00> : vector<16x1024xf32>
    %6 = tpu.matmul %4, %5, %cst {dimension_numbers = #tpu.dot_dimension_numbers<[1], [0], [0], [1], [0, 0, 1, 1], [], []>} : vector<16x896xbf16>, vector<896x1024xbf16>, vector<16x1024xf32> -> vector<16x1024xf32>
    %7 = arith.addf %3, %6 : vector<16x1024xf32>
    %c0_6 = arith.constant 0 : index
    %c0_7 = arith.constant 0 : index
    %8 = vector.load %arg7[%c0_6, %c0_7] : memref<16x1024xf32, #tpu.memory_space<vmem>>, vector<16x1024xf32>
    tpu.vector_store %arg7[%c0_6, %c0_7], %7 {strides = array<i32>} : memref<16x1024xf32, #tpu.memory_space<vmem>>, vector<16x1024xf32>,
    %c6_i32 = arith.constant 6 : i32
    %9 = arith.cmpi eq, %arg1, %c6_i32 : i32
    %10 = arith.extui %9 : i1 to i32
    %c0_i32_8 = arith.constant 0 : i32
    %11 = arith.cmpi ne, %10, %c0_i32_8 : i32
    scf.if %11 {
      %c0_9 = arith.constant 0 : index
      %c0_10 = arith.constant 0 : index
      %12 = vector.load %arg7[%c0_9, %c0_10] : memref<16x1024xf32, #tpu.memory_space<vmem>>, vector<16x1024xf32>
      %c0_11 = arith.constant 0 : index
      %c0_12 = arith.constant 0 : index
      %13 = vector.load %arg4[%c0_11, %c0_12] : memref<1x1024xf32, #tpu.memory_space<vmem>>, vector<1x1024xf32>
      %14 = vector.broadcast %13 : vector<1x1024xf32> to vector<16x1024xf32>
      %15 = arith.addf %12, %14 : vector<16x1024xf32>
      %c0_13 = arith.constant 0 : index
      %c0_14 = arith.constant 0 : index
      %16 = vector.load %arg5[%c0_13, %c0_14] : memref<1x1024xf32, #tpu.memory_space<vmem>>, vector<1x1024xf32>
      %c0_15 = arith.constant 0 : index
      %c0_16 = arith.constant 0 : index
      %17 = vector.load %arg6[%c0_15, %c0_16] : memref<1x1024xf32, #tpu.memory_space<vmem>>, vector<1x1024xf32>
      %18 = tpu.iota {dimensions = array<i32: 0>} : vector<16x1024xi32>
      %c4_i32 = arith.constant 4 : i32
      %19 = vector.broadcast %c4_i32 : i32 to vector<16x1024xi32>
      %20 = arith.cmpi slt, %18, %19 : vector<16x1024xi32>
      %cst_17 = arith.constant 0.000000e+00 : f32
      %21 = vector.broadcast %cst_17 : f32 to vector<16x1024xf32>
      %22 = arith.select %20, %15, %21 : vector<16x1024xi1>, vector<16x1024xf32>
      %cst_18 = arith.constant dense<0.000000e+00> : vector<1024xf32>
      %23 = vector.multi_reduction <add>, %22, %cst_18 [0] : vector<16x1024xf32> to vector<1024xf32>
      %24 = vector.shape_cast %23 : vector<1024xf32> to vector<1x1024xf32>
      %cst_19 = arith.constant 2.500000e-01 : f32
      %25 = vector.broadcast %cst_19 : f32 to vector<1x1024xf32>
      %26 = arith.mulf %24, %25 : vector<1x1024xf32>
      %27 = vector.broadcast %26 : vector<1x1024xf32> to vector<16x1024xf32>
      %28 = arith.subf %15, %27 : vector<16x1024xf32>
      %cst_20 = arith.constant 0.000000e+00 : f32
      %29 = vector.broadcast %cst_20 : f32 to vector<16x1024xf32>
      %30 = arith.select %20, %28, %29 : vector<16x1024xi1>, vector<16x1024xf32>
      %31 = arith.mulf %30, %30 : vector<16x1024xf32>
      %cst_21 = arith.constant dense<0.000000e+00> : vector<1024xf32>
      %32 = vector.multi_reduction <add>, %31, %cst_21 [0] : vector<16x1024xf32> to vector<1024xf32>
      %33 = vector.shape_cast %32 : vector<1024xf32> to vector<1x1024xf32>
      %cst_22 = arith.constant 2.500000e-01 : f32
      %34 = vector.broadcast %cst_22 : f32 to vector<1x1024xf32>
      %35 = arith.mulf %33, %34 : vector<1x1024xf32>
      %cst_23 = arith.constant 9.99999974E-6 : f32
      %36 = vector.broadcast %cst_23 : f32 to vector<1x1024xf32>
      %37 = arith.addf %35, %36 : vector<1x1024xf32>
      %38 = math.rsqrt %37 : vector<1x1024xf32>
      %39 = vector.broadcast %26 : vector<1x1024xf32> to vector<16x1024xf32>
      %40 = arith.subf %15, %39 : vector<16x1024xf32>
      %41 = vector.broadcast %16 : vector<1x1024xf32> to vector<16x1024xf32>
      %42 = arith.mulf %41, %40 : vector<16x1024xf32>
      %43 = vector.broadcast %38 : vector<1x1024xf32> to vector<16x1024xf32>
      %44 = arith.mulf %42, %43 : vector<16x1024xf32>
      %45 = vector.broadcast %17 : vector<1x1024xf32> to vector<16x1024xf32>
      %46 = arith.addf %44, %45 : vector<16x1024xf32>
      %cst_24 = arith.constant 0.000000e+00 : f32
      %47 = vector.broadcast %cst_24 : f32 to vector<16x1024xf32>
      %48 = arith.cmpf oge, %46, %47 : vector<16x1024xf32>
      %cst_25 = arith.constant 1.000000e-01 : f32
      %49 = vector.broadcast %cst_25 : f32 to vector<16x1024xf32>
      %50 = arith.mulf %49, %46 : vector<16x1024xf32>
      %51 = arith.select %48, %46, %50 : vector<16x1024xi1>, vector<16x1024xf32>
      %c0_26 = arith.constant 0 : index
      %c0_27 = arith.constant 0 : index
      %52 = vector.load %arg7[%c0_26, %c0_27] : memref<16x1024xf32, #tpu.memory_space<vmem>>, vector<16x1024xf32>
      tpu.vector_store %arg7[%c0_26, %c0_27], %51 {strides = array<i32>} : memref<16x1024xf32, #tpu.memory_space<vmem>>, vector<16x1024xf32>,
    } else {
    }
    return
  }
  func.func @transform_0(%arg0: i32, %arg1: i32) -> (i32, i32) {
    %c0_i32 = arith.constant 0 : i32
    return %arg0, %arg1 : i32, i32
  }
  func.func @transform_1(%arg0: i32, %arg1: i32) -> (i32, i32) {
    %c0_i32 = arith.constant 0 : i32
    %c0_i32_0 = arith.constant 0 : i32
    return %arg1, %c0_i32 : i32, i32
  }
  func.func @transform_2(%arg0: i32, %arg1: i32) -> (i32, i32) {
    %c0_i32 = arith.constant 0 : i32
    %c0_i32_0 = arith.constant 0 : i32
    %c0_i32_1 = arith.constant 0 : i32
    return %c0_i32, %c0_i32_0 : i32, i32
  }
  func.func @transform_3(%arg0: i32, %arg1: i32) -> (i32, i32) {
    %c0_i32 = arith.constant 0 : i32
    %c0_i32_0 = arith.constant 0 : i32
    %c0_i32_1 = arith.constant 0 : i32
    return %c0_i32, %c0_i32_0 : i32, i32
  }
  func.func @transform_4(%arg0: i32, %arg1: i32) -> (i32, i32) {
    %c0_i32 = arith.constant 0 : i32
    %c0_i32_0 = arith.constant 0 : i32
    %c0_i32_1 = arith.constant 0 : i32
    return %c0_i32, %c0_i32_0 : i32, i32
  }
  func.func @transform_5(%arg0: i32, %arg1: i32) -> (i32, i32) {
    %c0_i32 = arith.constant 0 : i32
    %c0_i32_0 = arith.constant 0 : i32
    return %arg0, %c0_i32 : i32, i32
  }
}

module attributes {stable_mosaic.version = 11 : i64} {
  func.func @_gemm_bias_bn_leaky_kernel(%arg0: i32, %arg1: i32, %arg2: memref<16x1024xbf16, #tpu.memory_space<vmem>>, %arg3: memref<1024x256xbf16, #tpu.memory_space<vmem>>, %arg4: memref<1x256xf32, #tpu.memory_space<vmem>>, %arg5: memref<1x256xf32, #tpu.memory_space<vmem>>, %arg6: memref<1x256xf32, #tpu.memory_space<vmem>>, %arg7: memref<16x256xf32, #tpu.memory_space<vmem>>) attributes {dimension_semantics = [#tpu.dimension_semantics<parallel>, #tpu.dimension_semantics<arbitrary>], iteration_bounds = array<i64: 1, 1>, scalar_prefetch = 0 : i64, scratch_operands = 0 : i64, tpu.core_type = #tpu.core_type<tc>, window_params = [{transform_indices = @transform_0, window_bounds = array<i64: 16, 1024>}, {transform_indices = @transform_1, window_bounds = array<i64: 1024, 256>}, {pipeline_mode = #tpu.pipeline_mode<synchronous>, transform_indices = @transform_2, window_bounds = array<i64: 1, 256>}, {pipeline_mode = #tpu.pipeline_mode<synchronous>, transform_indices = @transform_3, window_bounds = array<i64: 1, 256>}, {pipeline_mode = #tpu.pipeline_mode<synchronous>, transform_indices = @transform_4, window_bounds = array<i64: 1, 256>}, {transform_indices = @transform_5, window_bounds = array<i64: 16, 256>}]} {
    %c0 = arith.constant 0 : index
    %c0_0 = arith.constant 0 : index
    %0 = vector.load %arg2[%c0, %c0_0] : memref<16x1024xbf16, #tpu.memory_space<vmem>>, vector<16x1024xbf16>
    %c0_1 = arith.constant 0 : index
    %c0_2 = arith.constant 0 : index
    %1 = vector.load %arg3[%c0_1, %c0_2] : memref<1024x256xbf16, #tpu.memory_space<vmem>>, vector<1024x256xbf16>
    %cst = arith.constant dense<0.000000e+00> : vector<16x256xf32>
    %2 = tpu.matmul %0, %1, %cst {dimension_numbers = #tpu.dot_dimension_numbers<[1], [0], [0], [1], [0, 0, 1, 1], [], []>} : vector<16x1024xbf16>, vector<1024x256xbf16>, vector<16x256xf32> -> vector<16x256xf32>
    %c0_3 = arith.constant 0 : index
    %c0_4 = arith.constant 0 : index
    %3 = vector.load %arg4[%c0_3, %c0_4] : memref<1x256xf32, #tpu.memory_space<vmem>>, vector<1x256xf32>
    %4 = vector.broadcast %3 : vector<1x256xf32> to vector<16x256xf32>
    %5 = arith.addf %2, %4 : vector<16x256xf32>
    %c0_5 = arith.constant 0 : index
    %c0_6 = arith.constant 0 : index
    %6 = vector.load %arg5[%c0_5, %c0_6] : memref<1x256xf32, #tpu.memory_space<vmem>>, vector<1x256xf32>
    %c0_7 = arith.constant 0 : index
    %c0_8 = arith.constant 0 : index
    %7 = vector.load %arg6[%c0_7, %c0_8] : memref<1x256xf32, #tpu.memory_space<vmem>>, vector<1x256xf32>
    %8 = tpu.iota {dimensions = array<i32: 0>} : vector<16x256xi32>
    %c4_i32 = arith.constant 4 : i32
    %9 = vector.broadcast %c4_i32 : i32 to vector<16x256xi32>
    %10 = arith.cmpi slt, %8, %9 : vector<16x256xi32>
    %cst_9 = arith.constant 0.000000e+00 : f32
    %11 = vector.broadcast %cst_9 : f32 to vector<16x256xf32>
    %12 = arith.select %10, %5, %11 : vector<16x256xi1>, vector<16x256xf32>
    %cst_10 = arith.constant dense<0.000000e+00> : vector<256xf32>
    %13 = vector.multi_reduction <add>, %12, %cst_10 [0] : vector<16x256xf32> to vector<256xf32>
    %14 = vector.shape_cast %13 : vector<256xf32> to vector<1x256xf32>
    %cst_11 = arith.constant 2.500000e-01 : f32
    %15 = vector.broadcast %cst_11 : f32 to vector<1x256xf32>
    %16 = arith.mulf %14, %15 : vector<1x256xf32>
    %17 = vector.broadcast %16 : vector<1x256xf32> to vector<16x256xf32>
    %18 = arith.subf %5, %17 : vector<16x256xf32>
    %cst_12 = arith.constant 0.000000e+00 : f32
    %19 = vector.broadcast %cst_12 : f32 to vector<16x256xf32>
    %20 = arith.select %10, %18, %19 : vector<16x256xi1>, vector<16x256xf32>
    %21 = arith.mulf %20, %20 : vector<16x256xf32>
    %cst_13 = arith.constant dense<0.000000e+00> : vector<256xf32>
    %22 = vector.multi_reduction <add>, %21, %cst_13 [0] : vector<16x256xf32> to vector<256xf32>
    %23 = vector.shape_cast %22 : vector<256xf32> to vector<1x256xf32>
    %cst_14 = arith.constant 2.500000e-01 : f32
    %24 = vector.broadcast %cst_14 : f32 to vector<1x256xf32>
    %25 = arith.mulf %23, %24 : vector<1x256xf32>
    %cst_15 = arith.constant 9.99999974E-6 : f32
    %26 = vector.broadcast %cst_15 : f32 to vector<1x256xf32>
    %27 = arith.addf %25, %26 : vector<1x256xf32>
    %28 = math.rsqrt %27 : vector<1x256xf32>
    %29 = vector.broadcast %16 : vector<1x256xf32> to vector<16x256xf32>
    %30 = arith.subf %5, %29 : vector<16x256xf32>
    %31 = vector.broadcast %6 : vector<1x256xf32> to vector<16x256xf32>
    %32 = arith.mulf %31, %30 : vector<16x256xf32>
    %33 = vector.broadcast %28 : vector<1x256xf32> to vector<16x256xf32>
    %34 = arith.mulf %32, %33 : vector<16x256xf32>
    %35 = vector.broadcast %7 : vector<1x256xf32> to vector<16x256xf32>
    %36 = arith.addf %34, %35 : vector<16x256xf32>
    %cst_16 = arith.constant 0.000000e+00 : f32
    %37 = vector.broadcast %cst_16 : f32 to vector<16x256xf32>
    %38 = arith.cmpf oge, %36, %37 : vector<16x256xf32>
    %cst_17 = arith.constant 1.000000e-01 : f32
    %39 = vector.broadcast %cst_17 : f32 to vector<16x256xf32>
    %40 = arith.mulf %39, %36 : vector<16x256xf32>
    %41 = arith.select %38, %36, %40 : vector<16x256xi1>, vector<16x256xf32>
    %42 = tpu.iota {dimensions = array<i32: 1>} : vector<16x256xi32>
    %c0_i32 = arith.constant 0 : i32
    %43 = vector.broadcast %c0_i32 : i32 to vector<16x256xi32>
    %44 = arith.cmpi eq, %42, %43 : vector<16x256xi32>
    %45 = arith.negf %5 : vector<16x256xf32>
    %46 = math.exp %45 : vector<16x256xf32>
    %cst_18 = arith.constant 1.000000e+00 : f32
    %47 = vector.broadcast %cst_18 : f32 to vector<16x256xf32>
    %48 = arith.addf %47, %46 : vector<16x256xf32>
    %49 = arith.divf %47, %48 : vector<16x256xf32>
    %50 = arith.select %44, %49, %41 : vector<16x256xi1>, vector<16x256xf32>
    %c0_19 = arith.constant 0 : index
    %c0_20 = arith.constant 0 : index
    %51 = vector.load %arg7[%c0_19, %c0_20] : memref<16x256xf32, #tpu.memory_space<vmem>>, vector<16x256xf32>
    tpu.vector_store %arg7[%c0_19, %c0_20], %50 {strides = array<i32>} : memref<16x256xf32, #tpu.memory_space<vmem>>, vector<16x256xf32>,
    return
  }
  func.func @transform_0(%arg0: i32, %arg1: i32) -> (i32, i32) {
    %c0_i32 = arith.constant 0 : i32
    return %arg0, %arg1 : i32, i32
  }
  func.func @transform_1(%arg0: i32, %arg1: i32) -> (i32, i32) {
    %c0_i32 = arith.constant 0 : i32
    %c0_i32_0 = arith.constant 0 : i32
    return %arg1, %c0_i32 : i32, i32
  }
  func.func @transform_2(%arg0: i32, %arg1: i32) -> (i32, i32) {
    %c0_i32 = arith.constant 0 : i32
    %c0_i32_0 = arith.constant 0 : i32
    %c0_i32_1 = arith.constant 0 : i32
    return %c0_i32, %c0_i32_0 : i32, i32
  }
  func.func @transform_3(%arg0: i32, %arg1: i32) -> (i32, i32) {
    %c0_i32 = arith.constant 0 : i32
    %c0_i32_0 = arith.constant 0 : i32
    %c0_i32_1 = arith.constant 0 : i32
    return %c0_i32, %c0_i32_0 : i32, i32
  }
  func.func @transform_4(%arg0: i32, %arg1: i32) -> (i32, i32) {
    %c0_i32 = arith.constant 0 : i32
    %c0_i32_0 = arith.constant 0 : i32
    %c0_i32_1 = arith.constant 0 : i32
    return %c0_i32, %c0_i32_0 : i32, i32
  }
  func.func @transform_5(%arg0: i32, %arg1: i32) -> (i32, i32) {
    %c0_i32 = arith.constant 0 : i32
    %c0_i32_0 = arith.constant 0 : i32
    return %arg0, %c0_i32 : i32, i32
  }
}

module attributes {stable_mosaic.version = 11 : i64} {
  func.func @_gemm_bias_act_kernel(%arg0: i32, %arg1: i32, %arg2: memref<16x128xbf16, #tpu.memory_space<vmem>>, %arg3: memref<128x128xbf16, #tpu.memory_space<vmem>>, %arg4: memref<1x128xf32, #tpu.memory_space<vmem>>, %arg5: memref<16x128xf32, #tpu.memory_space<vmem>>) attributes {dimension_semantics = [#tpu.dimension_semantics<parallel>, #tpu.dimension_semantics<arbitrary>], iteration_bounds = array<i64: 1, 1>, scalar_prefetch = 0 : i64, scratch_operands = 0 : i64, tpu.core_type = #tpu.core_type<tc>, window_params = [{transform_indices = @transform_0, window_bounds = array<i64: 16, 128>}, {transform_indices = @transform_1, window_bounds = array<i64: 128, 128>}, {pipeline_mode = #tpu.pipeline_mode<synchronous>, transform_indices = @transform_2, window_bounds = array<i64: 1, 128>}, {transform_indices = @transform_3, window_bounds = array<i64: 16, 128>}]} {
    %c0 = arith.constant 0 : index
    %c0_0 = arith.constant 0 : index
    %0 = vector.load %arg2[%c0, %c0_0] : memref<16x128xbf16, #tpu.memory_space<vmem>>, vector<16x128xbf16>
    %c0_1 = arith.constant 0 : index
    %c0_2 = arith.constant 0 : index
    %1 = vector.load %arg3[%c0_1, %c0_2] : memref<128x128xbf16, #tpu.memory_space<vmem>>, vector<128x128xbf16>
    %cst = arith.constant dense<0.000000e+00> : vector<16x128xf32>
    %2 = tpu.matmul %0, %1, %cst {dimension_numbers = #tpu.dot_dimension_numbers<[1], [0], [0], [1], [0, 0, 1, 1], [], []>} : vector<16x128xbf16>, vector<128x128xbf16>, vector<16x128xf32> -> vector<16x128xf32>
    %c0_3 = arith.constant 0 : index
    %c0_4 = arith.constant 0 : index
    %3 = vector.load %arg4[%c0_3, %c0_4] : memref<1x128xf32, #tpu.memory_space<vmem>>, vector<1x128xf32>
    %4 = vector.broadcast %3 : vector<1x128xf32> to vector<16x128xf32>
    %5 = arith.addf %2, %4 : vector<16x128xf32>
    %c0_5 = arith.constant 0 : index
    %c0_6 = arith.constant 0 : index
    %6 = vector.load %arg5[%c0_5, %c0_6] : memref<16x128xf32, #tpu.memory_space<vmem>>, vector<16x128xf32>
    tpu.vector_store %arg5[%c0_5, %c0_6], %5 {strides = array<i32>} : memref<16x128xf32, #tpu.memory_space<vmem>>, vector<16x128xf32>,
    return
  }
  func.func @transform_0(%arg0: i32, %arg1: i32) -> (i32, i32) {
    %c0_i32 = arith.constant 0 : i32
    return %arg0, %arg1 : i32, i32
  }
  func.func @transform_1(%arg0: i32, %arg1: i32) -> (i32, i32) {
    %c0_i32 = arith.constant 0 : i32
    %c0_i32_0 = arith.constant 0 : i32
    return %arg1, %c0_i32 : i32, i32
  }
  func.func @transform_2(%arg0: i32, %arg1: i32) -> (i32, i32) {
    %c0_i32 = arith.constant 0 : i32
    %c0_i32_0 = arith.constant 0 : i32
    %c0_i32_1 = arith.constant 0 : i32
    return %c0_i32, %c0_i32_0 : i32, i32
  }
  func.func @transform_3(%arg0: i32, %arg1: i32) -> (i32, i32) {
    %c0_i32 = arith.constant 0 : i32
    %c0_i32_0 = arith.constant 0 : i32
    return %arg0, %c0_i32 : i32, i32
  }
}

</mosaic_0001>

<bundles_post_ra>
// kernel: discriminator_forward.5
= control target key start
LH: loop header
LB: loop body
LE: loop exit
PB: predicated region body
PF: predicated region fallthrough
CT: control target
= control target key end

     0   :  { %8 = vsyncpa [#allocation3], 0  ;;  %s1699_s0 = inlined_call_operand.vmem [shape: bf16[800,16], index: 0, kind: input, shape index: {}]   ;;  %s1700_s1 = inlined_call_operand.hbm [shape: bf16[16,128], index: 1, kind: input, shape index: {}]   ;;  %s1701_s2 = inlined_call_operand.hbm [shape: f32[1,128], index: 2, kind: input, shape index: {}]   ;;  %s1702_s3 = inlined_call_operand.vmem [shape: f32[800,128], index: 3, kind: output, shape index: {}]  }
   0x1   :  { %9 = vsyncpa [#allocation5], 0  ;;  %s1406_s12 = smov 0   ;;  %s1408_s13 = smov 0  }
   0x2   :  { %s1410_s14 = smov 0  }
   0x3 LB: > { %s1026_s15 = sadd.s32 4294967295, %s1378_s14   ;;  %s27_s16 = sadd.s32 1, %s1374_s13  ;;  %s1378_s14 = sphi %s1410_s14, %s15_s14   ;;  %s1374_s13 = sphi %s1408_s13, %s1707_s13   ;;  %s1370_s12 = sphi %s1406_s12, %s1706_s12  }
   0x4   : > { %p29_p0 = scmp.ge.s32.totalorder %s27_s16, 2  ;;  %p1028_p1 = scmp.ge.s32.totalorder %s1378_s14, 1 }
   0x5   : > { %p133_p2 = scmp.lt.s32.totalorder %s1378_s14, 3  ;;  %p1431_p4 = scmp.eq.s32.totalorder %s1026_s15, 0 }
   0x6   : > { %s1709_s16 = smov (%p29_p0, %s27_s16), 0  ;;  %s1380_s19 = smov [#allocation2]  }
   0x7   : > { %p1427_p3 = pnand %p1028_p1, %p133_p2  ;;  %s148_s20 = sshll.u32 %s1380_s19, 4  ;;  %s149_s20 = int_to_ptr.vmem [resolvable:$true] %s148_s20 }
   0x8   : > { %s1381_s22 = smov [#allocation4]   ;;  %s1307_s24 = scalar_lea.vmem %s149_s20, 128 }
   0x9   : > { %p1229_p5 = pneg %p1427_p3  ;;  %s162_s23 = sshll.u32 %s1381_s22, 4  ;;  %s163_s23 = int_to_ptr.vmem [resolvable:$true] %s162_s23 }
   0xa   : > { %p1308_p8 = scmp.ne.s32.totalorder %s149_s20, %s1307_s24  ;;  %p1315_p11 = scmp.lt.s32.totalorder %s149_s20, %s149_s20 }
   0xb   : > { %p1439_p6 = pnand %p1431_p4, %p1229_p5  ;;  %p1316_p12 = scmp.lt.s32.totalorder %s1307_s24, %s1307_s24 }
   0xd   : > { %p1298_p7 = pneg %p1439_p6  ;;  %p1317_p13 = por %p1316_p12, %p1315_p11 }
   0xf   : > { %p1310_p9 = pnand %p1308_p8, %p1298_p7 }
  0x11   : > { %p1311_p10 = pneg %p1310_p9 }
  0x13   : > { %p1318_p0 = pnand %p1317_p13, %p1311_p10 }
  0x15   : > { %1321 = shalt.err (!%p1318_p0)
}
  0x16   : > { %s1382_s25 = smov 64   ;;  %s1383_s26 = smov 4  }
  0x17   : > { %1232 = dma.hbm_to_vmem [thread:$0]  (!%p1439_p6), %s1700_s1, 128, %s149_s20, [#allocation3], %s1382_s25, %s1382_s25, %s1383_s26  }
  0x18   : > { %s1333_s29 = scalar_lea.vmem %s163_s23, 16  ;;  %s1340_s30 = scalar_lea.vmem %s163_s23, 32 }
  0x19   : > { %p1334_p1 = scmp.ne.s32.totalorder %s163_s23, %s1333_s29  ;;  %p1341_p8 = scmp.lt.s32.totalorder %s163_s23, %s163_s23 }
  0x1a   : > { %p1342_p9 = scmp.lt.s32.totalorder %s1340_s30, %s1333_s29 }
  0x1b   : > { %p1336_p2 = pnand %p1334_p1, %p1298_p7 }
  0x1c   : > { %p1343_p10 = por %p1342_p9, %p1341_p8 }
  0x1d   : > { %p1337_p5 = pneg %p1336_p2 }
  0x1f   : > { %p1344_p11 = pnand %p1343_p10, %p1337_p5 }
  0x21   : > { %1347 = shalt.err (!%p1344_p11)
}
  0x22   : > { %1235 = dma.hbm_to_vmem [thread:$0]  (!%p1439_p6), %s1701_s2, 16, %s163_s23, [#allocation5]  }
  0x23   : > { %187 = sbr.rel (%p1427_p3) target bundleno = 350 (0x15e), region = 32 }
  0x28   : > { %1361 = dma.done.wait (%p1431_p4), [#allocation3], 128  }
  0x29   : > { %1363 = vsyncadd (%p1431_p4), [#allocation3], 4294967168 }
  0x2a   : > { %1365 = dma.done.wait (%p1431_p4), [#allocation5], 16  }
  0x2b   : > { %1367 = vsyncadd (%p1431_p4), [#allocation5], 4294967280  ;;  %s218_s6 = smul.u32 50, %s1370_s12  ;;  %v1384_v0 = vmov 0.0   ;;  %vm1385_vm0 = vmmov 0   ;;  %v1270_v1 = vld [vmem:[#allocation2] sm:$0xff]  }
  0x2c   : > { %1117 = vmatprep.subr.bf16.mxu0 %v1384_v0  ;;  %1219 = vmatprep.subr.bf16.mxu1 %v1384_v0  ;;  %vm425_vm1 = vcmask 130048   ;;  %v1582_v27 = vld [vmem:[#allocation4] ss:$0 sm:$0xff] }
  0x2d   : > { %1119 = vmatprep.mubr.msk.bf16.mxu0 %vm1385_vm0, %v1384_v0  ;;  %p219_p3 = scmp.lt.s32.totalorder %s218_s6, 99  ;;  %1171 = vmatprep.mubr.msk.bf16.mxu1 %vm1385_vm0, %v1384_v0 }
  0x2e   : > { %1118 = vmatpush3.bf16.msra.mxu0 %v1270_v1  ;;  %1220 = vmatpush3.bf16.msra.mxu1 %v1270_v1 }
  0x2f   : > { %s1711_s6 = smov (!%p219_p3, %s218_s6), 99 }
  0x30   : > { %s1035_s7 = sshll.u32 %s1711_s6, 2  ;;  %s1036_s11 = sshll.u32 %s1711_s6, 3 }
  0x31   : > { %s1484_s10 = scalar_lea.vmem %s1699_s0, %s1035_s7  ;;  %s1590_s17 = scalar_lea.vmem %s1702_s3, %s1036_s11 }
  0x32   : > { %v1271_v2 = vld [vmem:[%s1484_s10] sm:$0xff]   ;;  %v1272_v3 = vld [vmem:[%s1484_s10 + $0x68] sm:$0xff]   ;;  %v1274_v5 = vld [vmem:[%s1484_s10 + $0x70] sm:$0xff]  }
  0x33   : > { %1120 = vmatmul.mubr.msk.bf16.vlgmr.msra.gmra.mxu0 %vm425_vm1, %v1271_v2  ;;  %1172 = vmatmul.mubr.msk.bf16.vlgmr.msra.gmra.mxu1 %vm425_vm1, %v1272_v3  ;;  %v1273_v4 = vld [vmem:[%s1484_s10 + $0x8] sm:$0xff]   ;;  %v1275_v6 = vld [vmem:[%s1484_s10 + $0x10] sm:$0xff]   ;;  %v1276_v7 = vld [vmem:[%s1484_s10 + $0x78] sm:$0xff]  }
  0x34   : > { %1123 = vmatprep.mubr.msk.bf16.mxu0 %vm1385_vm0, %v1384_v0  ;;  %1175 = vmatprep.mubr.msk.bf16.mxu1 %vm1385_vm0, %v1384_v0  ;;  %v1277_v8 = vld [vmem:[%s1484_s10 + $0x18] sm:$0xff]   ;;  %v1278_v9 = vld [vmem:[%s1484_s10 + $0x80] sm:$0xff]   ;;  %v1280_v11 = vld [vmem:[%s1484_s10 + $0x88] sm:$0xff]  }
  0x35   : > { %v1279_v10 = vld [vmem:[%s1484_s10 + $0x20] sm:$0xff]   ;;  %v1281_v12 = vld [vmem:[%s1484_s10 + $0x28] sm:$0xff]   ;;  %v1282_v13 = vld [vmem:[%s1484_s10 + $0x90] sm:$0xff]  }
  0x36   : > { %v1283_v14 = vld [vmem:[%s1484_s10 + $0x30] sm:$0xff]   ;;  %v1284_v15 = vld [vmem:[%s1484_s10 + $0x98] sm:$0xff]   ;;  %v1286_v17 = vld [vmem:[%s1484_s10 + $0xa0] sm:$0xff]  }
  0x37   : > { %v1285_v16 = vld [vmem:[%s1484_s10 + $0x38] sm:$0xff]   ;;  %v1287_v18 = vld [vmem:[%s1484_s10 + $0x40] sm:$0xff]   ;;  %v1288_v19 = vld [vmem:[%s1484_s10 + $0xa8] sm:$0xff]  }
  0x38   : > { %v1289_v20 = vld [vmem:[%s1484_s10 + $0x48] sm:$0xff]   ;;  %v1290_v21 = vld [vmem:[%s1484_s10 + $0xb0] sm:$0xff]   ;;  %v1292_v23 = vld [vmem:[%s1484_s10 + $0xb8] sm:$0xff]  }
  0x39   : > { %v1291_v22 = vld [vmem:[%s1484_s10 + $0x50] sm:$0xff]   ;;  %v1293_v24 = vld [vmem:[%s1484_s10 + $0x58] sm:$0xff]   ;;  %v1294_v25 = vld [vmem:[%s1484_s10 + $0xc0] sm:$0xff]  }
  0x3a   : > { %v1295_v26 = vld [vmem:[%s1484_s10 + $0x60] sm:$0xff]  }
  0x3b   : > { %1124 = vmatmul.mubr.msk.bf16.gmra.mxu0 %vm425_vm1, %v1273_v4  ;;  %1176 = vmatmul.mubr.msk.bf16.gmra.mxu1 %vm425_vm1, %v1274_v5 }
  0x3c   : > { %1127 = vmatprep.mubr.msk.bf16.mxu0 %vm1385_vm0, %v1384_v0  ;;  %1179 = vmatprep.mubr.msk.bf16.mxu1 %vm1385_vm0, %v1384_v0 }
  0x43   : > { %1128 = vmatmul.mubr.msk.bf16.gmra.mxu0 %vm425_vm1, %v1275_v6  ;;  %1180 = vmatmul.mubr.msk.bf16.gmra.mxu1 %vm425_vm1, %v1276_v7 }
  0x44   : > { %1131 = vmatprep.mubr.msk.bf16.mxu0 %vm1385_vm0, %v1384_v0  ;;  %1183 = vmatprep.mubr.msk.bf16.mxu1 %vm1385_vm0, %v1384_v0 }
  0x4b   : > { %1132 = vmatmul.mubr.msk.bf16.gmra.mxu0 %vm425_vm1, %v1277_v8  ;;  %1184 = vmatmul.mubr.msk.bf16.gmra.mxu1 %vm425_vm1, %v1278_v9 }
  0x4c   : > { %1135 = vmatprep.mubr.msk.bf16.mxu0 %vm1385_vm0, %v1384_v0  ;;  %1187 = vmatprep.mubr.msk.bf16.mxu1 %vm1385_vm0, %v1384_v0 }
  0x53   : > { %1136 = vmatmul.mubr.msk.bf16.gmra.mxu0 %vm425_vm1, %v1279_v10  ;;  %1188 = vmatmul.mubr.msk.bf16.gmra.mxu1 %vm425_vm1, %v1280_v11 }
  0x54   : > { %1139 = vmatprep.mubr.msk.bf16.mxu0 %vm1385_vm0, %v1384_v0  ;;  %1191 = vmatprep.mubr.msk.bf16.mxu1 %vm1385_vm0, %v1384_v0 }
  0x5b   : > { %1140 = vmatmul.mubr.msk.bf16.gmra.mxu0 %vm425_vm1, %v1281_v12  ;;  %1192 = vmatmul.mubr.msk.bf16.gmra.mxu1 %vm425_vm1, %v1282_v13 }
  0x5c   : > { %1143 = vmatprep.mubr.msk.bf16.mxu0 %vm1385_vm0, %v1384_v0  ;;  %1195 = vmatprep.mubr.msk.bf16.mxu1 %vm1385_vm0, %v1384_v0 }
  0x63   : > { %1144 = vmatmul.mubr.msk.bf16.gmra.mxu0 %vm425_vm1, %v1283_v14  ;;  %1196 = vmatmul.mubr.msk.bf16.gmra.mxu1 %vm425_vm1, %v1284_v15 }
  0x64   : > { %1147 = vmatprep.mubr.msk.bf16.mxu0 %vm1385_vm0, %v1384_v0  ;;  %1199 = vmatprep.mubr.msk.bf16.mxu1 %vm1385_vm0, %v1384_v0 }
  0x6b   : > { %1148 = vmatmul.mubr.msk.bf16.gmra.mxu0 %vm425_vm1, %v1285_v16  ;;  %1200 = vmatmul.mubr.msk.bf16.gmra.mxu1 %vm425_vm1, %v1286_v17 }
  0x6c   : > { %1151 = vmatprep.mubr.msk.bf16.mxu0 %vm1385_vm0, %v1384_v0  ;;  %1203 = vmatprep.mubr.msk.bf16.mxu1 %vm1385_vm0, %v1384_v0 }
  0x73   : > { %1152 = vmatmul.mubr.msk.bf16.gmra.mxu0 %vm425_vm1, %v1287_v18  ;;  %1204 = vmatmul.mubr.msk.bf16.gmra.mxu1 %vm425_vm1, %v1288_v19 }
  0x74   : > { %1155 = vmatprep.mubr.msk.bf16.mxu0 %vm1385_vm0, %v1384_v0  ;;  %1207 = vmatprep.mubr.msk.bf16.mxu1 %vm1385_vm0, %v1384_v0 }
  0x7b   : > { %1156 = vmatmul.mubr.msk.bf16.gmra.mxu0 %vm425_vm1, %v1289_v20  ;;  %1208 = vmatmul.mubr.msk.bf16.gmra.mxu1 %vm425_vm1, %v1290_v21 }
  0x7c   : > { %1159 = vmatprep.mubr.msk.bf16.mxu0 %vm1385_vm0, %v1384_v0  ;;  %1211 = vmatprep.mubr.msk.bf16.mxu1 %vm1385_vm0, %v1384_v0 }
  0x83   : > { %1160 = vmatmul.mubr.msk.bf16.gmra.mxu0 %vm425_vm1, %v1291_v22  ;;  %1212 = vmatmul.mubr.msk.bf16.gmra.mxu1 %vm425_vm1, %v1292_v23 }
  0x84   : > { %1163 = vmatprep.mubr.msk.bf16.mxu0 %vm1385_vm0, %v1384_v0  ;;  %1215 = vmatprep.mubr.msk.bf16.mxu1 %vm1385_vm0, %v1384_v0 }
  0x8b   : > { %1164 = vmatmul.mubr.msk.bf16.gmra.mxu0 %vm425_vm1, %v1293_v24  ;;  %1216 = vmatmul.mubr.msk.bf16.gmra.mxu1 %vm425_vm1, %v1294_v25 }
  0x8c   : > { %1167 = vmatprep.mubr.msk.bf16.mxu0 %vm1385_vm0, %v1384_v0 }
  0x93   : > { %1168 = vmatmul.mubr.msk.bf16.gmra.mxu0 %vm425_vm1, %v1295_v26 }
  0xf3   : > { %v535_v28 = vpop.f32.mrf.mxu0  ;;  %v639_v29 = vpop.f32.mrf.mxu1 }
  0xf4   : > { %v536_v30 = vadd.f32 %v1582_v27, %v535_v28  ;;  %v640_v31 = vadd.f32 %v1582_v27, %v639_v29 }
  0xf5   : > { %v1121_v32 = vpop.f32.mrf.mxu0  ;;  %v1173_v33 = vpop.f32.mrf.mxu1 }
  0xf6   : > { %vm734_vm2 = vcmp.ge.f32.partialorder %v536_v30, 0.0  ;;  %v784_v34 = vmul.f32 0.1, %v536_v30  ;;  %vm760_vm3 = vcmp.ge.f32.partialorder %v640_v31, 0.0  ;;  %v810_v35 = vmul.f32 0.1, %v640_v31 }
  0xf7   : > { %v538_v36 = vpop.f32.mrf.mxu0  ;;  %v642_v37 = vpop.f32.mrf.mxu1 }
  0xf8   : > { %v834_v38 = vsel %vm734_vm2, %v536_v30, %v784_v34  ;;  %v860_v39 = vsel %vm760_vm3, %v640_v31, %v810_v35  ;;  %v539_v40 = vadd.f32 %v1582_v27, %v538_v36  ;;  %v643_v41 = vadd.f32 %v1582_v27, %v642_v37 }
  0xf9   : > { %884 = vst [vmem:[%s1590_s17] sm:$0xff] %v834_v38  ;;  %910 = vst [vmem:[%s1590_s17 + $0xd0] sm:$0xff] %v860_v39  ;;  %v1122_v42 = vpop.f32.mrf.mxu0  ;;  %v1174_v43 = vpop.f32.mrf.mxu1 }
  0xfa   : > { %vm735_vm4 = vcmp.ge.f32.partialorder %v539_v40, 0.0  ;;  %v785_v44 = vmul.f32 0.1, %v539_v40  ;;  %vm761_vm5 = vcmp.ge.f32.partialorder %v643_v41, 0.0  ;;  %v811_v45 = vmul.f32 0.1, %v643_v41 }
  0xfb   : > { %v543_v46 = vpop.f32.mrf.mxu0  ;;  %v647_v47 = vpop.f32.mrf.mxu1 }
  0xfc   : > { %v835_v48 = vsel %vm735_vm4, %v539_v40, %v785_v44  ;;  %v861_v49 = vsel %vm761_vm5, %v643_v41, %v811_v45  ;;  %v544_v50 = vadd.f32 %v1582_v27, %v543_v46  ;;  %v648_v51 = vadd.f32 %v1582_v27, %v647_v47 }
  0xfd   : > { %885 = vst [vmem:[%s1590_s17 + $0x8] sm:$0xff] %v835_v48  ;;  %911 = vst [vmem:[%s1590_s17 + $0xd8] sm:$0xff] %v861_v49  ;;  %v1125_v52 = vpop.f32.mrf.mxu0  ;;  %v1177_v53 = vpop.f32.mrf.mxu1 }
  0xfe   : > { %vm736_vm6 = vcmp.ge.f32.partialorder %v544_v50, 0.0  ;;  %v786_v54 = vmul.f32 0.1, %v544_v50  ;;  %vm762_vm7 = vcmp.ge.f32.partialorder %v648_v51, 0.0  ;;  %v812_v55 = vmul.f32 0.1, %v648_v51 }
  0xff   : > { %v546_v56 = vpop.f32.mrf.mxu0  ;;  %v650_v57 = vpop.f32.mrf.mxu1 }
 0x100   : > { %v836_v58 = vsel %vm736_vm6, %v544_v50, %v786_v54  ;;  %v862_v59 = vsel %vm762_vm7, %v648_v51, %v812_v55  ;;  %v547_v60 = vadd.f32 %v1582_v27, %v546_v56  ;;  %v651_v61 = vadd.f32 %v1582_v27, %v650_v57 }
 0x101   : > { %886 = vst [vmem:[%s1590_s17 + $0x10] sm:$0xff] %v836_v58  ;;  %912 = vst [vmem:[%s1590_s17 + $0xe0] sm:$0xff] %v862_v59  ;;  %v1126_v62 = vpop.f32.mrf.mxu0  ;;  %v1178_v63 = vpop.f32.mrf.mxu1 }
 0x102   : > { %vm737_vm8 = vcmp.ge.f32.partialorder %v547_v60, 0.0  ;;  %v787_v0 = vmul.f32 0.1, %v547_v60  ;;  %vm763_vm9 = vcmp.ge.f32.partialorder %v651_v61, 0.0  ;;  %v813_v1 = vmul.f32 0.1, %v651_v61 }
 0x103   : > { %v551_v2 = vpop.f32.mrf.mxu0  ;;  %v655_v3 = vpop.f32.mrf.mxu1 }
 0x104   : > { %v837_v4 = vsel %vm737_vm8, %v547_v60, %v787_v0  ;;  %v863_v5 = vsel %vm763_vm9, %v651_v61, %v813_v1  ;;  %v552_v6 = vadd.f32 %v1582_v27, %v551_v2  ;;  %v656_v7 = vadd.f32 %v1582_v27, %v655_v3 }
 0x105   : > { %887 = vst [vmem:[%s1590_s17 + $0x18] sm:$0xff] %v837_v4  ;;  %913 = vst [vmem:[%s1590_s17 + $0xe8] sm:$0xff] %v863_v5  ;;  %v1129_v8 = vpop.f32.mrf.mxu0  ;;  %v1181_v9 = vpop.f32.mrf.mxu1 }
 0x106   : > { %vm738_vm10 = vcmp.ge.f32.partialorder %v552_v6, 0.0  ;;  %v788_v10 = vmul.f32 0.1, %v552_v6  ;;  %vm764_vm11 = vcmp.ge.f32.partialorder %v656_v7, 0.0  ;;  %v814_v11 = vmul.f32 0.1, %v656_v7 }
 0x107   : > { %v554_v12 = vpop.f32.mrf.mxu0  ;;  %v658_v13 = vpop.f32.mrf.mxu1 }
 0x108   : > { %v838_v14 = vsel %vm738_vm10, %v552_v6, %v788_v10  ;;  %v864_v15 = vsel %vm764_vm11, %v656_v7, %v814_v11  ;;  %v555_v16 = vadd.f32 %v1582_v27, %v554_v12  ;;  %v659_v17 = vadd.f32 %v1582_v27, %v658_v13 }
 0x109   : > { %888 = vst [vmem:[%s1590_s17 + $0x20] sm:$0xff] %v838_v14  ;;  %914 = vst [vmem:[%s1590_s17 + $0xf0] sm:$0xff] %v864_v15  ;;  %v1130_v18 = vpop.f32.mrf.mxu0  ;;  %v1182_v19 = vpop.f32.mrf.mxu1 }
 0x10a   : > { %vm739_vm12 = vcmp.ge.f32.partialorder %v555_v16, 0.0  ;;  %v789_v20 = vmul.f32 0.1, %v555_v16  ;;  %vm765_vm13 = vcmp.ge.f32.partialorder %v659_v17, 0.0  ;;  %v815_v21 = vmul.f32 0.1, %v659_v17 }
 0x10b   : > { %v559_v22 = vpop.f32.mrf.mxu0  ;;  %v663_v23 = vpop.f32.mrf.mxu1 }
 0x10c   : > { %v839_v24 = vsel %vm739_vm12, %v555_v16, %v789_v20  ;;  %v865_v25 = vsel %vm765_vm13, %v659_v17, %v815_v21  ;;  %v560_v26 = vadd.f32 %v1582_v27, %v559_v22  ;;  %v664_v28 = vadd.f32 %v1582_v27, %v663_v23 }
 0x10d   : > { %889 = vst [vmem:[%s1590_s17 + $0x28] sm:$0xff] %v839_v24  ;;  %915 = vst [vmem:[%s1590_s17 + $0xf8] sm:$0xff] %v865_v25  ;;  %v1133_v29 = vpop.f32.mrf.mxu0  ;;  %v1185_v30 = vpop.f32.mrf.mxu1 }
 0x10e   : > { %vm740_vm14 = vcmp.ge.f32.partialorder %v560_v26, 0.0  ;;  %v790_v31 = vmul.f32 0.1, %v560_v26  ;;  %vm766_vm15 = vcmp.ge.f32.partialorder %v664_v28, 0.0  ;;  %v816_v32 = vmul.f32 0.1, %v664_v28 }
 0x10f   : > { %v562_v33 = vpop.f32.mrf.mxu0  ;;  %v666_v34 = vpop.f32.mrf.mxu1 }
 0x110   : > { %v840_v35 = vsel %vm740_vm14, %v560_v26, %v790_v31  ;;  %v866_v36 = vsel %vm766_vm15, %v664_v28, %v816_v32  ;;  %v563_v37 = vadd.f32 %v1582_v27, %v562_v33  ;;  %v667_v38 = vadd.f32 %v1582_v27, %v666_v34 }
 0x111   : > { %890 = vst [vmem:[%s1590_s17 + $0x30] sm:$0xff] %v840_v35  ;;  %916 = vst [vmem:[%s1590_s17 + $0x100] sm:$0xff] %v866_v36  ;;  %v1134_v39 = vpop.f32.mrf.mxu0  ;;  %v1186_v40 = vpop.f32.mrf.mxu1 }
 0x112   : > { %vm741_vm0 = vcmp.ge.f32.partialorder %v563_v37, 0.0  ;;  %v791_v41 = vmul.f32 0.1, %v563_v37  ;;  %vm767_vm1 = vcmp.ge.f32.partialorder %v667_v38, 0.0  ;;  %v817_v42 = vmul.f32 0.1, %v667_v38 }
 0x113   : > { %v567_v43 = vpop.f32.mrf.mxu0  ;;  %v671_v44 = vpop.f32.mrf.mxu1 }
 0x114   : > { %v841_v45 = vsel %vm741_vm0, %v563_v37, %v791_v41  ;;  %v867_v46 = vsel %vm767_vm1, %v667_v38, %v817_v42  ;;  %v568_v47 = vadd.f32 %v1582_v27, %v567_v43  ;;  %v672_v48 = vadd.f32 %v1582_v27, %v671_v44 }
 0x115   : > { %891 = vst [vmem:[%s1590_s17 + $0x38] sm:$0xff] %v841_v45  ;;  %917 = vst [vmem:[%s1590_s17 + $0x108] sm:$0xff] %v867_v46  ;;  %v1137_v49 = vpop.f32.mrf.mxu0  ;;  %v1189_v50 = vpop.f32.mrf.mxu1 }
 0x116   : > { %vm742_vm2 = vcmp.ge.f32.partialorder %v568_v47, 0.0  ;;  %v792_v51 = vmul.f32 0.1, %v568_v47  ;;  %vm768_vm3 = vcmp.ge.f32.partialorder %v672_v48, 0.0  ;;  %v818_v52 = vmul.f32 0.1, %v672_v48 }
 0x117   : > { %v570_v53 = vpop.f32.mrf.mxu0  ;;  %v674_v54 = vpop.f32.mrf.mxu1 }
 0x118   : > { %v842_v55 = vsel %vm742_vm2, %v568_v47, %v792_v51  ;;  %v868_v56 = vsel %vm768_vm3, %v672_v48, %v818_v52  ;;  %v571_v57 = vadd.f32 %v1582_v27, %v570_v53  ;;  %v675_v58 = vadd.f32 %v1582_v27, %v674_v54 }
 0x119   : > { %892 = vst [vmem:[%s1590_s17 + $0x40] sm:$0xff] %v842_v55  ;;  %918 = vst [vmem:[%s1590_s17 + $0x110] sm:$0xff] %v868_v56  ;;  %v1138_v59 = vpop.f32.mrf.mxu0  ;;  %v1190_v60 = vpop.f32.mrf.mxu1 }
 0x11a   : > { %vm743_vm4 = vcmp.ge.f32.partialorder %v571_v57, 0.0  ;;  %v793_v61 = vmul.f32 0.1, %v571_v57  ;;  %vm769_vm5 = vcmp.ge.f32.partialorder %v675_v58, 0.0  ;;  %v819_v62 = vmul.f32 0.1, %v675_v58 }
 0x11b   : > { %v575_v63 = vpop.f32.mrf.mxu0  ;;  %v679_v0 = vpop.f32.mrf.mxu1 }
 0x11c   : > { %v843_v1 = vsel %vm743_vm4, %v571_v57, %v793_v61  ;;  %v869_v2 = vsel %vm769_vm5, %v675_v58, %v819_v62  ;;  %v576_v3 = vadd.f32 %v1582_v27, %v575_v63  ;;  %v680_v4 = vadd.f32 %v1582_v27, %v679_v0 }
 0x11d   : > { %893 = vst [vmem:[%s1590_s17 + $0x48] sm:$0xff] %v843_v1  ;;  %919 = vst [vmem:[%s1590_s17 + $0x118] sm:$0xff] %v869_v2  ;;  %v1141_v5 = vpop.f32.mrf.mxu0  ;;  %v1193_v6 = vpop.f32.mrf.mxu1 }
 0x11e   : > { %vm744_vm6 = vcmp.ge.f32.partialorder %v576_v3, 0.0  ;;  %v794_v7 = vmul.f32 0.1, %v576_v3  ;;  %vm770_vm7 = vcmp.ge.f32.partialorder %v680_v4, 0.0  ;;  %v820_v8 = vmul.f32 0.1, %v680_v4 }
 0x11f   : > { %v578_v9 = vpop.f32.mrf.mxu0  ;;  %v682_v10 = vpop.f32.mrf.mxu1 }
 0x120   : > { %v844_v11 = vsel %vm744_vm6, %v576_v3, %v794_v7  ;;  %v870_v12 = vsel %vm770_vm7, %v680_v4, %v820_v8  ;;  %v579_v13 = vadd.f32 %v1582_v27, %v578_v9  ;;  %v683_v14 = vadd.f32 %v1582_v27, %v682_v10 }
 0x121   : > { %894 = vst [vmem:[%s1590_s17 + $0x50] sm:$0xff] %v844_v11  ;;  %920 = vst [vmem:[%s1590_s17 + $0x120] sm:$0xff] %v870_v12  ;;  %v1142_v15 = vpop.f32.mrf.mxu0  ;;  %v1194_v16 = vpop.f32.mrf.mxu1 }
 0x122   : > { %vm745_vm8 = vcmp.ge.f32.partialorder %v579_v13, 0.0  ;;  %v795_v17 = vmul.f32 0.1, %v579_v13  ;;  %vm771_vm9 = vcmp.ge.f32.partialorder %v683_v14, 0.0  ;;  %v821_v18 = vmul.f32 0.1, %v683_v14 }
 0x123   : > { %v583_v19 = vpop.f32.mrf.mxu0  ;;  %v687_v20 = vpop.f32.mrf.mxu1 }
 0x124   : > { %v845_v21 = vsel %vm745_vm8, %v579_v13, %v795_v17  ;;  %v871_v22 = vsel %vm771_vm9, %v683_v14, %v821_v18  ;;  %v584_v23 = vadd.f32 %v1582_v27, %v583_v19  ;;  %v688_v24 = vadd.f32 %v1582_v27, %v687_v20 }
 0x125   : > { %895 = vst [vmem:[%s1590_s17 + $0x58] sm:$0xff] %v845_v21  ;;  %921 = vst [vmem:[%s1590_s17 + $0x128] sm:$0xff] %v871_v22  ;;  %v1145_v25 = vpop.f32.mrf.mxu0  ;;  %v1197_v26 = vpop.f32.mrf.mxu1 }
 0x126   : > { %vm746_vm10 = vcmp.ge.f32.partialorder %v584_v23, 0.0  ;;  %v796_v28 = vmul.f32 0.1, %v584_v23  ;;  %vm772_vm11 = vcmp.ge.f32.partialorder %v688_v24, 0.0  ;;  %v822_v29 = vmul.f32 0.1, %v688_v24 }
 0x127   : > { %v586_v30 = vpop.f32.mrf.mxu0  ;;  %v690_v31 = vpop.f32.mrf.mxu1 }
 0x128   : > { %v846_v32 = vsel %vm746_vm10, %v584_v23, %v796_v28  ;;  %v872_v33 = vsel %vm772_vm11, %v688_v24, %v822_v29  ;;  %v587_v34 = vadd.f32 %v1582_v27, %v586_v30  ;;  %v691_v35 = vadd.f32 %v1582_v27, %v690_v31 }
 0x129   : > { %896 = vst [vmem:[%s1590_s17 + $0x60] sm:$0xff] %v846_v32  ;;  %922 = vst [vmem:[%s1590_s17 + $0x130] sm:$0xff] %v872_v33  ;;  %v1146_v36 = vpop.f32.mrf.mxu0  ;;  %v1198_v37 = vpop.f32.mrf.mxu1 }
 0x12a   : > { %vm747_vm12 = vcmp.ge.f32.partialorder %v587_v34, 0.0  ;;  %v797_v38 = vmul.f32 0.1, %v587_v34  ;;  %vm773_vm13 = vcmp.ge.f32.partialorder %v691_v35, 0.0  ;;  %v823_v39 = vmul.f32 0.1, %v691_v35 }
 0x12b   : > { %v591_v40 = vpop.f32.mrf.mxu0  ;;  %v695_v41 = vpop.f32.mrf.mxu1 }
 0x12c   : > { %v847_v42 = vsel %vm747_vm12, %v587_v34, %v797_v38  ;;  %v873_v43 = vsel %vm773_vm13, %v691_v35, %v823_v39  ;;  %v592_v44 = vadd.f32 %v1582_v27, %v591_v40  ;;  %v696_v45 = vadd.f32 %v1582_v27, %v695_v41 }
 0x12d   : > { %897 = vst [vmem:[%s1590_s17 + $0x68] sm:$0xff] %v847_v42  ;;  %923 = vst [vmem:[%s1590_s17 + $0x138] sm:$0xff] %v873_v43  ;;  %v1149_v46 = vpop.f32.mrf.mxu0  ;;  %v1201_v47 = vpop.f32.mrf.mxu1 }
 0x12e   : > { %vm748_vm14 = vcmp.ge.f32.partialorder %v592_v44, 0.0  ;;  %v798_v48 = vmul.f32 0.1, %v592_v44  ;;  %vm774_vm15 = vcmp.ge.f32.partialorder %v696_v45, 0.0  ;;  %v824_v49 = vmul.f32 0.1, %v696_v45 }
 0x12f   : > { %v594_v50 = vpop.f32.mrf.mxu0  ;;  %v698_v51 = vpop.f32.mrf.mxu1 }
 0x130   : > { %v848_v52 = vsel %vm748_vm14, %v592_v44, %v798_v48  ;;  %v874_v53 = vsel %vm774_vm15, %v696_v45, %v824_v49  ;;  %v595_v54 = vadd.f32 %v1582_v27, %v594_v50  ;;  %v699_v55 = vadd.f32 %v1582_v27, %v698_v51 }
 0x131   : > { %898 = vst [vmem:[%s1590_s17 + $0x70] sm:$0xff] %v848_v52  ;;  %924 = vst [vmem:[%s1590_s17 + $0x140] sm:$0xff] %v874_v53  ;;  %v1150_v56 = vpop.f32.mrf.mxu0  ;;  %v1202_v57 = vpop.f32.mrf.mxu1 }
 0x132   : > { %vm749_vm0 = vcmp.ge.f32.partialorder %v595_v54, 0.0  ;;  %v799_v58 = vmul.f32 0.1, %v595_v54  ;;  %vm775_vm1 = vcmp.ge.f32.partialorder %v699_v55, 0.0  ;;  %v825_v59 = vmul.f32 0.1, %v699_v55 }
 0x133   : > { %v599_v60 = vpop.f32.mrf.mxu0  ;;  %v703_v61 = vpop.f32.mrf.mxu1 }
 0x134   : > { %v849_v62 = vsel %vm749_vm0, %v595_v54, %v799_v58  ;;  %v875_v63 = vsel %vm775_vm1, %v699_v55, %v825_v59  ;;  %v600_v0 = vadd.f32 %v1582_v27, %v599_v60  ;;  %v704_v1 = vadd.f32 %v1582_v27, %v703_v61 }
 0x135   : > { %899 = vst [vmem:[%s1590_s17 + $0x78] sm:$0xff] %v849_v62  ;;  %925 = vst [vmem:[%s1590_s17 + $0x148] sm:$0xff] %v875_v63  ;;  %v1153_v2 = vpop.f32.mrf.mxu0  ;;  %v1205_v3 = vpop.f32.mrf.mxu1 }
 0x136   : > { %vm750_vm2 = vcmp.ge.f32.partialorder %v600_v0, 0.0  ;;  %v800_v4 = vmul.f32 0.1, %v600_v0  ;;  %vm776_vm3 = vcmp.ge.f32.partialorder %v704_v1, 0.0  ;;  %v826_v5 = vmul.f32 0.1, %v704_v1 }
 0x137   : > { %v602_v6 = vpop.f32.mrf.mxu0  ;;  %v706_v7 = vpop.f32.mrf.mxu1 }
 0x138   : > { %v850_v8 = vsel %vm750_vm2, %v600_v0, %v800_v4  ;;  %v876_v9 = vsel %vm776_vm3, %v704_v1, %v826_v5  ;;  %v603_v10 = vadd.f32 %v1582_v27, %v602_v6  ;;  %v707_v11 = vadd.f32 %v1582_v27, %v706_v7 }
 0x139   : > { %900 = vst [vmem:[%s1590_s17 + $0x80] sm:$0xff] %v850_v8  ;;  %926 = vst [vmem:[%s1590_s17 + $0x150] sm:$0xff] %v876_v9  ;;  %v1154_v12 = vpop.f32.mrf.mxu0  ;;  %v1206_v13 = vpop.f32.mrf.mxu1 }
 0x13a   : > { %vm751_vm4 = vcmp.ge.f32.partialorder %v603_v10, 0.0  ;;  %v801_v14 = vmul.f32 0.1, %v603_v10  ;;  %vm777_vm5 = vcmp.ge.f32.partialorder %v707_v11, 0.0  ;;  %v827_v15 = vmul.f32 0.1, %v707_v11 }
 0x13b   : > { %v607_v16 = vpop.f32.mrf.mxu0  ;;  %v711_v17 = vpop.f32.mrf.mxu1 }
 0x13c   : > { %v851_v18 = vsel %vm751_vm4, %v603_v10, %v801_v14  ;;  %v877_v19 = vsel %vm777_vm5, %v707_v11, %v827_v15  ;;  %v608_v20 = vadd.f32 %v1582_v27, %v607_v16  ;;  %v712_v21 = vadd.f32 %v1582_v27, %v711_v17 }
 0x13d   : > { %901 = vst [vmem:[%s1590_s17 + $0x88] sm:$0xff] %v851_v18  ;;  %927 = vst [vmem:[%s1590_s17 + $0x158] sm:$0xff] %v877_v19  ;;  %v1157_v22 = vpop.f32.mrf.mxu0  ;;  %v1209_v23 = vpop.f32.mrf.mxu1 }
 0x13e   : > { %vm752_vm6 = vcmp.ge.f32.partialorder %v608_v20, 0.0  ;;  %v802_v24 = vmul.f32 0.1, %v608_v20  ;;  %vm778_vm7 = vcmp.ge.f32.partialorder %v712_v21, 0.0  ;;  %v828_v25 = vmul.f32 0.1, %v712_v21 }
 0x13f   : > { %v610_v26 = vpop.f32.mrf.mxu0  ;;  %v714_v28 = vpop.f32.mrf.mxu1 }
 0x140   : > { %v852_v29 = vsel %vm752_vm6, %v608_v20, %v802_v24  ;;  %v878_v30 = vsel %vm778_vm7, %v712_v21, %v828_v25  ;;  %v611_v31 = vadd.f32 %v1582_v27, %v610_v26  ;;  %v715_v32 = vadd.f32 %v1582_v27, %v714_v28 }
 0x141   : > { %902 = vst [vmem:[%s1590_s17 + $0x90] sm:$0xff] %v852_v29  ;;  %928 = vst [vmem:[%s1590_s17 + $0x160] sm:$0xff] %v878_v30  ;;  %v1158_v33 = vpop.f32.mrf.mxu0  ;;  %v1210_v34 = vpop.f32.mrf.mxu1 }
 0x142   : > { %vm753_vm8 = vcmp.ge.f32.partialorder %v611_v31, 0.0  ;;  %v803_v35 = vmul.f32 0.1, %v611_v31  ;;  %vm779_vm9 = vcmp.ge.f32.partialorder %v715_v32, 0.0  ;;  %v829_v36 = vmul.f32 0.1, %v715_v32 }
 0x143   : > { %v615_v37 = vpop.f32.mrf.mxu0  ;;  %v719_v38 = vpop.f32.mrf.mxu1 }
 0x144   : > { %v853_v39 = vsel %vm753_vm8, %v611_v31, %v803_v35  ;;  %v879_v40 = vsel %vm779_vm9, %v715_v32, %v829_v36  ;;  %v616_v41 = vadd.f32 %v1582_v27, %v615_v37  ;;  %v720_v42 = vadd.f32 %v1582_v27, %v719_v38 }
 0x145   : > { %903 = vst [vmem:[%s1590_s17 + $0x98] sm:$0xff] %v853_v39  ;;  %929 = vst [vmem:[%s1590_s17 + $0x168] sm:$0xff] %v879_v40  ;;  %v1161_v43 = vpop.f32.mrf.mxu0  ;;  %v1213_v44 = vpop.f32.mrf.mxu1 }
 0x146   : > { %vm754_vm10 = vcmp.ge.f32.partialorder %v616_v41, 0.0  ;;  %v804_v45 = vmul.f32 0.1, %v616_v41  ;;  %vm780_vm11 = vcmp.ge.f32.partialorder %v720_v42, 0.0  ;;  %v830_v46 = vmul.f32 0.1, %v720_v42 }
 0x147   : > { %v618_v47 = vpop.f32.mrf.mxu0  ;;  %v722_v48 = vpop.f32.mrf.mxu1 }
 0x148   : > { %v854_v49 = vsel %vm754_vm10, %v616_v41, %v804_v45  ;;  %v880_v50 = vsel %vm780_vm11, %v720_v42, %v830_v46  ;;  %v619_v51 = vadd.f32 %v1582_v27, %v618_v47  ;;  %v723_v52 = vadd.f32 %v1582_v27, %v722_v48 }
 0x149   : > { %904 = vst [vmem:[%s1590_s17 + $0xa0] sm:$0xff] %v854_v49  ;;  %930 = vst [vmem:[%s1590_s17 + $0x170] sm:$0xff] %v880_v50  ;;  %v1162_v53 = vpop.f32.mrf.mxu0  ;;  %v1214_v54 = vpop.f32.mrf.mxu1 }
 0x14a   : > { %vm755_vm12 = vcmp.ge.f32.partialorder %v619_v51, 0.0  ;;  %v805_v55 = vmul.f32 0.1, %v619_v51  ;;  %vm781_vm13 = vcmp.ge.f32.partialorder %v723_v52, 0.0  ;;  %v831_v56 = vmul.f32 0.1, %v723_v52 }
 0x14b   : > { %v623_v57 = vpop.f32.mrf.mxu0  ;;  %v727_v58 = vpop.f32.mrf.mxu1 }
 0x14c   : > { %v855_v59 = vsel %vm755_vm12, %v619_v51, %v805_v55  ;;  %v881_v60 = vsel %vm781_vm13, %v723_v52, %v831_v56  ;;  %v624_v61 = vadd.f32 %v1582_v27, %v623_v57  ;;  %v728_v62 = vadd.f32 %v1582_v27, %v727_v58 }
 0x14d   : > { %905 = vst [vmem:[%s1590_s17 + $0xa8] sm:$0xff] %v855_v59  ;;  %931 = vst [vmem:[%s1590_s17 + $0x178] sm:$0xff] %v881_v60  ;;  %v1165_v63 = vpop.f32.mrf.mxu0  ;;  %v1217_v0 = vpop.f32.mrf.mxu1 }
 0x14e   : > { %vm756_vm14 = vcmp.ge.f32.partialorder %v624_v61, 0.0  ;;  %v806_v1 = vmul.f32 0.1, %v624_v61  ;;  %vm782_vm15 = vcmp.ge.f32.partialorder %v728_v62, 0.0  ;;  %v832_v2 = vmul.f32 0.1, %v728_v62 }
 0x14f   : > { %v626_v3 = vpop.f32.mrf.mxu0  ;;  %v730_v4 = vpop.f32.mrf.mxu1 }
 0x150   : > { %v856_v5 = vsel %vm756_vm14, %v624_v61, %v806_v1  ;;  %v882_v6 = vsel %vm782_vm15, %v728_v62, %v832_v2  ;;  %v627_v7 = vadd.f32 %v1582_v27, %v626_v3  ;;  %v731_v8 = vadd.f32 %v1582_v27, %v730_v4 }
 0x151   : > { %906 = vst [vmem:[%s1590_s17 + $0xb0] sm:$0xff] %v856_v5  ;;  %932 = vst [vmem:[%s1590_s17 + $0x180] sm:$0xff] %v882_v6  ;;  %v1166_v9 = vpop.f32.mrf.mxu0  ;;  %v1218_v10 = vpop.f32.mrf.mxu1 }
 0x152   : > { %vm757_vm0 = vcmp.ge.f32.partialorder %v627_v7, 0.0  ;;  %v807_v11 = vmul.f32 0.1, %v627_v7  ;;  %vm783_vm1 = vcmp.ge.f32.partialorder %v731_v8, 0.0  ;;  %v833_v12 = vmul.f32 0.1, %v731_v8 }
 0x153   : > { %v631_v13 = vpop.f32.mrf.mxu0 }
 0x154   : > { %v857_v14 = vsel %vm757_vm0, %v627_v7, %v807_v11  ;;  %v883_v15 = vsel %vm783_vm1, %v731_v8, %v833_v12  ;;  %v632_v16 = vadd.f32 %v1582_v27, %v631_v13 }
 0x155   : > { %907 = vst [vmem:[%s1590_s17 + $0xb8] sm:$0xff] %v857_v14  ;;  %933 = vst [vmem:[%s1590_s17 + $0x188] sm:$0xff] %v883_v15  ;;  %v1169_v17 = vpop.f32.mrf.mxu0 }
 0x156   : > { %vm758_vm2 = vcmp.ge.f32.partialorder %v632_v16, 0.0  ;;  %v808_v18 = vmul.f32 0.1, %v632_v16 }
 0x157   : > { %v634_v19 = vpop.f32.mrf.mxu0 }
 0x158   : > { %v858_v20 = vsel %vm758_vm2, %v632_v16, %v808_v18  ;;  %v635_v21 = vadd.f32 %v1582_v27, %v634_v19 }
 0x159   : > { %908 = vst [vmem:[%s1590_s17 + $0xc0] sm:$0xff] %v858_v20  ;;  %v1170_v22 = vpop.f32.mrf.mxu0 }
 0x15a   : > { %vm759_vm3 = vcmp.ge.f32.partialorder %v635_v21, 0.0  ;;  %v809_v23 = vmul.f32 0.1, %v635_v21 }
 0x15c   : > { %v859_v24 = vsel %vm759_vm3, %v635_v21, %v809_v23 }
 0x15d   : > { %909 = vst [vmem:[%s1590_s17 + $0xc8] sm:$0xff] %v859_v24 }
 0x15e PF: > { %s15_s14 = sadd.s32 1, %s1378_s14   ;;  %s1706_s12 = smov %s1374_s13 }
 0x15f   : > { %p12_p4 = scmp.ge.s32.totalorder %s15_s14, 4   ;;  %s1707_s13 = smov %s1709_s16 }
 0x161   :  { %14 = sbr.rel (!%p12_p4) target bundleno = 3 (0x3), region = 72 }
 0x166   :  { %956 = vsyncpa [#allocation3], 1 }
 0x167   :  { %958 = vsyncpa [#allocation3 + $0x1], 1 }
 0x168   :  { %959 = vsyncpa [#allocation5], 1 }

// kernel: discriminator_forward.6
= control target key start
LH: loop header
LB: loop body
LE: loop exit
PB: predicated region body
PF: predicated region fallthrough
CT: control target
= control target key end

     0   :  { %10 = vsyncpa [#allocation3], 0  ;;  %s3902_s0 = inlined_call_operand.vmem [shape: bf16[208,1024], index: 0, kind: input, shape index: {}]   ;;  %s3903_s1 = inlined_call_operand.hbm [shape: bf16[1024,128], index: 1, kind: input, shape index: {}]   ;;  %s3904_s2 = inlined_call_operand.hbm [shape: f32[1,128], index: 2, kind: input, shape index: {}]   ;;  %s3905_s3 = inlined_call_operand.hbm [shape: f32[1,128], index: 3, kind: input, shape index: {}]   ;;  %s3906_s4 = inlined_call_operand.hbm [shape: f32[1,128], index: 4, kind: input, shape index: {}]   ;;  %s3907_s5 = inlined_call_operand.vmem [shape: f32[208,128], index: 5, kind: output, shape index: {}]  }
   0x1   :  { %11 = vsyncpa [#allocation5], 0 }
   0x2   :  { %12 = vsyncpa [#allocation8], 0  ;;  %s2892_s18 = smov [#allocation4]   ;;  %s2893_s20 = smov [#allocation2]  }
   0x3   :  { %s33_s19 = sshll.u32 %s2892_s18, 4  ;;  %s20_s21 = sshll.u32 %s2893_s20, 4  ;;  %s34_s19 = int_to_ptr.vmem [resolvable:$true] %s33_s19  ;;  %s21_s21 = int_to_ptr.vmem [resolvable:$true] %s20_s21 }
   0x4   :  { %s2814_s22 = scalar_lea.vmem %s34_s19, 16  ;;  %s2818_s23 = scalar_lea.vmem %s34_s19, 32 }
   0x5   :  { %p2815_p0 = scmp.ne.s32.totalorder %s34_s19, %s2814_s22  ;;  %p2819_p1 = scmp.lt.s32.totalorder %s34_s19, %s34_s19 }
   0x6   :  { %p2820_p2 = scmp.lt.s32.totalorder %s2818_s23, %s2814_s22 }
   0x8   :  { %p2821_p3 = por %p2820_p2, %p2819_p1 }
   0xa   :  { %p2822_p4 = pnand %p2821_p3, %p2815_p0 }
   0xc   :  { %2825 = shalt.err (!%p2822_p4)
}
   0xd   :  { %36 = dma.hbm_to_vmem [thread:$0]  %s3904_s2, 16, %s34_s19, [#allocation5]  }
   0xe   :  { %s2834_s26 = scalar_lea.vmem %s21_s21, 8192  ;;  %p2839_p6 = scmp.lt.s32.totalorder %s21_s21, %s21_s21 }
   0xf   :  { %p2835_p5 = scmp.ne.s32.totalorder %s21_s21, %s2834_s26  ;;  %p2840_p7 = scmp.lt.s32.totalorder %s2834_s26, %s2834_s26 }
  0x11   :  { %p2841_p8 = por %p2840_p7, %p2839_p6 }
  0x13   :  { %p2842_p9 = pnand %p2841_p8, %p2835_p5 }
  0x15   :  { %2845 = shalt.err (!%p2842_p9)
}
  0x16   :  { %s2894_s27 = smov 64   ;;  %s2895_s28 = smov 4  }
  0x17   :  { %26 = dma.hbm_to_vmem [thread:$0]  %s3903_s1, 8192, %s21_s21, [#allocation3], %s2894_s27, %s2894_s27, %s2895_s28  }
  0x18   :  { %s2896_s6 = smov [#allocation6]   ;;  %s2897_s8 = smov [#allocation7]  }
  0x19   :  { %s43_s7 = sshll.u32 %s2896_s6, 4  ;;  %s53_s9 = sshll.u32 %s2897_s8, 4  ;;  %s44_s7 = int_to_ptr.vmem [resolvable:$true] %s43_s7  ;;  %s54_s9 = int_to_ptr.vmem [resolvable:$true] %s53_s9 }
  0x1a   :  { %s2854_s2 = scalar_lea.vmem %s44_s7, 16  ;;  %s2858_s10 = scalar_lea.vmem %s44_s7, 32 }
  0x1b   :  { %p2855_p10 = scmp.ne.s32.totalorder %s44_s7, %s2854_s2  ;;  %p2859_p11 = scmp.lt.s32.totalorder %s44_s7, %s44_s7 }
  0x1c   :  { %p2860_p12 = scmp.lt.s32.totalorder %s2858_s10, %s2854_s2 }
  0x1e   :  { %p2861_p13 = por %p2860_p12, %p2859_p11 }
  0x20   :  { %p2862_p0 = pnand %p2861_p13, %p2855_p10 }
  0x22   :  { %2865 = shalt.err (!%p2862_p0)
}
  0x23   :  { %46 = dma.hbm_to_vmem [thread:$0]  %s3905_s3, 16, %s44_s7, [#allocation5]  }
  0x24   :  { %s2874_s13 = scalar_lea.vmem %s54_s9, 16  ;;  %s2878_s1 = scalar_lea.vmem %s54_s9, 32 }
  0x25   :  { %p2875_p1 = scmp.ne.s32.totalorder %s54_s9, %s2874_s13  ;;  %p2879_p2 = scmp.lt.s32.totalorder %s54_s9, %s54_s9 }
  0x26   :  { %p2880_p3 = scmp.lt.s32.totalorder %s2878_s1, %s2874_s13 }
  0x28   :  { %p2881_p4 = por %p2880_p3, %p2879_p2 }
  0x2a   :  { %p2882_p5 = pnand %p2881_p4, %p2875_p1 }
  0x2c   :  { %2885 = shalt.err (!%p2882_p5)
}
  0x2d   :  { %56 = dma.hbm_to_vmem [thread:$0]  %s3906_s4, 16, %s54_s9, [#allocation8]  }
  0x2e   :  { %2886 = dma.done.wait [#allocation3], 8192  }
  0x2f   :  { %2887 = vsyncadd [#allocation3], 4294959104 }
  0x30   :  { %2888 = dma.done.wait [#allocation5], 32  }
  0x31   :  { %2889 = vsyncadd [#allocation5], 4294967264 }
  0x32   :  { %2890 = dma.done.wait [#allocation8], 16  }
  0x33   :  { %2891 = vsyncadd [#allocation8], 4294967280  ;;  %v2740_v0 = vld [vmem:[#allocation2 + $0x78] sm:$0xff]   ;;  %v2744_v4 = vld [vmem:[#allocation2 + $0x70] sm:$0xff]  }
  0x34   :  { %v2741_v1 = vld [vmem:[#allocation2 + $0xf8] sm:$0xff]   ;;  %2358 = vmatprep.subr.bf16.mxu0 %v2740_v0  ;;  %v2745_v5 = vld [vmem:[#allocation2 + $0xf0] sm:$0xff]   ;;  %v2748_v8 = vld [vmem:[#allocation2 + $0x68] sm:$0xff]  }
  0x35   :  { %v2742_v2 = vld [vmem:[#allocation2 + $0x38] sm:$0xff]   ;;  %2452 = vmatprep.subr.bf16.mxu1 %v2741_v1  ;;  %v2746_v6 = vld [vmem:[#allocation2 + $0x30] sm:$0xff]   ;;  %v2749_v9 = vld [vmem:[#allocation2 + $0xe8] sm:$0xff]  }
  0x36   :  { %v2743_v3 = vld [vmem:[#allocation2 + $0xb8] sm:$0xff]   ;;  %2359 = vmatpush3.bf16.msra.mxu0 %v2742_v2  ;;  %v2747_v7 = vld [vmem:[#allocation2 + $0xb0] sm:$0xff]   ;;  %v2750_v10 = vld [vmem:[#allocation2 + $0x28] sm:$0xff]  }
  0x37   :  { %2453 = vmatpush3.bf16.msra.mxu1 %v2743_v3  ;;  %2360 = vmatprep.subr.bf16.mxu0 %v2744_v4  ;;  %v2751_v11 = vld [vmem:[#allocation2 + $0xa8] sm:$0xff]   ;;  %v2752_v12 = vld [vmem:[#allocation2 + $0x60] sm:$0xff]   ;;  %v2756_v16 = vld [vmem:[#allocation2 + $0x58] sm:$0xff]  }
  0x38   :  { %2454 = vmatprep.subr.bf16.mxu1 %v2745_v5  ;;  %v2753_v13 = vld [vmem:[#allocation2 + $0xe0] sm:$0xff]   ;;  %v2757_v17 = vld [vmem:[#allocation2 + $0xd8] sm:$0xff]   ;;  %v2760_v20 = vld [vmem:[#allocation2 + $0x50] sm:$0xff]  }
  0x39   :  { %v2754_v14 = vld [vmem:[#allocation2 + $0x20] sm:$0xff]   ;;  %v2758_v18 = vld [vmem:[#allocation2 + $0x18] sm:$0xff]   ;;  %v2761_v21 = vld [vmem:[#allocation2 + $0xd0] sm:$0xff]  }
  0x3a   :  { %2361 = vmatpush3.bf16.msra.mxu0 %v2746_v6  ;;  %v2755_v15 = vld [vmem:[#allocation2 + $0xa0] sm:$0xff]   ;;  %v2759_v19 = vld [vmem:[#allocation2 + $0x98] sm:$0xff]   ;;  %v2762_v22 = vld [vmem:[#allocation2 + $0x10] sm:$0xff]  }
  0x3b   :  { %2455 = vmatpush3.bf16.msra.mxu1 %v2747_v7  ;;  %2362 = vmatprep.subr.bf16.mxu0 %v2748_v8  ;;  %v2763_v23 = vld [vmem:[#allocation2 + $0x90] sm:$0xff]   ;;  %v2764_v24 = vld [vmem:[#allocation2 + $0x48] sm:$0xff]   ;;  %v2768_v28 = vld [vmem:[#allocation2 + $0x40] sm:$0xff]  }
  0x3c   :  { %2456 = vmatprep.subr.bf16.mxu1 %v2749_v9  ;;  %v2765_v25 = vld [vmem:[#allocation2 + $0xc8] sm:$0xff]   ;;  %v2769_v29 = vld [vmem:[#allocation2 + $0xc0] sm:$0xff]   ;;  %v2772_v40 = vld [vmem:[#allocation2 + $0x178] sm:$0xff]  }
  0x3d   :  { %v2766_v26 = vld [vmem:[#allocation2 + $0x8] sm:$0xff]   ;;  %v2770_v30 = vld [vmem:[#allocation2] sm:$0xff]   ;;  %v2773_v41 = vld [vmem:[#allocation2 + $0x138] sm:$0xff]  }
  0x3e   :  { %2363 = vmatpush3.bf16.msra.mxu0 %v2750_v10  ;;  %v2767_v27 = vld [vmem:[#allocation2 + $0x88] sm:$0xff]   ;;  %v2771_v31 = vld [vmem:[#allocation2 + $0x80] sm:$0xff]   ;;  %v2774_v42 = vld [vmem:[#allocation2 + $0x1f8] sm:$0xff]  }
  0x3f   :  { %2457 = vmatpush3.bf16.msra.mxu1 %v2751_v11  ;;  %2364 = vmatprep.subr.bf16.mxu0 %v2752_v12  ;;  %v70_v32 = vld [vmem:[%s3902_s0] sm:$0xff]  ;;  %v71_v34 = vld [vmem:[%s3902_s0 + $0x8] sm:$0xff]  ;;  %v2775_v43 = vld [vmem:[#allocation2 + $0x1b8] sm:$0xff]  }
  0x40   :  { %2458 = vmatprep.subr.bf16.mxu1 %v2753_v13  ;;  %v74_v33 = vld [vmem:[%s3902_s0 + $0x20] sm:$0xff]  ;;  %v75_v37 = vld [vmem:[%s3902_s0 + $0x28] sm:$0xff]  ;;  %v2776_v50 = vld [vmem:[#allocation2 + $0x170] sm:$0xff]  }
  0x41   :  { %v2188_v35 = vcombine.low %v70_v32, %v74_v33  ;;  %v2189_v36 = vcombine.high %v70_v32, %v74_v33  ;;  %v2190_v38 = vcombine.low %v71_v34, %v75_v37  ;;  %v2191_v39 = vcombine.high %v71_v34, %v75_v37  ;;  %v78_v44 = vld [vmem:[%s3902_s0 + $0x40] sm:$0xff]  ;;  %v79_v47 = vld [vmem:[%s3902_s0 + $0x48] sm:$0xff]  ;;  %v2777_v52 = vld [vmem:[#allocation2 + $0x130] sm:$0xff]  }
  0x42   :  { %2365 = vmatpush3.bf16.msra.mxu0 %v2754_v14  ;;  %v82_v45 = vld [vmem:[%s3902_s0 + $0x60] sm:$0xff]  ;;  %v83_v48 = vld [vmem:[%s3902_s0 + $0x68] sm:$0xff]  ;;  %v2778_v60 = vld [vmem:[#allocation2 + $0x1f0] sm:$0xff]  }
  0x43   :  { %2459 = vmatpush3.bf16.msra.mxu1 %v2755_v15  ;;  %2366 = vmatprep.subr.bf16.mxu0 %v2756_v16  ;;  %v2197_v46 = vcombine.high %v78_v44, %v82_v45  ;;  %v2199_v49 = vcombine.high %v79_v47, %v83_v48  ;;  %v2196_v51 = vcombine.low %v78_v44, %v82_v45  ;;  %v86_v53 = vld [vmem:[%s3902_s0 + $0x80] sm:$0xff]  ;;  %v87_v56 = vld [vmem:[%s3902_s0 + $0x88] sm:$0xff]  ;;  %v2779_v61 = vld [vmem:[#allocation2 + $0x1b0] sm:$0xff]  }
  0x44   :  { %2460 = vmatprep.subr.bf16.mxu1 %v2757_v17  ;;  %1245 = vmatprep.mubr.bf16.mxu0 %v2189_v36  ;;  %v2198_v54 = vcombine.low %v79_v47, %v83_v48  ;;  %v90_v55 = vld [vmem:[%s3902_s0 + $0xa0] sm:$0xff]  ;;  %v91_v57 = vld [vmem:[%s3902_s0 + $0xa8] sm:$0xff]  ;;  %v2793_v34 = vld [vmem:[#allocation2 + $0x110] sm:$0xff]  }
  0x45   :  { %1382 = vmatprep.mubr.bf16.mxu1 %v2191_v39  ;;  %v2205_v58 = vcombine.high %v86_v53, %v90_v55  ;;  %v2207_v59 = vcombine.high %v87_v56, %v91_v57  ;;  %v94_v62 = vld [vmem:[%s3902_s0 + $0xc0] sm:$0xff]  ;;  %v95_v0 = vld [vmem:[%s3902_s0 + $0xc8] sm:$0xff]  ;;  %v2204_v4 = vcombine.low %v86_v53, %v90_v55  ;;  %v2206_v6 = vcombine.low %v87_v56, %v91_v57  ;;  %v2794_v36 = vld [vmem:[#allocation2 + $0x1d0] sm:$0xff]  }
  0x46   :  { %2367 = vmatpush3.bf16.msra.mxu0 %v2758_v18  ;;  %v98_v63 = vld [vmem:[%s3902_s0 + $0xe0] sm:$0xff]  ;;  %v99_v1 = vld [vmem:[%s3902_s0 + $0xe8] sm:$0xff]  ;;  %v2795_v37 = vld [vmem:[#allocation2 + $0x190] sm:$0xff]  }
  0x47   :  { %2461 = vmatpush3.bf16.msra.mxu1 %v2759_v19  ;;  %2368 = vmatprep.subr.bf16.mxu0 %v2760_v20  ;;  %v2780_v2 = vld [vmem:[#allocation2 + $0x168] sm:$0xff]   ;;  %v2213_v7 = vcombine.high %v94_v62, %v98_v63  ;;  %v2215_v9 = vcombine.high %v95_v0, %v99_v1  ;;  %v102_v10 = vld [vmem:[%s3902_s0 + $0x100] sm:$0xff]  ;;  %v2212_v18 = vcombine.low %v94_v62, %v98_v63 }
  0x48   :  { %2462 = vmatprep.subr.bf16.mxu1 %v2761_v21  ;;  %v2781_v3 = vld [vmem:[#allocation2 + $0x128] sm:$0xff]   ;;  %v106_v11 = vld [vmem:[%s3902_s0 + $0x120] sm:$0xff]  ;;  %v2214_v19 = vcombine.low %v95_v0, %v99_v1 }
  0x49   :  { %v2782_v5 = vld [vmem:[#allocation2 + $0x1e8] sm:$0xff]   ;;  %v2784_v12 = vld [vmem:[#allocation2 + $0x160] sm:$0xff]   ;;  %v2221_v20 = vcombine.high %v102_v10, %v106_v11 }
  0x4a   :  { %2369 = vmatpush3.bf16.msra.mxu0 %v2762_v22  ;;  %v2783_v8 = vld [vmem:[#allocation2 + $0x1a8] sm:$0xff]   ;;  %v2785_v15 = vld [vmem:[#allocation2 + $0x120] sm:$0xff]   ;;  %v2788_v22 = vld [vmem:[#allocation2 + $0x158] sm:$0xff]  }
  0x4b   :  { %2463 = vmatpush3.bf16.msra.mxu1 %v2763_v23  ;;  %2370 = vmatprep.subr.bf16.mxu0 %v2764_v24  ;;  %v103_v13 = vld [vmem:[%s3902_s0 + $0x108] sm:$0xff]  ;;  %v2786_v16 = vld [vmem:[#allocation2 + $0x1e0] sm:$0xff]   ;;  %v2789_v23 = vld [vmem:[#allocation2 + $0x118] sm:$0xff]  }
  0x4c   :  { %2464 = vmatprep.subr.bf16.mxu1 %v2765_v25  ;;  %v107_v14 = vld [vmem:[%s3902_s0 + $0x128] sm:$0xff]  ;;  %v2787_v17 = vld [vmem:[#allocation2 + $0x1a0] sm:$0xff]   ;;  %v2790_v24 = vld [vmem:[#allocation2 + $0x1d8] sm:$0xff]  }
  0x4d   :  { %v2223_v21 = vcombine.high %v103_v13, %v107_v14  ;;  %v110_v25 = vld [vmem:[%s3902_s0 + $0x140] sm:$0xff]  ;;  %v2222_v32 = vcombine.low %v103_v13, %v107_v14  ;;  %v2797_v44 = vld [vmem:[#allocation2 + $0x108] sm:$0xff]  }
  0x4e   :  { %2371 = vmatpush3.bf16.msra.mxu0 %v2766_v26  ;;  %v114_v26 = vld [vmem:[%s3902_s0 + $0x160] sm:$0xff]  ;;  %v2798_v47 = vld [vmem:[#allocation2 + $0x1c8] sm:$0xff]  }
  0x4f   :  { %2465 = vmatpush3.bf16.msra.mxu1 %v2767_v27  ;;  %2372 = vmatprep.subr.bf16.mxu0 %v2768_v28  ;;  %v2791_v27 = vld [vmem:[#allocation2 + $0x198] sm:$0xff]   ;;  %v111_v28 = vld [vmem:[%s3902_s0 + $0x148] sm:$0xff]  ;;  %v2229_v33 = vcombine.high %v110_v25, %v114_v26  ;;  %v122_v39 = vld [vmem:[%s3902_s0 + $0x1a0] sm:$0xff] }
  0x50   :  { %2466 = vmatprep.subr.bf16.mxu1 %v2769_v29  ;;  %v115_v29 = vld [vmem:[%s3902_s0 + $0x168] sm:$0xff]  ;;  %v2801_v55 = vld [vmem:[#allocation2 + $0x100] sm:$0xff]  }
  0x51   :  { %v2230_v45 = vcombine.low %v111_v28, %v115_v29  ;;  %v127_v53 = vld [vmem:[%s3902_s0 + $0x1c8] sm:$0xff]  ;;  %v2802_v56 = vld [vmem:[#allocation2 + $0x1c0] sm:$0xff]  }
  0x52   :  { %2373 = vmatpush3.bf16.msra.mxu0 %v2770_v30  ;;  %v2220_v30 = vcombine.low %v102_v10, %v106_v11  ;;  %v2803_v57 = vld [vmem:[#allocation2 + $0x180] sm:$0xff]   ;;  %v135_v0 = vld [vmem:[%s3902_s0 + $0x208] sm:$0xff] }
  0x53   :  { %2467 = vmatpush3.bf16.msra.mxu1 %v2771_v31  ;;  %2546 = vmatprep.subr.bf16.mxu0 %v2772_v40  ;;  %v2792_v31 = vld [vmem:[#allocation2 + $0x150] sm:$0xff]   ;;  %v2796_v40 = vld [vmem:[#allocation2 + $0x148] sm:$0xff]   ;;  %v134_v62 = vld [vmem:[%s3902_s0 + $0x200] sm:$0xff] }
  0x54   :  { %2640 = vmatprep.subr.bf16.mxu1 %v2774_v42  ;;  %v123_v42 = vld [vmem:[%s3902_s0 + $0x1a8] sm:$0xff]  ;;  %v138_v63 = vld [vmem:[%s3902_s0 + $0x220] sm:$0xff] }
  0x55   :  { %1246 = vmatmul.mubr.bf16.vlgmr.msra.gmra.mxu0 %v2188_v35  ;;  %v2231_v35 = vcombine.high %v111_v28, %v115_v29  ;;  %v139_v1 = vld [vmem:[%s3902_s0 + $0x228] sm:$0xff]  ;;  %v2252_v10 = vcombine.low %v134_v62, %v138_v63  ;;  %v150_v14 = vld [vmem:[%s3902_s0 + $0x280] sm:$0xff] }
  0x56   :  { %1383 = vmatmul.mubr.bf16.vlgmr.msra.gmra.mxu1 %v2190_v38  ;;  %2547 = vmatpush3.bf16.msra.mxu0 %v2773_v41  ;;  %v118_v38 = vld [vmem:[%s3902_s0 + $0x180] sm:$0xff]  ;;  %v119_v41 = vld [vmem:[%s3902_s0 + $0x188] sm:$0xff]  ;;  %v2254_v11 = vcombine.low %v135_v0, %v139_v1 }
  0x57   :  { %2641 = vmatpush3.bf16.msra.mxu1 %v2775_v43  ;;  %1253 = vmatprep.mubr.bf16.mxu0 %v2197_v46  ;;  %v2228_v43 = vcombine.low %v110_v25, %v114_v26  ;;  %v2237_v46 = vcombine.high %v118_v38, %v122_v39  ;;  %v2239_v48 = vcombine.high %v119_v41, %v123_v42  ;;  %v163_v25 = vld [vmem:[%s3902_s0 + $0x2e8] sm:$0xff] }
  0x58   :  { %1390 = vmatprep.mubr.bf16.mxu1 %v2199_v49  ;;  %2548 = vmatprep.subr.bf16.mxu0 %v2776_v50  ;;  %v2799_v49 = vld [vmem:[#allocation2 + $0x188] sm:$0xff]   ;;  %v126_v50 = vld [vmem:[%s3902_s0 + $0x1c0] sm:$0xff] }
  0x59   :  { %2642 = vmatprep.subr.bf16.mxu1 %v2778_v60 }
  0x5a   :  { %2549 = vmatpush3.bf16.msra.mxu0 %v2777_v52  ;;  %v2800_v52 = vld [vmem:[#allocation2 + $0x140] sm:$0xff]  }
  0x5b   :  { %2643 = vmatpush3.bf16.msra.mxu1 %v2779_v61  ;;  %2550 = vmatprep.subr.bf16.mxu0 %v2780_v2 }
  0x5c   :  { %2644 = vmatprep.subr.bf16.mxu1 %v2782_v5  ;;  %v2255_v5 = vcombine.high %v135_v0, %v139_v1  ;;  %v97_v0 = vld [vmem:[%s3902_s0 + $0xd8] sm:$0xff] }
  0x5d   :  { %1254 = vmatmul.mubr.bf16.gmra.mxu0 %v2196_v51  ;;  %v130_v51 = vld [vmem:[%s3902_s0 + $0x1e0] sm:$0xff]  ;;  %v101_v1 = vld [vmem:[%s3902_s0 + $0xf8] sm:$0xff] }
  0x5e   :  { %1391 = vmatmul.mubr.bf16.gmra.mxu1 %v2198_v54  ;;  %1261 = vmatprep.mubr.bf16.mxu0 %v2205_v58  ;;  %v131_v54 = vld [vmem:[%s3902_s0 + $0x1e8] sm:$0xff]  ;;  %v2236_v58 = vcombine.low %v118_v38, %v122_v39  ;;  %v2245_v60 = vcombine.high %v126_v50, %v130_v51  ;;  %v2244_v2 = vcombine.low %v126_v50, %v130_v51  ;;  %v72_v38 = vld [vmem:[%s3902_s0 + $0x10] sm:$0xff] }
  0x5f   :  { %1398 = vmatprep.mubr.bf16.mxu1 %v2207_v59  ;;  %2551 = vmatpush3.bf16.msra.mxu0 %v2781_v3  ;;  %v2238_v59 = vcombine.low %v119_v41, %v123_v42  ;;  %v2247_v61 = vcombine.high %v127_v53, %v131_v54  ;;  %v2246_v3 = vcombine.low %v127_v53, %v131_v54  ;;  %v76_v39 = vld [vmem:[%s3902_s0 + $0x30] sm:$0xff]  ;;  %v77_v41 = vld [vmem:[%s3902_s0 + $0x38] sm:$0xff] }
  0x60   :  { %2645 = vmatpush3.bf16.msra.mxu1 %v2783_v8  ;;  %2552 = vmatprep.subr.bf16.mxu0 %v2784_v12  ;;  %v143_v8 = vld [vmem:[%s3902_s0 + $0x248] sm:$0xff]  ;;  %v2192_v50 = vcombine.low %v72_v38, %v76_v39  ;;  %v88_v54 = vld [vmem:[%s3902_s0 + $0x90] sm:$0xff] }
  0x61   :  { %2646 = vmatprep.subr.bf16.mxu1 %v2786_v16  ;;  %v151_v16 = vld [vmem:[%s3902_s0 + $0x288] sm:$0xff] }
  0x63   :  { %2553 = vmatpush3.bf16.msra.mxu0 %v2785_v15  ;;  %v154_v15 = vld [vmem:[%s3902_s0 + $0x2a0] sm:$0xff] }
  0x64   :  { %2647 = vmatpush3.bf16.msra.mxu1 %v2787_v17  ;;  %2554 = vmatprep.subr.bf16.mxu0 %v2788_v22  ;;  %v155_v17 = vld [vmem:[%s3902_s0 + $0x2a8] sm:$0xff]  ;;  %v158_v22 = vld [vmem:[%s3902_s0 + $0x2c0] sm:$0xff]  ;;  %v2268_v26 = vcombine.low %v150_v14, %v154_v15 }
  0x65   :  { %1262 = vmatmul.mubr.bf16.gmra.mxu0 %v2204_v4  ;;  %2648 = vmatprep.subr.bf16.mxu1 %v2790_v24  ;;  %v2253_v4 = vcombine.high %v134_v62, %v138_v63  ;;  %v159_v24 = vld [vmem:[%s3902_s0 + $0x2c8] sm:$0xff]  ;;  %v96_v62 = vld [vmem:[%s3902_s0 + $0xd0] sm:$0xff] }
  0x66   :  { %1399 = vmatmul.mubr.bf16.gmra.mxu1 %v2206_v6  ;;  %1269 = vmatprep.mubr.bf16.mxu0 %v2213_v7  ;;  %v142_v6 = vld [vmem:[%s3902_s0 + $0x240] sm:$0xff]  ;;  %v2279_v29 = vcombine.high %v159_v24, %v163_v25  ;;  %v100_v63 = vld [vmem:[%s3902_s0 + $0xf0] sm:$0xff] }
  0x67   :  { %1406 = vmatprep.mubr.bf16.mxu1 %v2215_v9  ;;  %2555 = vmatpush3.bf16.msra.mxu0 %v2789_v23  ;;  %v146_v7 = vld [vmem:[%s3902_s0 + $0x260] sm:$0xff]  ;;  %v147_v9 = vld [vmem:[%s3902_s0 + $0x268] sm:$0xff] }
  0x68   :  { %2649 = vmatpush3.bf16.msra.mxu1 %v2791_v27  ;;  %2556 = vmatprep.subr.bf16.mxu0 %v2792_v31  ;;  %v2261_v12 = vcombine.high %v142_v6, %v146_v7  ;;  %v2263_v13 = vcombine.high %v143_v8, %v147_v9  ;;  %v162_v23 = vld [vmem:[%s3902_s0 + $0x2e0] sm:$0xff]  ;;  %v2270_v27 = vcombine.low %v151_v16, %v155_v17 }
  0x69   :  { %2650 = vmatprep.subr.bf16.mxu1 %v2794_v36  ;;  %v2277_v28 = vcombine.high %v158_v22, %v162_v23  ;;  %v170_v31 = vld [vmem:[%s3902_s0 + $0x320] sm:$0xff] }
  0x6b   :  { %2557 = vmatpush3.bf16.msra.mxu0 %v2793_v34  ;;  %v2276_v34 = vcombine.low %v158_v22, %v162_v23  ;;  %v120_v22 = vld [vmem:[%s3902_s0 + $0x190] sm:$0xff] }
  0x6c   :  { %2651 = vmatpush3.bf16.msra.mxu1 %v2795_v37  ;;  %2558 = vmatprep.subr.bf16.mxu0 %v2796_v40  ;;  %v73_v40 = vld [vmem:[%s3902_s0 + $0x18] sm:$0xff]  ;;  %v124_v23 = vld [vmem:[%s3902_s0 + $0x1b0] sm:$0xff] }
  0x6d   :  { %1270 = vmatmul.mubr.bf16.gmra.mxu0 %v2212_v18  ;;  %2652 = vmatprep.subr.bf16.mxu1 %v2798_v47  ;;  %v2260_v18 = vcombine.low %v142_v6, %v146_v7  ;;  %v84_v47 = vld [vmem:[%s3902_s0 + $0x70] sm:$0xff]  ;;  %v2194_v51 = vcombine.low %v73_v40, %v77_v41 }
  0x6e   :  { %1407 = vmatmul.mubr.bf16.gmra.mxu1 %v2214_v19  ;;  %1277 = vmatprep.mubr.bf16.mxu0 %v2221_v20  ;;  %v2262_v19 = vcombine.low %v143_v8, %v147_v9  ;;  %v2269_v20 = vcombine.high %v150_v14, %v154_v15  ;;  %v104_v6 = vld [vmem:[%s3902_s0 + $0x110] sm:$0xff]  ;;  %v105_v8 = vld [vmem:[%s3902_s0 + $0x118] sm:$0xff] }
  0x6f   :  { %1414 = vmatprep.mubr.bf16.mxu1 %v2223_v21  ;;  %2559 = vmatpush3.bf16.msra.mxu0 %v2797_v44  ;;  %v2271_v21 = vcombine.high %v151_v16, %v155_v17  ;;  %v2193_v44 = vcombine.high %v72_v38, %v76_v39  ;;  %v108_v7 = vld [vmem:[%s3902_s0 + $0x130] sm:$0xff]  ;;  %v109_v9 = vld [vmem:[%s3902_s0 + $0x138] sm:$0xff] }
  0x70   :  { %2653 = vmatpush3.bf16.msra.mxu1 %v2799_v49  ;;  %2560 = vmatprep.subr.bf16.mxu0 %v2800_v52  ;;  %v85_v49 = vld [vmem:[%s3902_s0 + $0x78] sm:$0xff]  ;;  %v112_v14 = vld [vmem:[%s3902_s0 + $0x150] sm:$0xff] }
  0x71   :  { %2654 = vmatprep.subr.bf16.mxu1 %v2802_v56  ;;  %v89_v56 = vld [vmem:[%s3902_s0 + $0x98] sm:$0xff]  ;;  %v116_v15 = vld [vmem:[%s3902_s0 + $0x170] sm:$0xff] }
  0x72   :  { %v113_v16 = vld [vmem:[%s3902_s0 + $0x158] sm:$0xff]  ;;  %v136_v38 = vld [vmem:[%s3902_s0 + $0x210] sm:$0xff] }
  0x73   :  { %2561 = vmatpush3.bf16.msra.mxu0 %v2801_v55  ;;  %v92_v55 = vld [vmem:[%s3902_s0 + $0xb0] sm:$0xff]  ;;  %v117_v17 = vld [vmem:[%s3902_s0 + $0x178] sm:$0xff] }
  0x74   :  { %2655 = vmatpush3.bf16.msra.mxu1 %v2803_v57  ;;  %v93_v57 = vld [vmem:[%s3902_s0 + $0xb8] sm:$0xff]  ;;  %v140_v39 = vld [vmem:[%s3902_s0 + $0x230] sm:$0xff] }
  0x75   :  { %1278 = vmatmul.mubr.bf16.gmra.mxu0 %v2220_v30  ;;  %v166_v30 = vld [vmem:[%s3902_s0 + $0x300] sm:$0xff] }
  0x76   :  { %1415 = vmatmul.mubr.bf16.gmra.mxu1 %v2222_v32  ;;  %1285 = vmatprep.mubr.bf16.mxu0 %v2229_v33  ;;  %v167_v32 = vld [vmem:[%s3902_s0 + $0x308] sm:$0xff]  ;;  %v2285_v36 = vcombine.high %v166_v30, %v170_v31  ;;  %v2284_v42 = vcombine.low %v166_v30, %v170_v31  ;;  %v128_v30 = vld [vmem:[%s3902_s0 + $0x1d0] sm:$0xff] }
  0x77   :  { %1422 = vmatprep.mubr.bf16.mxu1 %v2231_v35  ;;  %v171_v33 = vld [vmem:[%s3902_s0 + $0x328] sm:$0xff]  ;;  %v2278_v35 = vcombine.low %v159_v24, %v163_v25  ;;  %v121_v24 = vld [vmem:[%s3902_s0 + $0x198] sm:$0xff]  ;;  %v132_v31 = vld [vmem:[%s3902_s0 + $0x1f0] sm:$0xff] }
  0x78   :  { %v2287_v37 = vcombine.high %v167_v32, %v171_v33  ;;  %v125_v25 = vld [vmem:[%s3902_s0 + $0x1b8] sm:$0xff] }
  0x7d   :  { %1286 = vmatmul.mubr.bf16.gmra.mxu0 %v2228_v43  ;;  %v2286_v43 = vcombine.low %v167_v32, %v171_v33  ;;  %v129_v32 = vld [vmem:[%s3902_s0 + $0x1d8] sm:$0xff] }
  0x7e   :  { %1423 = vmatmul.mubr.bf16.gmra.mxu1 %v2230_v45  ;;  %1293 = vmatprep.mubr.bf16.mxu0 %v2237_v46  ;;  %v2195_v45 = vcombine.high %v73_v40, %v77_v41  ;;  %v80_v46 = vld [vmem:[%s3902_s0 + $0x50] sm:$0xff]  ;;  %v133_v33 = vld [vmem:[%s3902_s0 + $0x1f8] sm:$0xff] }
  0x7f   :  { %1430 = vmatprep.mubr.bf16.mxu1 %v2239_v48  ;;  %v81_v48 = vld [vmem:[%s3902_s0 + $0x58] sm:$0xff]  ;;  %v2201_v52 = vcombine.high %v80_v46, %v84_v47 }
  0x80   :  { %v2203_v53 = vcombine.high %v81_v48, %v85_v49  ;;  %v137_v40 = vld [vmem:[%s3902_s0 + $0x218] sm:$0xff] }
  0x81   :  { %v141_v41 = vld [vmem:[%s3902_s0 + $0x238] sm:$0xff] }
  0x85   :  { %1294 = vmatmul.mubr.bf16.gmra.mxu0 %v2236_v58  ;;  %v2200_v58 = vcombine.low %v80_v46, %v84_v47  ;;  %v144_v46 = vld [vmem:[%s3902_s0 + $0x250] sm:$0xff] }
  0x86   :  { %1431 = vmatmul.mubr.bf16.gmra.mxu1 %v2238_v59  ;;  %1301 = vmatprep.mubr.bf16.mxu0 %v2245_v60  ;;  %v2202_v59 = vcombine.low %v81_v48, %v85_v49  ;;  %v2209_v60 = vcombine.high %v88_v54, %v92_v55  ;;  %v148_v47 = vld [vmem:[%s3902_s0 + $0x270] sm:$0xff]  ;;  %v145_v48 = vld [vmem:[%s3902_s0 + $0x258] sm:$0xff] }
  0x87   :  { %1438 = vmatprep.mubr.bf16.mxu1 %v2247_v61  ;;  %v2211_v61 = vcombine.high %v89_v56, %v93_v57  ;;  %v149_v49 = vld [vmem:[%s3902_s0 + $0x278] sm:$0xff] }
  0x8d   :  { %1302 = vmatmul.mubr.bf16.gmra.mxu0 %v2244_v2  ;;  %v2208_v2 = vcombine.low %v88_v54, %v92_v55  ;;  %v152_v54 = vld [vmem:[%s3902_s0 + $0x290] sm:$0xff] }
  0x8e   :  { %1439 = vmatmul.mubr.bf16.gmra.mxu1 %v2246_v3  ;;  %1309 = vmatprep.mubr.bf16.mxu0 %v2253_v4  ;;  %v2210_v3 = vcombine.low %v89_v56, %v93_v57  ;;  %v2217_v4 = vcombine.high %v96_v62, %v100_v63  ;;  %v156_v55 = vld [vmem:[%s3902_s0 + $0x2b0] sm:$0xff]  ;;  %v153_v56 = vld [vmem:[%s3902_s0 + $0x298] sm:$0xff] }
  0x8f   :  { %1446 = vmatprep.mubr.bf16.mxu1 %v2255_v5  ;;  %v2219_v5 = vcombine.high %v97_v0, %v101_v1  ;;  %v157_v57 = vld [vmem:[%s3902_s0 + $0x2b8] sm:$0xff] }
  0x95   :  { %1310 = vmatmul.mubr.bf16.gmra.mxu0 %v2252_v10  ;;  %v2216_v10 = vcombine.low %v96_v62, %v100_v63  ;;  %v160_v62 = vld [vmem:[%s3902_s0 + $0x2d0] sm:$0xff] }
  0x96   :  { %1447 = vmatmul.mubr.bf16.gmra.mxu1 %v2254_v11  ;;  %1317 = vmatprep.mubr.bf16.mxu0 %v2261_v12  ;;  %v2218_v11 = vcombine.low %v97_v0, %v101_v1  ;;  %v2225_v12 = vcombine.high %v104_v6, %v108_v7  ;;  %v164_v63 = vld [vmem:[%s3902_s0 + $0x2f0] sm:$0xff]  ;;  %v161_v0 = vld [vmem:[%s3902_s0 + $0x2d8] sm:$0xff] }
  0x97   :  { %1454 = vmatprep.mubr.bf16.mxu1 %v2263_v13  ;;  %v2227_v13 = vcombine.high %v105_v8, %v109_v9  ;;  %v165_v1 = vld [vmem:[%s3902_s0 + $0x2f8] sm:$0xff] }
  0x9d   :  { %1318 = vmatmul.mubr.bf16.gmra.mxu0 %v2260_v18  ;;  %v2224_v18 = vcombine.low %v104_v6, %v108_v7  ;;  %v168_v6 = vld [vmem:[%s3902_s0 + $0x310] sm:$0xff] }
  0x9e   :  { %1455 = vmatmul.mubr.bf16.gmra.mxu1 %v2262_v19  ;;  %1325 = vmatprep.mubr.bf16.mxu0 %v2269_v20  ;;  %v2226_v19 = vcombine.low %v105_v8, %v109_v9  ;;  %v2233_v20 = vcombine.high %v112_v14, %v116_v15  ;;  %v172_v7 = vld [vmem:[%s3902_s0 + $0x330] sm:$0xff]  ;;  %v169_v8 = vld [vmem:[%s3902_s0 + $0x318] sm:$0xff] }
  0x9f   :  { %1462 = vmatprep.mubr.bf16.mxu1 %v2271_v21  ;;  %v2235_v21 = vcombine.high %v113_v16, %v117_v17  ;;  %v173_v9 = vld [vmem:[%s3902_s0 + $0x338] sm:$0xff] }
  0xa5   :  { %1326 = vmatmul.mubr.bf16.gmra.mxu0 %v2268_v26  ;;  %v2232_v26 = vcombine.low %v112_v14, %v116_v15 }
  0xa6   :  { %1463 = vmatmul.mubr.bf16.gmra.mxu1 %v2270_v27  ;;  %1333 = vmatprep.mubr.bf16.mxu0 %v2277_v28  ;;  %v2234_v27 = vcombine.low %v113_v16, %v117_v17  ;;  %v2241_v28 = vcombine.high %v120_v22, %v124_v23  ;;  %v3252_v16 = vld [vmem:[#allocation4] ss:$0 sm:$0xff] }
  0xa7   :  { %1470 = vmatprep.mubr.bf16.mxu1 %v2279_v29  ;;  %v2243_v29 = vcombine.high %v121_v24, %v125_v25 }
  0xad   :  { %1334 = vmatmul.mubr.bf16.gmra.mxu0 %v2276_v34  ;;  %v2240_v34 = vcombine.low %v120_v22, %v124_v23  ;;  %v2288_v22 = vcombine.low %v168_v6, %v172_v7 }
  0xae   :  { %1471 = vmatmul.mubr.bf16.gmra.mxu1 %v2278_v35  ;;  %1341 = vmatprep.mubr.bf16.mxu0 %v2285_v36  ;;  %v2242_v35 = vcombine.low %v121_v24, %v125_v25  ;;  %v2249_v36 = vcombine.high %v128_v30, %v132_v31  ;;  %v2290_v25 = vcombine.low %v169_v8, %v173_v9 }
  0xaf   :  { %1478 = vmatprep.mubr.bf16.mxu1 %v2287_v37  ;;  %v2251_v37 = vcombine.high %v129_v32, %v133_v33 }
  0xb5   :  { %1342 = vmatmul.mubr.bf16.gmra.mxu0 %v2284_v42  ;;  %v2248_v42 = vcombine.low %v128_v30, %v132_v31 }
  0xb6   :  { %1479 = vmatmul.mubr.bf16.gmra.mxu1 %v2286_v43  ;;  %1519 = vmatprep.mubr.bf16.mxu0 %v2193_v44  ;;  %v2250_v43 = vcombine.low %v129_v32, %v133_v33  ;;  %v2257_v44 = vcombine.high %v136_v38, %v140_v39 }
  0xb7   :  { %1656 = vmatprep.mubr.bf16.mxu1 %v2195_v45  ;;  %v2259_v45 = vcombine.high %v137_v40, %v141_v41 }
  0xbd   :  { %1520 = vmatmul.mubr.bf16.vlgmr.msra.gmra.mxu0 %v2192_v50  ;;  %v2256_v50 = vcombine.low %v136_v38, %v140_v39 }
  0xbe   :  { %1657 = vmatmul.mubr.bf16.vlgmr.msra.gmra.mxu1 %v2194_v51  ;;  %1527 = vmatprep.mubr.bf16.mxu0 %v2201_v52  ;;  %v2258_v51 = vcombine.low %v137_v40, %v141_v41  ;;  %v2265_v52 = vcombine.high %v144_v46, %v148_v47 }
  0xbf   :  { %1664 = vmatprep.mubr.bf16.mxu1 %v2203_v53  ;;  %v2267_v53 = vcombine.high %v145_v48, %v149_v49 }
  0xc5   :  { %1528 = vmatmul.mubr.bf16.gmra.mxu0 %v2200_v58  ;;  %v2264_v58 = vcombine.low %v144_v46, %v148_v47 }
  0xc6   :  { %1665 = vmatmul.mubr.bf16.gmra.mxu1 %v2202_v59  ;;  %1535 = vmatprep.mubr.bf16.mxu0 %v2209_v60  ;;  %v2266_v59 = vcombine.low %v145_v48, %v149_v49  ;;  %v2273_v60 = vcombine.high %v152_v54, %v156_v55 }
  0xc7   :  { %1672 = vmatprep.mubr.bf16.mxu1 %v2211_v61  ;;  %v2275_v61 = vcombine.high %v153_v56, %v157_v57 }
  0xcd   :  { %1536 = vmatmul.mubr.bf16.gmra.mxu0 %v2208_v2  ;;  %v2272_v2 = vcombine.low %v152_v54, %v156_v55 }
  0xce   :  { %1673 = vmatmul.mubr.bf16.gmra.mxu1 %v2210_v3  ;;  %1543 = vmatprep.mubr.bf16.mxu0 %v2217_v4  ;;  %v2274_v3 = vcombine.low %v153_v56, %v157_v57  ;;  %v2281_v4 = vcombine.high %v160_v62, %v164_v63 }
  0xcf   :  { %1680 = vmatprep.mubr.bf16.mxu1 %v2219_v5  ;;  %v2283_v5 = vcombine.high %v161_v0, %v165_v1 }
  0xd5   :  { %1544 = vmatmul.mubr.bf16.gmra.mxu0 %v2216_v10  ;;  %v2280_v10 = vcombine.low %v160_v62, %v164_v63 }
  0xd6   :  { %1681 = vmatmul.mubr.bf16.gmra.mxu1 %v2218_v11  ;;  %1551 = vmatprep.mubr.bf16.mxu0 %v2225_v12  ;;  %v2282_v11 = vcombine.low %v161_v0, %v165_v1  ;;  %v2289_v12 = vcombine.high %v168_v6, %v172_v7 }
  0xd7   :  { %1688 = vmatprep.mubr.bf16.mxu1 %v2227_v13  ;;  %v2291_v13 = vcombine.high %v169_v8, %v173_v9 }
  0xdd   :  { %1552 = vmatmul.mubr.bf16.gmra.mxu0 %v2224_v18 }
  0xde   :  { %1689 = vmatmul.mubr.bf16.gmra.mxu1 %v2226_v19  ;;  %1559 = vmatprep.mubr.bf16.mxu0 %v2233_v20 }
  0xdf   :  { %1696 = vmatprep.mubr.bf16.mxu1 %v2235_v21 }
  0xe5   :  { %1560 = vmatmul.mubr.bf16.gmra.mxu0 %v2232_v26 }
  0xe6   :  { %1697 = vmatmul.mubr.bf16.gmra.mxu1 %v2234_v27  ;;  %1567 = vmatprep.mubr.bf16.mxu0 %v2241_v28 }
  0xe7   :  { %1704 = vmatprep.mubr.bf16.mxu1 %v2243_v29 }
  0xed   :  { %1568 = vmatmul.mubr.bf16.gmra.mxu0 %v2240_v34 }
  0xee   :  { %1705 = vmatmul.mubr.bf16.gmra.mxu1 %v2242_v35  ;;  %1575 = vmatprep.mubr.bf16.mxu0 %v2249_v36 }
  0xef   :  { %1712 = vmatprep.mubr.bf16.mxu1 %v2251_v37 }
  0xf5   :  { %1576 = vmatmul.mubr.bf16.gmra.mxu0 %v2248_v42 }
  0xf6   :  { %1713 = vmatmul.mubr.bf16.gmra.mxu1 %v2250_v43  ;;  %1583 = vmatprep.mubr.bf16.mxu0 %v2257_v44 }
  0xf7   :  { %1720 = vmatprep.mubr.bf16.mxu1 %v2259_v45 }
  0xfd   :  { %1584 = vmatmul.mubr.bf16.gmra.mxu0 %v2256_v50 }
  0xfe   :  { %1721 = vmatmul.mubr.bf16.gmra.mxu1 %v2258_v51  ;;  %1591 = vmatprep.mubr.bf16.mxu0 %v2265_v52 }
  0xff   :  { %1728 = vmatprep.mubr.bf16.mxu1 %v2267_v53 }
 0x105   :  { %1592 = vmatmul.mubr.bf16.gmra.mxu0 %v2264_v58 }
 0x106   :  { %1729 = vmatmul.mubr.bf16.gmra.mxu1 %v2266_v59  ;;  %1599 = vmatprep.mubr.bf16.mxu0 %v2273_v60 }
 0x107   :  { %1736 = vmatprep.mubr.bf16.mxu1 %v2275_v61 }
 0x10d   :  { %1600 = vmatmul.mubr.bf16.gmra.mxu0 %v2272_v2 }
 0x10e   :  { %1737 = vmatmul.mubr.bf16.gmra.mxu1 %v2274_v3  ;;  %1607 = vmatprep.mubr.bf16.mxu0 %v2281_v4 }
 0x10f   :  { %1744 = vmatprep.mubr.bf16.mxu1 %v2283_v5 }
 0x115   :  { %v2374_v14 = vpop.f32.mrf.mxu0  ;;  %1608 = vmatmul.mubr.bf16.gmra.mxu0 %v2280_v10 }
 0x116   :  { %v2468_v15 = vpop.f32.mrf.mxu1  ;;  %1745 = vmatmul.mubr.bf16.gmra.mxu1 %v2282_v11  ;;  %1615 = vmatprep.mubr.bf16.mxu0 %v2289_v12 }
 0x117   :  { %v2375_v17 = vpop.f32.mrf.mxu0  ;;  %1752 = vmatprep.mubr.bf16.mxu1 %v2291_v13 }
 0x118   :  { %v2376_v18 = vadd.f32 %v2375_v17, %v2374_v14  ;;  %v2469_v19 = vpop.f32.mrf.mxu1 }
 0x119   :  { %v2470_v20 = vadd.f32 %v2469_v19, %v2468_v15  ;;  %v2377_v21 = vpop.f32.mrf.mxu0 }
 0x11a   :  { %v1248_v23 = vadd.f32 %v2376_v18, %v3252_v16  ;;  %v2471_v24 = vpop.f32.mrf.mxu1 }
 0x11b   :  { %v2378_v26 = vpop.f32.mrf.mxu0 }
 0x11c   :  { %v3255_v27 = vadd.f32 %v2470_v20, %v1248_v23  ;;  %v2379_v28 = vadd.f32 %v2378_v26, %v2377_v21  ;;  %v2472_v29 = vpop.f32.mrf.mxu1 }
 0x11d   :  { %v2473_v30 = vadd.f32 %v2472_v29, %v2471_v24  ;;  %v2380_v31 = vpop.f32.mrf.mxu0  ;;  %1616 = vmatmul.mubr.bf16.gmra.mxu0 %v2288_v22 }
 0x11e   :  { %v1251_v32 = vadd.f32 %v2379_v28, %v3252_v16  ;;  %v2474_v33 = vpop.f32.mrf.mxu1  ;;  %1753 = vmatmul.mubr.bf16.gmra.mxu1 %v2290_v25 }
 0x11f   :  { %v2381_v34 = vpop.f32.mrf.mxu0 }
 0x120   :  { %v3258_v35 = vadd.f32 %v2473_v30, %v1251_v32  ;;  %v2382_v36 = vadd.f32 %v2381_v34, %v2380_v31  ;;  %v2475_v37 = vpop.f32.mrf.mxu1 }
 0x121   :  { %v2476_v38 = vadd.f32 %v2475_v37, %v2474_v33  ;;  %v2383_v39 = vpop.f32.mrf.mxu0 }
 0x122   :  { %v1256_v40 = vadd.f32 %v2382_v36, %v3252_v16  ;;  %v2477_v41 = vpop.f32.mrf.mxu1 }
 0x123   :  { %v2384_v42 = vpop.f32.mrf.mxu0 }
 0x124   :  { %v3261_v43 = vadd.f32 %v2476_v38, %v1256_v40  ;;  %v2385_v44 = vadd.f32 %v2384_v42, %v2383_v39  ;;  %v2478_v45 = vpop.f32.mrf.mxu1 }
 0x125   :  { %v2479_v46 = vadd.f32 %v2478_v45, %v2477_v41  ;;  %v2386_v47 = vpop.f32.mrf.mxu0 }
 0x126   :  { %v1259_v48 = vadd.f32 %v2385_v44, %v3252_v16  ;;  %v2480_v49 = vpop.f32.mrf.mxu1 }
 0x127   :  { %v2387_v50 = vpop.f32.mrf.mxu0 }
 0x128   :  { %v3264_v51 = vadd.f32 %v2479_v46, %v1259_v48  ;;  %v2388_v52 = vadd.f32 %v2387_v50, %v2386_v47  ;;  %v2481_v53 = vpop.f32.mrf.mxu1 }
 0x129   :  { %v2482_v54 = vadd.f32 %v2481_v53, %v2480_v49  ;;  %v2389_v55 = vpop.f32.mrf.mxu0 }
 0x12a   :  { %v1264_v56 = vadd.f32 %v2388_v52, %v3252_v16  ;;  %v2483_v57 = vpop.f32.mrf.mxu1 }
 0x12b   :  { %v2390_v58 = vpop.f32.mrf.mxu0 }
 0x12c   :  { %v3267_v59 = vadd.f32 %v2482_v54, %v1264_v56  ;;  %v2391_v60 = vadd.f32 %v2390_v58, %v2389_v55  ;;  %v2484_v61 = vpop.f32.mrf.mxu1 }
 0x12d   :  { %v2485_v62 = vadd.f32 %v2484_v61, %v2483_v57  ;;  %v2392_v63 = vpop.f32.mrf.mxu0 }
 0x12e   :  { %v1267_v0 = vadd.f32 %v2391_v60, %v3252_v16  ;;  %v2486_v1 = vpop.f32.mrf.mxu1 }
 0x12f   :  { %v2393_v2 = vpop.f32.mrf.mxu0 }
 0x130   :  { %v3270_v3 = vadd.f32 %v2485_v62, %v1267_v0  ;;  %v2394_v4 = vadd.f32 %v2393_v2, %v2392_v63  ;;  %v2487_v5 = vpop.f32.mrf.mxu1 }
 0x131   :  { %v2488_v6 = vadd.f32 %v2487_v5, %v2486_v1  ;;  %v2395_v7 = vpop.f32.mrf.mxu0 }
 0x132   :  { %v1272_v8 = vadd.f32 %v2394_v4, %v3252_v16  ;;  %v2489_v9 = vpop.f32.mrf.mxu1 }
 0x133   :  { %v2396_v10 = vpop.f32.mrf.mxu0 }
 0x134   :  { %v3273_v11 = vadd.f32 %v2488_v6, %v1272_v8  ;;  %v2397_v12 = vadd.f32 %v2396_v10, %v2395_v7  ;;  %v2490_v13 = vpop.f32.mrf.mxu1 }
 0x135   :  { %v2491_v14 = vadd.f32 %v2490_v13, %v2489_v9  ;;  %v2398_v15 = vpop.f32.mrf.mxu0 }
 0x136   :  { %v1275_v17 = vadd.f32 %v2397_v12, %v3252_v16  ;;  %v2492_v18 = vpop.f32.mrf.mxu1 }
 0x137   :  { %v2399_v19 = vpop.f32.mrf.mxu0 }
 0x138   :  { %v3276_v20 = vadd.f32 %v2491_v14, %v1275_v17  ;;  %v2400_v21 = vadd.f32 %v2399_v19, %v2398_v15  ;;  %v2493_v22 = vpop.f32.mrf.mxu1 }
 0x139   :  { %v2494_v23 = vadd.f32 %v2493_v22, %v2492_v18  ;;  %v2401_v24 = vpop.f32.mrf.mxu0 }
 0x13a   :  { %v1280_v25 = vadd.f32 %v2400_v21, %v3252_v16  ;;  %v2495_v26 = vpop.f32.mrf.mxu1 }
 0x13b   :  { %v2402_v28 = vpop.f32.mrf.mxu0 }
 0x13c   :  { %v3279_v29 = vadd.f32 %v2494_v23, %v1280_v25  ;;  %v2403_v30 = vadd.f32 %v2402_v28, %v2401_v24  ;;  %v2496_v31 = vpop.f32.mrf.mxu1 }
 0x13d   :  { %v2497_v32 = vadd.f32 %v2496_v31, %v2495_v26  ;;  %v2404_v33 = vpop.f32.mrf.mxu0 }
 0x13e   :  { %v1283_v34 = vadd.f32 %v2403_v30, %v3252_v16  ;;  %v2498_v36 = vpop.f32.mrf.mxu1 }
 0x13f   :  { %v2405_v37 = vpop.f32.mrf.mxu0 }
 0x140   :  { %v3282_v38 = vadd.f32 %v2497_v32, %v1283_v34  ;;  %v2406_v39 = vadd.f32 %v2405_v37, %v2404_v33  ;;  %v2499_v40 = vpop.f32.mrf.mxu1 }
 0x141   :  { %v2500_v41 = vadd.f32 %v2499_v40, %v2498_v36  ;;  %v2407_v42 = vpop.f32.mrf.mxu0 }
 0x142   :  { %v1288_v44 = vadd.f32 %v2406_v39, %v3252_v16  ;;  %v2501_v45 = vpop.f32.mrf.mxu1 }
 0x143   :  { %v2408_v46 = vpop.f32.mrf.mxu0 }
 0x144   :  { %v3285_v47 = vadd.f32 %v2500_v41, %v1288_v44  ;;  %v2409_v48 = vadd.f32 %v2408_v46, %v2407_v42  ;;  %v2502_v49 = vpop.f32.mrf.mxu1 }
 0x145   :  { %v2503_v50 = vadd.f32 %v2502_v49, %v2501_v45  ;;  %v2410_v52 = vpop.f32.mrf.mxu0 }
 0x146   :  { %v1291_v53 = vadd.f32 %v2409_v48, %v3252_v16  ;;  %v2504_v54 = vpop.f32.mrf.mxu1 }
 0x147   :  { %v2411_v55 = vpop.f32.mrf.mxu0 }
 0x148   :  { %v3288_v56 = vadd.f32 %v2503_v50, %v1291_v53  ;;  %v2412_v57 = vadd.f32 %v2411_v55, %v2410_v52  ;;  %v2505_v58 = vpop.f32.mrf.mxu1 }
 0x149   :  { %v2506_v60 = vadd.f32 %v2505_v58, %v2504_v54  ;;  %v2413_v61 = vpop.f32.mrf.mxu0 }
 0x14a   :  { %v1296_v62 = vadd.f32 %v2412_v57, %v3252_v16  ;;  %v2507_v63 = vpop.f32.mrf.mxu1 }
 0x14b   :  { %v2414_v0 = vpop.f32.mrf.mxu0 }
 0x14c   :  { %v3291_v1 = vadd.f32 %v2506_v60, %v1296_v62  ;;  %v2415_v2 = vadd.f32 %v2414_v0, %v2413_v61  ;;  %v2508_v4 = vpop.f32.mrf.mxu1 }
 0x14d   :  { %v2509_v5 = vadd.f32 %v2508_v4, %v2507_v63  ;;  %v2416_v6 = vpop.f32.mrf.mxu0 }
 0x14e   :  { %v1299_v7 = vadd.f32 %v2415_v2, %v3252_v16  ;;  %v2510_v8 = vpop.f32.mrf.mxu1 }
 0x14f   :  { %v2417_v9 = vpop.f32.mrf.mxu0 }
 0x150   :  { %v3294_v10 = vadd.f32 %v2509_v5, %v1299_v7  ;;  %v2418_v12 = vadd.f32 %v2417_v9, %v2416_v6  ;;  %v2511_v13 = vpop.f32.mrf.mxu1 }
 0x151   :  { %v2512_v14 = vadd.f32 %v2511_v13, %v2510_v8  ;;  %v2419_v15 = vpop.f32.mrf.mxu0 }
 0x152   :  { %v1304_v17 = vadd.f32 %v2418_v12, %v3252_v16  ;;  %v2513_v18 = vpop.f32.mrf.mxu1 }
 0x153   :  { %v2420_v19 = vpop.f32.mrf.mxu0 }
 0x154   :  { %v3297_v21 = vadd.f32 %v2512_v14, %v1304_v17  ;;  %v2421_v22 = vadd.f32 %v2420_v19, %v2419_v15  ;;  %v2514_v23 = vpop.f32.mrf.mxu1 }
 0x155   :  { %v2515_v24 = vadd.f32 %v2514_v23, %v2513_v18  ;;  %v2422_v25 = vpop.f32.mrf.mxu0 }
 0x156   :  { %v1307_v26 = vadd.f32 %v2421_v22, %v3252_v16  ;;  %v2516_v28 = vpop.f32.mrf.mxu1 }
 0x157   :  { %v2423_v30 = vpop.f32.mrf.mxu0 }
 0x158   :  { %v3300_v31 = vadd.f32 %v2515_v24, %v1307_v26  ;;  %v2424_v32 = vadd.f32 %v2423_v30, %v2422_v25  ;;  %v2517_v33 = vpop.f32.mrf.mxu1 }
 0x159   :  { %v2518_v34 = vadd.f32 %v2517_v33, %v2516_v28  ;;  %v2425_v36 = vpop.f32.mrf.mxu0 }
 0x15a   :  { %v1312_v37 = vadd.f32 %v2424_v32, %v3252_v16  ;;  %v2519_v39 = vpop.f32.mrf.mxu1 }
 0x15b   :  { %v2426_v40 = vpop.f32.mrf.mxu0 }
 0x15c   :  { %v3303_v41 = vadd.f32 %v2518_v34, %v1312_v37  ;;  %v2427_v42 = vadd.f32 %v2426_v40, %v2425_v36  ;;  %v2520_v44 = vpop.f32.mrf.mxu1 }
 0x15d   :  { %v2521_v45 = vadd.f32 %v2520_v44, %v2519_v39  ;;  %v2428_v46 = vpop.f32.mrf.mxu0 }
 0x15e   :  { %v1315_v48 = vadd.f32 %v2427_v42, %v3252_v16  ;;  %v2522_v49 = vpop.f32.mrf.mxu1 }
 0x15f   :  { %v2429_v50 = vpop.f32.mrf.mxu0 }
 0x160   :  { %v3306_v52 = vadd.f32 %v2521_v45, %v1315_v48  ;;  %v2430_v53 = vadd.f32 %v2429_v50, %v2428_v46  ;;  %v2523_v54 = vpop.f32.mrf.mxu1 }
 0x161   :  { %v2524_v55 = vadd.f32 %v2523_v54, %v2522_v49  ;;  %v2431_v57 = vpop.f32.mrf.mxu0 }
 0x162   :  { %v1320_v58 = vadd.f32 %v2430_v53, %v3252_v16  ;;  %v2525_v60 = vpop.f32.mrf.mxu1 }
 0x163   :  { %v2432_v61 = vpop.f32.mrf.mxu0 }
 0x164   :  { %v3309_v62 = vadd.f32 %v2524_v55, %v1320_v58  ;;  %v2433_v63 = vadd.f32 %v2432_v61, %v2431_v57  ;;  %v2526_v0 = vpop.f32.mrf.mxu1 }
 0x165   :  { %v2527_v2 = vadd.f32 %v2526_v0, %v2525_v60  ;;  %v2434_v4 = vpop.f32.mrf.mxu0 }
 0x166   :  { %v1323_v5 = vadd.f32 %v2433_v63, %v3252_v16  ;;  %v2528_v6 = vpop.f32.mrf.mxu1 }
 0x167   :  { %v2435_v7 = vpop.f32.mrf.mxu0 }
 0x168   :  { %v3312_v8 = vadd.f32 %v2527_v2, %v1323_v5  ;;  %v2436_v9 = vadd.f32 %v2435_v7, %v2434_v4  ;;  %v2529_v12 = vpop.f32.mrf.mxu1 }
 0x169   :  { %v2530_v13 = vadd.f32 %v2529_v12, %v2528_v6  ;;  %v2437_v14 = vpop.f32.mrf.mxu0 }
 0x16a   :  { %v1328_v15 = vadd.f32 %v2436_v9, %v3252_v16  ;;  %v2531_v17 = vpop.f32.mrf.mxu1 }
 0x16b   :  { %v2438_v18 = vpop.f32.mrf.mxu0 }
 0x16c   :  { %v3315_v19 = vadd.f32 %v2530_v13, %v1328_v15  ;;  %v2439_v22 = vadd.f32 %v2438_v18, %v2437_v14  ;;  %v2532_v23 = vpop.f32.mrf.mxu1 }
 0x16d   :  { %v2533_v24 = vadd.f32 %v2532_v23, %v2531_v17  ;;  %v2440_v25 = vpop.f32.mrf.mxu0 }
 0x16e   :  { %v1331_v26 = vadd.f32 %v2439_v22, %v3252_v16  ;;  %v2534_v28 = vpop.f32.mrf.mxu1 }
 0x16f   :  { %v2441_v30 = vpop.f32.mrf.mxu0 }
 0x170   :  { %v3318_v32 = vadd.f32 %v2533_v24, %v1331_v26  ;;  %v2442_v33 = vadd.f32 %v2441_v30, %v2440_v25  ;;  %v2535_v34 = vpop.f32.mrf.mxu1 }
 0x171   :  { %v2536_v36 = vadd.f32 %v2535_v34, %v2534_v28  ;;  %v2443_v37 = vpop.f32.mrf.mxu0 }
 0x172   :  { %v1336_v39 = vadd.f32 %v2442_v33, %v3252_v16  ;;  %v2537_v40 = vpop.f32.mrf.mxu1 }
 0x173   :  { %v2444_v42 = vpop.f32.mrf.mxu0 }
 0x174   :  { %v3321_v44 = vadd.f32 %v2536_v36, %v1336_v39  ;;  %v2445_v45 = vadd.f32 %v2444_v42, %v2443_v37  ;;  %v2538_v46 = vpop.f32.mrf.mxu1 }
 0x175   :  { %v2539_v48 = vadd.f32 %v2538_v46, %v2537_v40  ;;  %v2446_v49 = vpop.f32.mrf.mxu0 }
 0x176   :  { %v1339_v50 = vadd.f32 %v2445_v45, %v3252_v16  ;;  %v2540_v53 = vpop.f32.mrf.mxu1 }
 0x177   :  { %v2447_v54 = vpop.f32.mrf.mxu0 }
 0x178   :  { %v3324_v55 = vadd.f32 %v2539_v48, %v1339_v50  ;;  %v2448_v57 = vadd.f32 %v2447_v54, %v2446_v49  ;;  %v2541_v58 = vpop.f32.mrf.mxu1 }
 0x179   :  { %v2542_v60 = vadd.f32 %v2541_v58, %v2540_v53  ;;  %v2449_v61 = vpop.f32.mrf.mxu0 }
 0x17a   :  { %v1344_v63 = vadd.f32 %v2448_v57, %v3252_v16  ;;  %v2543_v0 = vpop.f32.mrf.mxu1 }
 0x17b   :  { %v2450_v2 = vpop.f32.mrf.mxu0 }
 0x17c   :  { %v3327_v4 = vadd.f32 %v2542_v60, %v1344_v63  ;;  %v2451_v5 = vadd.f32 %v2450_v2, %v2449_v61  ;;  %v2544_v6 = vpop.f32.mrf.mxu1 }
 0x17d   :  { %v2545_v7 = vadd.f32 %v2544_v6, %v2543_v0  ;;  %v2562_v9 = vpop.f32.mrf.mxu0 }
 0x17e   :  { %v1347_v12 = vadd.f32 %v2451_v5, %v3252_v16  ;;  %v2656_v13 = vpop.f32.mrf.mxu1 }
 0x17f   :  { %v2563_v14 = vpop.f32.mrf.mxu0 }
 0x180   :  { %v3330_v15 = vadd.f32 %v2545_v7, %v1347_v12  ;;  %v2564_v17 = vadd.f32 %v2563_v14, %v2562_v9  ;;  %v2657_v18 = vpop.f32.mrf.mxu1 }
 0x181   :  { %v2565_v22 = vpop.f32.mrf.mxu0  ;;  %v2658_v33 = vadd.f32 %v2657_v18, %v2656_v13 }
 0x182   :  { %v2659_v23 = vpop.f32.mrf.mxu1  ;;  %v1522_v25 = vadd.f32 %v2564_v17, %v3255_v27 }
 0x183   :  { %v2566_v24 = vpop.f32.mrf.mxu0 }
 0x184   :  { %v2567_v26 = vadd.f32 %v2566_v24, %v2565_v22  ;;  %v2660_v28 = vpop.f32.mrf.mxu1  ;;  %v3334_v39 = vadd.f32 %v2658_v33, %v1522_v25 }
 0x185   :  { %v2568_v30 = vpop.f32.mrf.mxu0  ;;  %v2661_v36 = vadd.f32 %v2660_v28, %v2659_v23 }
 0x186   :  { %v1525_v34 = vadd.f32 %v2567_v26, %v3258_v35  ;;  %v2662_v37 = vpop.f32.mrf.mxu1 }
 0x187   :  { %v2569_v16 = vpop.f32.mrf.mxu0 }
 0x188   :  { %v3336_v40 = vadd.f32 %v2661_v36, %v1525_v34  ;;  %v2570_v42 = vadd.f32 %v2569_v16, %v2568_v30  ;;  %v2663_v45 = vpop.f32.mrf.mxu1 }
 0x189   :  { %v2571_v46 = vpop.f32.mrf.mxu0  ;;  %v2664_v49 = vadd.f32 %v2663_v45, %v2662_v37 }
 0x18a   :  { %v1842_v48 = vadd.f32 %v3336_v40, %v3334_v39  ;;  %v1530_v27 = vadd.f32 %v2570_v42, %v3261_v43  ;;  %v2665_v50 = vpop.f32.mrf.mxu1 }
 0x18b   :  { %v2572_v53 = vpop.f32.mrf.mxu0 }
 0x18c   :  { %v3341_v54 = vadd.f32 %v2664_v49, %v1530_v27  ;;  %v2573_v35 = vadd.f32 %v2572_v53, %v2571_v46  ;;  %v2666_v57 = vpop.f32.mrf.mxu1 }
 0x18d   :  { %v2574_v58 = vpop.f32.mrf.mxu0  ;;  %v2667_v63 = vadd.f32 %v2666_v57, %v2665_v50 }
 0x18e   :  { %v1843_v60 = vadd.f32 %v1842_v48, %v3341_v54  ;;  %v1533_v61 = vadd.f32 %v2573_v35, %v3264_v51  ;;  %v2668_v0 = vpop.f32.mrf.mxu1 }
 0x18f   :  { %v2575_v2 = vpop.f32.mrf.mxu0 }
 0x190   :  { %v3345_v5 = vadd.f32 %v2667_v63, %v1533_v61  ;;  %v2576_v6 = vadd.f32 %v2575_v2, %v2574_v58  ;;  %v2669_v7 = vpop.f32.mrf.mxu1 }
 0x191   :  { %v2577_v43 = vpop.f32.mrf.mxu0  ;;  %v2670_v13 = vadd.f32 %v2669_v7, %v2668_v0 }
 0x192   :  { %v1844_v9 = vadd.f32 %v1843_v60, %v3345_v5  ;;  %v1538_v12 = vadd.f32 %v2576_v6, %v3267_v59  ;;  %v2671_v14 = vpop.f32.mrf.mxu1 }
 0x193   :  { %v2578_v17 = vpop.f32.mrf.mxu0 }
 0x194   :  { %v3349_v18 = vadd.f32 %v2670_v13, %v1538_v12  ;;  %v2579_v22 = vadd.f32 %v2578_v17, %v2577_v43  ;;  %v2672_v23 = vpop.f32.mrf.mxu1 }
 0x195   :  { %v2580_v51 = vpop.f32.mrf.mxu0  ;;  %v2673_v26 = vadd.f32 %v2672_v23, %v2671_v14 }
 0x196   :  { %v1845_v24 = vadd.f32 %v1844_v9, %v3349_v18  ;;  %v1541_v25 = vadd.f32 %v2579_v22, %v3270_v3  ;;  %v2674_v28 = vpop.f32.mrf.mxu1 }
 0x197   :  { %v2581_v30 = vpop.f32.mrf.mxu0 }
 0x198   :  { %v3353_v33 = vadd.f32 %v2673_v26, %v1541_v25  ;;  %v2582_v34 = vadd.f32 %v2581_v30, %v2580_v51  ;;  %v2675_v36 = vpop.f32.mrf.mxu1 }
 0x199   :  { %v2583_v59 = vpop.f32.mrf.mxu0  ;;  %v2676_v42 = vadd.f32 %v2675_v36, %v2674_v28 }
 0x19a   :  { %v1846_v37 = vadd.f32 %v1845_v24, %v3353_v33  ;;  %v1546_v16 = vadd.f32 %v2582_v34, %v3273_v11  ;;  %v2677_v45 = vpop.f32.mrf.mxu1 }
 0x19b   :  { %v2584_v46 = vpop.f32.mrf.mxu0 }
 0x19c   :  { %v3357_v48 = vadd.f32 %v2676_v42, %v1546_v16  ;;  %v2585_v27 = vadd.f32 %v2584_v46, %v2583_v59  ;;  %v2678_v49 = vpop.f32.mrf.mxu1 }
 0x19d   :  { %v2586_v3 = vpop.f32.mrf.mxu0  ;;  %v2679_v35 = vadd.f32 %v2678_v49, %v2677_v45 }
 0x19e   :  { %v1847_v50 = vadd.f32 %v1846_v37, %v3357_v48  ;;  %v1549_v53 = vadd.f32 %v2585_v27, %v3276_v20  ;;  %v2680_v57 = vpop.f32.mrf.mxu1 }
 0x19f   :  { %v2587_v58 = vpop.f32.mrf.mxu0 }
 0x1a0   :  { %v3361_v60 = vadd.f32 %v2679_v35, %v1549_v53  ;;  %v2588_v61 = vadd.f32 %v2587_v58, %v2586_v3  ;;  %v2681_v63 = vpop.f32.mrf.mxu1 }
 0x1a1   :  { %v2589_v11 = vpop.f32.mrf.mxu0  ;;  %v2682_v6 = vadd.f32 %v2681_v63, %v2680_v57 }
 0x1a2   :  { %v1848_v0 = vadd.f32 %v1847_v50, %v3361_v60  ;;  %v1554_v2 = vadd.f32 %v2588_v61, %v3279_v29  ;;  %v2683_v7 = vpop.f32.mrf.mxu1 }
 0x1a3   :  { %v2590_v43 = vpop.f32.mrf.mxu0 }
 0x1a4   :  { %v3365_v9 = vadd.f32 %v2682_v6, %v1554_v2  ;;  %v2591_v12 = vadd.f32 %v2590_v43, %v2589_v11  ;;  %v2684_v13 = vpop.f32.mrf.mxu1 }
 0x1a5   :  { %v2592_v20 = vpop.f32.mrf.mxu0  ;;  %v2685_v22 = vadd.f32 %v2684_v13, %v2683_v7 }
 0x1a6   :  { %v1849_v14 = vadd.f32 %v1848_v0, %v3365_v9  ;;  %v1557_v17 = vadd.f32 %v2591_v12, %v3282_v38  ;;  %v2686_v23 = vpop.f32.mrf.mxu1 }
 0x1a7   :  { %v2593_v51 = vpop.f32.mrf.mxu0 }
 0x1a8   :  { %v3369_v24 = vadd.f32 %v2685_v22, %v1557_v17  ;;  %v2594_v25 = vadd.f32 %v2593_v51, %v2592_v20  ;;  %v2687_v26 = vpop.f32.mrf.mxu1 }
 0x1a9   :  { %v2595_v29 = vpop.f32.mrf.mxu0  ;;  %v2688_v34 = vadd.f32 %v2687_v26, %v2686_v23 }
 0x1aa   :  { %v1850_v28 = vadd.f32 %v1849_v14, %v3369_v24  ;;  %v1562_v30 = vadd.f32 %v2594_v25, %v3285_v47  ;;  %v2689_v36 = vpop.f32.mrf.mxu1 }
 0x1ab   :  { %v2596_v59 = vpop.f32.mrf.mxu0 }
 0x1ac   :  { %v3373_v37 = vadd.f32 %v2688_v34, %v1562_v30  ;;  %v2597_v16 = vadd.f32 %v2596_v59, %v2595_v29  ;;  %v2690_v42 = vpop.f32.mrf.mxu1 }
 0x1ad   :  { %v2598_v38 = vpop.f32.mrf.mxu0  ;;  %v2691_v27 = vadd.f32 %v2690_v42, %v2689_v36 }
 0x1ae   :  { %v1851_v45 = vadd.f32 %v1850_v28, %v3373_v37  ;;  %v1565_v46 = vadd.f32 %v2597_v16, %v3288_v56  ;;  %v2692_v49 = vpop.f32.mrf.mxu1 }
 0x1af   :  { %v2599_v3 = vpop.f32.mrf.mxu0 }
 0x1b0   :  { %v3377_v50 = vadd.f32 %v2691_v27, %v1565_v46  ;;  %v2600_v53 = vadd.f32 %v2599_v3, %v2598_v38  ;;  %v2693_v35 = vpop.f32.mrf.mxu1 }
 0x1b1   :  { %v2601_v47 = vpop.f32.mrf.mxu0  ;;  %v2694_v61 = vadd.f32 %v2693_v35, %v2692_v49 }
 0x1b2   :  { %v1852_v57 = vadd.f32 %v1851_v45, %v3377_v50  ;;  %v1570_v58 = vadd.f32 %v2600_v53, %v3291_v1  ;;  %v2695_v63 = vpop.f32.mrf.mxu1 }
 0x1b3   :  { %v2602_v11 = vpop.f32.mrf.mxu0 }
 0x1b4   :  { %v3381_v0 = vadd.f32 %v2694_v61, %v1570_v58  ;;  %v2603_v2 = vadd.f32 %v2602_v11, %v2601_v47  ;;  %v2696_v6 = vpop.f32.mrf.mxu1 }
 0x1b5   :  { %v2604_v56 = vpop.f32.mrf.mxu0  ;;  %v2697_v12 = vadd.f32 %v2696_v6, %v2695_v63 }
 0x1b6   :  { %v1853_v7 = vadd.f32 %v1852_v57, %v3381_v0  ;;  %v1573_v43 = vadd.f32 %v2603_v2, %v3294_v10  ;;  %v2698_v13 = vpop.f32.mrf.mxu1 }
 0x1b7   :  { %v2605_v20 = vpop.f32.mrf.mxu0 }
 0x1b8   :  { %v3385_v14 = vadd.f32 %v2697_v12, %v1573_v43  ;;  %v2606_v17 = vadd.f32 %v2605_v20, %v2604_v56  ;;  %v2699_v22 = vpop.f32.mrf.mxu1 }
 0x1b9   :  { %v2607_v1 = vpop.f32.mrf.mxu0  ;;  %v2700_v25 = vadd.f32 %v2699_v22, %v2698_v13 }
 0x1ba   :  { %v1854_v23 = vadd.f32 %v1853_v7, %v3385_v14  ;;  %v1578_v51 = vadd.f32 %v2606_v17, %v3297_v21  ;;  %v2701_v26 = vpop.f32.mrf.mxu1 }
 0x1bb   :  { %v2608_v29 = vpop.f32.mrf.mxu0 }
 0x1bc   :  { %v3389_v28 = vadd.f32 %v2700_v25, %v1578_v51  ;;  %v2609_v30 = vadd.f32 %v2608_v29, %v2607_v1  ;;  %v2702_v34 = vpop.f32.mrf.mxu1 }
 0x1bd   :  { %v2610_v10 = vpop.f32.mrf.mxu0  ;;  %v2703_v16 = vadd.f32 %v2702_v34, %v2701_v26 }
 0x1be   :  { %v1855_v36 = vadd.f32 %v1854_v23, %v3389_v28  ;;  %v1581_v59 = vadd.f32 %v2609_v30, %v3300_v31  ;;  %v2704_v42 = vpop.f32.mrf.mxu1 }
 0x1bf   :  { %v2611_v38 = vpop.f32.mrf.mxu0 }
 0x1c0   :  { %v3393_v45 = vadd.f32 %v2703_v16, %v1581_v59  ;;  %v2612_v46 = vadd.f32 %v2611_v38, %v2610_v10  ;;  %v2705_v27 = vpop.f32.mrf.mxu1 }
 0x1c1   :  { %v2613_v21 = vpop.f32.mrf.mxu0  ;;  %v2706_v53 = vadd.f32 %v2705_v27, %v2704_v42 }
 0x1c2   :  { %v1856_v49 = vadd.f32 %v1855_v36, %v3393_v45  ;;  %v1586_v3 = vadd.f32 %v2612_v46, %v3303_v41  ;;  %v2707_v35 = vpop.f32.mrf.mxu1 }
 0x1c3   :  { %v2614_v47 = vpop.f32.mrf.mxu0 }
 0x1c4   :  { %v3397_v57 = vadd.f32 %v2706_v53, %v1586_v3  ;;  %v2615_v58 = vadd.f32 %v2614_v47, %v2613_v21  ;;  %v2708_v61 = vpop.f32.mrf.mxu1 }
 0x1c5   :  { %v2616_v31 = vpop.f32.mrf.mxu0  ;;  %v2709_v2 = vadd.f32 %v2708_v61, %v2707_v35 }
 0x1c6   :  { %v1857_v63 = vadd.f32 %v1856_v49, %v3397_v57  ;;  %v1589_v11 = vadd.f32 %v2615_v58, %v3306_v52  ;;  %v2710_v6 = vpop.f32.mrf.mxu1 }
 0x1c7   :  { %v2617_v56 = vpop.f32.mrf.mxu0 }
 0x1c8   :  { %v3401_v7 = vadd.f32 %v2709_v2, %v1589_v11  ;;  %v2618_v43 = vadd.f32 %v2617_v56, %v2616_v31  ;;  %v2711_v12 = vpop.f32.mrf.mxu1 }
 0x1c9   :  { %v2619_v41 = vpop.f32.mrf.mxu0  ;;  %v2712_v17 = vadd.f32 %v2711_v12, %v2710_v6 }
 0x1ca   :  { %v1858_v13 = vadd.f32 %v1857_v63, %v3401_v7  ;;  %v1594_v20 = vadd.f32 %v2618_v43, %v3309_v62  ;;  %v2713_v22 = vpop.f32.mrf.mxu1  ;;  %v1763_v63 = vlaneseq }
 0x1cb   :  { %v2620_v1 = vpop.f32.mrf.mxu0 }
 0x1cc   :  { %v3405_v23 = vadd.f32 %v2712_v17, %v1594_v20  ;;  %v2621_v51 = vadd.f32 %v2620_v1, %v2619_v41  ;;  %v2714_v25 = vpop.f32.mrf.mxu1  ;;  %v1764_v20 = vshrl.u32 %v1763_v63, 7 }
 0x1cd   :  { %v2622_v52 = vpop.f32.mrf.mxu0  ;;  %v2715_v30 = vadd.f32 %v2714_v25, %v2713_v22 }
 0x1ce   :  { %v1859_v26 = vadd.f32 %v1858_v13, %v3405_v23  ;;  %v1597_v29 = vadd.f32 %v2621_v51, %v3312_v8  ;;  %v2716_v34 = vpop.f32.mrf.mxu1 }
 0x1cf   :  { %v2623_v10 = vpop.f32.mrf.mxu0 }
 0x1d0   :  { %v3409_v36 = vadd.f32 %v2715_v30, %v1597_v29  ;;  %v2624_v59 = vadd.f32 %v2623_v10, %v2622_v52  ;;  %v2717_v16 = vpop.f32.mrf.mxu1  ;;  %v1788_v30 = vadd.s32 192, %v1764_v20 }
 0x1d1   :  { %v2625_v62 = vpop.f32.mrf.mxu0  ;;  %v2718_v46 = vadd.f32 %v2717_v16, %v2716_v34 }
 0x1d2   :  { %v1860_v42 = vadd.f32 %v1859_v26, %v3409_v36  ;;  %v1602_v38 = vadd.f32 %v2624_v59, %v3315_v19  ;;  %v2719_v27 = vpop.f32.mrf.mxu1  ;;  %vm1814_vm0 = vcmp.lt.s32.totalorder %v1788_v30, 196 }
 0x1d3   :  { %v2626_v21 = vpop.f32.mrf.mxu0 }
 0x1d4   :  { %v3413_v49 = vadd.f32 %v2718_v46, %v1602_v38  ;;  %v2627_v3 = vadd.f32 %v2626_v21, %v2625_v62  ;;  %v2720_v53 = vpop.f32.mrf.mxu1 }
 0x1d5   :  { %v2628_v8 = vpop.f32.mrf.mxu0  ;;  %v2721_v58 = vadd.f32 %v2720_v53, %v2719_v27 }
 0x1d6   :  { %v1861_v35 = vadd.f32 %v1860_v42, %v3413_v49  ;;  %v1605_v47 = vadd.f32 %v2627_v3, %v3318_v32  ;;  %v2722_v61 = vpop.f32.mrf.mxu1 }
 0x1d7   :  { %v2629_v31 = vpop.f32.mrf.mxu0 }
 0x1d8   :  { %v1742_v11 = vadd.f32 %v2721_v58, %v1605_v47  ;;  %v2630_v2 = vadd.f32 %v2629_v31, %v2628_v8  ;;  %v2723_v6 = vpop.f32.mrf.mxu1 }
 0x1d9   :  { %v2631_v19 = vpop.f32.mrf.mxu0  ;;  %v2724_v12 = vadd.f32 %v2723_v6, %v2722_v61 }
 0x1da   :  { %v1862_v56 = vadd.f32 %v1861_v35, %v1742_v11  ;;  %v1610_v43 = vadd.f32 %v2630_v2, %v3321_v44  ;;  %v2725_v41 = vpop.f32.mrf.mxu1 }
 0x1db   :  { %v2632_v13 = vpop.f32.mrf.mxu0 }
 0x1dc   :  { %v1747_v17 = vadd.f32 %v2724_v12, %v1610_v43  ;;  %v2633_v22 = vadd.f32 %v2632_v13, %v2631_v19  ;;  %v2726_v1 = vpop.f32.mrf.mxu1 }
 0x1dd   :  { %v2634_v51 = vpop.f32.mrf.mxu0  ;;  %v2727_v52 = vadd.f32 %v2726_v1, %v2725_v41 }
 0x1de   :  { %v1863_v32 = vadd.f32 %v1862_v56, %v1747_v17  ;;  %v1613_v25 = vadd.f32 %v2633_v22, %v3324_v55  ;;  %v2728_v26 = vpop.f32.mrf.mxu1 }
 0x1df   :  { %v2635_v29 = vpop.f32.mrf.mxu0 }
 0x1e0   :  { %v1750_v34 = vadd.f32 %v2727_v52, %v1613_v25  ;;  %v2636_v10 = vadd.f32 %v2635_v29, %v2634_v51  ;;  %v2729_v59 = vpop.f32.mrf.mxu1 }
 0x1e1   :  { %v2730_v62 = vadd.f32 %v2729_v59, %v2728_v26  ;;  %v2637_v63 = vpop.f32.mrf.mxu0 }
 0x1e2   :  { %v1864_v16 = vadd.f32 %v1863_v32, %v1750_v34  ;;  %v1618_v44 = vadd.f32 %v2636_v10, %v3327_v4  ;;  %v2731_v19 = vpop.f32.mrf.mxu1 }
 0x1e3   :  { %v2638_v6 = vpop.f32.mrf.mxu0 }
 0x1e4   :  { %v1755_v42 = vadd.f32 %v2730_v62, %v1618_v44  ;;  %v2639_v56 = vadd.f32 %v2638_v6, %v2637_v63  ;;  %v2732_v41 = vpop.f32.mrf.mxu1 }
 0x1e5   :  { %v2733_v51 = vadd.f32 %v2732_v41, %v2731_v19 }
 0x1e6   :  { %v1840_v38 = vsel %vm1814_vm0, %v1755_v42, 0.0 }
 0x1e7   :  { %v1865_v46 = vadd.f32 %v1864_v16, %v1840_v38 }
 0x1e9   :  { %v1867_v27 = vrot.slane %v1865_v46, 4 }
 0x1eb   :  { %v1868_v21 = vadd.f32 %v1867_v27, %v1865_v46 }
 0x1ed   :  { %v1869_v3 = vrot.slane %v1868_v21, 2 }
 0x1ef   :  { %v1870_v55 = vadd.f32 %v1869_v3, %v1868_v21 }
 0x1f1   :  { %v1871_v53 = vrot.slane %v1870_v55, 1 }
 0x1f3   :  { %v1872_v8 = vadd.f32 %v1871_v53, %v1870_v55 }
 0x1f5   :  { %v3421_v35 = vmul.f32 0.0051020407, %v1872_v8 }
 0x1f7   :  { %v3425_v47 = vsub.f32 %v3334_v39, %v3421_v35  ;;  %v3429_v4 = vsub.f32 %v3336_v40, %v3421_v35  ;;  %v3433_v58 = vsub.f32 %v3341_v54, %v3421_v35  ;;  %v3437_v61 = vsub.f32 %v3345_v5, %v3421_v35 }
 0x1f8   :  { %v3441_v31 = vsub.f32 %v3349_v18, %v3421_v35  ;;  %v3445_v39 = vsub.f32 %v3353_v33, %v3421_v35  ;;  %v3449_v40 = vsub.f32 %v3357_v48, %v3421_v35  ;;  %v3453_v54 = vsub.f32 %v3361_v60, %v3421_v35 }
 0x1f9   :  { %v3457_v5 = vsub.f32 %v3365_v9, %v3421_v35  ;;  %v3461_v18 = vsub.f32 %v3369_v24, %v3421_v35  ;;  %v3465_v33 = vsub.f32 %v3373_v37, %v3421_v35  ;;  %v3469_v48 = vsub.f32 %v3377_v50, %v3421_v35 }
 0x1fa   :  { %v3473_v60 = vsub.f32 %v3381_v0, %v3421_v35  ;;  %v3477_v9 = vsub.f32 %v3385_v14, %v3421_v35  ;;  %v3481_v24 = vsub.f32 %v3389_v28, %v3421_v35  ;;  %v3485_v37 = vsub.f32 %v3393_v45, %v3421_v35 }
 0x1fb   :  { %v3489_v50 = vsub.f32 %v3397_v57, %v3421_v35  ;;  %v3493_v0 = vsub.f32 %v3401_v7, %v3421_v35  ;;  %v3497_v14 = vsub.f32 %v3405_v23, %v3421_v35  ;;  %v3501_v28 = vsub.f32 %v3409_v36, %v3421_v35 }
 0x1fc   :  { %v3505_v45 = vsub.f32 %v3413_v49, %v3421_v35  ;;  %v3508_v2 = vsub.f32 %v1742_v11, %v3421_v35  ;;  %v3511_v57 = vsub.f32 %v1747_v17, %v3421_v35  ;;  %v3514_v7 = vsub.f32 %v1750_v34, %v3421_v35 }
 0x1fd   :  { %v3517_v23 = vsub.f32 %v1755_v42, %v3421_v35  ;;  %v1926_v49 = vmul.f32 %v3425_v47, %v3425_v47  ;;  %v1927_v11 = vmul.f32 %v3429_v4, %v3429_v4  ;;  %v1928_v43 = vmul.f32 %v3433_v58, %v3433_v58 }
 0x1fe   :  { %v1929_v13 = vmul.f32 %v3437_v61, %v3437_v61  ;;  %v1621_v17 = vadd.f32 %v2639_v56, %v3330_v15  ;;  %v1930_v22 = vmul.f32 %v3441_v31, %v3441_v31  ;;  %v1931_v32 = vmul.f32 %v3445_v39, %v3445_v39 }
 0x1ff   :  { %v1924_v36 = vsel %vm1814_vm0, %v3517_v23, 0.0  ;;  %v1952_v12 = vadd.f32 %v1927_v11, %v1926_v49  ;;  %v1932_v26 = vmul.f32 %v3449_v40, %v3449_v40  ;;  %v1933_v15 = vmul.f32 %v3453_v54, %v3453_v54 }
 0x200   :  { %v3534_v52 = vadd.f32 %v2733_v51, %v1621_v17  ;;  %v1934_v10 = vmul.f32 %v3457_v5, %v3457_v5  ;;  %v1935_v16 = vmul.f32 %v3461_v18, %v3461_v18  ;;  %v1936_v62 = vmul.f32 %v3465_v33, %v3465_v33 }
 0x201   :  { %v1953_v20 = vadd.f32 %v1952_v12, %v1928_v43  ;;  %v1937_v38 = vmul.f32 %v3469_v48, %v3469_v48  ;;  %v1938_v27 = vmul.f32 %v3473_v60, %v3473_v60  ;;  %v1939_v3 = vmul.f32 %v3477_v9, %v3477_v9 }
 0x202   :  { %v1899_v30 = vsub.f32 %v3534_v52, %v3421_v35  ;;  %v1940_v53 = vmul.f32 %v3481_v24, %v3481_v24  ;;  %v1941_v63 = vmul.f32 %v3485_v37, %v3485_v37  ;;  %v1942_v49 = vmul.f32 %v3489_v50, %v3489_v50 }
 0x203   :  { %v1954_v1 = vadd.f32 %v1953_v20, %v1929_v13  ;;  %v1943_v19 = vmul.f32 %v3493_v0, %v3493_v0  ;;  %v1944_v43 = vmul.f32 %v3497_v14, %v3497_v14  ;;  %v1945_v41 = vmul.f32 %v3501_v28, %v3501_v28 }
 0x204   :  { %v1946_v20 = vmul.f32 %v3505_v45, %v3505_v45  ;;  %v1948_v51 = vmul.f32 %v3511_v57, %v3511_v57 }
 0x205   :  { %v1955_v25 = vadd.f32 %v1954_v1, %v1930_v22  ;;  %v1947_v22 = vmul.f32 %v3508_v2, %v3508_v2 }
 0x207   :  { %v1956_v29 = vadd.f32 %v1955_v25, %v1931_v32  ;;  %v1949_v25 = vmul.f32 %v3514_v7, %v3514_v7 }
 0x209   :  { %v1957_v34 = vadd.f32 %v1956_v29, %v1932_v26  ;;  %v1950_v29 = vmul.f32 %v1924_v36, %v1924_v36 }
 0x20b   :  { %v1958_v59 = vadd.f32 %v1957_v34, %v1933_v15 }
 0x20d   :  { %v1959_v44 = vadd.f32 %v1958_v59, %v1934_v10 }
 0x20f   :  { %v1960_v42 = vadd.f32 %v1959_v44, %v1935_v16 }
 0x211   :  { %v1961_v46 = vadd.f32 %v1960_v42, %v1936_v62 }
 0x213   :  { %v1962_v21 = vadd.f32 %v1961_v46, %v1937_v38 }
 0x215   :  { %v1963_v55 = vadd.f32 %v1962_v21, %v1938_v27  ;;  %v2356_v27 = vld [vmem:[#allocation6] ss:$0 sm:$0xff] }
 0x216   :  { %v1992_v21 = vmul.f32 %v2356_v27, %v3425_v47  ;;  %v1995_v36 = vmul.f32 %v2356_v27, %v3437_v61  ;;  %v2002_v47 = vmul.f32 %v2356_v27, %v3465_v33  ;;  %v2005_v61 = vmul.f32 %v2356_v27, %v3477_v9 }
 0x217   :  { %v1964_v8 = vadd.f32 %v1963_v55, %v1939_v3  ;;  %v1993_v3 = vmul.f32 %v2356_v27, %v3429_v4  ;;  %v1994_v55 = vmul.f32 %v2356_v27, %v3433_v58  ;;  %v2003_v4 = vmul.f32 %v2356_v27, %v3469_v48 }
 0x218   :  { %v2004_v58 = vmul.f32 %v2356_v27, %v3473_v60  ;;  %v2012_v33 = vmul.f32 %v2356_v27, %v3505_v45  ;;  %v2013_v48 = vmul.f32 %v2356_v27, %v3508_v2  ;;  %v2014_v60 = vmul.f32 %v2356_v27, %v3511_v57 }
 0x219   :  { %v1965_v6 = vadd.f32 %v1964_v8, %v1940_v53  ;;  %v1996_v53 = vmul.f32 %v2356_v27, %v3441_v31  ;;  %v1997_v8 = vmul.f32 %v2356_v27, %v3445_v39  ;;  %v2006_v31 = vmul.f32 %v2356_v27, %v3481_v24 }
 0x21a   :  { %v2007_v39 = vmul.f32 %v2356_v27, %v3485_v37  ;;  %v2015_v9 = vmul.f32 %v2356_v27, %v3514_v7  ;;  %v2016_v24 = vmul.f32 %v2356_v27, %v3517_v23 }
 0x21b   :  { %v1966_v11 = vadd.f32 %v1965_v6, %v1941_v63  ;;  %v1998_v63 = vmul.f32 %v2356_v27, %v3449_v40  ;;  %v1999_v6 = vmul.f32 %v2356_v27, %v3453_v54  ;;  %v2008_v40 = vmul.f32 %v2356_v27, %v3489_v50 }
 0x21c   :  { %v2009_v54 = vmul.f32 %v2356_v27, %v3493_v0 }
 0x21d   :  { %v1967_v56 = vadd.f32 %v1966_v11, %v1942_v49  ;;  %v2000_v49 = vmul.f32 %v2356_v27, %v3457_v5  ;;  %v2001_v11 = vmul.f32 %v2356_v27, %v3461_v18  ;;  %v2010_v5 = vmul.f32 %v2356_v27, %v3497_v14 }
 0x21e   :  { %v2011_v18 = vmul.f32 %v2356_v27, %v3501_v28 }
 0x21f   :  { %v1968_v12 = vadd.f32 %v1967_v56, %v1943_v19 }
 0x221   :  { %v1969_v13 = vadd.f32 %v1968_v12, %v1944_v43 }
 0x223   :  { %v1970_v17 = vadd.f32 %v1969_v13, %v1945_v41 }
 0x225   :  { %v1971_v1 = vadd.f32 %v1970_v17, %v1946_v20 }
 0x227   :  { %v1972_v32 = vadd.f32 %v1971_v1, %v1947_v22 }
 0x229   :  { %v1973_v26 = vadd.f32 %v1972_v32, %v1948_v51  ;;  %v3621_v32 = vld [vmem:[#allocation7] ss:$0 sm:$0xff] }
 0x22b   :  { %v1974_v15 = vadd.f32 %v1973_v26, %v1949_v25 }
 0x22d   :  { %v1975_v34 = vadd.f32 %v1974_v15, %v1950_v29 }
 0x22f   :  { %v1977_v10 = vrot.slane %v1975_v34, 4 }
 0x231   :  { %v1978_v59 = vadd.f32 %v1977_v10, %v1975_v34  ;;  %v2017_v10 = vmul.f32 %v2356_v27, %v1899_v30 }
 0x233   :  { %v1979_v16 = vrot.slane %v1978_v59, 2 }
 0x235   :  { %v1980_v44 = vadd.f32 %v1979_v16, %v1978_v59 }
 0x237   :  { %v1981_v62 = vrot.slane %v1980_v44, 1 }
 0x239   :  { %v1982_v42 = vadd.f32 %v1981_v62, %v1980_v44 }
 0x23b   :  { %v1983_v38 = vmul.f32 0.0051020407, %v1982_v42 }
 0x23d   :  { %v1984_v46 = vadd.f32 1e-05, %v1983_v38 }
 0x23f   :  { %2804 = vrsqrt.f32 %v1984_v46 }
 0x24c   :  { %v3595_v19 = vpop.eup %2804 }
 0x24d   :  { %v2018_v37 = vmul.f32 %v3595_v19, %v1992_v21  ;;  %v2019_v50 = vmul.f32 %v3595_v19, %v1993_v3  ;;  %v2020_v0 = vmul.f32 %v3595_v19, %v1994_v55  ;;  %v2021_v14 = vmul.f32 %v3595_v19, %v1995_v36 }
 0x24e   :  { %v2022_v28 = vmul.f32 %v3595_v19, %v1996_v53  ;;  %v2023_v45 = vmul.f32 %v3595_v19, %v1997_v8  ;;  %v2024_v2 = vmul.f32 %v3595_v19, %v1998_v63  ;;  %v2025_v57 = vmul.f32 %v3595_v19, %v1999_v6 }
 0x24f   :  { %v2026_v7 = vmul.f32 %v3595_v19, %v2000_v49  ;;  %v2027_v23 = vmul.f32 %v3595_v19, %v2001_v11  ;;  %v2028_v56 = vmul.f32 %v3595_v19, %v2002_v47  ;;  %v2029_v43 = vmul.f32 %v3595_v19, %v2003_v4 }
 0x250   :  { %v2030_v12 = vmul.f32 %v3595_v19, %v2004_v58  ;;  %v2031_v41 = vmul.f32 %v3595_v19, %v2005_v61  ;;  %v2032_v13 = vmul.f32 %v3595_v19, %v2006_v31  ;;  %v2033_v20 = vmul.f32 %v3595_v19, %v2007_v39 }
 0x251   :  { %v2034_v17 = vmul.f32 %v3595_v19, %v2008_v40  ;;  %v2035_v22 = vmul.f32 %v3595_v19, %v2009_v54  ;;  %v2036_v1 = vmul.f32 %v3595_v19, %v2010_v5  ;;  %v2037_v51 = vmul.f32 %v3595_v19, %v2011_v18 }
 0x252   :  { %v2038_v25 = vmul.f32 %v3595_v19, %v2012_v33  ;;  %v2039_v26 = vmul.f32 %v3595_v19, %v2013_v48  ;;  %v2040_v29 = vmul.f32 %v3595_v19, %v2014_v60  ;;  %v2041_v15 = vmul.f32 %v3595_v19, %v2015_v9 }
 0x253   :  { %v2042_v34 = vmul.f32 %v3595_v19, %v2016_v24  ;;  %v2050_v59 = vadd.f32 %v3621_v32, %v2018_v37  ;;  %v2051_v16 = vadd.f32 %v3621_v32, %v2019_v50  ;;  %v3634_v44 = vadd.f32 %v3621_v32, %v2020_v0 }
 0x254   :  { %v3637_v62 = vadd.f32 %v3621_v32, %v2021_v14  ;;  %v3640_v42 = vadd.f32 %v3621_v32, %v2022_v28  ;;  %v3643_v38 = vadd.f32 %v3621_v32, %v2023_v45  ;;  %v3646_v46 = vadd.f32 %v3621_v32, %v2024_v2 }
 0x255   :  { %v3649_v35 = vadd.f32 %v3621_v32, %v2025_v57  ;;  %v3652_v52 = vadd.f32 %v3621_v32, %v2026_v7  ;;  %v3655_v30 = vadd.f32 %v3621_v32, %v2027_v23  ;;  %v3658_v27 = vadd.f32 %v3621_v32, %v2028_v56 }
 0x256   :  { %v3661_v21 = vadd.f32 %v3621_v32, %v2029_v43  ;;  %v3664_v3 = vadd.f32 %v3621_v32, %v2030_v12  ;;  %v3667_v55 = vadd.f32 %v3621_v32, %v2031_v41  ;;  %v3670_v36 = vadd.f32 %v3621_v32, %v2032_v13 }
 0x257   :  { %v3673_v53 = vadd.f32 %v3621_v32, %v2033_v20  ;;  %v3676_v8 = vadd.f32 %v3621_v32, %v2034_v17  ;;  %v3679_v63 = vadd.f32 %v3621_v32, %v2035_v22  ;;  %v3682_v6 = vadd.f32 %v3621_v32, %v2036_v1 }
 0x258   :  { %v3685_v49 = vadd.f32 %v3621_v32, %v2037_v51  ;;  %v3688_v11 = vadd.f32 %v3621_v32, %v2038_v25  ;;  %v3691_v47 = vadd.f32 %v3621_v32, %v2039_v26  ;;  %v3694_v4 = vadd.f32 %v3621_v32, %v2040_v29 }
 0x259   :  { %v3697_v58 = vadd.f32 %v3621_v32, %v2041_v15  ;;  %v3700_v61 = vadd.f32 %v3621_v32, %v2042_v34  ;;  %vm2076_vm1 = vcmp.ge.f32.partialorder %v2050_v59, 0.0  ;;  %vm2077_vm2 = vcmp.ge.f32.partialorder %v2051_v16, 0.0 }
 0x25a   :  { %vm2078_vm3 = vcmp.ge.f32.partialorder %v3634_v44, 0.0  ;;  %vm2079_vm4 = vcmp.ge.f32.partialorder %v3637_v62, 0.0  ;;  %vm2080_vm5 = vcmp.ge.f32.partialorder %v3640_v42, 0.0  ;;  %vm2081_vm6 = vcmp.ge.f32.partialorder %v3643_v38, 0.0 }
 0x25b   :  { %vm2089_vm14 = vcmp.ge.f32.partialorder %v3667_v55, 0.0  ;;  %vm2090_vm15 = vcmp.ge.f32.partialorder %v3670_v36, 0.0  ;;  %vm2091_vm0 = vcmp.ge.f32.partialorder %v3673_v53, 0.0  ;;  %vm2092_vm7 = vcmp.ge.f32.partialorder %v3676_v8, 0.0 }
 0x25c   :  { %v2102_v31 = vmul.f32 0.1, %v2050_v59  ;;  %vm2095_vm10 = vcmp.ge.f32.partialorder %v3685_v49, 0.0  ;;  %vm2096_vm11 = vcmp.ge.f32.partialorder %v3688_v11, 0.0  ;;  %vm2097_vm12 = vcmp.ge.f32.partialorder %v3691_v47, 0.0 }
 0x25d   :  { %vm2098_vm13 = vcmp.ge.f32.partialorder %v3694_v4, 0.0  ;;  %v2103_v39 = vmul.f32 0.1, %v2051_v16  ;;  %v2104_v40 = vmul.f32 0.1, %v3634_v44  ;;  %v3726_v5 = vmul.f32 %v3595_v19, %v2017_v10 }
 0x25e   :  { %v2105_v54 = vmul.f32 0.1, %v3637_v62  ;;  %vm2099_vm8 = vcmp.ge.f32.partialorder %v3697_v58, 0.0  ;;  %vm2100_vm9 = vcmp.ge.f32.partialorder %v3700_v61, 0.0  ;;  %v2106_v18 = vmul.f32 0.1, %v3640_v42 }
 0x25f   :  { %v2107_v33 = vmul.f32 0.1, %v3643_v38  ;;  %v2108_v48 = vmul.f32 0.1, %v3646_v46  ;;  %v2128_v60 = vsel %vm2076_vm1, %v2050_v59, %v2102_v31  ;;  %v2109_v9 = vmul.f32 0.1, %v3649_v35 }
 0x260   :  { %v2110_v24 = vmul.f32 0.1, %v3652_v52  ;;  %v2111_v37 = vmul.f32 0.1, %v3655_v30  ;;  %v2129_v19 = vsel %vm2077_vm2, %v2051_v16, %v2103_v39  ;;  %2154 = vst [vmem:[%s3907_s5] sm:$0xff] %v2128_v60  ;;  %v2112_v50 = vmul.f32 0.1, %v3658_v27 }
 0x261   :  { %v2113_v0 = vmul.f32 0.1, %v3661_v21  ;;  %v2114_v14 = vmul.f32 0.1, %v3664_v3  ;;  %v2130_v28 = vsel %vm2078_vm3, %v3634_v44, %v2104_v40  ;;  %2155 = vst [vmem:[%s3907_s5 + $0x8] sm:$0xff] %v2129_v19  ;;  %v2131_v7 = vsel %vm2079_vm4, %v3637_v62, %v2105_v54 }
 0x262   :  { %v2115_v45 = vmul.f32 0.1, %v3667_v55  ;;  %v2116_v2 = vmul.f32 0.1, %v3670_v36  ;;  %v2117_v57 = vmul.f32 0.1, %v3673_v53  ;;  %v2132_v12 = vsel %vm2080_vm5, %v3640_v42, %v2106_v18 }
 0x263   :  { %2156 = vst [vmem:[%s3907_s5 + $0x10] sm:$0xff] %v2130_v28  ;;  %v2118_v23 = vmul.f32 0.1, %v3676_v8  ;;  %v2119_v56 = vmul.f32 0.1, %v3679_v63  ;;  %2157 = vst [vmem:[%s3907_s5 + $0x18] sm:$0xff] %v2131_v7  ;;  %v2133_v17 = vsel %vm2081_vm6, %v3643_v38, %v2107_v33 }
 0x264   :  { %v2120_v43 = vmul.f32 0.1, %v3682_v6  ;;  %v2121_v41 = vmul.f32 0.1, %v3685_v49  ;;  %v2122_v13 = vmul.f32 0.1, %v3688_v11  ;;  %v2141_v16 = vsel %vm2089_vm14, %v3667_v55, %v2115_v45 }
 0x265   :  { %v2123_v20 = vmul.f32 0.1, %v3691_v47  ;;  %2158 = vst [vmem:[%s3907_s5 + $0x20] sm:$0xff] %v2132_v12  ;;  %v2124_v22 = vmul.f32 0.1, %v3694_v4  ;;  %vm3908_vm1 = vcmp.ge.f32.partialorder %v3646_v46, 0.0  ;;  %v2142_v44 = vsel %vm2090_vm15, %v3670_v36, %v2116_v2 }
 0x266   :  { %v2125_v1 = vmul.f32 0.1, %v3697_v58  ;;  %v2126_v51 = vmul.f32 0.1, %v3700_v61  ;;  %v2134_v25 = vsel %vm3908_vm1, %v3646_v46, %v2108_v48  ;;  %2159 = vst [vmem:[%s3907_s5 + $0x28] sm:$0xff] %v2133_v17  ;;  %vm3909_vm2 = vcmp.ge.f32.partialorder %v3649_v35, 0.0 }
 0x267   :  { %v2135_v26 = vsel %vm3909_vm2, %v3649_v35, %v2109_v9  ;;  %vm3910_vm3 = vcmp.ge.f32.partialorder %v3652_v52, 0.0  ;;  %vm3911_vm4 = vcmp.ge.f32.partialorder %v3655_v30, 0.0  ;;  %vm3912_vm5 = vcmp.ge.f32.partialorder %v3658_v27, 0.0  ;;  %2160 = vst [vmem:[%s3907_s5 + $0x30] sm:$0xff] %v2134_v25  ;;  %2167 = vst [vmem:[%s3907_s5 + $0x68] sm:$0xff] %v2141_v16 }
 0x268   :  { %v2136_v29 = vsel %vm3910_vm3, %v3652_v52, %v2110_v24  ;;  %v2137_v15 = vsel %vm3911_vm4, %v3655_v30, %v2111_v37  ;;  %v2138_v34 = vsel %vm3912_vm5, %v3658_v27, %v2112_v50  ;;  %vm3913_vm6 = vcmp.ge.f32.partialorder %v3661_v21, 0.0  ;;  %2161 = vst [vmem:[%s3907_s5 + $0x38] sm:$0xff] %v2135_v26  ;;  %2168 = vst [vmem:[%s3907_s5 + $0x70] sm:$0xff] %v2142_v44 }
 0x269   :  { %v2139_v10 = vsel %vm3913_vm6, %v3661_v21, %v2113_v0  ;;  %vm3914_vm1 = vcmp.ge.f32.partialorder %v3664_v3, 0.0  ;;  %2162 = vst [vmem:[%s3907_s5 + $0x40] sm:$0xff] %v2136_v29  ;;  %2163 = vst [vmem:[%s3907_s5 + $0x48] sm:$0xff] %v2137_v15  ;;  %v2143_v62 = vsel %vm2091_vm0, %v3673_v53, %v2117_v57  ;;  %v2144_v42 = vsel %vm2092_vm7, %v3676_v8, %v2118_v23 }
 0x26a   :  { %v2140_v59 = vsel %vm3914_vm1, %v3664_v3, %v2114_v14  ;;  %2164 = vst [vmem:[%s3907_s5 + $0x50] sm:$0xff] %v2138_v34  ;;  %vm3915_vm14 = vcmp.ge.f32.partialorder %v3679_v63, 0.0  ;;  %vm3916_vm15 = vcmp.ge.f32.partialorder %v3682_v6, 0.0  ;;  %2165 = vst [vmem:[%s3907_s5 + $0x58] sm:$0xff] %v2139_v10  ;;  %v2147_v35 = vsel %vm2095_vm10, %v3685_v49, %v2121_v41 }
 0x26b   :  { %v2145_v38 = vsel %vm3915_vm14, %v3679_v63, %v2119_v56  ;;  %v2146_v46 = vsel %vm3916_vm15, %v3682_v6, %v2120_v43  ;;  %2166 = vst [vmem:[%s3907_s5 + $0x60] sm:$0xff] %v2140_v59  ;;  %v2148_v52 = vsel %vm2096_vm11, %v3688_v11, %v2122_v13  ;;  %v2149_v30 = vsel %vm2097_vm12, %v3691_v47, %v2123_v20 }
 0x26c   :  { %v2150_v27 = vsel %vm2098_vm13, %v3694_v4, %v2124_v22  ;;  %2169 = vst [vmem:[%s3907_s5 + $0x78] sm:$0xff] %v2143_v62  ;;  %2170 = vst [vmem:[%s3907_s5 + $0x80] sm:$0xff] %v2144_v42  ;;  %v2151_v21 = vsel %vm2099_vm8, %v3697_v58, %v2125_v1  ;;  %v2152_v3 = vsel %vm2100_vm9, %v3700_v61, %v2126_v51 }
 0x26d   :  { %2171 = vst [vmem:[%s3907_s5 + $0x88] sm:$0xff] %v2145_v38  ;;  %2172 = vst [vmem:[%s3907_s5 + $0x90] sm:$0xff] %v2146_v46  ;;  %v2075_v55 = vadd.f32 %v3621_v32, %v3726_v5 }
 0x26e   :  { %2173 = vst [vmem:[%s3907_s5 + $0x98] sm:$0xff] %v2147_v35  ;;  %2174 = vst [vmem:[%s3907_s5 + $0xa0] sm:$0xff] %v2148_v52 }
 0x26f   :  { %2175 = vst [vmem:[%s3907_s5 + $0xa8] sm:$0xff] %v2149_v30  ;;  %2176 = vst [vmem:[%s3907_s5 + $0xb0] sm:$0xff] %v2150_v27  ;;  %vm2101_vm7 = vcmp.ge.f32.partialorder %v2075_v55, 0.0  ;;  %v2127_v36 = vmul.f32 0.1, %v2075_v55 }
 0x270   :  { %2177 = vst [vmem:[%s3907_s5 + $0xb8] sm:$0xff] %v2151_v21  ;;  %2178 = vst [vmem:[%s3907_s5 + $0xc0] sm:$0xff] %v2152_v3 }
 0x271   :  { %v2153_v53 = vsel %vm2101_vm7, %v2075_v55, %v2127_v36 }
 0x272   :  { %2179 = vst [vmem:[%s3907_s5 + $0xc8] sm:$0xff] %v2153_v53 }
 0x273   :  { %2184 = vsyncpa [#allocation3], 1 }
 0x274   :  { %2185 = vsyncpa [#allocation5], 1 }
 0x275   :  { %2186 = vsyncpa [#allocation8], 1 }

// kernel: discriminator_forward.8
= control target key start
LH: loop header
LB: loop body
LE: loop exit
PB: predicated region body
PF: predicated region fallthrough
CT: control target
= control target key end

     0   :  { %s2010_s1 = inlined_call_operand.vmem [shape: bf16[1024,256], index: 1, kind: input, shape index: {}]   ;;  %s2011_s0 = inlined_call_operand.vmem [shape: bf16[16,1024], index: 0, kind: input, shape index: {}]   ;;  %s2012_s2 = inlined_call_operand.vmem [shape: f32[1,256], index: 2, kind: input, shape index: {}]   ;;  %s2013_s3 = inlined_call_operand.vmem [shape: f32[1,256], index: 3, kind: input, shape index: {}]   ;;  %s2014_s4 = inlined_call_operand.vmem [shape: f32[1,256], index: 4, kind: input, shape index: {}]   ;;  %s2015_s5 = inlined_call_operand.vmem [shape: f32[16,256], index: 5, kind: output, shape index: {}]  }
   0x1   :  { %v1306_v0 = vld [vmem:[%s2010_s1 + $0x74] ss:$8 sps:$4 sm:$0xff]   ;;  %v1310_v2 = vld [vmem:[%s2010_s1 + $0x70] ss:$8 sps:$4 sm:$0xff]   ;;  %v1312_v4 = vld [vmem:[%s2010_s1 + $0x64] ss:$8 sps:$4 sm:$0xff]  }
   0x2   :  { %v1308_v1 = vld [vmem:[%s2010_s1 + $0x174] ss:$8 sps:$4 sm:$0xff]   ;;  %848 = vmatprep.subr.bf16.mxu0 %v1306_v0  ;;  %v1311_v3 = vld [vmem:[%s2010_s1 + $0x170] ss:$8 sps:$4 sm:$0xff]   ;;  %v1314_v5 = vld [vmem:[%s2010_s1 + $0x164] ss:$8 sps:$4 sm:$0xff]  }
   0x3   :  { %891 = vmatprep.subr.bf16.mxu1 %v1308_v1  ;;  %849 = vmatpush1.bf16.msra.mxu0 %v1310_v2  ;;  %v1316_v6 = vld [vmem:[%s2010_s1 + $0x60] ss:$8 sps:$4 sm:$0xff]   ;;  %v1318_v8 = vld [vmem:[%s2010_s1 + $0x54] ss:$8 sps:$4 sm:$0xff]   ;;  %v1322_v10 = vld [vmem:[%s2010_s1 + $0x50] ss:$8 sps:$4 sm:$0xff]  }
   0x4   :  { %892 = vmatpush1.bf16.msra.mxu1 %v1311_v3  ;;  %850 = vmatprep.subr.bf16.mxu0 %v1312_v4  ;;  %v1317_v7 = vld [vmem:[%s2010_s1 + $0x160] ss:$8 sps:$4 sm:$0xff]   ;;  %v1320_v9 = vld [vmem:[%s2010_s1 + $0x154] ss:$8 sps:$4 sm:$0xff]   ;;  %v1323_v11 = vld [vmem:[%s2010_s1 + $0x150] ss:$8 sps:$4 sm:$0xff]  }
   0x5   :  { %893 = vmatprep.subr.bf16.mxu1 %v1314_v5  ;;  %v1324_v12 = vld [vmem:[%s2010_s1 + $0x44] ss:$8 sps:$4 sm:$0xff]   ;;  %v1328_v14 = vld [vmem:[%s2010_s1 + $0x40] ss:$8 sps:$4 sm:$0xff]   ;;  %v1330_v16 = vld [vmem:[%s2010_s1 + $0x34] ss:$8 sps:$4 sm:$0xff]  }
   0x6   :  { %v1326_v13 = vld [vmem:[%s2010_s1 + $0x144] ss:$8 sps:$4 sm:$0xff]   ;;  %v1329_v15 = vld [vmem:[%s2010_s1 + $0x140] ss:$8 sps:$4 sm:$0xff]   ;;  %v1332_v17 = vld [vmem:[%s2010_s1 + $0x134] ss:$8 sps:$4 sm:$0xff]  }
   0x7   :  { %851 = vmatpush1.bf16.msra.mxu0 %v1316_v6  ;;  %v1334_v18 = vld [vmem:[%s2010_s1 + $0x30] ss:$8 sps:$4 sm:$0xff]   ;;  %v1336_v20 = vld [vmem:[%s2010_s1 + $0x24] ss:$8 sps:$4 sm:$0xff]   ;;  %v1340_v22 = vld [vmem:[%s2010_s1 + $0x20] ss:$8 sps:$4 sm:$0xff]  }
   0x8   :  { %894 = vmatpush1.bf16.msra.mxu1 %v1317_v7  ;;  %852 = vmatprep.subr.bf16.mxu0 %v1318_v8  ;;  %v1335_v19 = vld [vmem:[%s2010_s1 + $0x130] ss:$8 sps:$4 sm:$0xff]   ;;  %v1338_v21 = vld [vmem:[%s2010_s1 + $0x124] ss:$8 sps:$4 sm:$0xff]   ;;  %v1341_v23 = vld [vmem:[%s2010_s1 + $0x120] ss:$8 sps:$4 sm:$0xff]  }
   0x9   :  { %895 = vmatprep.subr.bf16.mxu1 %v1320_v9  ;;  %v1342_v24 = vld [vmem:[%s2010_s1 + $0x14] ss:$8 sps:$4 sm:$0xff]   ;;  %v1346_v26 = vld [vmem:[%s2010_s1 + $0x10] ss:$8 sps:$4 sm:$0xff]   ;;  %v1348_v28 = vld [vmem:[%s2010_s1 + $0x4] ss:$8 sps:$4 sm:$0xff]  }
   0xa   :  { %v1344_v25 = vld [vmem:[%s2010_s1 + $0x114] ss:$8 sps:$4 sm:$0xff]   ;;  %v1347_v27 = vld [vmem:[%s2010_s1 + $0x110] ss:$8 sps:$4 sm:$0xff]   ;;  %v1350_v29 = vld [vmem:[%s2010_s1 + $0x104] ss:$8 sps:$4 sm:$0xff]  }
   0xb   :  { %853 = vmatpush1.bf16.msra.mxu0 %v1322_v10  ;;  %v1352_v30 = vld [vmem:[%s2010_s1] ss:$8 sps:$4 sm:$0xff]   ;;  %v1354_v32 = vld [vmem:[%s2010_s1 + $0xf4] ss:$8 sps:$4 sm:$0xff]   ;;  %v1358_v34 = vld [vmem:[%s2010_s1 + $0xf0] ss:$8 sps:$4 sm:$0xff]  }
   0xc   :  { %896 = vmatpush1.bf16.msra.mxu1 %v1323_v11  ;;  %854 = vmatprep.subr.bf16.mxu0 %v1324_v12  ;;  %v1353_v31 = vld [vmem:[%s2010_s1 + $0x100] ss:$8 sps:$4 sm:$0xff]   ;;  %v1356_v33 = vld [vmem:[%s2010_s1 + $0x1f4] ss:$8 sps:$4 sm:$0xff]   ;;  %v1359_v35 = vld [vmem:[%s2010_s1 + $0x1f0] ss:$8 sps:$4 sm:$0xff]  }
   0xd   :  { %897 = vmatprep.subr.bf16.mxu1 %v1326_v13  ;;  %v1360_v36 = vld [vmem:[%s2010_s1 + $0xe4] ss:$8 sps:$4 sm:$0xff]   ;;  %v1364_v38 = vld [vmem:[%s2010_s1 + $0xe0] ss:$8 sps:$4 sm:$0xff]   ;;  %v1366_v40 = vld [vmem:[%s2010_s1 + $0xd4] ss:$8 sps:$4 sm:$0xff]  }
   0xe   :  { %v1362_v37 = vld [vmem:[%s2010_s1 + $0x1e4] ss:$8 sps:$4 sm:$0xff]   ;;  %v1365_v39 = vld [vmem:[%s2010_s1 + $0x1e0] ss:$8 sps:$4 sm:$0xff]   ;;  %v1368_v41 = vld [vmem:[%s2010_s1 + $0x1d4] ss:$8 sps:$4 sm:$0xff]  }
   0xf   :  { %855 = vmatpush1.bf16.msra.mxu0 %v1328_v14  ;;  %v1370_v42 = vld [vmem:[%s2010_s1 + $0xd0] ss:$8 sps:$4 sm:$0xff]   ;;  %v1372_v44 = vld [vmem:[%s2010_s1 + $0xc4] ss:$8 sps:$4 sm:$0xff]   ;;  %v1376_v46 = vld [vmem:[%s2010_s1 + $0xc0] ss:$8 sps:$4 sm:$0xff]  }
  0x10   :  { %898 = vmatpush1.bf16.msra.mxu1 %v1329_v15  ;;  %856 = vmatprep.subr.bf16.mxu0 %v1330_v16  ;;  %v1371_v43 = vld [vmem:[%s2010_s1 + $0x1d0] ss:$8 sps:$4 sm:$0xff]   ;;  %v1374_v45 = vld [vmem:[%s2010_s1 + $0x1c4] ss:$8 sps:$4 sm:$0xff]   ;;  %v1377_v47 = vld [vmem:[%s2010_s1 + $0x1c0] ss:$8 sps:$4 sm:$0xff]  }
  0x11   :  { %899 = vmatprep.subr.bf16.mxu1 %v1332_v17  ;;  %v20_v48 = vld [vmem:[%s2011_s0] sm:$0xff]  ;;  %v21_v50 = vld [vmem:[%s2011_s0 + $0x8] sm:$0xff]  ;;  %v1378_v52 = vld [vmem:[%s2010_s1 + $0xb4] ss:$8 sps:$4 sm:$0xff]  }
  0x12   :  { %v24_v49 = vld [vmem:[%s2011_s0 + $0x20] sm:$0xff]  ;;  %v25_v51 = vld [vmem:[%s2011_s0 + $0x28] sm:$0xff]  ;;  %v1380_v54 = vld [vmem:[%s2010_s1 + $0x1b4] ss:$8 sps:$4 sm:$0xff]  }
  0x13   :  { %857 = vmatpush1.bf16.msra.mxu0 %v1334_v18  ;;  %v1167_v53 = vcombine.high %v20_v48, %v24_v49  ;;  %v1169_v55 = vcombine.high %v21_v50, %v25_v51  ;;  %v1382_v56 = vld [vmem:[%s2010_s1 + $0xb0] ss:$8 sps:$4 sm:$0xff]   ;;  %v1384_v58 = vld [vmem:[%s2010_s1 + $0xa4] ss:$8 sps:$4 sm:$0xff]   ;;  %v1388_v60 = vld [vmem:[%s2010_s1 + $0xa0] ss:$8 sps:$4 sm:$0xff]   ;;  %v1166_v8 = vcombine.low %v20_v48, %v24_v49  ;;  %v1168_v9 = vcombine.low %v21_v50, %v25_v51 }
  0x14   :  { %900 = vmatpush1.bf16.msra.mxu1 %v1335_v19  ;;  %858 = vmatprep.subr.bf16.mxu0 %v1336_v20  ;;  %v1383_v57 = vld [vmem:[%s2010_s1 + $0x1b0] ss:$8 sps:$4 sm:$0xff]   ;;  %v1386_v59 = vld [vmem:[%s2010_s1 + $0x1a4] ss:$8 sps:$4 sm:$0xff]   ;;  %v1389_v61 = vld [vmem:[%s2010_s1 + $0x1a0] ss:$8 sps:$4 sm:$0xff]  }
  0x15   :  { %901 = vmatprep.subr.bf16.mxu1 %v1338_v21  ;;  %880 = vmatprep.mubr.bf16.mxu0 %v1167_v53  ;;  %v1390_v62 = vld [vmem:[%s2010_s1 + $0x94] ss:$8 sps:$4 sm:$0xff]   ;;  %v1394_v0 = vld [vmem:[%s2010_s1 + $0x90] ss:$8 sps:$4 sm:$0xff]   ;;  %v1396_v2 = vld [vmem:[%s2010_s1 + $0x84] ss:$8 sps:$4 sm:$0xff]  }
  0x16   :  { %923 = vmatprep.mubr.bf16.mxu1 %v1169_v55  ;;  %v1392_v63 = vld [vmem:[%s2010_s1 + $0x194] ss:$8 sps:$4 sm:$0xff]   ;;  %v1395_v1 = vld [vmem:[%s2010_s1 + $0x190] ss:$8 sps:$4 sm:$0xff]   ;;  %v1398_v3 = vld [vmem:[%s2010_s1 + $0x184] ss:$8 sps:$4 sm:$0xff]  }
  0x17   :  { %859 = vmatpush1.bf16.msra.mxu0 %v1340_v22  ;;  %v1400_v4 = vld [vmem:[%s2010_s1 + $0x80] ss:$8 sps:$4 sm:$0xff]   ;;  %v1404_v6 = vld [vmem:[%s2010_s1 + $0x274] ss:$8 sps:$4 sm:$0xff]   ;;  %v1402_v10 = vld [vmem:[%s2010_s1 + $0x270] ss:$8 sps:$4 sm:$0xff]  }
  0x18   :  { %902 = vmatpush1.bf16.msra.mxu1 %v1341_v23  ;;  %860 = vmatprep.subr.bf16.mxu0 %v1342_v24  ;;  %v1401_v5 = vld [vmem:[%s2010_s1 + $0x180] ss:$8 sps:$4 sm:$0xff]   ;;  %v1407_v7 = vld [vmem:[%s2010_s1 + $0x374] ss:$8 sps:$4 sm:$0xff]   ;;  %v1405_v11 = vld [vmem:[%s2010_s1 + $0x370] ss:$8 sps:$4 sm:$0xff]  }
  0x19   :  { %903 = vmatprep.subr.bf16.mxu1 %v1344_v25  ;;  %v1410_v12 = vld [vmem:[%s2010_s1 + $0x264] ss:$8 sps:$4 sm:$0xff]   ;;  %v1408_v14 = vld [vmem:[%s2010_s1 + $0x260] ss:$8 sps:$4 sm:$0xff]   ;;  %v1416_v16 = vld [vmem:[%s2010_s1 + $0x254] ss:$8 sps:$4 sm:$0xff]  }
  0x1a   :  { %v1413_v13 = vld [vmem:[%s2010_s1 + $0x364] ss:$8 sps:$4 sm:$0xff]   ;;  %v1411_v15 = vld [vmem:[%s2010_s1 + $0x360] ss:$8 sps:$4 sm:$0xff]   ;;  %v1419_v17 = vld [vmem:[%s2010_s1 + $0x354] ss:$8 sps:$4 sm:$0xff]  }
  0x1b   :  { %861 = vmatpush1.bf16.msra.mxu0 %v1346_v26  ;;  %v1414_v18 = vld [vmem:[%s2010_s1 + $0x250] ss:$8 sps:$4 sm:$0xff]   ;;  %v1422_v20 = vld [vmem:[%s2010_s1 + $0x244] ss:$8 sps:$4 sm:$0xff]   ;;  %v1420_v22 = vld [vmem:[%s2010_s1 + $0x240] ss:$8 sps:$4 sm:$0xff]  }
  0x1c   :  { %904 = vmatpush1.bf16.msra.mxu1 %v1347_v27  ;;  %862 = vmatprep.subr.bf16.mxu0 %v1348_v28  ;;  %v1417_v19 = vld [vmem:[%s2010_s1 + $0x350] ss:$8 sps:$4 sm:$0xff]   ;;  %v1425_v21 = vld [vmem:[%s2010_s1 + $0x344] ss:$8 sps:$4 sm:$0xff]   ;;  %v1423_v23 = vld [vmem:[%s2010_s1 + $0x340] ss:$8 sps:$4 sm:$0xff]  }
  0x1d   :  { %905 = vmatprep.subr.bf16.mxu1 %v1350_v29  ;;  %v1428_v24 = vld [vmem:[%s2010_s1 + $0x234] ss:$8 sps:$4 sm:$0xff]   ;;  %v1426_v26 = vld [vmem:[%s2010_s1 + $0x230] ss:$8 sps:$4 sm:$0xff]   ;;  %v1434_v28 = vld [vmem:[%s2010_s1 + $0x224] ss:$8 sps:$4 sm:$0xff]  }
  0x1e   :  { %v1431_v25 = vld [vmem:[%s2010_s1 + $0x334] ss:$8 sps:$4 sm:$0xff]   ;;  %v1429_v27 = vld [vmem:[%s2010_s1 + $0x330] ss:$8 sps:$4 sm:$0xff]   ;;  %v1437_v29 = vld [vmem:[%s2010_s1 + $0x324] ss:$8 sps:$4 sm:$0xff]  }
  0x1f   :  { %863 = vmatpush1.bf16.msra.mxu0 %v1352_v30  ;;  %v1432_v30 = vld [vmem:[%s2010_s1 + $0x220] ss:$8 sps:$4 sm:$0xff]   ;;  %v1450_v48 = vld [vmem:[%s2010_s1 + $0x2f0] ss:$8 sps:$4 sm:$0xff]   ;;  %v1458_v50 = vld [vmem:[%s2010_s1 + $0x2e4] ss:$8 sps:$4 sm:$0xff]  }
  0x20   :  { %906 = vmatpush1.bf16.msra.mxu1 %v1353_v31  ;;  %864 = vmatprep.subr.bf16.mxu0 %v1354_v32  ;;  %v1435_v31 = vld [vmem:[%s2010_s1 + $0x320] ss:$8 sps:$4 sm:$0xff]   ;;  %v1440_v32 = vld [vmem:[%s2010_s1 + $0x214] ss:$8 sps:$4 sm:$0xff]   ;;  %v1453_v49 = vld [vmem:[%s2010_s1 + $0x3f0] ss:$8 sps:$4 sm:$0xff]  }
  0x21   :  { %907 = vmatprep.subr.bf16.mxu1 %v1356_v33  ;;  %v1443_v33 = vld [vmem:[%s2010_s1 + $0x314] ss:$8 sps:$4 sm:$0xff]   ;;  %v1461_v51 = vld [vmem:[%s2010_s1 + $0x3e4] ss:$8 sps:$4 sm:$0xff]   ;;  %v1459_v53 = vld [vmem:[%s2010_s1 + $0x3e0] ss:$8 sps:$4 sm:$0xff]  }
  0x22   :  { %v1467_v55 = vld [vmem:[%s2010_s1 + $0x3d4] ss:$8 sps:$4 sm:$0xff]  }
  0x23   :  { %865 = vmatpush2.bf16.msra.mxu0 %v1358_v34  ;;  %v1825_v34 = vld [vmem:[%s2011_s0 + $0x10] sm:$0xff] }
  0x24   :  { %908 = vmatpush2.bf16.msra.mxu1 %v1359_v35  ;;  %866 = vmatprep.subr.bf16.mxu0 %v1360_v36  ;;  %v1830_v35 = vld [vmem:[%s2011_s0 + $0x30] sm:$0xff]  ;;  %v1835_v36 = vld [vmem:[%s2011_s0 + $0x18] sm:$0xff] }
  0x25   :  { %909 = vmatprep.subr.bf16.mxu1 %v1362_v37  ;;  %v1840_v37 = vld [vmem:[%s2011_s0 + $0x38] sm:$0xff] }
  0x27   :  { %867 = vmatpush2.bf16.msra.mxu0 %v1364_v38  ;;  %v1438_v38 = vld [vmem:[%s2010_s1 + $0x210] ss:$8 sps:$4 sm:$0xff]  }
  0x28   :  { %910 = vmatpush2.bf16.msra.mxu1 %v1365_v39  ;;  %868 = vmatprep.subr.bf16.mxu0 %v1366_v40  ;;  %v1441_v39 = vld [vmem:[%s2010_s1 + $0x310] ss:$8 sps:$4 sm:$0xff]   ;;  %v1171_v40 = vcombine.high %v1825_v34, %v1830_v35 }
  0x29   :  { %911 = vmatprep.subr.bf16.mxu1 %v1368_v41  ;;  %v1446_v41 = vld [vmem:[%s2010_s1 + $0x204] ss:$8 sps:$4 sm:$0xff]  }
  0x2b   :  { %869 = vmatpush2.bf16.msra.mxu0 %v1370_v42  ;;  %v1449_v42 = vld [vmem:[%s2010_s1 + $0x304] ss:$8 sps:$4 sm:$0xff]  }
  0x2c   :  { %912 = vmatpush2.bf16.msra.mxu1 %v1371_v43  ;;  %870 = vmatprep.subr.bf16.mxu0 %v1372_v44  ;;  %v1173_v43 = vcombine.high %v1835_v36, %v1840_v37  ;;  %v1444_v44 = vld [vmem:[%s2010_s1 + $0x200] ss:$8 sps:$4 sm:$0xff]  }
  0x2d   :  { %913 = vmatprep.subr.bf16.mxu1 %v1374_v45  ;;  %v1447_v45 = vld [vmem:[%s2010_s1 + $0x300] ss:$8 sps:$4 sm:$0xff]  }
  0x2f   :  { %871 = vmatpush2.bf16.msra.mxu0 %v1376_v46  ;;  %v1452_v46 = vld [vmem:[%s2010_s1 + $0x2f4] ss:$8 sps:$4 sm:$0xff]  }
  0x30   :  { %914 = vmatpush2.bf16.msra.mxu1 %v1377_v47  ;;  %872 = vmatprep.subr.bf16.mxu0 %v1378_v52  ;;  %v1455_v47 = vld [vmem:[%s2010_s1 + $0x3f4] ss:$8 sps:$4 sm:$0xff]   ;;  %v1456_v52 = vld [vmem:[%s2010_s1 + $0x2e0] ss:$8 sps:$4 sm:$0xff]  }
  0x31   :  { %915 = vmatprep.subr.bf16.mxu1 %v1380_v54  ;;  %v1464_v54 = vld [vmem:[%s2010_s1 + $0x2d4] ss:$8 sps:$4 sm:$0xff]  }
  0x33   :  { %873 = vmatpush2.bf16.msra.mxu0 %v1382_v56  ;;  %v1462_v56 = vld [vmem:[%s2010_s1 + $0x2d0] ss:$8 sps:$4 sm:$0xff]  }
  0x34   :  { %916 = vmatpush2.bf16.msra.mxu1 %v1383_v57  ;;  %874 = vmatprep.subr.bf16.mxu0 %v1384_v58  ;;  %v1465_v57 = vld [vmem:[%s2010_s1 + $0x3d0] ss:$8 sps:$4 sm:$0xff]   ;;  %v1470_v58 = vld [vmem:[%s2010_s1 + $0x2c4] ss:$8 sps:$4 sm:$0xff]  }
  0x35   :  { %917 = vmatprep.subr.bf16.mxu1 %v1386_v59  ;;  %v1473_v59 = vld [vmem:[%s2010_s1 + $0x3c4] ss:$8 sps:$4 sm:$0xff]  }
  0x37   :  { %875 = vmatpush2.bf16.msra.mxu0 %v1388_v60  ;;  %v1468_v60 = vld [vmem:[%s2010_s1 + $0x2c0] ss:$8 sps:$4 sm:$0xff]  }
  0x38   :  { %918 = vmatpush2.bf16.msra.mxu1 %v1389_v61  ;;  %876 = vmatprep.subr.bf16.mxu0 %v1390_v62  ;;  %v1471_v61 = vld [vmem:[%s2010_s1 + $0x3c0] ss:$8 sps:$4 sm:$0xff]   ;;  %v1476_v62 = vld [vmem:[%s2010_s1 + $0x2b4] ss:$8 sps:$4 sm:$0xff]  }
  0x39   :  { %919 = vmatprep.subr.bf16.mxu1 %v1392_v63  ;;  %v1479_v63 = vld [vmem:[%s2010_s1 + $0x3b4] ss:$8 sps:$4 sm:$0xff]  }
  0x3b   :  { %877 = vmatpush2.bf16.msra.mxu0 %v1394_v0  ;;  %v1474_v0 = vld [vmem:[%s2010_s1 + $0x2b0] ss:$8 sps:$4 sm:$0xff]  }
  0x3c   :  { %920 = vmatpush2.bf16.msra.mxu1 %v1395_v1  ;;  %878 = vmatprep.subr.bf16.mxu0 %v1396_v2  ;;  %v1477_v1 = vld [vmem:[%s2010_s1 + $0x3b0] ss:$8 sps:$4 sm:$0xff]   ;;  %v1482_v2 = vld [vmem:[%s2010_s1 + $0x2a4] ss:$8 sps:$4 sm:$0xff]  }
  0x3d   :  { %921 = vmatprep.subr.bf16.mxu1 %v1398_v3  ;;  %v1485_v3 = vld [vmem:[%s2010_s1 + $0x3a4] ss:$8 sps:$4 sm:$0xff]  }
  0x3f   :  { %879 = vmatpush2.bf16.msra.mxu0 %v1400_v4  ;;  %v1480_v4 = vld [vmem:[%s2010_s1 + $0x2a0] ss:$8 sps:$4 sm:$0xff]  }
  0x40   :  { %922 = vmatpush2.bf16.msra.mxu1 %v1401_v5  ;;  %934 = vmatprep.subr.bf16.mxu0 %v1404_v6  ;;  %v1483_v5 = vld [vmem:[%s2010_s1 + $0x3a0] ss:$8 sps:$4 sm:$0xff]   ;;  %v1488_v6 = vld [vmem:[%s2010_s1 + $0x294] ss:$8 sps:$4 sm:$0xff]  }
  0x41   :  { %977 = vmatprep.subr.bf16.mxu1 %v1407_v7  ;;  %v1491_v7 = vld [vmem:[%s2010_s1 + $0x394] ss:$8 sps:$4 sm:$0xff]  }
  0x42   :  { %881 = vmatmul.mubr.bf16.vlgmr.msra.gmra.mxu0 %v1166_v8  ;;  %v1486_v8 = vld [vmem:[%s2010_s1 + $0x290] ss:$8 sps:$4 sm:$0xff]  }
  0x43   :  { %924 = vmatmul.mubr.bf16.vlgmr.msra.gmra.mxu1 %v1168_v9  ;;  %935 = vmatpush1.bf16.msra.mxu0 %v1402_v10  ;;  %v1489_v9 = vld [vmem:[%s2010_s1 + $0x390] ss:$8 sps:$4 sm:$0xff]   ;;  %v1494_v10 = vld [vmem:[%s2010_s1 + $0x284] ss:$8 sps:$4 sm:$0xff]  }
  0x44   :  { %978 = vmatpush1.bf16.msra.mxu1 %v1405_v11  ;;  %936 = vmatprep.subr.bf16.mxu0 %v1410_v12  ;;  %v1497_v11 = vld [vmem:[%s2010_s1 + $0x384] ss:$8 sps:$4 sm:$0xff]   ;;  %v1492_v12 = vld [vmem:[%s2010_s1 + $0x280] ss:$8 sps:$4 sm:$0xff]  }
  0x45   :  { %979 = vmatprep.subr.bf16.mxu1 %v1413_v13  ;;  %966 = vmatprep.mubr.bf16.mxu0 %v1171_v40  ;;  %v1495_v13 = vld [vmem:[%s2010_s1 + $0x380] ss:$8 sps:$4 sm:$0xff]  }
  0x46   :  { %1009 = vmatprep.mubr.bf16.mxu1 %v1173_v43 }
  0x47   :  { %937 = vmatpush1.bf16.msra.mxu0 %v1408_v14  ;;  %v1170_v14 = vcombine.low %v1825_v34, %v1830_v35 }
  0x48   :  { %980 = vmatpush1.bf16.msra.mxu1 %v1411_v15  ;;  %938 = vmatprep.subr.bf16.mxu0 %v1416_v16  ;;  %v1172_v15 = vcombine.low %v1835_v36, %v1840_v37  ;;  %v158_v16 = vlaneseq }
  0x49   :  { %981 = vmatprep.subr.bf16.mxu1 %v1419_v17 }
  0x4a   :  { %v159_v17 = vshrl.u32 %v158_v16, 7 }
  0x4b   :  { %939 = vmatpush1.bf16.msra.mxu0 %v1414_v18 }
  0x4c   :  { %982 = vmatpush1.bf16.msra.mxu1 %v1417_v19  ;;  %940 = vmatprep.subr.bf16.mxu0 %v1422_v20  ;;  %v1965_v20 = vsub.s32 0, %v159_v17  ;;  %vm1025_vm0 = vcmp.lt.s32.totalorder %v159_v17, 4 }
  0x4d   :  { %983 = vmatprep.subr.bf16.mxu1 %v1425_v21  ;;  %v156_v21 = vld [vmem:[%s2012_s2] sm:$0x3] }
  0x4f   :  { %941 = vmatpush1.bf16.msra.mxu0 %v1420_v22  ;;  %v1970_v22 = vsub.s32 1, %v159_v17 }
  0x50   :  { %984 = vmatpush1.bf16.msra.mxu1 %v1423_v23  ;;  %942 = vmatprep.subr.bf16.mxu0 %v1428_v24 }
  0x51   :  { %985 = vmatprep.subr.bf16.mxu1 %v1431_v25  ;;  %v161_v25 = vrot.slane %v156_v21, %v1965_v20 }
  0x53   :  { %943 = vmatpush1.bf16.msra.mxu0 %v1426_v26  ;;  %v1974_v26 = vrot.slane %v156_v21, %v1970_v22 }
  0x54   :  { %986 = vmatpush1.bf16.msra.mxu1 %v1429_v27  ;;  %944 = vmatprep.subr.bf16.mxu0 %v1434_v28 }
  0x55   :  { %987 = vmatprep.subr.bf16.mxu1 %v1437_v29 }
  0x57   :  { %945 = vmatpush1.bf16.msra.mxu0 %v1432_v30 }
  0x58   :  { %988 = vmatpush1.bf16.msra.mxu1 %v1435_v31  ;;  %946 = vmatprep.subr.bf16.mxu0 %v1440_v32 }
  0x59   :  { %989 = vmatprep.subr.bf16.mxu1 %v1443_v33 }
  0x5b   :  { %947 = vmatpush1.bf16.msra.mxu0 %v1438_v38 }
  0x5c   :  { %990 = vmatpush1.bf16.msra.mxu1 %v1441_v39  ;;  %948 = vmatprep.subr.bf16.mxu0 %v1446_v41 }
  0x5d   :  { %991 = vmatprep.subr.bf16.mxu1 %v1449_v42 }
  0x5f   :  { %949 = vmatpush1.bf16.msra.mxu0 %v1444_v44 }
  0x60   :  { %992 = vmatpush1.bf16.msra.mxu1 %v1447_v45  ;;  %950 = vmatprep.subr.bf16.mxu0 %v1452_v46 }
  0x61   :  { %993 = vmatprep.subr.bf16.mxu1 %v1455_v47 }
  0x63   :  { %951 = vmatpush2.bf16.msra.mxu0 %v1450_v48 }
  0x64   :  { %994 = vmatpush2.bf16.msra.mxu1 %v1453_v49  ;;  %952 = vmatprep.subr.bf16.mxu0 %v1458_v50 }
  0x65   :  { %995 = vmatprep.subr.bf16.mxu1 %v1461_v51 }
  0x67   :  { %953 = vmatpush2.bf16.msra.mxu0 %v1456_v52 }
  0x68   :  { %996 = vmatpush2.bf16.msra.mxu1 %v1459_v53  ;;  %954 = vmatprep.subr.bf16.mxu0 %v1464_v54 }
  0x69   :  { %997 = vmatprep.subr.bf16.mxu1 %v1467_v55 }
  0x6b   :  { %955 = vmatpush2.bf16.msra.mxu0 %v1462_v56 }
  0x6c   :  { %998 = vmatpush2.bf16.msra.mxu1 %v1465_v57  ;;  %956 = vmatprep.subr.bf16.mxu0 %v1470_v58 }
  0x6d   :  { %999 = vmatprep.subr.bf16.mxu1 %v1473_v59 }
  0x6f   :  { %957 = vmatpush2.bf16.msra.mxu0 %v1468_v60 }
  0x70   :  { %1000 = vmatpush2.bf16.msra.mxu1 %v1471_v61  ;;  %958 = vmatprep.subr.bf16.mxu0 %v1476_v62 }
  0x71   :  { %1001 = vmatprep.subr.bf16.mxu1 %v1479_v63 }
  0x73   :  { %959 = vmatpush2.bf16.msra.mxu0 %v1474_v0 }
  0x74   :  { %1002 = vmatpush2.bf16.msra.mxu1 %v1477_v1  ;;  %960 = vmatprep.subr.bf16.mxu0 %v1482_v2 }
  0x75   :  { %1003 = vmatprep.subr.bf16.mxu1 %v1485_v3 }
  0x77   :  { %961 = vmatpush2.bf16.msra.mxu0 %v1480_v4 }
  0x78   :  { %1004 = vmatpush2.bf16.msra.mxu1 %v1483_v5  ;;  %962 = vmatprep.subr.bf16.mxu0 %v1488_v6 }
  0x79   :  { %1005 = vmatprep.subr.bf16.mxu1 %v1491_v7 }
  0x7b   :  { %963 = vmatpush2.bf16.msra.mxu0 %v1486_v8 }
  0x7c   :  { %1006 = vmatpush2.bf16.msra.mxu1 %v1489_v9  ;;  %964 = vmatprep.subr.bf16.mxu0 %v1494_v10 }
  0x7d   :  { %1007 = vmatprep.subr.bf16.mxu1 %v1497_v11 }
  0x7f   :  { %965 = vmatpush2.bf16.msra.mxu0 %v1492_v12 }
  0x80   :  { %1008 = vmatpush2.bf16.msra.mxu1 %v1495_v13 }
  0x82   :  { %967 = vmatmul.mubr.bf16.vlgmr.msra.gmra.mxu0 %v1170_v14 }
  0x83   :  { %1010 = vmatmul.mubr.bf16.vlgmr.msra.gmra.mxu1 %v1172_v15 }
 0x102   :  { %v882_v18 = vpop.f32.mrf.mxu0 }
 0x103   :  { %v925_v19 = vpop.f32.mrf.mxu1  ;;  %v883_v29 = vadd.f32 %v882_v18, %v161_v25 }
 0x104   :  { %v884_v23 = vpop.f32.mrf.mxu0 }
 0x105   :  { %v927_v24 = vpop.f32.mrf.mxu1  ;;  %v885_v30 = vadd.f32 %v884_v23, %v1974_v26  ;;  %v926_v33 = vadd.f32 %v925_v19, %v883_v29 }
 0x106   :  { %v886_v27 = vpop.f32.mrf.mxu0 }
 0x107   :  { %v929_v28 = vpop.f32.mrf.mxu1  ;;  %v928_v36 = vadd.f32 %v927_v24, %v885_v30  ;;  %v887_v50 = vadd.f32 %v886_v27, %v161_v25 }
 0x108   :  { %v888_v31 = vpop.f32.mrf.mxu0 }
 0x109   :  { %v1977_v32 = vpop.f32.mrf.mxu1  ;;  %v930_v56 = vadd.f32 %v929_v28, %v887_v50  ;;  %v889_v17 = vadd.f32 %v888_v31, %v1974_v26 }
 0x142   :  { %v968_v34 = vpop.f32.mrf.mxu0 }
 0x143   :  { %v1011_v35 = vpop.f32.mrf.mxu1  ;;  %v969_v37 = vadd.f32 %v968_v34, %v926_v33 }
 0x144   :  { %v970_v38 = vpop.f32.mrf.mxu0 }
 0x145   :  { %v1012_v39 = vadd.f32 %v1011_v35, %v969_v37  ;;  %v971_v40 = vadd.f32 %v970_v38, %v928_v36  ;;  %v1013_v41 = vpop.f32.mrf.mxu1  ;;  %v932_v35 = vadd.f32 %v1977_v32, %v889_v17 }
 0x146   :  { %v972_v54 = vpop.f32.mrf.mxu0 }
 0x147   :  { %v1027_v42 = vsel %vm1025_vm0, %v1012_v39, 0.0  ;;  %v1014_v43 = vadd.f32 %v1013_v41, %v971_v40  ;;  %v973_v59 = vadd.f32 %v972_v54, %v930_v56  ;;  %v1015_v63 = vpop.f32.mrf.mxu1  ;;  %v1302_v5 = vmul.f32 -1.442695, %v1012_v39 }
 0x148   :  { %v1032_v44 = vrot.slane %v1027_v42, 4  ;;  %v974_v34 = vpop.f32.mrf.mxu0 }
 0x149   :  { %v1028_v45 = vsel %vm1025_vm0, %v1014_v43, 0.0  ;;  %v1016_v1 = vadd.f32 %v1015_v63, %v973_v59  ;;  %1498 = vpow2.f32 %v1302_v5  ;;  %v975_v38 = vadd.f32 %v974_v34, %v932_v35  ;;  %v1017_v40 = vpop.f32.mrf.mxu1 }
 0x14a   :  { %v1033_v46 = vadd.f32 %v1032_v44, %v1027_v42  ;;  %v1039_v47 = vrot.slane %v1028_v45, 4  ;;  %v1021_v42 = vld [vmem:[%s2014_s4] sm:$0x3] }
 0x14b   :  { %v1304_v9 = vmul.f32 -1.442695, %v1016_v1  ;;  %v1018_v41 = vadd.f32 %v1017_v40, %v975_v38 }
 0x14c   :  { %v1034_v48 = vrot.slane %v1033_v46, 2  ;;  %v1040_v49 = vadd.f32 %v1039_v47, %v1028_v45 }
 0x14d   :  { %1500 = vpow2.f32 %v1304_v9 }
 0x14e   :  { %v1041_v51 = vrot.slane %v1040_v49, 2  ;;  %v1035_v52 = vadd.f32 %v1034_v48, %v1033_v46  ;;  %v1102_v46 = vrot.slane %v1021_v42, %v1965_v20  ;;  %v1126_v48 = vand.u32 127, %v158_v16 }
 0x150   :  { %v1042_v53 = vadd.f32 %v1041_v51, %v1040_v49  ;;  %v1036_v55 = vrot.slane %v1035_v52, 1  ;;  %v1106_v49 = vrot.slane %v1021_v42, %v1970_v22  ;;  %vm1128_vm1 = vcmp.eq.s32.totalorder %v1126_v48, 0 }
 0x152   :  { %v1043_v57 = vrot.slane %v1042_v53, 1  ;;  %v1037_v58 = vadd.f32 %v1036_v55, %v1035_v52 }
 0x154   :  { %v1044_v60 = vadd.f32 %v1043_v57, %v1042_v53  ;;  %v1045_v61 = vmul.f32 0.25, %v1037_v58 }
 0x156   :  { %v1046_v62 = vmul.f32 0.25, %v1044_v60  ;;  %v1047_v0 = vsub.f32 %v1012_v39, %v1045_v61  ;;  %v1499_v29 = vpop.eup %1498  ;;  %v1020_v39 = vld [vmem:[%s2013_s3] sm:$0x3]  ;;  %v1049_v26 = vsub.f32 %v1016_v1, %v1045_v61 }
 0x157   :  { %v1142_v36 = vadd.f32 1.0, %v1499_v29  ;;  %v1083_v31 = vrot.slane %v1020_v39, %v1965_v20  ;;  %v1087_v32 = vrot.slane %v1020_v39, %v1970_v22 }
 0x158   :  { %v1048_v2 = vsub.f32 %v1014_v43, %v1046_v62  ;;  %v1051_v3 = vsel %vm1025_vm0, %v1047_v0, 0.0  ;;  %v1050_v43 = vsub.f32 %v1018_v41, %v1046_v62 }
 0x159   :  { %v1055_v4 = vmul.f32 %v1051_v3, %v1051_v3  ;;  %v1090_v44 = vmul.f32 %v1083_v31, %v1047_v0  ;;  %v1092_v45 = vmul.f32 %v1083_v31, %v1049_v26 }
 0x15a   :  { %v1052_v6 = vsel %vm1025_vm0, %v1048_v2, 0.0  ;;  %v1501_v33 = vpop.eup %1500  ;;  %v1091_v50 = vmul.f32 %v1087_v32, %v1048_v2  ;;  %v1093_v53 = vmul.f32 %v1087_v32, %v1050_v43 }
 0x15b   :  { %v1056_v7 = vmul.f32 %v1052_v6, %v1052_v6  ;;  %v1060_v8 = vrot.slane %v1055_v4, 4  ;;  %v1144_v37 = vadd.f32 1.0, %v1501_v33 }
 0x15d   :  { %v1067_v10 = vrot.slane %v1056_v7, 4  ;;  %v1061_v11 = vadd.f32 %v1060_v8, %v1055_v4 }
 0x15f   :  { %v1068_v12 = vadd.f32 %v1067_v10, %v1056_v7  ;;  %v1062_v13 = vrot.slane %v1061_v11, 2 }
 0x161   :  { %v1069_v14 = vrot.slane %v1068_v12, 2  ;;  %v1063_v15 = vadd.f32 %v1062_v13, %v1061_v11 }
 0x163   :  { %v1070_v18 = vadd.f32 %v1069_v14, %v1068_v12  ;;  %v1064_v19 = vrot.slane %v1063_v15, 1 }
 0x165   :  { %v1071_v21 = vrot.slane %v1070_v18, 1  ;;  %v1065_v23 = vadd.f32 %v1064_v19, %v1063_v15 }
 0x167   :  { %v1072_v24 = vadd.f32 %v1071_v21, %v1070_v18  ;;  %v1073_v25 = vmul.f32 0.25, %v1065_v23 }
 0x169   :  { %v1074_v27 = vmul.f32 0.25, %v1072_v24  ;;  %v1075_v28 = vadd.f32 1e-05, %v1073_v25 }
 0x16b   :  { %v1076_v30 = vadd.f32 1e-05, %v1074_v27  ;;  %1502 = vrsqrt.f32 %v1075_v28 }
 0x16d   :  { %1504 = vrsqrt.f32 %v1076_v30 }
 0x16e   :  { %1506 = vrcp.f32 %v1142_v36 }
 0x16f   :  { %1508 = vrcp.f32 %v1144_v37 }
 0x178   :  { %v1503_v47 = vpop.eup %1502 }
 0x179   :  { %v1094_v51 = vmul.f32 %v1503_v47, %v1090_v44  ;;  %v1096_v52 = vmul.f32 %v1503_v47, %v1092_v45 }
 0x17a   :  { %v1505_v54 = vpop.eup %1504 }
 0x17b   :  { %v1095_v55 = vmul.f32 %v1505_v54, %v1091_v50  ;;  %v1109_v56 = vadd.f32 %v1102_v46, %v1094_v51  ;;  %v1111_v57 = vadd.f32 %v1102_v46, %v1096_v52  ;;  %v1097_v58 = vmul.f32 %v1505_v54, %v1093_v53  ;;  %v1507_v62 = vpop.eup %1506 }
 0x17c   :  { %v1509_v63 = vpop.eup %1508 }
 0x17d   :  { %v1110_v59 = vadd.f32 %v1106_v49, %v1095_v55  ;;  %vm1113_vm2 = vcmp.ge.f32.partialorder %v1109_v56, 0.0  ;;  %vm1115_vm3 = vcmp.ge.f32.partialorder %v1111_v57, 0.0  ;;  %v1117_v60 = vmul.f32 0.1, %v1109_v56 }
 0x17e   :  { %v1119_v20 = vmul.f32 0.1, %v1111_v57  ;;  %v1112_v61 = vadd.f32 %v1106_v49, %v1097_v58 }
 0x17f   :  { %vm1114_vm4 = vcmp.ge.f32.partialorder %v1110_v59, 0.0  ;;  %v1118_v16 = vmul.f32 0.1, %v1110_v59  ;;  %v1121_v22 = vsel %vm1113_vm2, %v1109_v56, %v1117_v60 }
 0x180   :  { %v1123_v0 = vsel %vm1115_vm3, %v1111_v57, %v1119_v20  ;;  %v1154_v1 = vsel %vm1128_vm1, %v1507_v62, %v1121_v22  ;;  %vm1116_vm5 = vcmp.ge.f32.partialorder %v1112_v61, 0.0  ;;  %v1120_v2 = vmul.f32 0.1, %v1112_v61 }
 0x181   :  { %v1122_v3 = vsel %vm1114_vm4, %v1110_v59, %v1118_v16  ;;  %v1156_v4 = vsel %vm1128_vm1, %v1509_v63, %v1123_v0  ;;  %1158 = vst [vmem:[%s2015_s5] sm:$0xff] %v1154_v1 }
 0x182   :  { %1159 = vst [vmem:[%s2015_s5 + $0x8] sm:$0xff] %v1122_v3  ;;  %1160 = vst [vmem:[%s2015_s5 + $0x10] sm:$0xff] %v1156_v4  ;;  %v1124_v5 = vsel %vm1116_vm5, %v1112_v61, %v1120_v2 }
 0x183   :  { %1161 = vst [vmem:[%s2015_s5 + $0x18] sm:$0xff] %v1124_v5 }

// kernel: discriminator_forward.7
= control target key start
LH: loop header
LB: loop body
LE: loop exit
PB: predicated region body
PF: predicated region fallthrough
CT: control target
= control target key end

     0   :  { %s5004_s18 = smov 0   ;;  %s5006_s19 = smov 0   ;;  %s6142_s0 = inlined_call_operand.vmem [shape: bf16[16,6272], index: 0, kind: input, shape index: {}]   ;;  %s6143_s1 = inlined_call_operand.vmem [shape: bf16[6272,1024], index: 1, kind: input, shape index: {}]   ;;  %s6144_s2 = inlined_call_operand.vmem [shape: f32[1,1024], index: 2, kind: input, shape index: {}]   ;;  %s6145_s3 = inlined_call_operand.vmem [shape: f32[1,1024], index: 3, kind: input, shape index: {}]   ;;  %s6146_s4 = inlined_call_operand.vmem [shape: f32[1,1024], index: 4, kind: input, shape index: {}]   ;;  %s6147_s5 = inlined_call_operand.vmem [shape: f32[16,1024], index: 5, kind: output, shape index: {}]  }
   0x1   :  { %s5008_s20 = smov 0   ;;  %s5010_s21 = smov 0  }
   0x2   :  { %s5012_s22 = smov 0  }
   0x3 LB: > { %s24_s23 = sadd.s32 1, %s4966_s21  ;;  %p43_p1 = scmp.ne.s32.totalorder %s4958_s19, %s4954_s18  ;;  %s4970_s22 = sphi %s5012_s22, %s15_s22   ;;  %s4966_s21 = sphi %s5010_s21, %s6161_s21   ;;  %s4962_s20 = sphi %s5008_s20, %s6160_s20   ;;  %s4958_s19 = sphi %s5006_s19, %s6159_s19   ;;  %s4954_s18 = sphi %s5004_s18, %s6158_s18  }
   0x4   : > { %p25_p0 = scmp.ge.s32.totalorder %s24_s23, 7  ;;  %p44_p2 = scmp.eq.s32.totalorder %s4970_s22, 0 }
   0x5   : > { %s36_s25 = sadd.s32 1, %s4958_s19  ;;  %p4383_p5 = scmp.ge.s32.totalorder %s4970_s22, 7 }
   0x6   : > { %s6163_s23 = smov (%p25_p0, %s24_s23), 0  ;;  %p45_p3 = por %p44_p2, %p43_p1 }
   0x7   : > { %s32_s24 = ssub.s32 %s4966_s21, %s6163_s23  ;;  %193 = sbr.rel (%p4383_p5) target bundleno = 21 (0x15), region = 28 }
   0x8   : > { %p34_p4 = scmp.eq.s32.totalorder %s32_s24, 0 }
   0xa   : > { %s5039_s26 = scalar_select %p34_p4, %s4958_s19, %s36_s25  }
   0xc   : > { %196 = sbr.rel (!%p45_p3) target bundleno = 21 (0x15), region = 32  ;;  %s198_s27 = sand.u32 (%p45_p3), 1, %s4958_s19  }
   0xd   : > { %s4853_s28 = smul.u32 (%p45_p3), 28, %s4966_s21 }
   0xe   : > { %s4855_s29 = smul.u32 (%p45_p3), 56, %s198_s27 }
   0xf   : > { %s206_s7 = scalar_lea.vmem (%p45_p3), %s6142_s0, %s4853_s28 }
  0x10   : > { %v221_v0 = vld [vmem:[%s206_s7] sm:$0xff] (%p45_p3)  ;;  %v223_v1 = vld [vmem:[%s206_s7 + $0x8] sm:$0xff] (%p45_p3)  ;;  %v225_v2 = vld [vmem:[%s206_s7 + $0x10] sm:$0xff] (%p45_p3)  ;;  %s200_s8 = scalar_lea.vmem (%p45_p3), [#allocation2], %s4855_s29 }
  0x11   : > { %222 = vst [vmem:[%s200_s8] sm:$0xff] %v221_v0  ;;  %224 = vst [vmem:[%s200_s8 + $0x8] sm:$0xff] %v223_v1  ;;  %v227_v3 = vld [vmem:[%s206_s7 + $0xc4] sm:$0xff]  ;;  %v229_v4 = vld [vmem:[%s206_s7 + $0xcc] sm:$0xff] }
  0x12   : > { %226 = vst [vmem:[%s200_s8 + $0x10] sm:$0xff] %v225_v2  ;;  %v231_v5 = vld [vmem:[%s206_s7 + $0xd4] sm:$0xff]  ;;  %228 = vst [vmem:[%s200_s8 + $0x1c] sm:$0xff] %v227_v3  ;;  %v4387_v7 = vld [vmem:[%s206_s7 + $0xdc] sm:$0xf] }
  0x13   : > { %230 = vst [vmem:[%s200_s8 + $0x24] sm:$0xff] %v229_v4  ;;  %232 = vst [vmem:[%s200_s8 + $0x2c] sm:$0xff] %v231_v5  ;;  %v4385_v6 = vld [vmem:[%s206_s7 + $0x18] sm:$0xf] }
  0x14   : > { %4386 = vst [vmem:[%s200_s8 + $0x18] sm:$0xf] %v4385_v6  ;;  %4388 = vst [vmem:[%s200_s8 + $0x34] sm:$0xf] %v4387_v7 }
  0x15 PF: > { %p4389_p6 = scmp.ge.s32.totalorder %s4970_s22, 1  ;;  %p259_p7 = scmp.lt.s32.totalorder %s4970_s22, 8 }
  0x17   : > { %p260_p8 = pnand %p4389_p6, %p259_p7 }
  0x18   : > { %s266_s9 = sand.u32 (!%p260_p8), 1, %s4954_s18   ;;  %s302_s10 = smul.u32 (!%p260_p8), 112, %s4962_s20 }
  0x19   : > { %263 = sbr.rel (%p260_p8) target bundleno = 804 (0x324), region = 62  ;;  %p4392_p10 = scmp.ne.s32.totalorder (!%p260_p8), %s4962_s20, 0 }
  0x1a   : > { %s4856_s11 = smul.u32 (!%p260_p8), 56, %s266_s9  ;;  %p303_p9 = scmp.lt.s32.totalorder (!%p260_p8), %s302_s10, 783 }
  0x1c   : > { %s5056_s16 = scalar_lea.vmem (!%p260_p8), [#allocation2], %s4856_s11 }
  0x1e   : > { %s6165_s10 = smov (!%p303_p9, %s302_s10), 783  ;;  %320 = sbr.rel (%p4392_p10) target bundleno = 44 (0x2c), region = 70 }
  0x1f   : > { %s4854_s12 = sshll.u32 %s6165_s10, 5 }
  0x20   : > { %s5054_s15 = scalar_lea.vmem %s6143_s1, %s4854_s12 }
  0x23   : > { %v4972_v8 = vmov 0.0  }
  0x24   : > { %321 = vst [vmem:[%s6147_s5] sm:$0xff] %v4972_v8  ;;  %322 = vst [vmem:[%s6147_s5 + $0x8] sm:$0xff] %v4972_v8 }
  0x25   : > { %323 = vst [vmem:[%s6147_s5 + $0x10] sm:$0xff] %v4972_v8  ;;  %324 = vst [vmem:[%s6147_s5 + $0x18] sm:$0xff] %v4972_v8 }
  0x26   : > { %325 = vst [vmem:[%s6147_s5 + $0x20] sm:$0xff] %v4972_v8  ;;  %326 = vst [vmem:[%s6147_s5 + $0x28] sm:$0xff] %v4972_v8 }
  0x27   : > { %327 = vst [vmem:[%s6147_s5 + $0x30] sm:$0xff] %v4972_v8  ;;  %328 = vst [vmem:[%s6147_s5 + $0x38] sm:$0xff] %v4972_v8 }
  0x28   : > { %329 = vst [vmem:[%s6147_s5 + $0x40] sm:$0xff] %v4972_v8  ;;  %330 = vst [vmem:[%s6147_s5 + $0x48] sm:$0xff] %v4972_v8 }
  0x29   : > { %331 = vst [vmem:[%s6147_s5 + $0x50] sm:$0xff] %v4972_v8  ;;  %332 = vst [vmem:[%s6147_s5 + $0x58] sm:$0xff] %v4972_v8 }
  0x2a   : > { %333 = vst [vmem:[%s6147_s5 + $0x60] sm:$0xff] %v4972_v8  ;;  %334 = vst [vmem:[%s6147_s5 + $0x68] sm:$0xff] %v4972_v8 }
  0x2b   : > { %335 = vst [vmem:[%s6147_s5 + $0x70] sm:$0xff] %v4972_v8  ;;  %336 = vst [vmem:[%s6147_s5 + $0x78] sm:$0xff] %v4972_v8 }
  0x2c PF: > { %v417_v9 = vld [vmem:[%s5054_s15 + $0x1c0] sm:$0xff]  ;;  %p4848_p11 = scmp.ne.s32.totalorder %s4962_s20, 6 }
  0x2d   : > { %v421_v10 = vld [vmem:[%s5054_s15 + $0x1e0] sm:$0xff] }
  0x2e   : > { %v545_v11 = vld [vmem:[%s5054_s15 + $0x5c0] sm:$0xff]  ;;  %v4457_v12 = vcombine.high %v417_v9, %v421_v10  ;;  %v4456_v14 = vcombine.low %v417_v9, %v421_v10 }
  0x2f   : > { %v549_v13 = vld [vmem:[%s5054_s15 + $0x5e0] sm:$0xff] }
  0x30   : > { %v409_v15 = vld [vmem:[%s5054_s15 + $0x180] sm:$0xff]  ;;  %v4585_v17 = vcombine.high %v545_v11, %v549_v13  ;;  %v4584_v18 = vcombine.low %v545_v11, %v549_v13  ;;  %3085 = vmatprep.subr.bf16.mxu0 %v4457_v12 }
  0x31   : > { %v413_v16 = vld [vmem:[%s5054_s15 + $0x1a0] sm:$0xff]  ;;  %3086 = vmatpush1.bf16.msra.mxu0 %v4456_v14 }
  0x32   : > { %v4449_v19 = vcombine.high %v409_v15, %v413_v16  ;;  %v537_v20 = vld [vmem:[%s5054_s15 + $0x580] sm:$0xff]  ;;  %3128 = vmatprep.subr.bf16.mxu1 %v4585_v17  ;;  %v4448_v27 = vcombine.low %v409_v15, %v413_v16 }
  0x33   : > { %v541_v21 = vld [vmem:[%s5054_s15 + $0x5a0] sm:$0xff]  ;;  %3129 = vmatpush1.bf16.msra.mxu1 %v4584_v18 }
  0x34   : > { %v401_v22 = vld [vmem:[%s5054_s15 + $0x140] sm:$0xff]  ;;  %v4577_v23 = vcombine.high %v537_v20, %v541_v21  ;;  %3087 = vmatprep.subr.bf16.mxu0 %v4449_v19  ;;  %v4576_v28 = vcombine.low %v537_v20, %v541_v21 }
  0x35   : > { %v405_v24 = vld [vmem:[%s5054_s15 + $0x160] sm:$0xff]  ;;  %3088 = vmatpush1.bf16.msra.mxu0 %v4448_v27 }
  0x36   : > { %v529_v25 = vld [vmem:[%s5054_s15 + $0x540] sm:$0xff]  ;;  %v4441_v29 = vcombine.high %v401_v22, %v405_v24  ;;  %3130 = vmatprep.subr.bf16.mxu1 %v4577_v23  ;;  %v4440_v35 = vcombine.low %v401_v22, %v405_v24 }
  0x37   : > { %v533_v26 = vld [vmem:[%s5054_s15 + $0x560] sm:$0xff]  ;;  %3131 = vmatpush1.bf16.msra.mxu1 %v4576_v28 }
  0x38   : > { %v4569_v30 = vcombine.high %v529_v25, %v533_v26  ;;  %v393_v31 = vld [vmem:[%s5054_s15 + $0x100] sm:$0xff]  ;;  %3089 = vmatprep.subr.bf16.mxu0 %v4441_v29  ;;  %v4568_v36 = vcombine.low %v529_v25, %v533_v26 }
  0x39   : > { %v397_v32 = vld [vmem:[%s5054_s15 + $0x120] sm:$0xff]  ;;  %3090 = vmatpush1.bf16.msra.mxu0 %v4440_v35 }
  0x3a   : > { %v521_v33 = vld [vmem:[%s5054_s15 + $0x500] sm:$0xff]  ;;  %v4433_v37 = vcombine.high %v393_v31, %v397_v32  ;;  %3132 = vmatprep.subr.bf16.mxu1 %v4569_v30  ;;  %v4432_v43 = vcombine.low %v393_v31, %v397_v32 }
  0x3b   : > { %v525_v34 = vld [vmem:[%s5054_s15 + $0x520] sm:$0xff]  ;;  %3133 = vmatpush1.bf16.msra.mxu1 %v4568_v36 }
  0x3c   : > { %v4561_v38 = vcombine.high %v521_v33, %v525_v34  ;;  %v385_v39 = vld [vmem:[%s5054_s15 + $0xc0] sm:$0xff]  ;;  %3091 = vmatprep.subr.bf16.mxu0 %v4433_v37  ;;  %v4560_v44 = vcombine.low %v521_v33, %v525_v34 }
  0x3d   : > { %v389_v40 = vld [vmem:[%s5054_s15 + $0xe0] sm:$0xff]  ;;  %3092 = vmatpush1.bf16.msra.mxu0 %v4432_v43 }
  0x3e   : > { %v513_v41 = vld [vmem:[%s5054_s15 + $0x4c0] sm:$0xff]  ;;  %v4425_v45 = vcombine.high %v385_v39, %v389_v40  ;;  %3134 = vmatprep.subr.bf16.mxu1 %v4561_v38  ;;  %v4424_v51 = vcombine.low %v385_v39, %v389_v40 }
  0x3f   : > { %v517_v42 = vld [vmem:[%s5054_s15 + $0x4e0] sm:$0xff]  ;;  %3135 = vmatpush1.bf16.msra.mxu1 %v4560_v44 }
  0x40   : > { %v4553_v46 = vcombine.high %v513_v41, %v517_v42  ;;  %v377_v47 = vld [vmem:[%s5054_s15 + $0x80] sm:$0xff]  ;;  %3093 = vmatprep.subr.bf16.mxu0 %v4425_v45  ;;  %v4552_v52 = vcombine.low %v513_v41, %v517_v42 }
  0x41   : > { %v381_v48 = vld [vmem:[%s5054_s15 + $0xa0] sm:$0xff]  ;;  %3094 = vmatpush1.bf16.msra.mxu0 %v4424_v51 }
  0x42   : > { %v505_v49 = vld [vmem:[%s5054_s15 + $0x480] sm:$0xff]  ;;  %v4417_v53 = vcombine.high %v377_v47, %v381_v48  ;;  %3136 = vmatprep.subr.bf16.mxu1 %v4553_v46  ;;  %v4416_v59 = vcombine.low %v377_v47, %v381_v48 }
  0x43   : > { %v509_v50 = vld [vmem:[%s5054_s15 + $0x4a0] sm:$0xff]  ;;  %3137 = vmatpush1.bf16.msra.mxu1 %v4552_v52 }
  0x44   : > { %v4545_v54 = vcombine.high %v505_v49, %v509_v50  ;;  %v369_v55 = vld [vmem:[%s5054_s15 + $0x40] sm:$0xff]  ;;  %3095 = vmatprep.subr.bf16.mxu0 %v4417_v53  ;;  %v4544_v61 = vcombine.low %v505_v49, %v509_v50 }
  0x45   : > { %v373_v56 = vld [vmem:[%s5054_s15 + $0x60] sm:$0xff]  ;;  %3096 = vmatpush1.bf16.msra.mxu0 %v4416_v59 }
  0x46   : > { %v497_v57 = vld [vmem:[%s5054_s15 + $0x440] sm:$0xff]  ;;  %v4409_v62 = vcombine.high %v369_v55, %v373_v56  ;;  %3138 = vmatprep.subr.bf16.mxu1 %v4545_v54  ;;  %v4408_v5 = vcombine.low %v369_v55, %v373_v56 }
  0x47   : > { %v501_v58 = vld [vmem:[%s5054_s15 + $0x460] sm:$0xff]  ;;  %3139 = vmatpush1.bf16.msra.mxu1 %v4544_v61 }
  0x48   : > { %v361_v60 = vld [vmem:[%s5054_s15] sm:$0xff]  ;;  %v4537_v0 = vcombine.high %v497_v57, %v501_v58  ;;  %3097 = vmatprep.subr.bf16.mxu0 %v4409_v62  ;;  %v4536_v6 = vcombine.low %v497_v57, %v501_v58 }
  0x49   : > { %v365_v63 = vld [vmem:[%s5054_s15 + $0x20] sm:$0xff]  ;;  %3098 = vmatpush1.bf16.msra.mxu0 %v4408_v5 }
  0x4a   : > { %v5138_v1 = vld [vmem:[%s5056_s16 + $0x4] ss:$28 sps:$4 sm:$0xff]   ;;  %v5143_v4 = vld [vmem:[%s5056_s16 + $0xc] ss:$28 sps:$4 sm:$0xff]   ;;  %v4401_v7 = vcombine.high %v361_v60, %v365_v63  ;;  %3140 = vmatprep.subr.bf16.mxu1 %v4537_v0  ;;  %v4400_v13 = vcombine.low %v361_v60, %v365_v63 }
  0x4b   : > { %v489_v2 = vld [vmem:[%s5054_s15 + $0x400] sm:$0xff]  ;;  %3117 = vmatprep.mubr.bf16.mxu0 %v5138_v1  ;;  %3160 = vmatprep.mubr.bf16.mxu1 %v5143_v4 }
  0x4c   : > { %v493_v3 = vld [vmem:[%s5054_s15 + $0x420] sm:$0xff]  ;;  %3141 = vmatpush1.bf16.msra.mxu1 %v4536_v6  ;;  %3099 = vmatprep.subr.bf16.mxu0 %v4401_v7 }
  0x4d   : > { %v4529_v8 = vcombine.high %v489_v2, %v493_v3  ;;  %v481_v9 = vld [vmem:[%s5054_s15 + $0x3c0] sm:$0xff]  ;;  %v4528_v14 = vcombine.low %v489_v2, %v493_v3  ;;  %3100 = vmatpush1.bf16.msra.mxu0 %v4400_v13 }
  0x4e   : > { %v485_v10 = vld [vmem:[%s5054_s15 + $0x3e0] sm:$0xff] }
  0x4f   : > { %v609_v11 = vld [vmem:[%s5054_s15 + $0x7c0] sm:$0xff]  ;;  %v4521_v15 = vcombine.high %v481_v9, %v485_v10  ;;  %3142 = vmatprep.subr.bf16.mxu1 %v4529_v8  ;;  %v4520_v21 = vcombine.low %v481_v9, %v485_v10 }
  0x50   : > { %v613_v12 = vld [vmem:[%s5054_s15 + $0x7e0] sm:$0xff]  ;;  %3143 = vmatpush1.bf16.msra.mxu1 %v4528_v14 }
  0x51   : > { %v4649_v16 = vcombine.high %v609_v11, %v613_v12  ;;  %v473_v17 = vld [vmem:[%s5054_s15 + $0x380] sm:$0xff]  ;;  %3101 = vmatprep.subr.bf16.mxu0 %v4521_v15  ;;  %v4648_v22 = vcombine.low %v609_v11, %v613_v12 }
  0x52   : > { %v477_v18 = vld [vmem:[%s5054_s15 + $0x3a0] sm:$0xff]  ;;  %3102 = vmatpush2.bf16.msra.mxu0 %v4520_v21 }
  0x53   : > { %v601_v19 = vld [vmem:[%s5054_s15 + $0x780] sm:$0xff]  ;;  %v4513_v23 = vcombine.high %v473_v17, %v477_v18  ;;  %3144 = vmatprep.subr.bf16.mxu1 %v4649_v16  ;;  %v4512_v29 = vcombine.low %v473_v17, %v477_v18 }
  0x54   : > { %v605_v20 = vld [vmem:[%s5054_s15 + $0x7a0] sm:$0xff]  ;;  %3145 = vmatpush2.bf16.msra.mxu1 %v4648_v22 }
  0x55   : > { %v4641_v24 = vcombine.high %v601_v19, %v605_v20  ;;  %v465_v25 = vld [vmem:[%s5054_s15 + $0x340] sm:$0xff]  ;;  %3103 = vmatprep.subr.bf16.mxu0 %v4513_v23  ;;  %v4640_v30 = vcombine.low %v601_v19, %v605_v20 }
  0x56   : > { %v469_v26 = vld [vmem:[%s5054_s15 + $0x360] sm:$0xff]  ;;  %3104 = vmatpush2.bf16.msra.mxu0 %v4512_v29 }
  0x57   : > { %v593_v27 = vld [vmem:[%s5054_s15 + $0x740] sm:$0xff]  ;;  %v4505_v31 = vcombine.high %v465_v25, %v469_v26  ;;  %3146 = vmatprep.subr.bf16.mxu1 %v4641_v24  ;;  %v4504_v37 = vcombine.low %v465_v25, %v469_v26 }
  0x58   : > { %v597_v28 = vld [vmem:[%s5054_s15 + $0x760] sm:$0xff]  ;;  %3147 = vmatpush2.bf16.msra.mxu1 %v4640_v30 }
  0x59   : > { %v4633_v32 = vcombine.high %v593_v27, %v597_v28  ;;  %v457_v33 = vld [vmem:[%s5054_s15 + $0x300] sm:$0xff]  ;;  %3105 = vmatprep.subr.bf16.mxu0 %v4505_v31  ;;  %v4632_v38 = vcombine.low %v593_v27, %v597_v28 }
  0x5a   : > { %v461_v34 = vld [vmem:[%s5054_s15 + $0x320] sm:$0xff]  ;;  %3106 = vmatpush2.bf16.msra.mxu0 %v4504_v37 }
  0x5b   : > { %v585_v35 = vld [vmem:[%s5054_s15 + $0x700] sm:$0xff]  ;;  %v4497_v39 = vcombine.high %v457_v33, %v461_v34  ;;  %3148 = vmatprep.subr.bf16.mxu1 %v4633_v32  ;;  %v4496_v45 = vcombine.low %v457_v33, %v461_v34  ;;  %v5199_v33 = vld [vmem:[%s5056_s16 + $0x14] ss:$28 sps:$4 sm:$0xff]  }
  0x5c   : > { %v589_v36 = vld [vmem:[%s5054_s15 + $0x720] sm:$0xff]  ;;  %3149 = vmatpush2.bf16.msra.mxu1 %v4632_v38 }
  0x5d   : > { %v4625_v40 = vcombine.high %v585_v35, %v589_v36  ;;  %v449_v41 = vld [vmem:[%s5054_s15 + $0x2c0] sm:$0xff]  ;;  %3107 = vmatprep.subr.bf16.mxu0 %v4497_v39  ;;  %v4624_v46 = vcombine.low %v585_v35, %v589_v36 }
  0x5e   : > { %v453_v42 = vld [vmem:[%s5054_s15 + $0x2e0] sm:$0xff]  ;;  %3108 = vmatpush2.bf16.msra.mxu0 %v4496_v45 }
  0x5f   : > { %v577_v43 = vld [vmem:[%s5054_s15 + $0x6c0] sm:$0xff]  ;;  %v4489_v47 = vcombine.high %v449_v41, %v453_v42  ;;  %3150 = vmatprep.subr.bf16.mxu1 %v4625_v40  ;;  %v4488_v53 = vcombine.low %v449_v41, %v453_v42  ;;  %v4973_v40 = vmov 0  }
  0x60   : > { %v581_v44 = vld [vmem:[%s5054_s15 + $0x6e0] sm:$0xff]  ;;  %3151 = vmatpush2.bf16.msra.mxu1 %v4624_v46 }
  0x61   : > { %v441_v48 = vld [vmem:[%s5054_s15 + $0x280] sm:$0xff]  ;;  %v4617_v49 = vcombine.high %v577_v43, %v581_v44  ;;  %3109 = vmatprep.subr.bf16.mxu0 %v4489_v47  ;;  %v4616_v54 = vcombine.low %v577_v43, %v581_v44 }
  0x62   : > { %v445_v50 = vld [vmem:[%s5054_s15 + $0x2a0] sm:$0xff]  ;;  %3110 = vmatpush2.bf16.msra.mxu0 %v4488_v53 }
  0x63   : > { %v569_v51 = vld [vmem:[%s5054_s15 + $0x680] sm:$0xff]  ;;  %v4481_v55 = vcombine.high %v441_v48, %v445_v50  ;;  %3152 = vmatprep.subr.bf16.mxu1 %v4617_v49  ;;  %v4480_v61 = vcombine.low %v441_v48, %v445_v50 }
  0x64   : > { %v573_v52 = vld [vmem:[%s5054_s15 + $0x6a0] sm:$0xff]  ;;  %3153 = vmatpush2.bf16.msra.mxu1 %v4616_v54 }
  0x65   : > { %v4609_v56 = vcombine.high %v569_v51, %v573_v52  ;;  %v433_v57 = vld [vmem:[%s5054_s15 + $0x240] sm:$0xff]  ;;  %3111 = vmatprep.subr.bf16.mxu0 %v4481_v55  ;;  %v4608_v62 = vcombine.low %v569_v51, %v573_v52 }
  0x66   : > { %v437_v58 = vld [vmem:[%s5054_s15 + $0x260] sm:$0xff]  ;;  %3112 = vmatpush2.bf16.msra.mxu0 %v4480_v61 }
  0x67   : > { %v561_v59 = vld [vmem:[%s5054_s15 + $0x640] sm:$0xff]  ;;  %v4473_v63 = vcombine.high %v433_v57, %v437_v58  ;;  %3154 = vmatprep.subr.bf16.mxu1 %v4609_v56  ;;  %v4472_v7 = vcombine.low %v433_v57, %v437_v58 }
  0x68   : > { %v565_v60 = vld [vmem:[%s5054_s15 + $0x660] sm:$0xff]  ;;  %3155 = vmatpush2.bf16.msra.mxu1 %v4608_v62 }
  0x69   : > { %v4601_v0 = vcombine.high %v561_v59, %v565_v60  ;;  %v425_v2 = vld [vmem:[%s5054_s15 + $0x200] sm:$0xff]  ;;  %3113 = vmatprep.subr.bf16.mxu0 %v4473_v63  ;;  %v4600_v8 = vcombine.low %v561_v59, %v565_v60 }
  0x6a   : > { %v429_v3 = vld [vmem:[%s5054_s15 + $0x220] sm:$0xff]  ;;  %3114 = vmatpush2.bf16.msra.mxu0 %v4472_v7 }
  0x6b   : > { %v553_v5 = vld [vmem:[%s5054_s15 + $0x600] sm:$0xff]  ;;  %v4465_v9 = vcombine.high %v425_v2, %v429_v3  ;;  %3156 = vmatprep.subr.bf16.mxu1 %v4601_v0  ;;  %v4464_v15 = vcombine.low %v425_v2, %v429_v3 }
  0x6c   : > { %v557_v6 = vld [vmem:[%s5054_s15 + $0x620] sm:$0xff]  ;;  %3157 = vmatpush2.bf16.msra.mxu1 %v4600_v8 }
  0x6d   : > { %v4593_v10 = vcombine.high %v553_v5, %v557_v6  ;;  %v673_v11 = vld [vmem:[%s5054_s15 + $0x9c0] sm:$0xff]  ;;  %3115 = vmatprep.subr.bf16.mxu0 %v4465_v9  ;;  %v4592_v16 = vcombine.low %v553_v5, %v557_v6 }
  0x6e   : > { %v677_v12 = vld [vmem:[%s5054_s15 + $0x9e0] sm:$0xff]  ;;  %3116 = vmatpush2.bf16.msra.mxu0 %v4464_v15 }
  0x6f   : > { %v801_v13 = vld [vmem:[%s5054_s15 + $0xdc0] sm:$0xff]  ;;  %v4713_v17 = vcombine.high %v673_v11, %v677_v12  ;;  %3158 = vmatprep.subr.bf16.mxu1 %v4593_v10  ;;  %v4712_v25 = vcombine.low %v673_v11, %v677_v12 }
  0x70   : > { %v805_v14 = vld [vmem:[%s5054_s15 + $0xde0] sm:$0xff]  ;;  %3159 = vmatpush2.bf16.msra.mxu1 %v4592_v16 }
  0x71   : > { %v4841_v18 = vcombine.high %v801_v13, %v805_v14  ;;  %v665_v19 = vld [vmem:[%s5054_s15 + $0x980] sm:$0xff]  ;;  %3171 = vmatprep.subr.bf16.mxu0 %v4713_v17  ;;  %v4840_v26 = vcombine.low %v801_v13, %v805_v14 }
  0x72   : > { %v669_v20 = vld [vmem:[%s5054_s15 + $0x9a0] sm:$0xff] }
  0x73   : > { %v5186_v21 = vld [vmem:[%s5056_s16] ss:$28 sps:$4 sm:$0xff]   ;;  %v5191_v24 = vld [vmem:[%s5056_s16 + $0x8] ss:$28 sps:$4 sm:$0xff]   ;;  %v4705_v27 = vcombine.high %v665_v19, %v669_v20  ;;  %3214 = vmatprep.subr.bf16.mxu1 %v4841_v18  ;;  %v4704_v34 = vcombine.low %v665_v19, %v669_v20 }
  0x74   : > { %v793_v22 = vld [vmem:[%s5054_s15 + $0xd80] sm:$0xff]  ;;  %3118 = vmatmul.mubr.bf16.vlgmr.msra.gmra.mxu0 %v5186_v21  ;;  %3161 = vmatmul.mubr.bf16.vlgmr.msra.gmra.mxu1 %v5191_v24  ;;  %v418_v19 = vld [vmem:[%s5054_s15 + $0x1c8] sm:$0xff] }
  0x75   : > { %v797_v23 = vld [vmem:[%s5054_s15 + $0xda0] sm:$0xff]  ;;  %3172 = vmatpush1.bf16.msra.mxu0 %v4712_v25  ;;  %3215 = vmatpush1.bf16.msra.mxu1 %v4840_v26  ;;  %v422_v20 = vld [vmem:[%s5054_s15 + $0x1e8] sm:$0xff] }
  0x76   : > { %v4833_v28 = vcombine.high %v793_v22, %v797_v23  ;;  %v657_v29 = vld [vmem:[%s5054_s15 + $0x940] sm:$0xff]  ;;  %3173 = vmatprep.subr.bf16.mxu0 %v4705_v27  ;;  %v4832_v35 = vcombine.low %v793_v22, %v797_v23  ;;  %3246 = vmatprep.mubr.bf16.mxu1 %v4973_v40  ;;  %v4459_v26 = vcombine.high %v418_v19, %v422_v20 }
  0x77   : > { %v661_v30 = vld [vmem:[%s5054_s15 + $0x960] sm:$0xff]  ;;  %3203 = vmatprep.mubr.bf16.mxu0 %v5199_v33 }
  0x78   : > { %v785_v31 = vld [vmem:[%s5054_s15 + $0xd40] sm:$0xff]  ;;  %v4697_v36 = vcombine.high %v657_v29, %v661_v30  ;;  %3216 = vmatprep.subr.bf16.mxu1 %v4833_v28  ;;  %v4696_v43 = vcombine.low %v657_v29, %v661_v30  ;;  %v410_v29 = vld [vmem:[%s5054_s15 + $0x188] sm:$0xff] }
  0x79   : > { %v789_v32 = vld [vmem:[%s5054_s15 + $0xd60] sm:$0xff]  ;;  %3174 = vmatpush1.bf16.msra.mxu0 %v4704_v34  ;;  %3217 = vmatpush1.bf16.msra.mxu1 %v4832_v35  ;;  %v414_v30 = vld [vmem:[%s5054_s15 + $0x1a8] sm:$0xff]  ;;  %v4458_v34 = vcombine.low %v418_v19, %v422_v20 }
  0x7a   : > { %v4825_v37 = vcombine.high %v785_v31, %v789_v32  ;;  %v649_v38 = vld [vmem:[%s5054_s15 + $0x900] sm:$0xff]  ;;  %3175 = vmatprep.subr.bf16.mxu0 %v4697_v36  ;;  %v4824_v44 = vcombine.low %v785_v31, %v789_v32  ;;  %v5233_v32 = vld [vmem:[%s5056_s16 + $0x18] ss:$28 sps:$4 sm:$0xff]   ;;  %v4451_v36 = vcombine.high %v410_v29, %v414_v30 }
  0x7b   : > { %v653_v39 = vld [vmem:[%s5054_s15 + $0x920] sm:$0xff] }
  0x7c   : > { %v777_v41 = vld [vmem:[%s5054_s15 + $0xd00] sm:$0xff]  ;;  %v4689_v45 = vcombine.high %v649_v38, %v653_v39  ;;  %3218 = vmatprep.subr.bf16.mxu1 %v4825_v37  ;;  %v4688_v51 = vcombine.low %v649_v38, %v653_v39  ;;  %v402_v39 = vld [vmem:[%s5054_s15 + $0x148] sm:$0xff] }
  0x7d   : > { %v781_v42 = vld [vmem:[%s5054_s15 + $0xd20] sm:$0xff]  ;;  %3176 = vmatpush1.bf16.msra.mxu0 %v4696_v43  ;;  %3219 = vmatpush1.bf16.msra.mxu1 %v4824_v44  ;;  %v4450_v43 = vcombine.low %v410_v29, %v414_v30 }
  0x7e   : > { %v4817_v46 = vcombine.high %v777_v41, %v781_v42  ;;  %v641_v47 = vld [vmem:[%s5054_s15 + $0x8c0] sm:$0xff]  ;;  %3177 = vmatprep.subr.bf16.mxu0 %v4689_v45  ;;  %v4816_v52 = vcombine.low %v777_v41, %v781_v42  ;;  %v406_v41 = vld [vmem:[%s5054_s15 + $0x168] sm:$0xff] }
  0x7f   : > { %v645_v48 = vld [vmem:[%s5054_s15 + $0x8e0] sm:$0xff]  ;;  %v4443_v45 = vcombine.high %v402_v39, %v406_v41 }
  0x80   : > { %v769_v49 = vld [vmem:[%s5054_s15 + $0xcc0] sm:$0xff]  ;;  %v4681_v53 = vcombine.high %v641_v47, %v645_v48  ;;  %3220 = vmatprep.subr.bf16.mxu1 %v4817_v46  ;;  %v4680_v59 = vcombine.low %v641_v47, %v645_v48  ;;  %v394_v48 = vld [vmem:[%s5054_s15 + $0x108] sm:$0xff] }
  0x81   : > { %v773_v50 = vld [vmem:[%s5054_s15 + $0xce0] sm:$0xff]  ;;  %3178 = vmatpush1.bf16.msra.mxu0 %v4688_v51  ;;  %3221 = vmatpush1.bf16.msra.mxu1 %v4816_v52  ;;  %v4442_v51 = vcombine.low %v402_v39, %v406_v41  ;;  %v478_v39 = vld [vmem:[%s5054_s15 + $0x3a8] sm:$0xff] }
  0x82   : > { %v4809_v54 = vcombine.high %v769_v49, %v773_v50  ;;  %v633_v55 = vld [vmem:[%s5054_s15 + $0x880] sm:$0xff]  ;;  %3179 = vmatprep.subr.bf16.mxu0 %v4681_v53  ;;  %v4808_v60 = vcombine.low %v769_v49, %v773_v50  ;;  %v398_v49 = vld [vmem:[%s5054_s15 + $0x128] sm:$0xff] }
  0x83   : > { %v637_v56 = vld [vmem:[%s5054_s15 + $0x8a0] sm:$0xff]  ;;  %v4435_v53 = vcombine.high %v394_v48, %v398_v49 }
  0x84   : > { %v761_v57 = vld [vmem:[%s5054_s15 + $0xc80] sm:$0xff]  ;;  %v4673_v61 = vcombine.high %v633_v55, %v637_v56  ;;  %3222 = vmatprep.subr.bf16.mxu1 %v4809_v54  ;;  %v4672_v5 = vcombine.low %v633_v55, %v637_v56  ;;  %v386_v56 = vld [vmem:[%s5054_s15 + $0xc8] sm:$0xff] }
  0x85   : > { %v765_v58 = vld [vmem:[%s5054_s15 + $0xca0] sm:$0xff]  ;;  %3180 = vmatpush1.bf16.msra.mxu0 %v4680_v59  ;;  %3223 = vmatpush1.bf16.msra.mxu1 %v4808_v60 }
  0x86   : > { %v4801_v62 = vcombine.high %v761_v57, %v765_v58  ;;  %v625_v63 = vld [vmem:[%s5054_s15 + $0x840] sm:$0xff]  ;;  %3181 = vmatprep.subr.bf16.mxu0 %v4673_v61  ;;  %v4800_v6 = vcombine.low %v761_v57, %v765_v58  ;;  %v390_v57 = vld [vmem:[%s5054_s15 + $0xe8] sm:$0xff]  ;;  %v4434_v58 = vcombine.low %v394_v48, %v398_v49 }
  0x87   : > { %v629_v0 = vld [vmem:[%s5054_s15 + $0x860] sm:$0xff]  ;;  %v4427_v60 = vcombine.high %v386_v56, %v390_v57  ;;  %v470_v48 = vld [vmem:[%s5054_s15 + $0x368] sm:$0xff] }
  0x88   : > { %v753_v2 = vld [vmem:[%s5054_s15 + $0xc40] sm:$0xff]  ;;  %v4665_v7 = vcombine.high %v625_v63, %v629_v0  ;;  %3224 = vmatprep.subr.bf16.mxu1 %v4801_v62  ;;  %v4664_v13 = vcombine.low %v625_v63, %v629_v0  ;;  %v378_v63 = vld [vmem:[%s5054_s15 + $0x88] sm:$0xff] }
  0x89   : > { %v757_v3 = vld [vmem:[%s5054_s15 + $0xc60] sm:$0xff]  ;;  %3182 = vmatpush1.bf16.msra.mxu0 %v4672_v5  ;;  %3225 = vmatpush1.bf16.msra.mxu1 %v4800_v6  ;;  %v382_v0 = vld [vmem:[%s5054_s15 + $0xa8] sm:$0xff] }
  0x8a   : > { %v4793_v8 = vcombine.high %v753_v2, %v757_v3  ;;  %v617_v9 = vld [vmem:[%s5054_s15 + $0x800] sm:$0xff]  ;;  %3183 = vmatprep.subr.bf16.mxu0 %v4665_v7  ;;  %v4792_v14 = vcombine.low %v753_v2, %v757_v3  ;;  %v4426_v3 = vcombine.low %v386_v56, %v390_v57  ;;  %v4419_v6 = vcombine.high %v378_v63, %v382_v0  ;;  %v462_v56 = vld [vmem:[%s5054_s15 + $0x328] sm:$0xff] }
  0x8b   : > { %v621_v10 = vld [vmem:[%s5054_s15 + $0x820] sm:$0xff] }
  0x8c   : > { %v745_v11 = vld [vmem:[%s5054_s15 + $0xc00] sm:$0xff]  ;;  %v4657_v15 = vcombine.high %v617_v9, %v621_v10  ;;  %3226 = vmatprep.subr.bf16.mxu1 %v4793_v8  ;;  %v4656_v22 = vcombine.low %v617_v9, %v621_v10  ;;  %v370_v9 = vld [vmem:[%s5054_s15 + $0x48] sm:$0xff] }
  0x8d   : > { %v749_v12 = vld [vmem:[%s5054_s15 + $0xc20] sm:$0xff]  ;;  %3184 = vmatpush1.bf16.msra.mxu0 %v4664_v13  ;;  %3227 = vmatpush1.bf16.msra.mxu1 %v4792_v14  ;;  %v374_v10 = vld [vmem:[%s5054_s15 + $0x68] sm:$0xff] }
  0x8e   : > { %v4785_v16 = vcombine.high %v745_v11, %v749_v12  ;;  %v737_v17 = vld [vmem:[%s5054_s15 + $0xbc0] sm:$0xff]  ;;  %3185 = vmatprep.subr.bf16.mxu0 %v4657_v15  ;;  %v4784_v23 = vcombine.low %v745_v11, %v749_v12  ;;  %v4418_v12 = vcombine.low %v378_v63, %v382_v0  ;;  %v4411_v14 = vcombine.high %v370_v9, %v374_v10 }
  0x8f   : > { %v741_v18 = vld [vmem:[%s5054_s15 + $0xbe0] sm:$0xff]  ;;  %v4410_v20 = vcombine.low %v370_v9, %v374_v10 }
  0x90   : > { %v4777_v25 = vcombine.high %v737_v17, %v741_v18  ;;  %3228 = vmatprep.subr.bf16.mxu1 %v4785_v16  ;;  %v729_v27 = vld [vmem:[%s5054_s15 + $0xb80] sm:$0xff]  ;;  %v4776_v31 = vcombine.low %v737_v17, %v741_v18  ;;  %v362_v17 = vld [vmem:[%s5054_s15 + $0x8] sm:$0xff] }
  0x91   : > { %v733_v28 = vld [vmem:[%s5054_s15 + $0xba0] sm:$0xff]  ;;  %3186 = vmatpush1.bf16.msra.mxu0 %v4656_v22  ;;  %3229 = vmatpush1.bf16.msra.mxu1 %v4784_v23  ;;  %v366_v18 = vld [vmem:[%s5054_s15 + $0x28] sm:$0xff] }
  0x92   : > { %3187 = vmatprep.subr.bf16.mxu0 %v4777_v25  ;;  %v4769_v35 = vcombine.high %v729_v27, %v733_v28  ;;  %3257 = vmatprep.subr.bf16.mxu1 %v4459_v26  ;;  %v721_v37 = vld [vmem:[%s5054_s15 + $0xb40] sm:$0xff]  ;;  %v4768_v42 = vcombine.low %v729_v27, %v733_v28  ;;  %v4403_v23 = vcombine.high %v362_v17, %v366_v18  ;;  %v546_v25 = vld [vmem:[%s5054_s15 + $0x5c8] sm:$0xff] }
  0x93   : > { %v725_v38 = vld [vmem:[%s5054_s15 + $0xb60] sm:$0xff]  ;;  %v550_v26 = vld [vmem:[%s5054_s15 + $0x5e8] sm:$0xff]  ;;  %v4402_v30 = vcombine.low %v362_v17, %v366_v18 }
  0x94   : > { %3247 = vmatmul.mubr.bf16.vlgmr.msra.gmra.mxu1 %v5233_v32  ;;  %v4761_v44 = vcombine.high %v721_v37, %v725_v38  ;;  %v713_v46 = vld [vmem:[%s5054_s15 + $0xb00] sm:$0xff]  ;;  %v4760_v50 = vcombine.low %v721_v37, %v725_v38  ;;  %v482_v27 = vld [vmem:[%s5054_s15 + $0x3c8] sm:$0xff]  ;;  %v4586_v41 = vcombine.low %v546_v25, %v550_v26 }
  0x95   : > { %3188 = vmatpush2.bf16.msra.mxu0 %v4776_v31  ;;  %3258 = vmatpush1.bf16.msra.mxu1 %v4458_v34  ;;  %v717_v47 = vld [vmem:[%s5054_s15 + $0xb20] sm:$0xff]  ;;  %v486_v28 = vld [vmem:[%s5054_s15 + $0x3e8] sm:$0xff]  ;;  %v4587_v31 = vcombine.high %v546_v25, %v550_v26 }
  0x96   : > { %3189 = vmatprep.subr.bf16.mxu0 %v4769_v35  ;;  %3259 = vmatprep.subr.bf16.mxu1 %v4451_v36  ;;  %v4753_v52 = vcombine.high %v713_v46, %v717_v47  ;;  %v705_v54 = vld [vmem:[%s5054_s15 + $0xac0] sm:$0xff]  ;;  %v4523_v34 = vcombine.high %v482_v27, %v486_v28  ;;  %v538_v35 = vld [vmem:[%s5054_s15 + $0x588] sm:$0xff] }
  0x97   : > { %3289 = vmatprep.mubr.bf16.mxu1 %v5138_v1  ;;  %v709_v55 = vld [vmem:[%s5054_s15 + $0xae0] sm:$0xff]  ;;  %v4752_v1 = vcombine.low %v713_v46, %v717_v47  ;;  %v542_v36 = vld [vmem:[%s5054_s15 + $0x5a8] sm:$0xff] }
  0x98   : > { %v4745_v59 = vcombine.high %v705_v54, %v709_v55  ;;  %v697_v61 = vld [vmem:[%s5054_s15 + $0xa80] sm:$0xff]  ;;  %v4744_v2 = vcombine.low %v705_v54, %v709_v55  ;;  %v474_v38 = vld [vmem:[%s5054_s15 + $0x388] sm:$0xff]  ;;  %v4578_v49 = vcombine.low %v538_v35, %v542_v36 }
  0x99   : > { %3190 = vmatpush2.bf16.msra.mxu0 %v4768_v42  ;;  %3260 = vmatpush1.bf16.msra.mxu1 %v4450_v43  ;;  %v701_v62 = vld [vmem:[%s5054_s15 + $0xaa0] sm:$0xff]  ;;  %v4522_v42 = vcombine.low %v482_v27, %v486_v28  ;;  %v4579_v43 = vcombine.high %v538_v35, %v542_v36  ;;  %v534_v46 = vld [vmem:[%s5054_s15 + $0x568] sm:$0xff] }
  0x9a   : > { %3191 = vmatprep.subr.bf16.mxu0 %v4761_v44  ;;  %3261 = vmatprep.subr.bf16.mxu1 %v4443_v45  ;;  %v4737_v5 = vcombine.high %v697_v61, %v701_v62  ;;  %v689_v7 = vld [vmem:[%s5054_s15 + $0xa40] sm:$0xff]  ;;  %v4736_v11 = vcombine.low %v697_v61, %v701_v62  ;;  %v4515_v44 = vcombine.high %v474_v38, %v478_v39  ;;  %v530_v45 = vld [vmem:[%s5054_s15 + $0x548] sm:$0xff] }
  0x9b   : > { %v693_v8 = vld [vmem:[%s5054_s15 + $0xa60] sm:$0xff]  ;;  %v466_v47 = vld [vmem:[%s5054_s15 + $0x348] sm:$0xff]  ;;  %v4570_v57 = vcombine.low %v530_v45, %v534_v46 }
  0x9c   : > { %v4729_v13 = vcombine.high %v689_v7, %v693_v8  ;;  %v681_v15 = vld [vmem:[%s5054_s15 + $0xa00] sm:$0xff]  ;;  %v4728_v19 = vcombine.low %v689_v7, %v693_v8  ;;  %v526_v54 = vld [vmem:[%s5054_s15 + $0x528] sm:$0xff] }
  0x9d   : > { %3192 = vmatpush2.bf16.msra.mxu0 %v4760_v50  ;;  %3262 = vmatpush1.bf16.msra.mxu1 %v4442_v51  ;;  %v685_v16 = vld [vmem:[%s5054_s15 + $0xa20] sm:$0xff]  ;;  %v4514_v50 = vcombine.low %v474_v38, %v478_v39  ;;  %v4571_v51 = vcombine.high %v530_v45, %v534_v46  ;;  %v458_v55 = vld [vmem:[%s5054_s15 + $0x308] sm:$0xff] }
  0x9e   : > { %3193 = vmatprep.subr.bf16.mxu0 %v4753_v52  ;;  %3263 = vmatprep.subr.bf16.mxu1 %v4435_v53  ;;  %v4721_v22 = vcombine.high %v681_v15, %v685_v16  ;;  %v4720_v29 = vcombine.low %v681_v15, %v685_v16  ;;  %v5268_v37 = vld [vmem:[%s5056_s16 + $0x10] ss:$28 sps:$4 sm:$0xff]   ;;  %v4507_v52 = vcombine.high %v466_v47, %v470_v48 }
  0x9f   : > { %v522_v53 = vld [vmem:[%s5054_s15 + $0x508] sm:$0xff]  ;;  %v4498_v0 = vcombine.low %v458_v55, %v462_v56 }
  0xa0   : > { %v450_v61 = vld [vmem:[%s5054_s15 + $0x2c8] sm:$0xff]  ;;  %v4562_v63 = vcombine.low %v522_v53, %v526_v54 }
  0xa1   : > { %3194 = vmatpush2.bf16.msra.mxu0 %v4752_v1  ;;  %3264 = vmatpush1.bf16.msra.mxu1 %v4434_v58  ;;  %v4506_v1 = vcombine.low %v466_v47, %v470_v48  ;;  %v4499_v58 = vcombine.high %v458_v55, %v462_v56  ;;  %v454_v62 = vld [vmem:[%s5054_s15 + $0x2e8] sm:$0xff] }
  0xa2   : > { %3195 = vmatprep.subr.bf16.mxu0 %v4745_v59  ;;  %3265 = vmatprep.subr.bf16.mxu1 %v4427_v60  ;;  %v514_v59 = vld [vmem:[%s5054_s15 + $0x4c8] sm:$0xff]  ;;  %v4490_v10 = vcombine.low %v450_v61, %v454_v62 }
  0xa3   : > { %v518_v60 = vld [vmem:[%s5054_s15 + $0x4e8] sm:$0xff] }
  0xa4   : > { %v442_v7 = vld [vmem:[%s5054_s15 + $0x288] sm:$0xff]  ;;  %v4554_v9 = vcombine.low %v514_v59, %v518_v60 }
  0xa5   : > { %3196 = vmatpush2.bf16.msra.mxu0 %v4744_v2  ;;  %3266 = vmatpush1.bf16.msra.mxu1 %v4426_v3  ;;  %v4555_v2 = vcombine.high %v514_v59, %v518_v60  ;;  %v4491_v3 = vcombine.high %v450_v61, %v454_v62  ;;  %v446_v8 = vld [vmem:[%s5054_s15 + $0x2a8] sm:$0xff] }
  0xa6   : > { %3197 = vmatprep.subr.bf16.mxu0 %v4737_v5  ;;  %3267 = vmatprep.subr.bf16.mxu1 %v4419_v6  ;;  %v506_v5 = vld [vmem:[%s5054_s15 + $0x488] sm:$0xff]  ;;  %v4482_v18 = vcombine.low %v442_v7, %v446_v8 }
  0xa7   : > { %v510_v6 = vld [vmem:[%s5054_s15 + $0x4a8] sm:$0xff] }
  0xa8   : > { %v434_v15 = vld [vmem:[%s5054_s15 + $0x248] sm:$0xff]  ;;  %v4546_v17 = vcombine.low %v506_v5, %v510_v6 }
  0xa9   : > { %3198 = vmatpush2.bf16.msra.mxu0 %v4736_v11  ;;  %3268 = vmatpush1.bf16.msra.mxu1 %v4418_v12  ;;  %v4547_v11 = vcombine.high %v506_v5, %v510_v6  ;;  %v4483_v12 = vcombine.high %v442_v7, %v446_v8  ;;  %v438_v16 = vld [vmem:[%s5054_s15 + $0x268] sm:$0xff] }
  0xaa   : > { %3199 = vmatprep.subr.bf16.mxu0 %v4729_v13  ;;  %3269 = vmatprep.subr.bf16.mxu1 %v4411_v14  ;;  %v498_v13 = vld [vmem:[%s5054_s15 + $0x448] sm:$0xff]  ;;  %v4474_v28 = vcombine.low %v434_v15, %v438_v16 }
  0xab   : > { %v502_v14 = vld [vmem:[%s5054_s15 + $0x468] sm:$0xff] }
  0xac   : > { %v426_v25 = vld [vmem:[%s5054_s15 + $0x208] sm:$0xff]  ;;  %v4538_v27 = vcombine.low %v498_v13, %v502_v14 }
  0xad   : > { %3200 = vmatpush2.bf16.msra.mxu0 %v4728_v19  ;;  %3270 = vmatpush1.bf16.msra.mxu1 %v4410_v20  ;;  %v4539_v19 = vcombine.high %v498_v13, %v502_v14  ;;  %v4475_v20 = vcombine.high %v434_v15, %v438_v16  ;;  %v430_v26 = vld [vmem:[%s5054_s15 + $0x228] sm:$0xff] }
  0xae   : > { %3201 = vmatprep.subr.bf16.mxu0 %v4721_v22  ;;  %3271 = vmatprep.subr.bf16.mxu1 %v4403_v23  ;;  %v490_v22 = vld [vmem:[%s5054_s15 + $0x408] sm:$0xff]  ;;  %v4466_v39 = vcombine.low %v426_v25, %v430_v26 }
  0xaf   : > { %v494_v23 = vld [vmem:[%s5054_s15 + $0x428] sm:$0xff] }
  0xb0   : > { %v674_v35 = vld [vmem:[%s5054_s15 + $0x9c8] sm:$0xff]  ;;  %v4530_v38 = vcombine.low %v490_v22, %v494_v23 }
  0xb1   : > { %3202 = vmatpush2.bf16.msra.mxu0 %v4720_v29  ;;  %3272 = vmatpush1.bf16.msra.mxu1 %v4402_v30  ;;  %v4531_v29 = vcombine.high %v490_v22, %v494_v23  ;;  %v4467_v30 = vcombine.high %v426_v25, %v430_v26  ;;  %v678_v36 = vld [vmem:[%s5054_s15 + $0x9e8] sm:$0xff] }
  0xb2   : > { %3300 = vmatprep.subr.bf16.mxu0 %v4587_v31  ;;  %3273 = vmatprep.subr.bf16.mxu1 %v4523_v34  ;;  %v610_v31 = vld [vmem:[%s5054_s15 + $0x7c8] sm:$0xff]  ;;  %v4714_v48 = vcombine.low %v674_v35, %v678_v36 }
  0xb3   : > { %v614_v34 = vld [vmem:[%s5054_s15 + $0x7e8] sm:$0xff] }
  0xb4   : > { %3204 = vmatmul.mubr.bf16.vlgmr.msra.gmra.mxu0 %v5268_v37  ;;  %v666_v45 = vld [vmem:[%s5054_s15 + $0x988] sm:$0xff]  ;;  %v4650_v47 = vcombine.low %v610_v31, %v614_v34 }
  0xb5   : > { %3301 = vmatpush1.bf16.msra.mxu0 %v4586_v41  ;;  %3332 = vmatprep.mubr.bf16.mxu0 %v5143_v4  ;;  %v4563_v4 = vcombine.high %v522_v53, %v526_v54  ;;  %v4651_v41 = vcombine.high %v610_v31, %v614_v34  ;;  %v670_v46 = vld [vmem:[%s5054_s15 + $0x9a8] sm:$0xff] }
  0xb6   : > { %3274 = vmatpush2.bf16.msra.mxu1 %v4522_v42  ;;  %3302 = vmatprep.subr.bf16.mxu0 %v4579_v43  ;;  %v4715_v42 = vcombine.high %v674_v35, %v678_v36  ;;  %v602_v43 = vld [vmem:[%s5054_s15 + $0x788] sm:$0xff]  ;;  %v4706_v56 = vcombine.low %v666_v45, %v670_v46 }
  0xb7   : > { %3275 = vmatprep.subr.bf16.mxu1 %v4515_v44  ;;  %v606_v44 = vld [vmem:[%s5054_s15 + $0x7a8] sm:$0xff] }
  0xb8   : > { %v658_v53 = vld [vmem:[%s5054_s15 + $0x948] sm:$0xff]  ;;  %v4642_v55 = vcombine.low %v602_v43, %v606_v44 }
  0xb9   : > { %3303 = vmatpush1.bf16.msra.mxu0 %v4578_v49  ;;  %v4643_v49 = vcombine.high %v602_v43, %v606_v44  ;;  %v662_v54 = vld [vmem:[%s5054_s15 + $0x968] sm:$0xff] }
  0xba   : > { %3276 = vmatpush2.bf16.msra.mxu1 %v4514_v50  ;;  %3304 = vmatprep.subr.bf16.mxu0 %v4571_v51  ;;  %v4707_v50 = vcombine.high %v666_v45, %v670_v46  ;;  %v594_v51 = vld [vmem:[%s5054_s15 + $0x748] sm:$0xff]  ;;  %v4698_v61 = vcombine.low %v658_v53, %v662_v54 }
  0xbb   : > { %3277 = vmatprep.subr.bf16.mxu1 %v4507_v52  ;;  %v598_v52 = vld [vmem:[%s5054_s15 + $0x768] sm:$0xff] }
  0xbc   : > { %v650_v59 = vld [vmem:[%s5054_s15 + $0x908] sm:$0xff] }
  0xbd   : > { %3305 = vmatpush1.bf16.msra.mxu0 %v4570_v57  ;;  %v4635_v57 = vcombine.high %v594_v51, %v598_v52  ;;  %v654_v60 = vld [vmem:[%s5054_s15 + $0x928] sm:$0xff] }
  0xbe   : > { %3278 = vmatpush2.bf16.msra.mxu1 %v4506_v1  ;;  %3306 = vmatprep.subr.bf16.mxu0 %v4563_v4  ;;  %v4699_v1 = vcombine.high %v658_v53, %v662_v54  ;;  %v586_v4 = vld [vmem:[%s5054_s15 + $0x708] sm:$0xff]  ;;  %v4690_v6 = vcombine.low %v650_v59, %v654_v60 }
  0xbf   : > { %3279 = vmatprep.subr.bf16.mxu1 %v4499_v58  ;;  %v590_v58 = vld [vmem:[%s5054_s15 + $0x728] sm:$0xff] }
  0xc0   : > { %v4627_v62 = vcombine.high %v586_v4, %v590_v58  ;;  %v646_v5 = vld [vmem:[%s5054_s15 + $0x8e8] sm:$0xff] }
  0xc1   : > { %3307 = vmatpush1.bf16.msra.mxu0 %v4562_v63  ;;  %v4691_v63 = vcombine.high %v650_v59, %v654_v60 }
  0xc2   : > { %3280 = vmatpush2.bf16.msra.mxu1 %v4498_v0  ;;  %3308 = vmatprep.subr.bf16.mxu0 %v4555_v2  ;;  %v578_v0 = vld [vmem:[%s5054_s15 + $0x6c8] sm:$0xff] }
  0xc3   : > { %3281 = vmatprep.subr.bf16.mxu1 %v4491_v3  ;;  %v582_v2 = vld [vmem:[%s5054_s15 + $0x6e8] sm:$0xff] }
  0xc4   : > { %v642_v3 = vld [vmem:[%s5054_s15 + $0x8c8] sm:$0xff]  ;;  %v4619_v7 = vcombine.high %v578_v0, %v582_v2  ;;  %v4618_v13 = vcombine.low %v578_v0, %v582_v2 }
  0xc5   : > { %3309 = vmatpush1.bf16.msra.mxu0 %v4554_v9  ;;  %v4683_v8 = vcombine.high %v642_v3, %v646_v5  ;;  %v570_v9 = vld [vmem:[%s5054_s15 + $0x688] sm:$0xff]  ;;  %v4682_v14 = vcombine.low %v642_v3, %v646_v5 }
  0xc6   : > { %3282 = vmatpush2.bf16.msra.mxu1 %v4490_v10  ;;  %3310 = vmatprep.subr.bf16.mxu0 %v4547_v11  ;;  %v574_v10 = vld [vmem:[%s5054_s15 + $0x6a8] sm:$0xff] }
  0xc7   : > { %3283 = vmatprep.subr.bf16.mxu1 %v4483_v12  ;;  %v634_v11 = vld [vmem:[%s5054_s15 + $0x888] sm:$0xff]  ;;  %v4611_v15 = vcombine.high %v570_v9, %v574_v10  ;;  %v4610_v22 = vcombine.low %v570_v9, %v574_v10 }
  0xc8   : > { %v638_v12 = vld [vmem:[%s5054_s15 + $0x8a8] sm:$0xff] }
  0xc9   : > { %3311 = vmatpush1.bf16.msra.mxu0 %v4546_v17  ;;  %v4675_v16 = vcombine.high %v634_v11, %v638_v12  ;;  %v562_v17 = vld [vmem:[%s5054_s15 + $0x648] sm:$0xff]  ;;  %v4674_v23 = vcombine.low %v634_v11, %v638_v12 }
  0xca   : > { %3284 = vmatpush2.bf16.msra.mxu1 %v4482_v18  ;;  %3312 = vmatprep.subr.bf16.mxu0 %v4539_v19  ;;  %v566_v18 = vld [vmem:[%s5054_s15 + $0x668] sm:$0xff] }
  0xcb   : > { %3285 = vmatprep.subr.bf16.mxu1 %v4475_v20  ;;  %v626_v19 = vld [vmem:[%s5054_s15 + $0x848] sm:$0xff]  ;;  %v4603_v25 = vcombine.high %v562_v17, %v566_v18  ;;  %v4602_v31 = vcombine.low %v562_v17, %v566_v18 }
  0xcc   : > { %v630_v20 = vld [vmem:[%s5054_s15 + $0x868] sm:$0xff] }
  0xcd   : > { %3313 = vmatpush1.bf16.msra.mxu0 %v4538_v27  ;;  %v4667_v26 = vcombine.high %v626_v19, %v630_v20  ;;  %v554_v27 = vld [vmem:[%s5054_s15 + $0x608] sm:$0xff]  ;;  %v4666_v34 = vcombine.low %v626_v19, %v630_v20 }
  0xce   : > { %3286 = vmatpush2.bf16.msra.mxu1 %v4474_v28  ;;  %3314 = vmatprep.subr.bf16.mxu0 %v4531_v29  ;;  %v558_v28 = vld [vmem:[%s5054_s15 + $0x628] sm:$0xff] }
  0xcf   : > { %3287 = vmatprep.subr.bf16.mxu1 %v4467_v30  ;;  %v618_v29 = vld [vmem:[%s5054_s15 + $0x808] sm:$0xff]  ;;  %v4595_v35 = vcombine.high %v554_v27, %v558_v28  ;;  %v4594_v43 = vcombine.low %v554_v27, %v558_v28 }
  0xd0   : > { %v622_v30 = vld [vmem:[%s5054_s15 + $0x828] sm:$0xff] }
  0xd1   : > { %3315 = vmatpush1.bf16.msra.mxu0 %v4530_v38  ;;  %v4659_v36 = vcombine.high %v618_v29, %v622_v30  ;;  %v802_v38 = vld [vmem:[%s5054_s15 + $0xdc8] sm:$0xff]  ;;  %v4658_v44 = vcombine.low %v618_v29, %v622_v30 }
  0xd2   : > { %3288 = vmatpush2.bf16.msra.mxu1 %v4466_v39  ;;  %3316 = vmatprep.subr.bf16.mxu0 %v4651_v41  ;;  %v806_v39 = vld [vmem:[%s5054_s15 + $0xde8] sm:$0xff] }
  0xd3   : > { %3343 = vmatprep.subr.bf16.mxu1 %v4715_v42  ;;  %v738_v41 = vld [vmem:[%s5054_s15 + $0xbc8] sm:$0xff]  ;;  %v4843_v45 = vcombine.high %v802_v38, %v806_v39 }
  0xd4   : > { %v742_v42 = vld [vmem:[%s5054_s15 + $0xbe8] sm:$0xff] }
  0xd5   : > { %3290 = vmatmul.mubr.bf16.vlgmr.msra.gmra.mxu1 %v5186_v21  ;;  %3317 = vmatpush2.bf16.msra.mxu0 %v4650_v47  ;;  %v4634_v21 = vcombine.low %v594_v51, %v598_v52  ;;  %v4779_v46 = vcombine.high %v738_v41, %v742_v42  ;;  %v794_v47 = vld [vmem:[%s5054_s15 + $0xd88] sm:$0xff]  ;;  %v4842_v51 = vcombine.low %v802_v38, %v806_v39 }
  0xd6   : > { %3344 = vmatpush1.bf16.msra.mxu1 %v4714_v48  ;;  %3318 = vmatprep.subr.bf16.mxu0 %v4643_v49  ;;  %v798_v48 = vld [vmem:[%s5054_s15 + $0xda8] sm:$0xff]  ;;  %v4778_v52 = vcombine.low %v738_v41, %v742_v42  ;;  %v419_v42 = vld [vmem:[%s5054_s15 + $0x1d0] sm:$0xff] }
  0xd7   : > { %3345 = vmatprep.subr.bf16.mxu1 %v4707_v50  ;;  %3375 = vmatprep.mubr.bf16.mxu1 %v5199_v33  ;;  %v4626_v33 = vcombine.low %v586_v4, %v590_v58  ;;  %v730_v49 = vld [vmem:[%s5054_s15 + $0xb88] sm:$0xff]  ;;  %v4835_v53 = vcombine.high %v794_v47, %v798_v48  ;;  %v4834_v4 = vcombine.low %v794_v47, %v798_v48 }
  0xd8   : > { %v734_v50 = vld [vmem:[%s5054_s15 + $0xba8] sm:$0xff] }
  0xd9   : > { %3319 = vmatpush2.bf16.msra.mxu0 %v4642_v55  ;;  %v4771_v54 = vcombine.high %v730_v49, %v734_v50  ;;  %v786_v55 = vld [vmem:[%s5054_s15 + $0xd48] sm:$0xff]  ;;  %v4770_v58 = vcombine.low %v730_v49, %v734_v50  ;;  %v411_v50 = vld [vmem:[%s5054_s15 + $0x190] sm:$0xff] }
  0xda   : > { %3346 = vmatpush1.bf16.msra.mxu1 %v4706_v56  ;;  %3320 = vmatprep.subr.bf16.mxu0 %v4635_v57  ;;  %v790_v56 = vld [vmem:[%s5054_s15 + $0xd68] sm:$0xff] }
  0xdb   : > { %3347 = vmatprep.subr.bf16.mxu1 %v4699_v1  ;;  %v722_v57 = vld [vmem:[%s5054_s15 + $0xb48] sm:$0xff]  ;;  %v4827_v59 = vcombine.high %v786_v55, %v790_v56 }
  0xdc   : > { %v726_v1 = vld [vmem:[%s5054_s15 + $0xb68] sm:$0xff] }
  0xdd   : > { %3321 = vmatpush2.bf16.msra.mxu0 %v4634_v21  ;;  %v4763_v60 = vcombine.high %v722_v57, %v726_v1  ;;  %v778_v21 = vld [vmem:[%s5054_s15 + $0xd08] sm:$0xff]  ;;  %v4762_v0 = vcombine.low %v722_v57, %v726_v1  ;;  %v403_v1 = vld [vmem:[%s5054_s15 + $0x150] sm:$0xff] }
  0xde   : > { %3348 = vmatpush1.bf16.msra.mxu1 %v4698_v61  ;;  %3322 = vmatprep.subr.bf16.mxu0 %v4627_v62  ;;  %v782_v61 = vld [vmem:[%s5054_s15 + $0xd28] sm:$0xff] }
  0xdf   : > { %3349 = vmatprep.subr.bf16.mxu1 %v4691_v63  ;;  %v714_v62 = vld [vmem:[%s5054_s15 + $0xb08] sm:$0xff]  ;;  %v4826_v63 = vcombine.low %v786_v55, %v790_v56  ;;  %v4819_v2 = vcombine.high %v778_v21, %v782_v61 }
  0xe0   : > { %v770_v5 = vld [vmem:[%s5054_s15 + $0xcc8] sm:$0xff] }
  0xe1   : > { %3323 = vmatpush2.bf16.msra.mxu0 %v4626_v33  ;;  %v774_v33 = vld [vmem:[%s5054_s15 + $0xce8] sm:$0xff] }
  0xe2   : > { %3350 = vmatpush1.bf16.msra.mxu1 %v4690_v6  ;;  %3324 = vmatprep.subr.bf16.mxu0 %v4619_v7  ;;  %v706_v6 = vld [vmem:[%s5054_s15 + $0xac8] sm:$0xff]  ;;  %v4811_v10 = vcombine.high %v770_v5, %v774_v33 }
  0xe3   : > { %3351 = vmatprep.subr.bf16.mxu1 %v4683_v8  ;;  %v710_v7 = vld [vmem:[%s5054_s15 + $0xae8] sm:$0xff]  ;;  %v4818_v8 = vcombine.low %v778_v21, %v782_v61 }
  0xe4   : > { %v4747_v11 = vcombine.high %v706_v6, %v710_v7  ;;  %v762_v12 = vld [vmem:[%s5054_s15 + $0xc88] sm:$0xff]  ;;  %v4746_v17 = vcombine.low %v706_v6, %v710_v7  ;;  %v387_v7 = vld [vmem:[%s5054_s15 + $0xd0] sm:$0xff] }
  0xe5   : > { %3325 = vmatpush2.bf16.msra.mxu0 %v4618_v13  ;;  %v766_v13 = vld [vmem:[%s5054_s15 + $0xca8] sm:$0xff] }
  0xe6   : > { %3352 = vmatpush1.bf16.msra.mxu1 %v4682_v14  ;;  %3326 = vmatprep.subr.bf16.mxu0 %v4611_v15  ;;  %v698_v14 = vld [vmem:[%s5054_s15 + $0xa88] sm:$0xff]  ;;  %v4803_v18 = vcombine.high %v762_v12, %v766_v13 }
  0xe7   : > { %3353 = vmatprep.subr.bf16.mxu1 %v4675_v16  ;;  %v702_v15 = vld [vmem:[%s5054_s15 + $0xaa8] sm:$0xff]  ;;  %v4810_v16 = vcombine.low %v770_v5, %v774_v33 }
  0xe8   : > { %v4739_v19 = vcombine.high %v698_v14, %v702_v15  ;;  %v754_v20 = vld [vmem:[%s5054_s15 + $0xc48] sm:$0xff]  ;;  %v4738_v27 = vcombine.low %v698_v14, %v702_v15  ;;  %v379_v15 = vld [vmem:[%s5054_s15 + $0x90] sm:$0xff] }
  0xe9   : > { %3327 = vmatpush2.bf16.msra.mxu0 %v4610_v22  ;;  %v758_v22 = vld [vmem:[%s5054_s15 + $0xc68] sm:$0xff] }
  0xea   : > { %3354 = vmatpush1.bf16.msra.mxu1 %v4674_v23  ;;  %3328 = vmatprep.subr.bf16.mxu0 %v4603_v25  ;;  %v690_v23 = vld [vmem:[%s5054_s15 + $0xa48] sm:$0xff]  ;;  %v4795_v28 = vcombine.high %v754_v20, %v758_v22 }
  0xeb   : > { %3355 = vmatprep.subr.bf16.mxu1 %v4667_v26  ;;  %v694_v25 = vld [vmem:[%s5054_s15 + $0xa68] sm:$0xff]  ;;  %v4802_v26 = vcombine.low %v762_v12, %v766_v13 }
  0xec   : > { %v4731_v29 = vcombine.high %v690_v23, %v694_v25  ;;  %v746_v30 = vld [vmem:[%s5054_s15 + $0xc08] sm:$0xff]  ;;  %v4730_v38 = vcombine.low %v690_v23, %v694_v25  ;;  %v371_v25 = vld [vmem:[%s5054_s15 + $0x50] sm:$0xff] }
  0xed   : > { %3329 = vmatpush2.bf16.msra.mxu0 %v4602_v31  ;;  %v750_v31 = vld [vmem:[%s5054_s15 + $0xc28] sm:$0xff] }
  0xee   : > { %3356 = vmatpush1.bf16.msra.mxu1 %v4666_v34  ;;  %3330 = vmatprep.subr.bf16.mxu0 %v4595_v35  ;;  %v682_v34 = vld [vmem:[%s5054_s15 + $0xa08] sm:$0xff]  ;;  %v4787_v39 = vcombine.high %v746_v30, %v750_v31 }
  0xef   : > { %3357 = vmatprep.subr.bf16.mxu1 %v4659_v36  ;;  %v686_v35 = vld [vmem:[%s5054_s15 + $0xa28] sm:$0xff]  ;;  %v4794_v36 = vcombine.low %v754_v20, %v758_v22 }
  0xf0   : > { %v4723_v41 = vcombine.high %v682_v34, %v686_v35  ;;  %v4722_v47 = vcombine.low %v682_v34, %v686_v35  ;;  %v363_v35 = vld [vmem:[%s5054_s15 + $0x10] sm:$0xff] }
  0xf1   : > { %3331 = vmatpush2.bf16.msra.mxu0 %v4594_v43  ;;  %v423_v43 = vld [vmem:[%s5054_s15 + $0x1f0] sm:$0xff] }
  0xf2   : > { %3358 = vmatpush1.bf16.msra.mxu1 %v4658_v44  ;;  %3386 = vmatprep.subr.bf16.mxu0 %v4843_v45  ;;  %v547_v44 = vld [vmem:[%s5054_s15 + $0x5d0] sm:$0xff]  ;;  %v4461_v48 = vcombine.high %v419_v42, %v423_v43 }
  0xf3   : > { %3359 = vmatprep.subr.bf16.mxu1 %v4779_v46  ;;  %v551_v45 = vld [vmem:[%s5054_s15 + $0x5f0] sm:$0xff]  ;;  %v4786_v46 = vcombine.low %v746_v30, %v750_v31 }
  0xf4   : > { %3333 = vmatmul.mubr.bf16.vlgmr.msra.gmra.mxu0 %v5191_v24  ;;  %v718_v24 = vld [vmem:[%s5054_s15 + $0xb28] sm:$0xff]  ;;  %v4589_v49 = vcombine.high %v547_v44, %v551_v45  ;;  %v4588_v55 = vcombine.low %v547_v44, %v551_v45  ;;  %v483_v45 = vld [vmem:[%s5054_s15 + $0x3d0] sm:$0xff] }
  0xf5   : > { %3387 = vmatpush1.bf16.msra.mxu0 %v4842_v51  ;;  %3418 = vmatprep.mubr.bf16.mxu0 %v4973_v40  ;;  %v4755_v3 = vcombine.high %v714_v62, %v718_v24  ;;  %v4754_v9 = vcombine.low %v714_v62, %v718_v24  ;;  %v415_v51 = vld [vmem:[%s5054_s15 + $0x1b0] sm:$0xff] }
  0xf6   : > { %3360 = vmatpush2.bf16.msra.mxu1 %v4778_v52  ;;  %3388 = vmatprep.subr.bf16.mxu0 %v4835_v53  ;;  %v539_v52 = vld [vmem:[%s5054_s15 + $0x590] sm:$0xff]  ;;  %v4453_v56 = vcombine.high %v411_v50, %v415_v51 }
  0xf7   : > { %3361 = vmatprep.subr.bf16.mxu1 %v4771_v54  ;;  %v543_v53 = vld [vmem:[%s5054_s15 + $0x5b0] sm:$0xff]  ;;  %v4460_v54 = vcombine.low %v419_v42, %v423_v43 }
  0xf8   : > { %v4581_v57 = vcombine.high %v539_v52, %v543_v53  ;;  %v4580_v21 = vcombine.low %v539_v52, %v543_v53  ;;  %v395_v24 = vld [vmem:[%s5054_s15 + $0x110] sm:$0xff] }
  0xf9   : > { %3389 = vmatpush1.bf16.msra.mxu0 %v4834_v4  ;;  %v407_v4 = vld [vmem:[%s5054_s15 + $0x170] sm:$0xff] }
  0xfa   : > { %3362 = vmatpush2.bf16.msra.mxu1 %v4770_v58  ;;  %3390 = vmatprep.subr.bf16.mxu0 %v4827_v59  ;;  %v531_v58 = vld [vmem:[%s5054_s15 + $0x550] sm:$0xff]  ;;  %v4445_v61 = vcombine.high %v403_v1, %v407_v4 }
  0xfb   : > { %3363 = vmatprep.subr.bf16.mxu1 %v4763_v60  ;;  %v535_v59 = vld [vmem:[%s5054_s15 + $0x570] sm:$0xff]  ;;  %v4452_v60 = vcombine.low %v411_v50, %v415_v51 }
  0xfc   : > { %v4573_v62 = vcombine.high %v531_v58, %v535_v59  ;;  %v4572_v5 = vcombine.low %v531_v58, %v535_v59  ;;  %v475_v53 = vld [vmem:[%s5054_s15 + $0x390] sm:$0xff] }
  0xfd   : > { %3391 = vmatpush1.bf16.msra.mxu0 %v4826_v63  ;;  %v399_v63 = vld [vmem:[%s5054_s15 + $0x130] sm:$0xff] }
  0xfe   : > { %3364 = vmatpush2.bf16.msra.mxu1 %v4762_v0  ;;  %3392 = vmatprep.subr.bf16.mxu0 %v4819_v2  ;;  %v523_v0 = vld [vmem:[%s5054_s15 + $0x510] sm:$0xff]  ;;  %v5389_v2 = vld [vmem:[%s5056_s16 + $0xc] ss:$28 sps:$4 sm:$0xff]   ;;  %v4437_v33 = vcombine.high %v395_v24, %v399_v63 }
  0xff   : > { %3365 = vmatprep.subr.bf16.mxu1 %v4755_v3  ;;  %v4444_v3 = vcombine.low %v403_v1, %v407_v4  ;;  %v467_v59 = vld [vmem:[%s5054_s15 + $0x350] sm:$0xff] }
 0x101   : > { %3393 = vmatpush1.bf16.msra.mxu0 %v4818_v8  ;;  %v391_v8 = vld [vmem:[%s5054_s15 + $0xf0] sm:$0xff] }
 0x102   : > { %3366 = vmatpush2.bf16.msra.mxu1 %v4754_v9  ;;  %3394 = vmatprep.subr.bf16.mxu0 %v4811_v10  ;;  %v515_v9 = vld [vmem:[%s5054_s15 + $0x4d0] sm:$0xff]  ;;  %v4429_v13 = vcombine.high %v387_v7, %v391_v8 }
 0x103   : > { %3367 = vmatprep.subr.bf16.mxu1 %v4747_v11  ;;  %v519_v10 = vld [vmem:[%s5054_s15 + $0x4f0] sm:$0xff]  ;;  %v4436_v11 = vcombine.low %v395_v24, %v399_v63 }
 0x104   : > { %v4557_v14 = vcombine.high %v515_v9, %v519_v10  ;;  %v4556_v20 = vcombine.low %v515_v9, %v519_v10  ;;  %v451_v10 = vld [vmem:[%s5054_s15 + $0x2d0] sm:$0xff] }
 0x105   : > { %3395 = vmatpush1.bf16.msra.mxu0 %v4810_v16  ;;  %v383_v16 = vld [vmem:[%s5054_s15 + $0xb0] sm:$0xff] }
 0x106   : > { %3368 = vmatpush2.bf16.msra.mxu1 %v4746_v17  ;;  %3396 = vmatprep.subr.bf16.mxu0 %v4803_v18  ;;  %v507_v17 = vld [vmem:[%s5054_s15 + $0x490] sm:$0xff]  ;;  %v4421_v22 = vcombine.high %v379_v15, %v383_v16 }
 0x107   : > { %3369 = vmatprep.subr.bf16.mxu1 %v4739_v19  ;;  %v511_v18 = vld [vmem:[%s5054_s15 + $0x4b0] sm:$0xff]  ;;  %v4428_v19 = vcombine.low %v387_v7, %v391_v8 }
 0x108   : > { %v4549_v23 = vcombine.high %v507_v17, %v511_v18  ;;  %v4548_v30 = vcombine.low %v507_v17, %v511_v18  ;;  %v443_v18 = vld [vmem:[%s5054_s15 + $0x290] sm:$0xff] }
 0x109   : > { %3397 = vmatpush1.bf16.msra.mxu0 %v4802_v26  ;;  %v375_v26 = vld [vmem:[%s5054_s15 + $0x70] sm:$0xff] }
 0x10a   : > { %3370 = vmatpush2.bf16.msra.mxu1 %v4738_v27  ;;  %3398 = vmatprep.subr.bf16.mxu0 %v4795_v28  ;;  %v499_v27 = vld [vmem:[%s5054_s15 + $0x450] sm:$0xff]  ;;  %v4413_v31 = vcombine.high %v371_v25, %v375_v26 }
 0x10b   : > { %3371 = vmatprep.subr.bf16.mxu1 %v4731_v29  ;;  %v503_v28 = vld [vmem:[%s5054_s15 + $0x470] sm:$0xff]  ;;  %v4420_v29 = vcombine.low %v379_v15, %v383_v16 }
 0x10c   : > { %v4541_v34 = vcombine.high %v499_v27, %v503_v28  ;;  %v4540_v42 = vcombine.low %v499_v27, %v503_v28  ;;  %v435_v28 = vld [vmem:[%s5054_s15 + $0x250] sm:$0xff] }
 0x10d   : > { %3399 = vmatpush1.bf16.msra.mxu0 %v4794_v36  ;;  %v367_v36 = vld [vmem:[%s5054_s15 + $0x30] sm:$0xff] }
 0x10e   : > { %3372 = vmatpush2.bf16.msra.mxu1 %v4730_v38  ;;  %3400 = vmatprep.subr.bf16.mxu0 %v4787_v39  ;;  %v491_v38 = vld [vmem:[%s5054_s15 + $0x410] sm:$0xff]  ;;  %v4405_v43 = vcombine.high %v363_v35, %v367_v36 }
 0x10f   : > { %3373 = vmatprep.subr.bf16.mxu1 %v4723_v41  ;;  %v495_v39 = vld [vmem:[%s5054_s15 + $0x430] sm:$0xff]  ;;  %v4412_v41 = vcombine.low %v371_v25, %v375_v26 }
 0x110   : > { %v4533_v44 = vcombine.high %v491_v38, %v495_v39  ;;  %v4532_v50 = vcombine.low %v491_v38, %v495_v39  ;;  %v427_v39 = vld [vmem:[%s5054_s15 + $0x210] sm:$0xff] }
 0x111   : > { %3401 = vmatpush1.bf16.msra.mxu0 %v4786_v46  ;;  %v487_v46 = vld [vmem:[%s5054_s15 + $0x3f0] sm:$0xff] }
 0x112   : > { %3374 = vmatpush2.bf16.msra.mxu1 %v4722_v47  ;;  %3429 = vmatprep.subr.bf16.mxu0 %v4461_v48  ;;  %v611_v47 = vld [vmem:[%s5054_s15 + $0x7d0] sm:$0xff]  ;;  %v4525_v51 = vcombine.high %v483_v45, %v487_v46 }
 0x113   : > { %3472 = vmatprep.subr.bf16.mxu1 %v4589_v49  ;;  %v615_v48 = vld [vmem:[%s5054_s15 + $0x7f0] sm:$0xff]  ;;  %v4404_v49 = vcombine.low %v363_v35, %v367_v36 }
 0x114   : > { %3419 = vmatmul.mubr.bf16.vlgmr.msra.gmra.mxu0 %v5233_v32  ;;  %v5383_v32 = vld [vmem:[%s5056_s16 + $0x4] ss:$28 sps:$4 sm:$0xff]   ;;  %v4653_v52 = vcombine.high %v611_v47, %v615_v48  ;;  %v4652_v1 = vcombine.low %v611_v47, %v615_v48  ;;  %v675_v48 = vld [vmem:[%s5054_s15 + $0x9d0] sm:$0xff] }
 0x115   : > { %3376 = vmatmul.mubr.bf16.vlgmr.msra.gmra.mxu1 %v5268_v37  ;;  %3430 = vmatpush1.bf16.msra.mxu0 %v4460_v54  ;;  %v527_v37 = vld [vmem:[%s5054_s15 + $0x530] sm:$0xff] }
 0x116   : > { %3473 = vmatpush1.bf16.msra.mxu1 %v4588_v55  ;;  %3431 = vmatprep.subr.bf16.mxu0 %v4453_v56  ;;  %v4565_v6 = vcombine.high %v523_v0, %v527_v37  ;;  %v4564_v12 = vcombine.low %v523_v0, %v527_v37  ;;  %v479_v54 = vld [vmem:[%s5054_s15 + $0x3b0] sm:$0xff] }
 0x117   : > { %3474 = vmatprep.subr.bf16.mxu1 %v4581_v57  ;;  %3461 = vmatprep.mubr.bf16.mxu0 %v5383_v32  ;;  %v603_v55 = vld [vmem:[%s5054_s15 + $0x790] sm:$0xff]  ;;  %v4524_v57 = vcombine.low %v483_v45, %v487_v46  ;;  %v4517_v4 = vcombine.high %v475_v53, %v479_v54 }
 0x118   : > { %3504 = vmatprep.mubr.bf16.mxu1 %v5389_v2  ;;  %v607_v56 = vld [vmem:[%s5054_s15 + $0x7b0] sm:$0xff] }
 0x119   : > { %3432 = vmatpush1.bf16.msra.mxu0 %v4452_v60  ;;  %v4645_v58 = vcombine.high %v603_v55, %v607_v56  ;;  %v471_v60 = vld [vmem:[%s5054_s15 + $0x370] sm:$0xff]  ;;  %v4644_v24 = vcombine.low %v603_v55, %v607_v56 }
 0x11a   : > { %3475 = vmatpush1.bf16.msra.mxu1 %v4580_v21  ;;  %3433 = vmatprep.subr.bf16.mxu0 %v4445_v61  ;;  %v595_v21 = vld [vmem:[%s5054_s15 + $0x750] sm:$0xff]  ;;  %v4509_v63 = vcombine.high %v467_v59, %v471_v60 }
 0x11b   : > { %3476 = vmatprep.subr.bf16.mxu1 %v4573_v62  ;;  %v599_v61 = vld [vmem:[%s5054_s15 + $0x770] sm:$0xff]  ;;  %v4516_v62 = vcombine.low %v475_v53, %v479_v54 }
 0x11c   : > { %v4637_v0 = vcombine.high %v595_v21, %v599_v61  ;;  %v459_v37 = vld [vmem:[%s5054_s15 + $0x310] sm:$0xff]  ;;  %v4636_v7 = vcombine.low %v595_v21, %v599_v61 }
 0x11d   : > { %3434 = vmatpush1.bf16.msra.mxu0 %v4444_v3  ;;  %v463_v3 = vld [vmem:[%s5054_s15 + $0x330] sm:$0xff] }
 0x11e   : > { %3477 = vmatpush1.bf16.msra.mxu1 %v4572_v5  ;;  %3435 = vmatprep.subr.bf16.mxu0 %v4437_v33  ;;  %v587_v5 = vld [vmem:[%s5054_s15 + $0x710] sm:$0xff]  ;;  %v4501_v8 = vcombine.high %v459_v37, %v463_v3 }
 0x11f   : > { %3478 = vmatprep.subr.bf16.mxu1 %v4565_v6  ;;  %v591_v33 = vld [vmem:[%s5054_s15 + $0x730] sm:$0xff]  ;;  %v4508_v6 = vcombine.low %v467_v59, %v471_v60 }
 0x120   : > { %v4629_v9 = vcombine.high %v587_v5, %v591_v33  ;;  %v4628_v15 = vcombine.low %v587_v5, %v591_v33  ;;  %v667_v56 = vld [vmem:[%s5054_s15 + $0x990] sm:$0xff] }
 0x121   : > { %3436 = vmatpush1.bf16.msra.mxu0 %v4436_v11  ;;  %v455_v11 = vld [vmem:[%s5054_s15 + $0x2f0] sm:$0xff] }
 0x122   : > { %3479 = vmatpush1.bf16.msra.mxu1 %v4564_v12  ;;  %3437 = vmatprep.subr.bf16.mxu0 %v4429_v13  ;;  %v579_v12 = vld [vmem:[%s5054_s15 + $0x6d0] sm:$0xff]  ;;  %v4493_v16 = vcombine.high %v451_v10, %v455_v11 }
 0x123   : > { %3480 = vmatprep.subr.bf16.mxu1 %v4557_v14  ;;  %v583_v13 = vld [vmem:[%s5054_s15 + $0x6f0] sm:$0xff]  ;;  %v4500_v14 = vcombine.low %v459_v37, %v463_v3  ;;  %v5457_v37 = vld [vmem:[%s5056_s16 + $0x8] ss:$28 sps:$4 sm:$0xff]  }
 0x124   : > { %v4621_v17 = vcombine.high %v579_v12, %v583_v13  ;;  %v4620_v25 = vcombine.low %v579_v12, %v583_v13  ;;  %v659_v61 = vld [vmem:[%s5054_s15 + $0x950] sm:$0xff] }
 0x125   : > { %3438 = vmatpush1.bf16.msra.mxu0 %v4428_v19  ;;  %v447_v19 = vld [vmem:[%s5054_s15 + $0x2b0] sm:$0xff] }
 0x126   : > { %3481 = vmatpush1.bf16.msra.mxu1 %v4556_v20  ;;  %3439 = vmatprep.subr.bf16.mxu0 %v4421_v22  ;;  %v571_v20 = vld [vmem:[%s5054_s15 + $0x690] sm:$0xff]  ;;  %v4485_v26 = vcombine.high %v443_v18, %v447_v19 }
 0x127   : > { %3482 = vmatprep.subr.bf16.mxu1 %v4549_v23  ;;  %v575_v22 = vld [vmem:[%s5054_s15 + $0x6b0] sm:$0xff]  ;;  %v4492_v23 = vcombine.low %v451_v10, %v455_v11 }
 0x128   : > { %v4613_v27 = vcombine.high %v571_v20, %v575_v22  ;;  %v4612_v35 = vcombine.low %v571_v20, %v575_v22  ;;  %v783_v10 = vld [vmem:[%s5054_s15 + $0xd30] sm:$0xff] }
 0x129   : > { %3440 = vmatpush1.bf16.msra.mxu0 %v4420_v29  ;;  %v439_v29 = vld [vmem:[%s5054_s15 + $0x270] sm:$0xff] }
 0x12a   : > { %3483 = vmatpush1.bf16.msra.mxu1 %v4548_v30  ;;  %3441 = vmatprep.subr.bf16.mxu0 %v4413_v31  ;;  %v563_v30 = vld [vmem:[%s5054_s15 + $0x650] sm:$0xff]  ;;  %v4477_v36 = vcombine.high %v435_v28, %v439_v29 }
 0x12b   : > { %3484 = vmatprep.subr.bf16.mxu1 %v4541_v34  ;;  %v567_v31 = vld [vmem:[%s5054_s15 + $0x670] sm:$0xff]  ;;  %v4484_v34 = vcombine.low %v443_v18, %v447_v19 }
 0x12c   : > { %v4605_v38 = vcombine.high %v563_v30, %v567_v31  ;;  %v4604_v45 = vcombine.low %v563_v30, %v567_v31  ;;  %v5466_v11 = vld [vmem:[%s5056_s16 + $0x14] ss:$28 sps:$4 sm:$0xff]  }
 0x12d   : > { %3442 = vmatpush1.bf16.msra.mxu0 %v4412_v41  ;;  %v431_v41 = vld [vmem:[%s5054_s15 + $0x230] sm:$0xff] }
 0x12e   : > { %3485 = vmatpush1.bf16.msra.mxu1 %v4540_v42  ;;  %3443 = vmatprep.subr.bf16.mxu0 %v4405_v43  ;;  %v555_v42 = vld [vmem:[%s5054_s15 + $0x610] sm:$0xff]  ;;  %v4469_v46 = vcombine.high %v427_v39, %v431_v41 }
 0x12f   : > { %3486 = vmatprep.subr.bf16.mxu1 %v4533_v44  ;;  %v559_v43 = vld [vmem:[%s5054_s15 + $0x630] sm:$0xff]  ;;  %v4476_v44 = vcombine.low %v435_v28, %v439_v29 }
 0x130   : > { %v4597_v47 = vcombine.high %v555_v42, %v559_v43  ;;  %v4596_v53 = vcombine.low %v555_v42, %v559_v43  ;;  %v771_v18 = vld [vmem:[%s5054_s15 + $0xcd0] sm:$0xff] }
 0x131   : > { %3444 = vmatpush1.bf16.msra.mxu0 %v4404_v49  ;;  %v679_v49 = vld [vmem:[%s5054_s15 + $0x9f0] sm:$0xff] }
 0x132   : > { %3487 = vmatpush1.bf16.msra.mxu1 %v4532_v50  ;;  %3445 = vmatprep.subr.bf16.mxu0 %v4525_v51  ;;  %v803_v50 = vld [vmem:[%s5054_s15 + $0xdd0] sm:$0xff]  ;;  %v4717_v54 = vcombine.high %v675_v48, %v679_v49 }
 0x133   : > { %3488 = vmatprep.subr.bf16.mxu1 %v4653_v52  ;;  %v807_v51 = vld [vmem:[%s5054_s15 + $0xdf0] sm:$0xff]  ;;  %v4468_v52 = vcombine.low %v427_v39, %v431_v41 }
 0x134   : > { %v4845_v55 = vcombine.high %v803_v50, %v807_v51  ;;  %v4844_v59 = vcombine.low %v803_v50, %v807_v51  ;;  %v775_v19 = vld [vmem:[%s5054_s15 + $0xcf0] sm:$0xff]  ;;  %v3162_v31 = vpop.f32.mrf.mxu1 }
 0x135   : > { %3446 = vmatpush2.bf16.msra.mxu0 %v4524_v57  ;;  %v671_v57 = vld [vmem:[%s5054_s15 + $0x9b0] sm:$0xff] }
 0x136   : > { %3489 = vmatpush2.bf16.msra.mxu1 %v4652_v1  ;;  %3447 = vmatprep.subr.bf16.mxu0 %v4517_v4  ;;  %v795_v1 = vld [vmem:[%s5054_s15 + $0xd90] sm:$0xff]  ;;  %v4709_v60 = vcombine.high %v667_v56, %v671_v57  ;;  %v4708_v3 = vcombine.low %v667_v56, %v671_v57 }
 0x137   : > { %3490 = vmatprep.subr.bf16.mxu1 %v4645_v58  ;;  %v799_v4 = vld [vmem:[%s5054_s15 + $0xdb0] sm:$0xff]  ;;  %v4716_v58 = vcombine.low %v675_v48, %v679_v49 }
 0x138   : > { %v4837_v21 = vcombine.high %v795_v1, %v799_v4  ;;  %v4836_v5 = vcombine.low %v795_v1, %v799_v4  ;;  %v763_v28 = vld [vmem:[%s5054_s15 + $0xc90] sm:$0xff] }
 0x139   : > { %3448 = vmatpush2.bf16.msra.mxu0 %v4516_v62  ;;  %v663_v62 = vld [vmem:[%s5054_s15 + $0x970] sm:$0xff] }
 0x13a   : > { %3491 = vmatpush2.bf16.msra.mxu1 %v4644_v24  ;;  %3449 = vmatprep.subr.bf16.mxu0 %v4509_v63  ;;  %v5451_v24 = vld [vmem:[%s5056_s16] ss:$28 sps:$4 sm:$0xff]   ;;  %v4701_v33 = vcombine.high %v659_v61, %v663_v62  ;;  %v4700_v12 = vcombine.low %v659_v61, %v663_v62 }
 0x13b   : > { %3492 = vmatprep.subr.bf16.mxu1 %v4637_v0  ;;  %v787_v63 = vld [vmem:[%s5054_s15 + $0xd50] sm:$0xff] }
 0x13c   : > { %v791_v0 = vld [vmem:[%s5054_s15 + $0xd70] sm:$0xff] }
 0x13d   : > { %3450 = vmatpush2.bf16.msra.mxu0 %v4508_v6  ;;  %v4829_v6 = vcombine.high %v787_v63, %v791_v0  ;;  %v4828_v13 = vcombine.low %v787_v63, %v791_v0  ;;  %v767_v29 = vld [vmem:[%s5054_s15 + $0xcb0] sm:$0xff] }
 0x13e   : > { %3493 = vmatpush2.bf16.msra.mxu1 %v4636_v7  ;;  %3451 = vmatprep.subr.bf16.mxu0 %v4501_v8  ;;  %v651_v7 = vld [vmem:[%s5054_s15 + $0x910] sm:$0xff] }
 0x13f   : > { %3494 = vmatprep.subr.bf16.mxu1 %v4629_v9  ;;  %v655_v8 = vld [vmem:[%s5054_s15 + $0x930] sm:$0xff] }
 0x140   : > { %v779_v9 = vld [vmem:[%s5054_s15 + $0xd10] sm:$0xff]  ;;  %v4692_v20 = vcombine.low %v651_v7, %v655_v8 }
 0x141   : > { %3452 = vmatpush2.bf16.msra.mxu0 %v4500_v14  ;;  %v4693_v14 = vcombine.high %v651_v7, %v655_v8  ;;  %v4820_v22 = vcombine.low %v779_v9, %v783_v10  ;;  %v631_v39 = vld [vmem:[%s5054_s15 + $0x870] sm:$0xff]  ;;  %v412_v7 = vld [vmem:[%s5054_s15 + $0x198] sm:$0xff] }
 0x142   : > { %3495 = vmatpush2.bf16.msra.mxu1 %v4628_v15  ;;  %3453 = vmatprep.subr.bf16.mxu0 %v4493_v16  ;;  %v4821_v15 = vcombine.high %v779_v9, %v783_v10  ;;  %v643_v16 = vld [vmem:[%s5054_s15 + $0x8d0] sm:$0xff]  ;;  %v416_v8 = vld [vmem:[%s5054_s15 + $0x1b8] sm:$0xff] }
 0x143   : > { %3496 = vmatprep.subr.bf16.mxu1 %v4621_v17  ;;  %v647_v17 = vld [vmem:[%s5054_s15 + $0x8f0] sm:$0xff] }
 0x144   : > { %v4684_v30 = vcombine.low %v643_v16, %v647_v17  ;;  %v755_v41 = vld [vmem:[%s5054_s15 + $0xc50] sm:$0xff] }
 0x145   : > { %3454 = vmatpush2.bf16.msra.mxu0 %v4492_v23  ;;  %v4685_v23 = vcombine.high %v643_v16, %v647_v17  ;;  %v759_v42 = vld [vmem:[%s5054_s15 + $0xc70] sm:$0xff]  ;;  %v4455_v16 = vcombine.high %v412_v7, %v416_v8 }
 0x146   : > { %3497 = vmatpush2.bf16.msra.mxu1 %v4620_v25  ;;  %3455 = vmatprep.subr.bf16.mxu0 %v4485_v26  ;;  %v4813_v25 = vcombine.high %v771_v18, %v775_v19  ;;  %v635_v26 = vld [vmem:[%s5054_s15 + $0x890] sm:$0xff]  ;;  %v4797_v48 = vcombine.high %v755_v41, %v759_v42  ;;  %v4796_v56 = vcombine.low %v755_v41, %v759_v42 }
 0x147   : > { %3498 = vmatprep.subr.bf16.mxu1 %v4613_v27  ;;  %v639_v27 = vld [vmem:[%s5054_s15 + $0x8b0] sm:$0xff] }
 0x148   : > { %v4676_v43 = vcombine.low %v635_v26, %v639_v27  ;;  %v619_v49 = vld [vmem:[%s5054_s15 + $0x810] sm:$0xff] }
 0x149   : > { %3456 = vmatpush2.bf16.msra.mxu0 %v4484_v34  ;;  %v4812_v34 = vcombine.low %v771_v18, %v775_v19  ;;  %v623_v50 = vld [vmem:[%s5054_s15 + $0x830] sm:$0xff]  ;;  %v404_v18 = vld [vmem:[%s5054_s15 + $0x158] sm:$0xff] }
 0x14a   : > { %3499 = vmatpush2.bf16.msra.mxu1 %v4612_v35  ;;  %3457 = vmatprep.subr.bf16.mxu0 %v4477_v36  ;;  %v4677_v35 = vcombine.high %v635_v26, %v639_v27  ;;  %v4805_v36 = vcombine.high %v763_v28, %v767_v29  ;;  %v747_v51 = vld [vmem:[%s5054_s15 + $0xc10] sm:$0xff]  ;;  %v4661_v57 = vcombine.high %v619_v49, %v623_v50  ;;  %v408_v19 = vld [vmem:[%s5054_s15 + $0x178] sm:$0xff] }
 0x14b   : > { %3500 = vmatprep.subr.bf16.mxu1 %v4605_v38  ;;  %v627_v38 = vld [vmem:[%s5054_s15 + $0x850] sm:$0xff] }
 0x14c   : > { %v739_v4 = vld [vmem:[%s5054_s15 + $0xbd0] sm:$0xff] }
 0x14d   : > { %3458 = vmatpush2.bf16.msra.mxu0 %v4476_v44  ;;  %v3119_v44 = vpop.f32.mrf.mxu0  ;;  %v727_v17 = vld [vmem:[%s5054_s15 + $0xb70] sm:$0xff] }
 0x14e   : > { %3501 = vmatpush2.bf16.msra.mxu1 %v4604_v45  ;;  %3459 = vmatprep.subr.bf16.mxu0 %v4469_v46  ;;  %v3164_v45 = vpop.f32.mrf.mxu1  ;;  %v4804_v46 = vcombine.low %v763_v28, %v767_v29  ;;  %v5498_v26 = vld [vmem:[%s5056_s16 + $0x18] ss:$28 sps:$4 sm:$0xff]   ;;  %v337_v28 = vld [vmem:[%s6147_s5] sm:$0xff] }
 0x14f   : > { %3502 = vmatprep.subr.bf16.mxu1 %v4597_v47  ;;  %v4669_v47 = vcombine.high %v627_v38, %v631_v39  ;;  %v719_v41 = vld [vmem:[%s5054_s15 + $0xb30] sm:$0xff] }
 0x151   : > { %3460 = vmatpush2.bf16.msra.mxu0 %v4468_v52  ;;  %v751_v52 = vld [vmem:[%s5054_s15 + $0xc30] sm:$0xff] }
 0x152   : > { %3503 = vmatpush2.bf16.msra.mxu1 %v4596_v53  ;;  %3515 = vmatprep.subr.bf16.mxu0 %v4717_v54  ;;  %v4668_v53 = vcombine.low %v627_v38, %v631_v39  ;;  %v3121_v54 = vpop.f32.mrf.mxu0  ;;  %v4789_v1 = vcombine.high %v747_v51, %v751_v52  ;;  %v4788_v63 = vcombine.low %v747_v51, %v751_v52  ;;  %v715_v39 = vld [vmem:[%s5054_s15 + $0xb10] sm:$0xff] }
 0x153   : > { %3558 = vmatprep.subr.bf16.mxu1 %v4845_v55  ;;  %v3166_v55 = vpop.f32.mrf.mxu1 }
 0x154   : > { %3462 = vmatmul.mubr.bf16.vlgmr.msra.gmra.mxu0 %v5451_v24  ;;  %v3123_v61 = vpop.f32.mrf.mxu0 }
 0x155   : > { %3505 = vmatmul.mubr.bf16.vlgmr.msra.gmra.mxu1 %v5457_v37  ;;  %3516 = vmatpush1.bf16.msra.mxu0 %v4716_v58  ;;  %v743_v58 = vld [vmem:[%s5054_s15 + $0xbf0] sm:$0xff]  ;;  %v3168_v62 = vpop.f32.mrf.mxu1 }
 0x156   : > { %3559 = vmatpush1.bf16.msra.mxu1 %v4844_v59  ;;  %3517 = vmatprep.subr.bf16.mxu0 %v4709_v60  ;;  %v420_v59 = vld [vmem:[%s5054_s15 + $0x1d8] sm:$0xff]  ;;  %v4781_v0 = vcombine.high %v739_v4, %v743_v58  ;;  %v4780_v9 = vcombine.low %v739_v4, %v743_v58  ;;  %v3125_v10 = vpop.f32.mrf.mxu0  ;;  %v707_v4 = vld [vmem:[%s5054_s15 + $0xad0] sm:$0xff] }
 0x157   : > { %3560 = vmatprep.subr.bf16.mxu1 %v4837_v21  ;;  %3590 = vmatprep.mubr.bf16.mxu1 %v4973_v40  ;;  %v424_v60 = vld [vmem:[%s5054_s15 + $0x1f8] sm:$0xff]  ;;  %v4660_v21 = vcombine.low %v619_v49, %v623_v50  ;;  %v711_v58 = vld [vmem:[%s5054_s15 + $0xaf0] sm:$0xff] }
 0x158   : > { %3547 = vmatprep.mubr.bf16.mxu0 %v5466_v11 }
 0x159   : > { %3518 = vmatpush1.bf16.msra.mxu0 %v4708_v3  ;;  %v4463_v3 = vcombine.high %v420_v59, %v424_v60 }
 0x15a   : > { %3561 = vmatpush1.bf16.msra.mxu1 %v4836_v5  ;;  %3519 = vmatprep.subr.bf16.mxu0 %v4701_v33  ;;  %v731_v5 = vld [vmem:[%s5054_s15 + $0xb90] sm:$0xff] }
 0x15b   : > { %3562 = vmatprep.subr.bf16.mxu1 %v4829_v6  ;;  %v735_v33 = vld [vmem:[%s5054_s15 + $0xbb0] sm:$0xff]  ;;  %v3248_v6 = vpop.f32.mrf.mxu1 }
 0x15c   : > { %v4772_v27 = vcombine.low %v731_v5, %v735_v33 }
 0x15d   : > { %3520 = vmatpush1.bf16.msra.mxu0 %v4700_v12  ;;  %v4462_v12 = vcombine.low %v420_v59, %v424_v60  ;;  %v346_v60 = vld [vmem:[%s6147_s5 + $0x48] sm:$0xff] }
 0x15e   : > { %3563 = vmatpush1.bf16.msra.mxu1 %v4828_v13  ;;  %3521 = vmatprep.subr.bf16.mxu0 %v4693_v14  ;;  %v4773_v13 = vcombine.high %v731_v5, %v735_v33  ;;  %v723_v14 = vld [vmem:[%s5054_s15 + $0xb50] sm:$0xff]  ;;  %v4749_v5 = vcombine.high %v707_v4, %v711_v58 }
 0x15f   : > { %3564 = vmatprep.subr.bf16.mxu1 %v4821_v15  ;;  %v3163_v15 = vadd.f32 %v3162_v31, %v3119_v44  ;;  %v4765_v31 = vcombine.high %v723_v14, %v727_v17 }
 0x161   : > { %3522 = vmatpush1.bf16.msra.mxu0 %v4692_v20  ;;  %v3250_v20 = vpop.f32.mrf.mxu1 }
 0x162   : > { %3565 = vmatpush1.bf16.msra.mxu1 %v4820_v22  ;;  %3523 = vmatprep.subr.bf16.mxu0 %v4685_v23  ;;  %v3165_v23 = vadd.f32 %v3164_v45, %v3121_v54  ;;  %v4764_v45 = vcombine.low %v723_v14, %v727_v17  ;;  %v4757_v54 = vcombine.high %v715_v39, %v719_v41  ;;  %v695_v17 = vld [vmem:[%s5054_s15 + $0xa70] sm:$0xff] }
 0x163   : > { %3566 = vmatprep.subr.bf16.mxu1 %v4813_v25  ;;  %v3252_v42 = vpop.f32.mrf.mxu1 }
 0x165   : > { %3524 = vmatpush1.bf16.msra.mxu0 %v4684_v30  ;;  %v4454_v30 = vcombine.low %v412_v7, %v416_v8  ;;  %v3254_v59 = vpop.f32.mrf.mxu1  ;;  %v699_v7 = vld [vmem:[%s5054_s15 + $0xa90] sm:$0xff] }
 0x166   : > { %3567 = vmatpush1.bf16.msra.mxu1 %v4812_v34  ;;  %3525 = vmatprep.subr.bf16.mxu0 %v4677_v35  ;;  %v4447_v34 = vcombine.high %v404_v18, %v408_v19  ;;  %v3167_v35 = vadd.f32 %v3166_v55, %v3123_v61  ;;  %v392_v61 = vld [vmem:[%s5054_s15 + $0xf8] sm:$0xff]  ;;  %v703_v8 = vld [vmem:[%s5054_s15 + $0xab0] sm:$0xff] }
 0x167   : > { %3568 = vmatprep.subr.bf16.mxu1 %v4805_v36  ;;  %v4741_v14 = vcombine.high %v699_v7, %v703_v8 }
 0x169   : > { %3526 = vmatpush1.bf16.msra.mxu0 %v4676_v43  ;;  %v338_v43 = vld [vmem:[%s6147_s5 + $0x8] sm:$0xff] }
 0x16a   : > { %3569 = vmatpush1.bf16.msra.mxu1 %v4804_v46  ;;  %3527 = vmatprep.subr.bf16.mxu0 %v4669_v47  ;;  %v396_v46 = vld [vmem:[%s5054_s15 + $0x118] sm:$0xff] }
 0x16b   : > { %3570 = vmatprep.subr.bf16.mxu1 %v4797_v48  ;;  %v400_v47 = vld [vmem:[%s5054_s15 + $0x138] sm:$0xff]  ;;  %v3169_v48 = vadd.f32 %v3168_v62, %v3125_v10 }
 0x16c   : > { %v384_v10 = vld [vmem:[%s5054_s15 + $0xb8] sm:$0xff] }
 0x16d   : > { %3528 = vmatpush1.bf16.msra.mxu0 %v4668_v53  ;;  %v4446_v53 = vcombine.low %v404_v18, %v408_v19  ;;  %v372_v18 = vld [vmem:[%s5054_s15 + $0x58] sm:$0xff] }
 0x16e   : > { %3571 = vmatpush1.bf16.msra.mxu1 %v4796_v56  ;;  %3529 = vmatprep.subr.bf16.mxu0 %v4661_v57  ;;  %v376_v19 = vld [vmem:[%s5054_s15 + $0x78] sm:$0xff] }
 0x16f   : > { %3572 = vmatprep.subr.bf16.mxu1 %v4789_v1  ;;  %v4439_v1 = vcombine.high %v396_v46, %v400_v47 }
 0x171   : > { %3530 = vmatpush1.bf16.msra.mxu0 %v4660_v21  ;;  %v388_v21 = vld [vmem:[%s5054_s15 + $0xd8] sm:$0xff] }
 0x172   : > { %3573 = vmatpush1.bf16.msra.mxu1 %v4788_v63  ;;  %3531 = vmatprep.subr.bf16.mxu0 %v4781_v0  ;;  %v4756_v0 = vcombine.low %v715_v39, %v719_v41  ;;  %v552_v39 = vld [vmem:[%s5054_s15 + $0x5f8] sm:$0xff] }
 0x173   : > { %3601 = vmatprep.subr.bf16.mxu1 %v4463_v3  ;;  %v4438_v3 = vcombine.low %v396_v46, %v400_v47  ;;  %v484_v41 = vld [vmem:[%s5054_s15 + $0x3d8] sm:$0xff] }
 0x174   : > { %v3205_v22 = vpop.f32.mrf.mxu0  ;;  %v540_v47 = vld [vmem:[%s5054_s15 + $0x598] sm:$0xff] }
 0x175   : > { %v3206_v25 = vadd.f32 %v3205_v22, %v3163_v15  ;;  %3591 = vmatmul.mubr.bf16.vlgmr.msra.gmra.mxu1 %v5498_v26  ;;  %3532 = vmatpush2.bf16.msra.mxu0 %v4780_v9  ;;  %v380_v9 = vld [vmem:[%s5054_s15 + $0x98] sm:$0xff] }
 0x176   : > { %3602 = vmatpush1.bf16.msra.mxu1 %v4462_v12  ;;  %v3207_v29 = vpop.f32.mrf.mxu0  ;;  %3533 = vmatprep.subr.bf16.mxu0 %v4773_v13  ;;  %v4748_v12 = vcombine.low %v707_v4, %v711_v58  ;;  %v4430_v13 = vcombine.low %v388_v21, %v392_v61  ;;  %v4423_v15 = vcombine.high %v380_v9, %v384_v10 }
 0x177   : > { %v3249_v36 = vadd.f32 %v3248_v6, %v3206_v25  ;;  %v3208_v38 = vadd.f32 %v3207_v29, %v3165_v23  ;;  %3603 = vmatprep.subr.bf16.mxu1 %v4455_v16  ;;  %3633 = vmatprep.mubr.bf16.mxu1 %v5383_v32  ;;  %v345_v32 = vld [vmem:[%s6147_s5 + $0x40] sm:$0xff]  ;;  %v4431_v6 = vcombine.high %v388_v21, %v392_v61  ;;  %v691_v16 = vld [vmem:[%s5054_s15 + $0xa50] sm:$0xff]  ;;  %v364_v29 = vld [vmem:[%s5054_s15 + $0x18] sm:$0xff] }
 0x178   : > { %v3209_v44 = vpop.f32.mrf.mxu0  ;;  %v4422_v22 = vcombine.low %v380_v9, %v384_v10  ;;  %v4733_v23 = vcombine.high %v691_v16, %v695_v17  ;;  %v4415_v25 = vcombine.high %v372_v18, %v376_v19  ;;  %v524_v21 = vld [vmem:[%s5054_s15 + $0x518] sm:$0xff] }
 0x179   : > { %v3773_v49 = vadd.f32 %v3249_v36, %v337_v28  ;;  %v3251_v50 = vadd.f32 %v3250_v20, %v3208_v38  ;;  %v3210_v51 = vadd.f32 %v3209_v44, %v3167_v35  ;;  %3534 = vmatpush2.bf16.msra.mxu0 %v4772_v27  ;;  %v4740_v20 = vcombine.low %v699_v7, %v703_v8  ;;  %v683_v27 = vld [vmem:[%s5054_s15 + $0xa10] sm:$0xff]  ;;  %v548_v38 = vld [vmem:[%s5054_s15 + $0x5d8] sm:$0xff] }
 0x17a   : > { %3604 = vmatpush1.bf16.msra.mxu1 %v4454_v30  ;;  %v3211_v52 = vpop.f32.mrf.mxu0  ;;  %3535 = vmatprep.subr.bf16.mxu0 %v4765_v31  ;;  %v687_v28 = vld [vmem:[%s5054_s15 + $0xa30] sm:$0xff]  ;;  %v368_v30 = vld [vmem:[%s5054_s15 + $0x38] sm:$0xff]  ;;  %v4732_v31 = vcombine.low %v691_v16, %v695_v17 }
 0x17b   : > { %3789 = vst [vmem:[%s6147_s5] sm:$0xff] %v3773_v49  ;;  %v3774_v55 = vadd.f32 %v3251_v50, %v338_v43  ;;  %v3253_v56 = vadd.f32 %v3252_v42, %v3210_v51  ;;  %v3212_v57 = vadd.f32 %v3211_v52, %v3169_v48  ;;  %3605 = vmatprep.subr.bf16.mxu1 %v4447_v34  ;;  %v488_v42 = vld [vmem:[%s5054_s15 + $0x3f8] sm:$0xff] }
 0x17c   : > { %v4414_v34 = vcombine.low %v372_v18, %v376_v19  ;;  %v4725_v35 = vcombine.high %v683_v27, %v687_v28  ;;  %v4407_v36 = vcombine.high %v364_v29, %v368_v30  ;;  %v4724_v43 = vcombine.low %v683_v27, %v687_v28  ;;  %v544_v48 = vld [vmem:[%s5054_s15 + $0x5b8] sm:$0xff] }
 0x17d   : > { %3790 = vst [vmem:[%s6147_s5 + $0x8] sm:$0xff] %v3774_v55  ;;  %v3781_v62 = vadd.f32 %v3253_v56, %v345_v32  ;;  %v3255_v63 = vadd.f32 %v3254_v59, %v3212_v57  ;;  %3536 = vmatpush2.bf16.msra.mxu0 %v4764_v45  ;;  %v4406_v44 = vcombine.low %v364_v29, %v368_v30  ;;  %v476_v49 = vld [vmem:[%s5054_s15 + $0x398] sm:$0xff]  ;;  %v5557_v56 = vld [vmem:[%s5056_s16 + $0x10] ss:$28 sps:$4 sm:$0xff]  }
 0x17e   : > { %3606 = vmatpush1.bf16.msra.mxu1 %v4446_v53  ;;  %3537 = vmatprep.subr.bf16.mxu0 %v4757_v54  ;;  %v4591_v45 = vcombine.high %v548_v38, %v552_v39  ;;  %v4527_v46 = vcombine.high %v484_v41, %v488_v42  ;;  %v480_v50 = vld [vmem:[%s5054_s15 + $0x3b8] sm:$0xff]  ;;  %v4590_v51 = vcombine.low %v548_v38, %v552_v39 }
 0x17f   : > { %3797 = vst [vmem:[%s6147_s5 + $0x40] sm:$0xff] %v3781_v62  ;;  %v3782_v33 = vadd.f32 %v3255_v63, %v346_v60  ;;  %3607 = vmatprep.subr.bf16.mxu1 %v4439_v1  ;;  %v4526_v32 = vcombine.low %v484_v41, %v488_v42  ;;  %v4583_v52 = vcombine.high %v540_v47, %v544_v48  ;;  %v532_v54 = vld [vmem:[%s5054_s15 + $0x558] sm:$0xff] }
 0x180   : > { %v4519_v53 = vcombine.high %v476_v49, %v480_v50  ;;  %v536_v55 = vld [vmem:[%s5054_s15 + $0x578] sm:$0xff]  ;;  %v4582_v4 = vcombine.low %v540_v47, %v544_v48  ;;  %v4518_v58 = vcombine.low %v476_v49, %v480_v50 }
 0x181   : > { %3798 = vst [vmem:[%s6147_s5 + $0x48] sm:$0xff] %v3782_v33  ;;  %3538 = vmatpush2.bf16.msra.mxu0 %v4756_v0  ;;  %v468_v57 = vld [vmem:[%s5054_s15 + $0x358] sm:$0xff]  ;;  %v4575_v59 = vcombine.high %v532_v54, %v536_v55  ;;  %v4574_v0 = vcombine.low %v532_v54, %v536_v55 }
 0x182   : > { %3608 = vmatpush1.bf16.msra.mxu1 %v4438_v3  ;;  %3539 = vmatprep.subr.bf16.mxu0 %v4749_v5  ;;  %v472_v1 = vld [vmem:[%s5054_s15 + $0x378] sm:$0xff] }
 0x183   : > { %3609 = vmatprep.subr.bf16.mxu1 %v4431_v6  ;;  %v4511_v60 = vcombine.high %v468_v57, %v472_v1  ;;  %v528_v61 = vld [vmem:[%s5054_s15 + $0x538] sm:$0xff]  ;;  %v4510_v3 = vcombine.low %v468_v57, %v472_v1 }
 0x184   : > { %v460_v62 = vld [vmem:[%s5054_s15 + $0x318] sm:$0xff]  ;;  %v4566_v9 = vcombine.low %v524_v21, %v528_v61 }
 0x185   : > { %3540 = vmatpush2.bf16.msra.mxu0 %v4748_v12  ;;  %v464_v63 = vld [vmem:[%s5054_s15 + $0x338] sm:$0xff] }
 0x186   : > { %3610 = vmatpush1.bf16.msra.mxu1 %v4430_v13  ;;  %3541 = vmatprep.subr.bf16.mxu0 %v4741_v14  ;;  %v4503_v5 = vcombine.high %v460_v62, %v464_v63  ;;  %v516_v33 = vld [vmem:[%s5054_s15 + $0x4d8] sm:$0xff]  ;;  %v4502_v10 = vcombine.low %v460_v62, %v464_v63 }
 0x187   : > { %3611 = vmatprep.subr.bf16.mxu1 %v4423_v15  ;;  %v520_v6 = vld [vmem:[%s5054_s15 + $0x4f8] sm:$0xff] }
 0x188   : > { %v452_v7 = vld [vmem:[%s5054_s15 + $0x2d8] sm:$0xff]  ;;  %v4559_v12 = vcombine.high %v516_v33, %v520_v6  ;;  %v4558_v18 = vcombine.low %v516_v33, %v520_v6 }
 0x189   : > { %3542 = vmatpush2.bf16.msra.mxu0 %v4740_v20  ;;  %v456_v8 = vld [vmem:[%s5054_s15 + $0x2f8] sm:$0xff] }
 0x18a   : > { %3612 = vmatpush1.bf16.msra.mxu1 %v4422_v22  ;;  %3543 = vmatprep.subr.bf16.mxu0 %v4733_v23  ;;  %v4495_v13 = vcombine.high %v452_v7, %v456_v8  ;;  %v508_v14 = vld [vmem:[%s5054_s15 + $0x498] sm:$0xff]  ;;  %v4494_v19 = vcombine.low %v452_v7, %v456_v8 }
 0x18b   : > { %3613 = vmatprep.subr.bf16.mxu1 %v4415_v25  ;;  %v512_v15 = vld [vmem:[%s5054_s15 + $0x4b8] sm:$0xff] }
 0x18c   : > { %v444_v16 = vld [vmem:[%s5054_s15 + $0x298] sm:$0xff]  ;;  %v4551_v20 = vcombine.high %v508_v14, %v512_v15  ;;  %v4550_v29 = vcombine.low %v508_v14, %v512_v15 }
 0x18d   : > { %3544 = vmatpush2.bf16.msra.mxu0 %v4732_v31  ;;  %v448_v17 = vld [vmem:[%s5054_s15 + $0x2b8] sm:$0xff] }
 0x18e   : > { %3614 = vmatpush1.bf16.msra.mxu1 %v4414_v34  ;;  %3545 = vmatprep.subr.bf16.mxu0 %v4725_v35  ;;  %v4487_v22 = vcombine.high %v444_v16, %v448_v17  ;;  %v500_v23 = vld [vmem:[%s5054_s15 + $0x458] sm:$0xff]  ;;  %v4486_v30 = vcombine.low %v444_v16, %v448_v17 }
 0x18f   : > { %3615 = vmatprep.subr.bf16.mxu1 %v4407_v36  ;;  %v504_v25 = vld [vmem:[%s5054_s15 + $0x478] sm:$0xff] }
 0x190   : > { %v436_v27 = vld [vmem:[%s5054_s15 + $0x258] sm:$0xff]  ;;  %v4543_v31 = vcombine.high %v500_v23, %v504_v25  ;;  %v4542_v41 = vcombine.low %v500_v23, %v504_v25 }
 0x191   : > { %3546 = vmatpush2.bf16.msra.mxu0 %v4724_v43  ;;  %v440_v28 = vld [vmem:[%s5054_s15 + $0x278] sm:$0xff] }
 0x192   : > { %3616 = vmatpush1.bf16.msra.mxu1 %v4406_v44  ;;  %3644 = vmatprep.subr.bf16.mxu0 %v4591_v45  ;;  %v4479_v34 = vcombine.high %v436_v27, %v440_v28  ;;  %v492_v35 = vld [vmem:[%s5054_s15 + $0x418] sm:$0xff]  ;;  %v4478_v42 = vcombine.low %v436_v27, %v440_v28 }
 0x193   : > { %3617 = vmatprep.subr.bf16.mxu1 %v4527_v46  ;;  %v496_v36 = vld [vmem:[%s5054_s15 + $0x438] sm:$0xff] }
 0x194   : > { %3548 = vmatmul.mubr.bf16.vlgmr.msra.gmra.mxu0 %v5557_v56  ;;  %v428_v38 = vld [vmem:[%s5054_s15 + $0x218] sm:$0xff]  ;;  %v4535_v43 = vcombine.high %v492_v35, %v496_v36  ;;  %v4534_v49 = vcombine.low %v492_v35, %v496_v36 }
 0x195   : > { %3645 = vmatpush1.bf16.msra.mxu0 %v4590_v51  ;;  %3676 = vmatprep.mubr.bf16.mxu0 %v5389_v2  ;;  %v4567_v2 = vcombine.high %v524_v21, %v528_v61  ;;  %v432_v39 = vld [vmem:[%s5054_s15 + $0x238] sm:$0xff] }
 0x196   : > { %3618 = vmatpush2.bf16.msra.mxu1 %v4526_v32  ;;  %3646 = vmatprep.subr.bf16.mxu0 %v4583_v52  ;;  %v4471_v44 = vcombine.high %v428_v38, %v432_v39  ;;  %v612_v45 = vld [vmem:[%s5054_s15 + $0x7d8] sm:$0xff]  ;;  %v4470_v50 = vcombine.low %v428_v38, %v432_v39 }
 0x197   : > { %3619 = vmatprep.subr.bf16.mxu1 %v4519_v53  ;;  %v616_v46 = vld [vmem:[%s5054_s15 + $0x7f8] sm:$0xff] }
 0x198   : > { %v676_v47 = vld [vmem:[%s5054_s15 + $0x9d8] sm:$0xff]  ;;  %v4655_v51 = vcombine.high %v612_v45, %v616_v46  ;;  %v4654_v57 = vcombine.low %v612_v45, %v616_v46 }
 0x199   : > { %3647 = vmatpush1.bf16.msra.mxu0 %v4582_v4  ;;  %v680_v48 = vld [vmem:[%s5054_s15 + $0x9f8] sm:$0xff] }
 0x19a   : > { %3620 = vmatpush2.bf16.msra.mxu1 %v4518_v58  ;;  %3648 = vmatprep.subr.bf16.mxu0 %v4575_v59  ;;  %v4719_v32 = vcombine.high %v676_v47, %v680_v48  ;;  %v604_v52 = vld [vmem:[%s5054_s15 + $0x798] sm:$0xff]  ;;  %v4718_v1 = vcombine.low %v676_v47, %v680_v48 }
 0x19b   : > { %3621 = vmatprep.subr.bf16.mxu1 %v4511_v60  ;;  %v608_v53 = vld [vmem:[%s5054_s15 + $0x7b8] sm:$0xff] }
 0x19c   : > { %v668_v54 = vld [vmem:[%s5054_s15 + $0x998] sm:$0xff]  ;;  %v4647_v4 = vcombine.high %v604_v52, %v608_v53  ;;  %v4646_v62 = vcombine.low %v604_v52, %v608_v53 }
 0x19d   : > { %3649 = vmatpush1.bf16.msra.mxu0 %v4574_v0  ;;  %v672_v55 = vld [vmem:[%s5054_s15 + $0x9b8] sm:$0xff] }
 0x19e   : > { %3622 = vmatpush2.bf16.msra.mxu1 %v4510_v3  ;;  %3650 = vmatprep.subr.bf16.mxu0 %v4567_v2  ;;  %v4711_v58 = vcombine.high %v668_v54, %v672_v55  ;;  %v596_v59 = vld [vmem:[%s5054_s15 + $0x758] sm:$0xff]  ;;  %v4710_v63 = vcombine.low %v668_v54, %v672_v55 }
 0x19f   : > { %3623 = vmatprep.subr.bf16.mxu1 %v4503_v5  ;;  %v600_v60 = vld [vmem:[%s5054_s15 + $0x778] sm:$0xff] }
 0x1a0   : > { %v660_v21 = vld [vmem:[%s5054_s15 + $0x958] sm:$0xff]  ;;  %v4639_v0 = vcombine.high %v596_v59, %v600_v60 }
 0x1a1   : > { %3651 = vmatpush1.bf16.msra.mxu0 %v4566_v9  ;;  %v664_v61 = vld [vmem:[%s5054_s15 + $0x978] sm:$0xff] }
 0x1a2   : > { %3624 = vmatpush2.bf16.msra.mxu1 %v4502_v10  ;;  %3652 = vmatprep.subr.bf16.mxu0 %v4559_v12  ;;  %v4703_v3 = vcombine.high %v660_v21, %v664_v61  ;;  %v588_v2 = vld [vmem:[%s5054_s15 + $0x718] sm:$0xff]  ;;  %v4702_v7 = vcombine.low %v660_v21, %v664_v61 }
 0x1a3   : > { %3625 = vmatprep.subr.bf16.mxu1 %v4495_v13  ;;  %v592_v5 = vld [vmem:[%s5054_s15 + $0x738] sm:$0xff] }
 0x1a4   : > { %v652_v33 = vld [vmem:[%s5054_s15 + $0x918] sm:$0xff]  ;;  %v4631_v8 = vcombine.high %v588_v2, %v592_v5 }
 0x1a5   : > { %3653 = vmatpush1.bf16.msra.mxu0 %v4558_v18  ;;  %v656_v6 = vld [vmem:[%s5054_s15 + $0x938] sm:$0xff] }
 0x1a6   : > { %3626 = vmatpush2.bf16.msra.mxu1 %v4494_v19  ;;  %3654 = vmatprep.subr.bf16.mxu0 %v4551_v20  ;;  %v4695_v9 = vcombine.high %v652_v33, %v656_v6  ;;  %v580_v10 = vld [vmem:[%s5054_s15 + $0x6d8] sm:$0xff]  ;;  %v4694_v15 = vcombine.low %v652_v33, %v656_v6 }
 0x1a7   : > { %3627 = vmatprep.subr.bf16.mxu1 %v4487_v22  ;;  %v584_v12 = vld [vmem:[%s5054_s15 + $0x6f8] sm:$0xff] }
 0x1a8   : > { %v644_v13 = vld [vmem:[%s5054_s15 + $0x8d8] sm:$0xff]  ;;  %v4623_v16 = vcombine.high %v580_v10, %v584_v12  ;;  %v4622_v23 = vcombine.low %v580_v10, %v584_v12 }
 0x1a9   : > { %3655 = vmatpush1.bf16.msra.mxu0 %v4550_v29  ;;  %v648_v14 = vld [vmem:[%s5054_s15 + $0x8f8] sm:$0xff] }
 0x1aa   : > { %3628 = vmatpush2.bf16.msra.mxu1 %v4486_v30  ;;  %3656 = vmatprep.subr.bf16.mxu0 %v4543_v31  ;;  %v4687_v17 = vcombine.high %v644_v13, %v648_v14  ;;  %v572_v18 = vld [vmem:[%s5054_s15 + $0x698] sm:$0xff]  ;;  %v4686_v25 = vcombine.low %v644_v13, %v648_v14 }
 0x1ab   : > { %3629 = vmatprep.subr.bf16.mxu1 %v4479_v34  ;;  %v576_v19 = vld [vmem:[%s5054_s15 + $0x6b8] sm:$0xff] }
 0x1ac   : > { %v636_v20 = vld [vmem:[%s5054_s15 + $0x898] sm:$0xff]  ;;  %v4615_v27 = vcombine.high %v572_v18, %v576_v19  ;;  %v4614_v35 = vcombine.low %v572_v18, %v576_v19 }
 0x1ad   : > { %3657 = vmatpush1.bf16.msra.mxu0 %v4542_v41  ;;  %v640_v22 = vld [vmem:[%s5054_s15 + $0x8b8] sm:$0xff]  ;;  %v3291_v41 = vpop.f32.mrf.mxu1 }
 0x1ae   : > { %3630 = vmatpush2.bf16.msra.mxu1 %v4478_v42  ;;  %3658 = vmatprep.subr.bf16.mxu0 %v4535_v43  ;;  %v4679_v28 = vcombine.high %v636_v20, %v640_v22  ;;  %v564_v29 = vld [vmem:[%s5054_s15 + $0x658] sm:$0xff]  ;;  %v4678_v38 = vcombine.low %v636_v20, %v640_v22 }
 0x1af   : > { %3631 = vmatprep.subr.bf16.mxu1 %v4471_v44  ;;  %v568_v30 = vld [vmem:[%s5054_s15 + $0x678] sm:$0xff] }
 0x1b0   : > { %v628_v31 = vld [vmem:[%s5054_s15 + $0x858] sm:$0xff]  ;;  %v4607_v39 = vcombine.high %v564_v29, %v568_v30  ;;  %v4606_v47 = vcombine.low %v564_v29, %v568_v30 }
 0x1b1   : > { %3659 = vmatpush1.bf16.msra.mxu0 %v4534_v49  ;;  %v632_v34 = vld [vmem:[%s5054_s15 + $0x878] sm:$0xff] }
 0x1b2   : > { %3632 = vmatpush2.bf16.msra.mxu1 %v4470_v50  ;;  %3660 = vmatprep.subr.bf16.mxu0 %v4655_v51  ;;  %v4671_v42 = vcombine.high %v628_v31, %v632_v34  ;;  %v556_v43 = vld [vmem:[%s5054_s15 + $0x618] sm:$0xff]  ;;  %v4670_v49 = vcombine.low %v628_v31, %v632_v34  ;;  %v3293_v51 = vpop.f32.mrf.mxu1 }
 0x1b3   : > { %3687 = vmatprep.subr.bf16.mxu1 %v4719_v32  ;;  %v560_v44 = vld [vmem:[%s5054_s15 + $0x638] sm:$0xff] }
 0x1b4   : > { %v3334_v36 = vpop.f32.mrf.mxu0  ;;  %v620_v45 = vld [vmem:[%s5054_s15 + $0x818] sm:$0xff]  ;;  %v4599_v50 = vcombine.high %v556_v43, %v560_v44 }
 0x1b5   : > { %3634 = vmatmul.mubr.bf16.vlgmr.msra.gmra.mxu1 %v5451_v24  ;;  %3661 = vmatpush2.bf16.msra.mxu0 %v4654_v57  ;;  %v4638_v24 = vcombine.low %v596_v59, %v600_v60  ;;  %v624_v46 = vld [vmem:[%s5054_s15 + $0x838] sm:$0xff]  ;;  %v4598_v57 = vcombine.low %v556_v43, %v560_v44  ;;  %v3295_v59 = vpop.f32.mrf.mxu1  ;;  %v347_v44 = vld [vmem:[%s6147_s5 + $0x50] sm:$0xff] }
 0x1b6   : > { %3688 = vmatpush1.bf16.msra.mxu1 %v4718_v1  ;;  %3662 = vmatprep.subr.bf16.mxu0 %v4647_v4  ;;  %v3336_v48 = vpop.f32.mrf.mxu0  ;;  %v4663_v32 = vcombine.high %v620_v45, %v624_v46  ;;  %v804_v52 = vld [vmem:[%s5054_s15 + $0xdd8] sm:$0xff]  ;;  %v4662_v4 = vcombine.low %v620_v45, %v624_v46 }
 0x1b7   : > { %3689 = vmatprep.subr.bf16.mxu1 %v4711_v58  ;;  %3719 = vmatprep.mubr.bf16.mxu1 %v5466_v11  ;;  %v4630_v11 = vcombine.low %v588_v2, %v592_v5  ;;  %v808_v53 = vld [vmem:[%s5054_s15 + $0xdf8] sm:$0xff]  ;;  %v3297_v33 = vpop.f32.mrf.mxu1 }
 0x1b8   : > { %v740_v54 = vld [vmem:[%s5054_s15 + $0xbd8] sm:$0xff]  ;;  %v3338_v1 = vpop.f32.mrf.mxu0  ;;  %v4847_v58 = vcombine.high %v804_v52, %v808_v53 }
 0x1b9   : > { %3663 = vmatpush2.bf16.msra.mxu0 %v4646_v62  ;;  %v744_v55 = vld [vmem:[%s5054_s15 + $0xbf8] sm:$0xff] }
 0x1ba   : > { %3690 = vmatpush1.bf16.msra.mxu1 %v4710_v63  ;;  %3664 = vmatprep.subr.bf16.mxu0 %v4639_v0  ;;  %v4783_v60 = vcombine.high %v740_v54, %v744_v55  ;;  %v796_v21 = vld [vmem:[%s5054_s15 + $0xd98] sm:$0xff]  ;;  %v4846_v0 = vcombine.low %v804_v52, %v808_v53  ;;  %v4782_v2 = vcombine.low %v740_v54, %v744_v55 }
 0x1bb   : > { %3691 = vmatprep.subr.bf16.mxu1 %v4703_v3  ;;  %v800_v61 = vld [vmem:[%s5054_s15 + $0xdb8] sm:$0xff]  ;;  %v3340_v3 = vpop.f32.mrf.mxu0 }
 0x1bc   : > { %v732_v62 = vld [vmem:[%s5054_s15 + $0xb98] sm:$0xff]  ;;  %v4839_v5 = vcombine.high %v796_v21, %v800_v61  ;;  %v3341_v30 = vadd.f32 %v3340_v3, %v3297_v33 }
 0x1bd   : > { %3665 = vmatpush2.bf16.msra.mxu0 %v4638_v24  ;;  %v736_v63 = vld [vmem:[%s5054_s15 + $0xbb8] sm:$0xff] }
 0x1be   : > { %3692 = vmatpush1.bf16.msra.mxu1 %v4702_v7  ;;  %3666 = vmatprep.subr.bf16.mxu0 %v4631_v8  ;;  %v4775_v6 = vcombine.high %v732_v62, %v736_v63  ;;  %v788_v24 = vld [vmem:[%s5054_s15 + $0xd58] sm:$0xff]  ;;  %v3335_v8 = vadd.f32 %v3334_v36, %v3291_v41  ;;  %v4774_v14 = vcombine.low %v732_v62, %v736_v63 }
 0x1bf   : > { %3693 = vmatprep.subr.bf16.mxu1 %v4695_v9  ;;  %v792_v7 = vld [vmem:[%s5054_s15 + $0xd78] sm:$0xff] }
 0x1c0   : > { %v724_v10 = vld [vmem:[%s5054_s15 + $0xb58] sm:$0xff]  ;;  %v4831_v18 = vcombine.high %v788_v24, %v792_v7 }
 0x1c1   : > { %3667 = vmatpush2.bf16.msra.mxu0 %v4630_v11  ;;  %v728_v12 = vld [vmem:[%s5054_s15 + $0xb78] sm:$0xff]  ;;  %v4838_v11 = vcombine.low %v796_v21, %v800_v61 }
 0x1c2   : > { %3694 = vmatpush1.bf16.msra.mxu1 %v4694_v15  ;;  %3668 = vmatprep.subr.bf16.mxu0 %v4623_v16  ;;  %v3337_v15 = vadd.f32 %v3336_v48, %v3293_v51  ;;  %v780_v19 = vld [vmem:[%s5054_s15 + $0xd18] sm:$0xff]  ;;  %v4766_v36 = vcombine.low %v724_v10, %v728_v12 }
 0x1c3   : > { %3695 = vmatprep.subr.bf16.mxu1 %v4687_v17  ;;  %v784_v20 = vld [vmem:[%s5054_s15 + $0xd38] sm:$0xff] }
 0x1c4   : > { %v720_v29 = vld [vmem:[%s5054_s15 + $0xb38] sm:$0xff] }
 0x1c5   : > { %3669 = vmatpush2.bf16.msra.mxu0 %v4622_v23  ;;  %v4767_v23 = vcombine.high %v724_v10, %v728_v12  ;;  %v340_v31 = vld [vmem:[%s6147_s5 + $0x18] sm:$0xff] }
 0x1c6   : > { %3696 = vmatpush1.bf16.msra.mxu1 %v4686_v25  ;;  %3670 = vmatprep.subr.bf16.mxu0 %v4615_v27  ;;  %v3339_v25 = vadd.f32 %v3338_v1, %v3295_v59  ;;  %v776_v48 = vld [vmem:[%s5054_s15 + $0xcf8] sm:$0xff] }
 0x1c7   : > { %3697 = vmatprep.subr.bf16.mxu1 %v4679_v28  ;;  %v716_v28 = vld [vmem:[%s5054_s15 + $0xb18] sm:$0xff] }
 0x1c8   : > { %v4759_v46 = vcombine.high %v716_v28, %v720_v29  ;;  %v712_v52 = vld [vmem:[%s5054_s15 + $0xaf8] sm:$0xff]  ;;  %v4758_v55 = vcombine.low %v716_v28, %v720_v29 }
 0x1c9   : > { %3671 = vmatpush2.bf16.msra.mxu0 %v4614_v35  ;;  %v348_v53 = vld [vmem:[%s6147_s5 + $0x58] sm:$0xff] }
 0x1ca   : > { %3698 = vmatpush1.bf16.msra.mxu1 %v4678_v38  ;;  %3672 = vmatprep.subr.bf16.mxu0 %v4607_v39  ;;  %v4830_v38 = vcombine.low %v788_v24, %v792_v7  ;;  %v4823_v39 = vcombine.high %v780_v19, %v784_v20  ;;  %v768_v21 = vld [vmem:[%s5054_s15 + $0xcb8] sm:$0xff] }
 0x1cb   : > { %3699 = vmatprep.subr.bf16.mxu1 %v4671_v42  ;;  %v700_v62 = vld [vmem:[%s5054_s15 + $0xa98] sm:$0xff] }
 0x1cc   : > { %v704_v63 = vld [vmem:[%s5054_s15 + $0xab8] sm:$0xff] }
 0x1cd   : > { %3673 = vmatpush2.bf16.msra.mxu0 %v4606_v47  ;;  %v772_v47 = vld [vmem:[%s5054_s15 + $0xcd8] sm:$0xff] }
 0x1ce   : > { %3700 = vmatpush1.bf16.msra.mxu1 %v4670_v49  ;;  %3674 = vmatprep.subr.bf16.mxu0 %v4599_v50  ;;  %v756_v33 = vld [vmem:[%s5054_s15 + $0xc58] sm:$0xff] }
 0x1cf   : > { %3701 = vmatprep.subr.bf16.mxu1 %v4663_v32  ;;  %v708_v32 = vld [vmem:[%s5054_s15 + $0xad8] sm:$0xff] }
 0x1d0   : > { %v4751_v59 = vcombine.high %v708_v32, %v712_v52  ;;  %v4750_v3 = vcombine.low %v708_v32, %v712_v52  ;;  %v692_v24 = vld [vmem:[%s5054_s15 + $0xa58] sm:$0xff] }
 0x1d1   : > { %3675 = vmatpush2.bf16.msra.mxu0 %v4598_v57  ;;  %v4822_v57 = vcombine.low %v780_v19, %v784_v20  ;;  %v696_v7 = vld [vmem:[%s5054_s15 + $0xa78] sm:$0xff] }
 0x1d2   : > { %3702 = vmatpush1.bf16.msra.mxu1 %v4662_v4  ;;  %3730 = vmatprep.subr.bf16.mxu0 %v4847_v58  ;;  %v4815_v58 = vcombine.high %v772_v47, %v776_v48  ;;  %v4735_v12 = vcombine.high %v692_v24, %v696_v7 }
 0x1d3   : > { %3703 = vmatprep.subr.bf16.mxu1 %v4783_v60  ;;  %v764_v60 = vld [vmem:[%s5054_s15 + $0xc98] sm:$0xff] }
 0x1d4   : > { %v3420_v9 = vpop.f32.mrf.mxu0  ;;  %3677 = vmatmul.mubr.bf16.vlgmr.msra.gmra.mxu0 %v5457_v37  ;;  %v339_v37 = vld [vmem:[%s6147_s5 + $0x10] sm:$0xff] }
 0x1d5   : > { %v3377_v13 = vpop.f32.mrf.mxu1  ;;  %3731 = vmatpush1.bf16.msra.mxu0 %v4846_v0  ;;  %3762 = vmatprep.mubr.bf16.mxu0 %v4973_v40  ;;  %v4814_v0 = vcombine.low %v772_v47, %v776_v48 }
 0x1d6   : > { %v3378_v16 = vadd.f32 %v3377_v13, %v3335_v8  ;;  %3704 = vmatpush2.bf16.msra.mxu1 %v4782_v2  ;;  %v3422_v17 = vpop.f32.mrf.mxu0  ;;  %3732 = vmatprep.subr.bf16.mxu0 %v4839_v5  ;;  %v4807_v2 = vcombine.high %v764_v60, %v768_v21  ;;  %v4743_v5 = vcombine.high %v700_v62, %v704_v63  ;;  %v748_v13 = vld [vmem:[%s5054_s15 + $0xc18] sm:$0xff] }
 0x1d7   : > { %v3379_v22 = vpop.f32.mrf.mxu1  ;;  %3705 = vmatprep.subr.bf16.mxu1 %v4775_v6  ;;  %v760_v6 = vld [vmem:[%s5054_s15 + $0xc78] sm:$0xff]  ;;  %v4806_v8 = vcombine.low %v764_v60, %v768_v21 }
 0x1d8   : > { %v3421_v27 = vadd.f32 %v3420_v9, %v3378_v16  ;;  %v3380_v40 = vadd.f32 %v3379_v22, %v3337_v15  ;;  %v3424_v35 = vpop.f32.mrf.mxu0  ;;  %v4742_v9 = vcombine.low %v700_v62, %v704_v63  ;;  %v4799_v10 = vcombine.high %v756_v33, %v760_v6  ;;  %v688_v15 = vld [vmem:[%s5054_s15 + $0xa38] sm:$0xff] }
 0x1d9   : > { %v3381_v34 = vpop.f32.mrf.mxu1  ;;  %3733 = vmatpush1.bf16.msra.mxu0 %v4838_v11  ;;  %v684_v11 = vld [vmem:[%s5054_s15 + $0xa18] sm:$0xff]  ;;  %v4798_v16 = vcombine.low %v756_v33, %v760_v6 }
 0x1da   : > { %v3775_v41 = vadd.f32 %v3421_v27, %v339_v37  ;;  %v3423_v42 = vadd.f32 %v3422_v17, %v3380_v40  ;;  %v3382_v43 = vadd.f32 %v3381_v34, %v3339_v25  ;;  %3706 = vmatpush2.bf16.msra.mxu1 %v4774_v14  ;;  %3734 = vmatprep.subr.bf16.mxu0 %v4831_v18  ;;  %v3426_v54 = vpop.f32.mrf.mxu0  ;;  %v752_v14 = vld [vmem:[%s5054_s15 + $0xc38] sm:$0xff] }
 0x1db   : > { %v3383_v45 = vpop.f32.mrf.mxu1  ;;  %3707 = vmatprep.subr.bf16.mxu1 %v4767_v23  ;;  %v4734_v17 = vcombine.low %v692_v24, %v696_v7  ;;  %v4791_v18 = vcombine.high %v748_v13, %v752_v14  ;;  %v4727_v19 = vcombine.high %v684_v11, %v688_v15  ;;  %v4790_v20 = vcombine.low %v748_v13, %v752_v14  ;;  %v344_v14 = vld [vmem:[%s6147_s5 + $0x38] sm:$0xff] }
 0x1dc   : > { %3791 = vst [vmem:[%s6147_s5 + $0x10] sm:$0xff] %v3775_v41  ;;  %v3776_v49 = vadd.f32 %v3423_v42, %v340_v31  ;;  %v3425_v50 = vadd.f32 %v3424_v35, %v3382_v43  ;;  %v3384_v51 = vadd.f32 %v3383_v45, %v3341_v30  ;;  %v4726_v37 = vcombine.low %v684_v11, %v688_v15  ;;  %v342_v45 = vld [vmem:[%s6147_s5 + $0x28] sm:$0xff] }
 0x1dd   : > { %3735 = vmatpush1.bf16.msra.mxu0 %v4830_v38 }
 0x1de   : > { %3792 = vst [vmem:[%s6147_s5 + $0x18] sm:$0xff] %v3776_v49  ;;  %v3783_v1 = vadd.f32 %v3425_v50, %v347_v44  ;;  %v3427_v4 = vadd.f32 %v3426_v54, %v3384_v51  ;;  %3708 = vmatpush2.bf16.msra.mxu1 %v4766_v36  ;;  %3736 = vmatprep.subr.bf16.mxu0 %v4823_v39  ;;  %v349_v51 = vld [vmem:[%s6147_s5 + $0x60] sm:$0xff] }
 0x1df   : > { %3709 = vmatprep.subr.bf16.mxu1 %v4759_v46 }
 0x1e0   : > { %3799 = vst [vmem:[%s6147_s5 + $0x50] sm:$0xff] %v3783_v1  ;;  %v3784_v61 = vadd.f32 %v3427_v4, %v348_v53 }
 0x1e1   : > { %3737 = vmatpush1.bf16.msra.mxu0 %v4822_v57  ;;  %v350_v57 = vld [vmem:[%s6147_s5 + $0x68] sm:$0xff] }
 0x1e2   : > { %3800 = vst [vmem:[%s6147_s5 + $0x58] sm:$0xff] %v3784_v61  ;;  %3710 = vmatpush2.bf16.msra.mxu1 %v4758_v55  ;;  %3738 = vmatprep.subr.bf16.mxu0 %v4815_v58 }
 0x1e3   : > { %3711 = vmatprep.subr.bf16.mxu1 %v4751_v59 }
 0x1e5   : > { %3739 = vmatpush1.bf16.msra.mxu0 %v4814_v0 }
 0x1e6   : > { %3712 = vmatpush2.bf16.msra.mxu1 %v4750_v3  ;;  %3740 = vmatprep.subr.bf16.mxu0 %v4807_v2 }
 0x1e7   : > { %3713 = vmatprep.subr.bf16.mxu1 %v4743_v5 }
 0x1e9   : > { %3741 = vmatpush1.bf16.msra.mxu0 %v4806_v8  ;;  %v343_v8 = vld [vmem:[%s6147_s5 + $0x30] sm:$0xff] }
 0x1ea   : > { %3714 = vmatpush2.bf16.msra.mxu1 %v4742_v9  ;;  %3742 = vmatprep.subr.bf16.mxu0 %v4799_v10 }
 0x1eb   : > { %3715 = vmatprep.subr.bf16.mxu1 %v4735_v12 }
 0x1ed   : > { %3743 = vmatpush1.bf16.msra.mxu0 %v4798_v16 }
 0x1ee   : > { %3716 = vmatpush2.bf16.msra.mxu1 %v4734_v17  ;;  %3744 = vmatprep.subr.bf16.mxu0 %v4791_v18 }
 0x1ef   : > { %3717 = vmatprep.subr.bf16.mxu1 %v4727_v19 }
 0x1f1   : > { %3745 = vmatpush1.bf16.msra.mxu0 %v4790_v20  ;;  %v351_v20 = vld [vmem:[%s6147_s5 + $0x70] sm:$0xff] }
 0x1f2   : > { %3718 = vmatpush2.bf16.msra.mxu1 %v4726_v37 }
 0x1f4   : > { %3763 = vmatmul.mubr.bf16.vlgmr.msra.gmra.mxu0 %v5498_v26  ;;  %v341_v26 = vld [vmem:[%s6147_s5 + $0x20] sm:$0xff] }
 0x1f5   : > { %3720 = vmatmul.mubr.bf16.vlgmr.msra.gmra.mxu1 %v5557_v56 }
 0x214   : > { %v3463_v23 = vpop.f32.mrf.mxu0 }
 0x215   : > { %v3506_v22 = vpop.f32.mrf.mxu1 }
 0x216   : > { %v3465_v27 = vpop.f32.mrf.mxu0  ;;  %v3507_v34 = vadd.f32 %v3506_v22, %v3463_v23 }
 0x217   : > { %v3508_v25 = vpop.f32.mrf.mxu1 }
 0x218   : > { %v3467_v28 = vpop.f32.mrf.mxu0  ;;  %v3509_v38 = vadd.f32 %v3508_v25, %v3465_v27  ;;  %v352_v27 = vld [vmem:[%s6147_s5 + $0x78] sm:$0xff] }
 0x219   : > { %v3510_v40 = vpop.f32.mrf.mxu1 }
 0x21a   : > { %v3469_v31 = vpop.f32.mrf.mxu0  ;;  %v3511_v56 = vadd.f32 %v3510_v40, %v3467_v28 }
 0x21b   : > { %v3512_v29 = vpop.f32.mrf.mxu1 }
 0x21c   : > { %v3513_v47 = vadd.f32 %v3512_v29, %v3469_v31 }
 0x235   : > { %v3592_v30 = vpop.f32.mrf.mxu1 }
 0x237   : > { %v3594_v35 = vpop.f32.mrf.mxu1 }
 0x239   : > { %v3596_v44 = vpop.f32.mrf.mxu1 }
 0x23b   : > { %v3598_v55 = vpop.f32.mrf.mxu1 }
 0x254   : > { %v3549_v36 = vpop.f32.mrf.mxu0 }
 0x255   : > { %v3550_v39 = vadd.f32 %v3549_v36, %v3507_v34 }
 0x256   : > { %v3551_v41 = vpop.f32.mrf.mxu0 }
 0x257   : > { %v3593_v42 = vadd.f32 %v3592_v30, %v3550_v39  ;;  %v3552_v43 = vadd.f32 %v3551_v41, %v3509_v38 }
 0x258   : > { %v3553_v46 = vpop.f32.mrf.mxu0 }
 0x259   : > { %v3777_v48 = vadd.f32 %v3593_v42, %v341_v26  ;;  %v3595_v49 = vadd.f32 %v3594_v35, %v3552_v43  ;;  %v3554_v50 = vadd.f32 %v3553_v46, %v3511_v56 }
 0x25a   : > { %v3555_v32 = vpop.f32.mrf.mxu0 }
 0x25b   : > { %3793 = vst [vmem:[%s6147_s5 + $0x20] sm:$0xff] %v3777_v48  ;;  %v3778_v52 = vadd.f32 %v3595_v49, %v342_v45  ;;  %v3597_v53 = vadd.f32 %v3596_v44, %v3554_v50  ;;  %v3556_v54 = vadd.f32 %v3555_v32, %v3513_v47 }
 0x25d   : > { %3794 = vst [vmem:[%s6147_s5 + $0x28] sm:$0xff] %v3778_v52  ;;  %v3785_v1 = vadd.f32 %v3597_v53, %v349_v51  ;;  %v3599_v4 = vadd.f32 %v3598_v55, %v3556_v54 }
 0x25f   : > { %3801 = vst [vmem:[%s6147_s5 + $0x60] sm:$0xff] %v3785_v1  ;;  %v3786_v58 = vadd.f32 %v3599_v4, %v350_v57 }
 0x261   : > { %3802 = vst [vmem:[%s6147_s5 + $0x68] sm:$0xff] %v3786_v58 }
 0x275   : > { %v3635_v60 = vpop.f32.mrf.mxu1 }
 0x277   : > { %v3637_v61 = vpop.f32.mrf.mxu1 }
 0x279   : > { %v3639_v63 = vpop.f32.mrf.mxu1 }
 0x27b   : > { %v3641_v3 = vpop.f32.mrf.mxu1 }
 0x294   : > { %v3678_v59 = vpop.f32.mrf.mxu0 }
 0x295   : > { %v3679_v2 = vadd.f32 %v3678_v59, %v3635_v60 }
 0x296   : > { %v3680_v21 = vpop.f32.mrf.mxu0 }
 0x297   : > { %v3681_v6 = vadd.f32 %v3680_v21, %v3637_v61 }
 0x298   : > { %v3682_v62 = vpop.f32.mrf.mxu0 }
 0x299   : > { %v3683_v10 = vadd.f32 %v3682_v62, %v3639_v63 }
 0x29a   : > { %v3684_v0 = vpop.f32.mrf.mxu0 }
 0x29b   : > { %v3685_v16 = vadd.f32 %v3684_v0, %v3641_v3 }
 0x2b4   : > { %v3764_v5 = vpop.f32.mrf.mxu0 }
 0x2b5   : > { %v3721_v33 = vpop.f32.mrf.mxu1 }
 0x2b6   : > { %v3722_v24 = vadd.f32 %v3721_v33, %v3679_v2  ;;  %v3766_v7 = vpop.f32.mrf.mxu0 }
 0x2b7   : > { %v3723_v9 = vpop.f32.mrf.mxu1 }
 0x2b8   : > { %v3765_v12 = vadd.f32 %v3764_v5, %v3722_v24  ;;  %v3724_v13 = vadd.f32 %v3723_v9, %v3681_v6  ;;  %v3768_v15 = vpop.f32.mrf.mxu0 }
 0x2b9   : > { %v3725_v11 = vpop.f32.mrf.mxu1 }
 0x2ba   : > { %v3779_v17 = vadd.f32 %v3765_v12, %v343_v8  ;;  %v3767_v18 = vadd.f32 %v3766_v7, %v3724_v13  ;;  %v3726_v19 = vadd.f32 %v3725_v11, %v3683_v10  ;;  %v3770_v40 = vpop.f32.mrf.mxu0 }
 0x2bb   : > { %v3727_v37 = vpop.f32.mrf.mxu1 }
 0x2bc   : > { %3795 = vst [vmem:[%s6147_s5 + $0x30] sm:$0xff] %v3779_v17  ;;  %v3780_v22 = vadd.f32 %v3767_v18, %v344_v14  ;;  %v3769_v23 = vadd.f32 %v3768_v15, %v3726_v19  ;;  %v3728_v25 = vadd.f32 %v3727_v37, %v3685_v16 }
 0x2be   : > { %3796 = vst [vmem:[%s6147_s5 + $0x38] sm:$0xff] %v3780_v22  ;;  %v3787_v28 = vadd.f32 %v3769_v23, %v351_v20  ;;  %v3771_v29 = vadd.f32 %v3770_v40, %v3728_v25  ;;  %3808 = sbr.rel (%p4848_p11) target bundleno = 804 (0x324), region = 74 }
 0x2c0   : > { %3803 = vst [vmem:[%s6147_s5 + $0x70] sm:$0xff] %v3787_v28  ;;  %v3788_v30 = vadd.f32 %v3771_v29, %v352_v27 }
 0x2c2   : > { %3804 = vst [vmem:[%s6147_s5 + $0x78] sm:$0xff] %v3788_v30 }
 0x2c3   : > { %v3827_v31 = vlaneseq  ;;  %v5731_v35 = vld [vmem:[%s6144_s2] sm:$0xff]  ;;  %v3810_v41 = vld [vmem:[%s6147_s5 + $0x8] sm:$0xff]  ;;  %v3811_v45 = vld [vmem:[%s6147_s5 + $0x10] sm:$0xff] }
 0x2c4   : > { %v3809_v26 = vld [vmem:[%s6147_s5] sm:$0xff]  ;;  %v3812_v47 = vld [vmem:[%s6147_s5 + $0x18] sm:$0xff]  ;;  %v3814_v62 = vld [vmem:[%s6147_s5 + $0x28] sm:$0xff] }
 0x2c5   : > { %v5726_v34 = vshrl.u32 %v3827_v31, 7  ;;  %v3813_v51 = vld [vmem:[%s6147_s5 + $0x20] sm:$0xff]  ;;  %v3815_v15 = vld [vmem:[%s6147_s5 + $0x30] sm:$0xff] }
 0x2c6   : > { %v5786_v52 = vld [vmem:[%s6145_s3] sm:$0xff] }
 0x2c7   : > { %v3829_v36 = vsub.s32 0, %v5726_v34  ;;  %v3833_v38 = vsub.s32 1, %v5726_v34  ;;  %v5736_v39 = vsub.s32 2, %v5726_v34  ;;  %v5745_v56 = vsub.s32 3, %v5726_v34  ;;  %v5810_v58 = vld [vmem:[%s6146_s4] sm:$0xff] }
 0x2c8   : > { %v5748_v42 = vsub.s32 4, %v5726_v34  ;;  %vm3888_vm0 = vcmp.lt.s32.totalorder %v5726_v34, 4  ;;  %v5781_v32 = vsub.s32 5, %v5726_v34  ;;  %v5805_v4 = vsub.s32 6, %v5726_v34 }
 0x2c9   : > { %v5751_v43 = vrot.slane %v5731_v35, %v3829_v36  ;;  %v5754_v44 = vrot.slane %v5731_v35, %v3833_v38  ;;  %v5762_v46 = vrot.slane %v5731_v35, %v5736_v39  ;;  %v5775_v50 = vrot.slane %v5731_v35, %v5745_v56 }
 0x2ca   : > { %v5793_v54 = vrot.slane %v5731_v35, %v5748_v42  ;;  %v5822_v63 = vrot.slane %v5786_v52, %v3829_v36  ;;  %v5829_v2 = vrot.slane %v5731_v35, %v5781_v32  ;;  %v5835_v7 = vrot.slane %v5810_v58, %v3829_v36 }
 0x2cb   : > { %v5768_v48 = vadd.f32 %v5751_v43, %v3809_v26  ;;  %v5771_v49 = vadd.f32 %v5754_v44, %v3810_v41  ;;  %v5789_v53 = vadd.f32 %v5762_v46, %v3811_v45  ;;  %v5802_v1 = vadd.f32 %v5775_v50, %v3812_v47 }
 0x2cc   : > { %v5816_v61 = vadd.f32 %v5793_v54, %v3813_v51  ;;  %v5838_v10 = vadd.f32 %v5829_v2, %v3814_v62  ;;  %v5841_v14 = vrot.slane %v5786_v52, %v3833_v38  ;;  %v5851_v19 = vrot.slane %v5731_v35, %v5805_v4 }
 0x2cd   : > { %v3890_v55 = vsel %vm3888_vm0, %v5768_v48, 0.0  ;;  %v3891_v57 = vsel %vm3888_vm0, %v5771_v49, 0.0  ;;  %v3892_v21 = vsel %vm3888_vm0, %v5789_v53, 0.0  ;;  %v3893_v3 = vsel %vm3888_vm0, %v5802_v1, 0.0 }
 0x2ce   : > { %v3907_v59 = vrot.slane %v3890_v55, 4  ;;  %v3914_v60 = vrot.slane %v3891_v57, 4  ;;  %v3921_v0 = vrot.slane %v3892_v21, 4  ;;  %v3928_v6 = vrot.slane %v3893_v3, 4 }
 0x2cf   : > { %v3894_v24 = vsel %vm3888_vm0, %v5816_v61, 0.0  ;;  %v3895_v18 = vsel %vm3888_vm0, %v5838_v10, 0.0  ;;  %v5854_v25 = vrot.slane %v5810_v58, %v3833_v38  ;;  %v5857_v28 = vadd.f32 %v5851_v19, %v3815_v15 }
 0x2d0   : > { %v3908_v5 = vadd.f32 %v3907_v59, %v3890_v55  ;;  %v3915_v33 = vadd.f32 %v3914_v60, %v3891_v57  ;;  %v3922_v8 = vadd.f32 %v3921_v0, %v3892_v21  ;;  %v3935_v9 = vrot.slane %v3894_v24, 4 }
 0x2d1   : > { %v3929_v11 = vadd.f32 %v3928_v6, %v3893_v3  ;;  %v3942_v23 = vrot.slane %v3895_v18, 4  ;;  %v5861_v41 = vrot.slane %v5786_v52, %v5736_v39  ;;  %v3896_v38 = vsel %vm3888_vm0, %v5857_v28, 0.0 }
 0x2d2   : > { %v3909_v12 = vrot.slane %v3908_v5, 2  ;;  %v3916_v13 = vrot.slane %v3915_v33, 2  ;;  %v3923_v16 = vrot.slane %v3922_v8, 2  ;;  %v3936_v17 = vadd.f32 %v3935_v9, %v3894_v24  ;;  %v3816_v9 = vld [vmem:[%s6147_s5 + $0x38] sm:$0xff] }
 0x2d3   : > { %v3930_v22 = vrot.slane %v3929_v11, 2  ;;  %v3943_v36 = vadd.f32 %v3942_v23, %v3895_v18  ;;  %v3949_v21 = vrot.slane %v3896_v38, 4  ;;  %v5867_v62 = vsub.s32 7, %v5726_v34 }
 0x2d4   : > { %v3910_v20 = vadd.f32 %v3909_v12, %v3908_v5  ;;  %v3917_v37 = vadd.f32 %v3916_v13, %v3915_v33  ;;  %v3924_v27 = vadd.f32 %v3923_v16, %v3922_v8  ;;  %v3937_v40 = vrot.slane %v3936_v17, 2 }
 0x2d5   : > { %v3931_v31 = vadd.f32 %v3930_v22, %v3929_v11  ;;  %v3944_v57 = vrot.slane %v3943_v36, 2  ;;  %6152 = vst [vmem:[#allocation3_spill] sm:$0xff] %v5867_v62  ;;  %v3950_v8 = vadd.f32 %v3949_v21, %v3896_v38  ;;  %v5880_v12 = vrot.slane %v5731_v35, %v5867_v62 }
 0x2d6   : > { %v3911_v29 = vrot.slane %v3910_v20, 1  ;;  %v3918_v30 = vrot.slane %v3917_v37, 1  ;;  %v3925_v26 = vrot.slane %v3924_v27, 1  ;;  %v3938_v45 = vadd.f32 %v3937_v40, %v3936_v17 }
 0x2d7   : > { %v3932_v55 = vrot.slane %v3931_v31, 1  ;;  %v3945_v33 = vadd.f32 %v3944_v57, %v3943_v36  ;;  %6153 = vst [vmem:[#allocation4_spill] sm:$0xff] %v5880_v12  ;;  %v5898_v18 = vrot.slane %v5810_v58, %v5736_v39  ;;  %v5945_v21 = vrot.slane %v5810_v58, %v5748_v42 }
 0x2d8   : > { %v3912_v47 = vadd.f32 %v3911_v29, %v3910_v20  ;;  %v3919_v51 = vadd.f32 %v3918_v30, %v3917_v37  ;;  %v3926_v59 = vadd.f32 %v3925_v26, %v3924_v27  ;;  %v3939_v60 = vrot.slane %v3938_v45, 1 }
 0x2d9   : > { %v3933_v5 = vadd.f32 %v3932_v55, %v3931_v31  ;;  %v3946_v16 = vrot.slane %v3945_v33, 1  ;;  %v3951_v20 = vrot.slane %v3950_v8, 2  ;;  %v5910_v37 = vrot.slane %v5786_v52, %v5745_v56  ;;  %6154 = vst [vmem:[#allocation5_spill] sm:$0xff] %v5945_v21 }
 0x2da   : > { %v5869_v0 = vmul.f32 0.25, %v3912_v47  ;;  %v5871_v3 = vmul.f32 0.25, %v3919_v51  ;;  %v5873_v6 = vmul.f32 0.25, %v3926_v59  ;;  %v3940_v24 = vadd.f32 %v3939_v60, %v3938_v45 }
 0x2db   : > { %v5890_v15 = vmul.f32 0.25, %v3933_v5  ;;  %v5920_v27 = vrot.slane %v5810_v58, %v5745_v56  ;;  %v3947_v31 = vadd.f32 %v3946_v16, %v3945_v33  ;;  %v5932_v45 = vrot.slane %v5786_v52, %v5748_v42 }
 0x2dc   : > { %v5884_v13 = vsub.f32 %v5768_v48, %v5869_v0  ;;  %v5888_v11 = vsub.f32 %v5771_v49, %v5871_v3  ;;  %v5894_v17 = vsub.f32 %v5789_v53, %v5873_v6  ;;  %v5900_v35 = vmul.f32 0.25, %v3940_v24 }
 0x2dd   : > { %v5913_v53 = vadd.f32 %v5880_v12, %v3816_v9  ;;  %v5924_v29 = vsub.f32 %v5802_v1, %v5890_v15  ;;  %v3952_v38 = vadd.f32 %v3951_v20, %v3950_v8  ;;  %v5947_v5 = vmul.f32 0.25, %v3947_v31 }
 0x2de   : > { %v3986_v48 = vsel %vm3888_vm0, %v5884_v13, 0.0  ;;  %v3987_v49 = vsel %vm3888_vm0, %v5888_v11, 0.0  ;;  %v3988_v23 = vsel %vm3888_vm0, %v5894_v17, 0.0  ;;  %v5928_v30 = vsub.f32 %v5816_v61, %v5900_v35 }
 0x2df   : > { %v4002_v39 = vmul.f32 %v3986_v48, %v3986_v48  ;;  %v4003_v22 = vmul.f32 %v3987_v49, %v3987_v49  ;;  %v4004_v40 = vmul.f32 %v3988_v23, %v3988_v23  ;;  %v3989_v56 = vsel %vm3888_vm0, %v5924_v29, 0.0 }
 0x2e0   : > { %v3990_v1 = vsel %vm3888_vm0, %v5928_v30, 0.0  ;;  %v3897_v61 = vsel %vm3888_vm0, %v5913_v53, 0.0  ;;  %v4005_v57 = vmul.f32 %v3989_v56, %v3989_v56  ;;  %v3953_v33 = vrot.slane %v3952_v38, 1 }
 0x2e1   : > { %v4019_v36 = vrot.slane %v4002_v39, 4  ;;  %v4026_v26 = vrot.slane %v4003_v22, 4  ;;  %v4033_v47 = vrot.slane %v4004_v40, 4  ;;  %v4006_v59 = vmul.f32 %v3990_v1, %v3990_v1 }
 0x2e2   : > { %v4040_v9 = vrot.slane %v4005_v57, 4  ;;  %v5951_v48 = vsub.f32 %v5838_v10, %v5947_v5  ;;  %v3954_v49 = vadd.f32 %v3953_v33, %v3952_v38 }
 0x2e3   : > { %v4020_v51 = vadd.f32 %v4019_v36, %v4002_v39  ;;  %v4027_v55 = vadd.f32 %v4026_v26, %v4003_v22  ;;  %v4034_v60 = vadd.f32 %v4033_v47, %v4004_v40  ;;  %v4047_v16 = vrot.slane %v4006_v59, 4 }
 0x2e4   : > { %v3956_v39 = vrot.slane %v3897_v61, 4  ;;  %v4041_v40 = vadd.f32 %v4040_v9, %v4005_v57  ;;  %v3991_v31 = vsel %vm3888_vm0, %v5951_v48, 0.0  ;;  %v5958_v26 = vrot.slane %v5786_v52, %v5781_v32 }
 0x2e5   : > { %v4021_v24 = vrot.slane %v4020_v51, 2  ;;  %v4028_v8 = vrot.slane %v4027_v55, 2  ;;  %v4035_v20 = vrot.slane %v4034_v60, 2  ;;  %v4048_v36 = vadd.f32 %v4047_v16, %v4006_v59 }
 0x2e6   : > { %v5960_v47 = vmul.f32 0.25, %v3954_v49  ;;  %v4042_v1 = vrot.slane %v4041_v40, 2  ;;  %v3957_v57 = vadd.f32 %v3956_v39, %v3897_v61  ;;  %v6037_v34 = vmul.f32 %v5958_v26, %v5951_v48 }
 0x2e7   : > { %v4022_v22 = vadd.f32 %v4021_v24, %v4020_v51  ;;  %v4029_v23 = vadd.f32 %v4028_v8, %v4027_v55  ;;  %v4036_v42 = vadd.f32 %v4035_v20, %v4034_v60  ;;  %v4049_v38 = vrot.slane %v4048_v36, 2 }
 0x2e8   : > { %v4007_v51 = vmul.f32 %v3991_v31, %v3991_v31  ;;  %v5964_v55 = vsub.f32 %v5857_v28, %v5960_v47  ;;  %v4043_v24 = vadd.f32 %v4042_v1, %v4041_v40  ;;  %v5968_v20 = vrot.slane %v5810_v58, %v5781_v32 }
 0x2e9   : > { %v4023_v56 = vrot.slane %v4022_v22, 1  ;;  %v4030_v10 = vrot.slane %v4029_v23, 1  ;;  %v4037_v33 = vrot.slane %v4036_v42, 1  ;;  %v4050_v8 = vadd.f32 %v4049_v38, %v4048_v36 }
 0x2ea   : > { %v4054_v16 = vrot.slane %v4007_v51, 4  ;;  %v3992_v49 = vsel %vm3888_vm0, %v5964_v55, 0.0  ;;  %v4044_v12 = vrot.slane %v4043_v24, 1 }
 0x2eb   : > { %v4024_v59 = vadd.f32 %v4023_v56, %v4022_v22  ;;  %v4031_v60 = vadd.f32 %v4030_v10, %v4029_v23  ;;  %v4038_v9 = vadd.f32 %v4037_v33, %v4036_v42  ;;  %v4051_v28 = vrot.slane %v4050_v8, 1 }
 0x2ec   : > { %v4055_v61 = vadd.f32 %v4054_v16, %v4007_v51  ;;  %v4008_v39 = vmul.f32 %v3992_v49, %v3992_v49  ;;  %v3958_v22 = vrot.slane %v3957_v57, 2  ;;  %v4045_v36 = vadd.f32 %v4044_v12, %v4043_v24  ;;  %v3817_v51 = vld [vmem:[%s6147_s5 + $0x40] sm:$0xff]  ;;  %v3820_v24 = vld [vmem:[%s6147_s5 + $0x58] sm:$0xff] }
 0x2ed   : > { %v4074_v31 = vmul.f32 0.25, %v4024_v59  ;;  %v4075_v62 = vmul.f32 0.25, %v4031_v60  ;;  %v4076_v21 = vmul.f32 0.25, %v4038_v9  ;;  %v4052_v42 = vadd.f32 %v4051_v28, %v4050_v8 }
 0x2ee   : > { %v4056_v10 = vrot.slane %v4055_v61, 2  ;;  %v4061_v32 = vrot.slane %v4008_v39, 4  ;;  %v3959_v1 = vadd.f32 %v3958_v22, %v3957_v57  ;;  %v4077_v38 = vmul.f32 0.25, %v4045_v36  ;;  %v3819_v57 = vld [vmem:[%s6147_s5 + $0x50] sm:$0xff] }
 0x2ef   : > { %v4082_v23 = vadd.f32 1e-05, %v4074_v31  ;;  %v4083_v40 = vadd.f32 1e-05, %v4075_v62  ;;  %v4084_v56 = vadd.f32 1e-05, %v4076_v21  ;;  %v5975_v59 = vrot.slane %v5786_v52, %v5805_v4 }
 0x2f0   : > { %v4078_v33 = vmul.f32 0.25, %v4052_v42  ;;  %v4057_v60 = vadd.f32 %v4056_v10, %v4055_v61  ;;  %v4062_v62 = vadd.f32 %v4061_v32, %v4008_v39  ;;  %v3960_v12 = vrot.slane %v3959_v1, 1  ;;  %v3818_v21 = vld [vmem:[%s6147_s5 + $0x48] sm:$0xff] }
 0x2f1   : > { %4916 = vrsqrt.f32 %v4082_v23  ;;  %v4085_v8 = vadd.f32 1e-05, %v4077_v38  ;;  %v5991_v16 = vrot.slane %v5810_v58, %v5805_v4  ;;  %v3875_v61 = vadd.f32 %v5751_v43, %v3817_v51  ;;  %v3822_v38 = vld [vmem:[%s6147_s5 + $0x68] sm:$0xff] }
 0x2f2   : > { %4918 = vrsqrt.f32 %v4083_v40  ;;  %v4086_v9 = vadd.f32 1e-05, %v4078_v33  ;;  %v4058_v49 = vrot.slane %v4057_v60, 1  ;;  %v4063_v31 = vrot.slane %v4062_v62, 2  ;;  %v3821_v40 = vld [vmem:[%s6147_s5 + $0x60] sm:$0xff] }
 0x2f3   : > { %4920 = vrsqrt.f32 %v4084_v56  ;;  %v3961_v28 = vadd.f32 %v3960_v12, %v3959_v1  ;;  %v3876_v39 = vadd.f32 %v5754_v44, %v3818_v21  ;;  %v3877_v22 = vadd.f32 %v5762_v46, %v3819_v57 }
 0x2f4   : > { %4922 = vrsqrt.f32 %v4085_v8  ;;  %v3878_v23 = vadd.f32 %v5775_v50, %v3820_v24  ;;  %v4059_v36 = vadd.f32 %v4058_v49, %v4057_v60  ;;  %v4064_v4 = vadd.f32 %v4063_v31, %v4062_v62 }
 0x2f5   : > { %4924 = vrsqrt.f32 %v4086_v9  ;;  %v6000_v42 = vmul.f32 0.25, %v3961_v28  ;;  %v4139_v56 = vmul.f32 %v5822_v63, %v5884_v13  ;;  %v4140_v43 = vmul.f32 %v5841_v14, %v5888_v11  ;;  %v3823_v13 = vld [vmem:[%s6147_s5 + $0x70] sm:$0xff] }
 0x2f6   : > { %v3978_v44 = vsub.f32 %v3875_v61, %v5869_v0  ;;  %v3979_v46 = vsub.f32 %v3876_v39, %v5871_v3  ;;  %v4079_v50 = vmul.f32 0.25, %v4059_v36  ;;  %v4065_v10 = vrot.slane %v4064_v4, 1 }
 0x2f7   : > { %v6010_v32 = vsub.f32 %v5913_v53, %v6000_v42  ;;  %v3879_v1 = vadd.f32 %v5793_v54, %v3821_v40  ;;  %v4141_v0 = vmul.f32 %v5861_v41, %v5894_v17  ;;  %v4142_v3 = vmul.f32 %v5910_v37, %v5924_v29 }
 0x2f8   : > { %v3980_v11 = vsub.f32 %v3877_v22, %v5873_v6  ;;  %v3981_v53 = vsub.f32 %v3878_v23, %v5890_v15  ;;  %v4087_v33 = vadd.f32 1e-05, %v4079_v50  ;;  %v4066_v54 = vadd.f32 %v4065_v10, %v4064_v4 }
 0x2f9   : > { %v3993_v51 = vsel %vm3888_vm0, %v6010_v32, 0.0  ;;  %v4147_v60 = vmul.f32 %v5822_v63, %v3978_v44  ;;  %v3982_v12 = vsub.f32 %v3879_v1, %v5900_v35  ;;  %v3880_v17 = vadd.f32 %v5829_v2, %v3822_v38 }
 0x2fa   : > { %v4009_v62 = vmul.f32 %v3993_v51, %v3993_v51  ;;  %v3881_v21 = vadd.f32 %v5851_v19, %v3823_v13  ;;  %v4143_v6 = vmul.f32 %v5932_v45, %v5928_v30  ;;  %4926 = vrsqrt.f32 %v4087_v33 }
 0x2fb   : > { %v4080_v15 = vmul.f32 0.25, %v4066_v54  ;;  %v4148_v29 = vmul.f32 %v5841_v14, %v3979_v46  ;;  %v3983_v63 = vsub.f32 %v3880_v17, %v5947_v5  ;;  %v6043_v19 = vmul.f32 %v5975_v59, %v5964_v55 }
 0x2fc   : > { %v4068_v57 = vrot.slane %v4009_v62, 4  ;;  %v3984_v35 = vsub.f32 %v3881_v21, %v5960_v47  ;;  %v4149_v30 = vmul.f32 %v5861_v41, %v3980_v11  ;;  %v4150_v8 = vmul.f32 %v5910_v37, %v3981_v53 }
 0x2fd   : > { %v4088_v2 = vadd.f32 1e-05, %v4080_v15  ;;  %v4151_v31 = vmul.f32 %v5932_v45, %v3982_v12  ;;  %v4152_v61 = vmul.f32 %v5958_v26, %v3983_v63 }
 0x2fe   : > { %v4917_v24 = vpop.eup %4916  ;;  %v4069_v49 = vadd.f32 %v4068_v57, %v4009_v62  ;;  %v6051_v41 = vmul.f32 %v5975_v59, %v3984_v35 }
 0x2ff   : > { %v4919_v14 = vpop.eup %4918  ;;  %v4155_v9 = vmul.f32 %v4917_v24, %v4139_v56  ;;  %v4163_v48 = vmul.f32 %v4917_v24, %v4147_v60  ;;  %4928 = vrsqrt.f32 %v4088_v2 }
 0x300   : > { %v4921_v28 = vpop.eup %4920  ;;  %v4156_v5 = vmul.f32 %v4919_v14, %v4140_v43  ;;  %v4164_v47 = vmul.f32 %v4919_v14, %v4148_v29  ;;  %v4070_v22 = vrot.slane %v4069_v49, 2  ;;  %v3824_v29 = vld [vmem:[%s6147_s5 + $0x78] sm:$0xff] }
 0x301   : > { %v4212_v39 = vadd.f32 %v5835_v7, %v4155_v9  ;;  %v4157_v55 = vmul.f32 %v4921_v28, %v4141_v0  ;;  %v4923_v37 = vpop.eup %4922  ;;  %v4220_v40 = vadd.f32 %v5835_v7, %v4163_v48  ;;  %v4165_v36 = vmul.f32 %v4921_v28, %v4149_v30  ;;  %v6156_v9 = vld [vmem:[#allocation4_spill] sm:$0xff] }
 0x302   : > { %v4213_v23 = vadd.f32 %v5854_v25, %v4156_v5  ;;  %v4221_v45 = vadd.f32 %v5854_v25, %v4164_v47  ;;  %v4925_v4 = vpop.eup %4924  ;;  %v4158_v43 = vmul.f32 %v4923_v37, %v4142_v3  ;;  %v4071_v50 = vadd.f32 %v4070_v22, %v4069_v49  ;;  %v6155_v25 = vld [vmem:[#allocation5_spill] sm:$0xff] }
 0x303   : > { %vm4228_vm1 = vcmp.ge.f32.partialorder %v4212_v39, 0.0  ;;  %v4244_v56 = vmul.f32 0.1, %v4212_v39  ;;  %v4214_v26 = vadd.f32 %v5898_v18, %v4157_v55  ;;  %v4159_v46 = vmul.f32 %v4925_v4, %v4143_v6 }
 0x304   : > { %vm4229_vm2 = vcmp.ge.f32.partialorder %v4213_v23, 0.0  ;;  %v4245_v44 = vmul.f32 0.1, %v4213_v23  ;;  %v4215_v1 = vadd.f32 %v5920_v27, %v4158_v43  ;;  %v4072_v13 = vrot.slane %v4071_v50, 1 }
 0x305   : > { %v4260_v59 = vsel %vm4228_vm1, %v4212_v39, %v4244_v56  ;;  %vm4230_vm3 = vcmp.ge.f32.partialorder %v4214_v26, 0.0  ;;  %v4246_v10 = vmul.f32 0.1, %v4214_v26  ;;  %v4216_v38 = vadd.f32 %v6155_v25, %v4159_v46 }
 0x306   : > { %4276 = vst [vmem:[%s6147_s5] sm:$0xff] %v4260_v59  ;;  %v4261_v7 = vsel %vm4229_vm2, %v4213_v23, %v4245_v44  ;;  %vm4236_vm4 = vcmp.ge.f32.partialorder %v4220_v40, 0.0  ;;  %vm4231_vm5 = vcmp.ge.f32.partialorder %v4215_v1, 0.0  ;;  %v4247_v3 = vmul.f32 0.1, %v4215_v1  ;;  %v6157_v23 = vld [vmem:[#allocation3_spill] sm:$0xff] }
 0x307   : > { %4277 = vst [vmem:[%s6147_s5 + $0x8] sm:$0xff] %v4261_v7  ;;  %v4262_v0 = vsel %vm4230_vm3, %v4214_v26, %v4246_v10  ;;  %v4252_v11 = vmul.f32 0.1, %v4220_v40  ;;  %vm4232_vm6 = vcmp.ge.f32.partialorder %v4216_v38, 0.0  ;;  %v4248_v53 = vmul.f32 0.1, %v4216_v38  ;;  %v4927_v54 = vpop.eup %4926 }
 0x308   : > { %4278 = vst [vmem:[%s6147_s5 + $0x10] sm:$0xff] %v4262_v0  ;;  %v4073_v33 = vadd.f32 %v4072_v13, %v4071_v50  ;;  %vm4237_vm7 = vcmp.ge.f32.partialorder %v4221_v45, 0.0  ;;  %v4263_v51 = vsel %vm4231_vm5, %v4215_v1, %v4247_v3  ;;  %v4253_v62 = vmul.f32 0.1, %v4221_v45 }
 0x309   : > { %v4268_v60 = vsel %vm4236_vm4, %v4220_v40, %v4252_v11  ;;  %v4222_v12 = vadd.f32 %v5898_v18, %v4165_v36  ;;  %4279 = vst [vmem:[%s6147_s5 + $0x18] sm:$0xff] %v4263_v51  ;;  %v4264_v17 = vsel %vm4232_vm6, %v4216_v38, %v4248_v53  ;;  %v4160_v21 = vmul.f32 %v4927_v54, %v6037_v34 }
 0x30a   : > { %v4081_v6 = vmul.f32 0.25, %v4073_v33  ;;  %4284 = vst [vmem:[%s6147_s5 + $0x40] sm:$0xff] %v4268_v60  ;;  %v4166_v15 = vmul.f32 %v4923_v37, %v4150_v8  ;;  %4280 = vst [vmem:[%s6147_s5 + $0x20] sm:$0xff] %v4264_v17  ;;  %v4269_v18 = vsel %vm4237_vm7, %v4221_v45, %v4253_v62  ;;  %v4167_v63 = vmul.f32 %v4925_v4, %v4151_v31 }
 0x30b   : > { %vm4238_vm8 = vcmp.ge.f32.partialorder %v4222_v12, 0.0  ;;  %v4254_v57 = vmul.f32 0.1, %v4222_v12  ;;  %v4217_v34 = vadd.f32 %v5968_v20, %v4160_v21  ;;  %4285 = vst [vmem:[%s6147_s5 + $0x48] sm:$0xff] %v4269_v18  ;;  %v4168_v2 = vmul.f32 %v4927_v54, %v4152_v61 }
 0x30c   : > { %v4089_v35 = vadd.f32 1e-05, %v4081_v6  ;;  %v4223_v24 = vadd.f32 %v5920_v27, %v4166_v15  ;;  %v4929_v30 = vpop.eup %4928  ;;  %v4224_v14 = vadd.f32 %v6155_v25, %v4167_v63  ;;  %v3882_v49 = vadd.f32 %v6156_v9, %v3824_v29 }
 0x30d   : > { %v4270_v8 = vsel %vm4238_vm8, %v4222_v12, %v4254_v57  ;;  %vm4233_vm9 = vcmp.ge.f32.partialorder %v4217_v34, 0.0  ;;  %v4249_v48 = vmul.f32 0.1, %v4217_v34  ;;  %v4161_v31 = vmul.f32 %v4929_v30, %v6043_v19 }
 0x30e   : > { %4930 = vrsqrt.f32 %v4089_v35  ;;  %4286 = vst [vmem:[%s6147_s5 + $0x50] sm:$0xff] %v4270_v8  ;;  %vm4239_vm10 = vcmp.ge.f32.partialorder %v4223_v24, 0.0  ;;  %v4255_v28 = vmul.f32 0.1, %v4223_v24  ;;  %vm4240_vm11 = vcmp.ge.f32.partialorder %v4224_v14, 0.0 }
 0x30f   : > { %v4256_v27 = vmul.f32 0.1, %v4224_v14  ;;  %v4265_v5 = vsel %vm4233_vm9, %v4217_v34, %v4249_v48  ;;  %v4218_v47 = vadd.f32 %v5991_v16, %v4161_v31  ;;  %v4225_v61 = vadd.f32 %v5968_v20, %v4168_v2 }
 0x310   : > { %v4169_v39 = vmul.f32 %v4929_v30, %v6051_v41  ;;  %4281 = vst [vmem:[%s6147_s5 + $0x28] sm:$0xff] %v4265_v5  ;;  %v4271_v19 = vsel %vm4239_vm10, %v4223_v24, %v4255_v28  ;;  %v4130_v40 = vrot.slane %v5786_v52, %v6157_v23  ;;  %v3985_v36 = vsub.f32 %v3882_v49, %v6000_v42 }
 0x311   : > { %v4272_v55 = vsel %vm4240_vm11, %v4224_v14, %v4256_v27  ;;  %vm4234_vm12 = vcmp.ge.f32.partialorder %v4218_v47, 0.0  ;;  %v4250_v22 = vmul.f32 0.1, %v4218_v47  ;;  %4287 = vst [vmem:[%s6147_s5 + $0x58] sm:$0xff] %v4271_v19  ;;  %vm4241_vm13 = vcmp.ge.f32.partialorder %v4225_v61, 0.0 }
 0x312   : > { %4288 = vst [vmem:[%s6147_s5 + $0x60] sm:$0xff] %v4272_v55  ;;  %v4257_v20 = vmul.f32 0.1, %v4225_v61  ;;  %v4226_v41 = vadd.f32 %v5991_v16, %v4169_v39  ;;  %v4146_v16 = vmul.f32 %v4130_v40, %v6010_v32  ;;  %v4154_v52 = vmul.f32 %v4130_v40, %v3985_v36 }
 0x313   : > { %v4266_v37 = vsel %vm4234_vm12, %v4218_v47, %v4250_v22  ;;  %v4203_v42 = vrot.slane %v5810_v58, %v6157_v23 }
 0x314   : > { %v4273_v45 = vsel %vm4241_vm13, %v4225_v61, %v4257_v20  ;;  %4282 = vst [vmem:[%s6147_s5 + $0x30] sm:$0xff] %v4266_v37  ;;  %vm4242_vm14 = vcmp.ge.f32.partialorder %v4226_v41, 0.0  ;;  %v4258_v4 = vmul.f32 0.1, %v4226_v41 }
 0x315   : > { %4289 = vst [vmem:[%s6147_s5 + $0x68] sm:$0xff] %v4273_v45 }
 0x316   : > { %v4274_v56 = vsel %vm4242_vm14, %v4226_v41, %v4258_v4 }
 0x317   : > { %4290 = vst [vmem:[%s6147_s5 + $0x70] sm:$0xff] %v4274_v56 }
 0x31b   : > { %v4931_v26 = vpop.eup %4930 }
 0x31c   : > { %v4162_v43 = vmul.f32 %v4931_v26, %v4146_v16  ;;  %v4170_v44 = vmul.f32 %v4931_v26, %v4154_v52 }
 0x31e   : > { %v4219_v46 = vadd.f32 %v4203_v42, %v4162_v43  ;;  %v4227_v50 = vadd.f32 %v4203_v42, %v4170_v44 }
 0x320   : > { %vm4235_vm15 = vcmp.ge.f32.partialorder %v4219_v46, 0.0  ;;  %v4251_v59 = vmul.f32 0.1, %v4219_v46  ;;  %vm4243_vm0 = vcmp.ge.f32.partialorder %v4227_v50, 0.0  ;;  %v4259_v10 = vmul.f32 0.1, %v4227_v50 }
 0x322   : > { %v4267_v1 = vsel %vm4235_vm15, %v4219_v46, %v4251_v59  ;;  %v4275_v7 = vsel %vm4243_vm0, %v4227_v50, %v4259_v10 }
 0x323   : > { %4283 = vst [vmem:[%s6147_s5 + $0x38] sm:$0xff] %v4267_v1  ;;  %4291 = vst [vmem:[%s6147_s5 + $0x78] sm:$0xff] %v4275_v7 }
 0x324 PF: > { %s15_s22 = sadd.s32 1, %s4970_s22   ;;  %s6158_s18 = smov %s4958_s19 }
 0x325   : > { %p12_p12 = scmp.ge.s32.totalorder %s15_s22, 9   ;;  %s6159_s19 = smov %s5039_s26 }
 0x326   : > { %s6160_s20 = smov %s4966_s21  ;;  %s6161_s21 = smov %s6163_s23 }
 0x327   :  { %14 = sbr.rel (!%p12_p12) target bundleno = 3 (0x3), region = 118 }

// kernel: discriminator_forward.9
= control target key start
LH: loop header
LB: loop body
LE: loop exit
PB: predicated region body
PF: predicated region fallthrough
CT: control target
= control target key end

     0   :  { %v191_v0 = vmov 0.0   ;;  %vm192_vm0 = vmmov 0   ;;  %s249_s1 = inlined_call_operand.vmem [shape: bf16[128,128], index: 1, kind: input, shape index: {}]   ;;  %s250_s0 = inlined_call_operand.vmem [shape: bf16[16,128], index: 0, kind: input, shape index: {}]   ;;  %s251_s2 = inlined_call_operand.vmem [shape: f32[1,128], index: 2, kind: input, shape index: {}]   ;;  %s252_s3 = inlined_call_operand.vmem [shape: f32[16,128], index: 3, kind: output, shape index: {}]  }
   0x1   :  { %160 = vmatprep.subr.bf16.mxu0 %v191_v0  ;;  %v182_v1 = vld [vmem:[%s249_s1 + $0x38] sm:$0xff]   ;;  %176 = vmatprep.mubr.msk.bf16.mxu0 %vm192_vm0, %v191_v0  ;;  %v183_v2 = vld [vmem:[%s249_s1 + $0x30] sm:$0xff]   ;;  %v184_v3 = vld [vmem:[%s249_s1 + $0x28] sm:$0xff]  }
   0x2   :  { %161 = vmatpush3.bf16.msra.mxu0 %v182_v1  ;;  %v185_v4 = vld [vmem:[%s249_s1 + $0x20] sm:$0xff]   ;;  %v186_v5 = vld [vmem:[%s249_s1 + $0x18] sm:$0xff]   ;;  %v187_v6 = vld [vmem:[%s249_s1 + $0x10] sm:$0xff]  }
   0x3   :  { %162 = vmatprep.subr.bf16.mxu0 %v191_v0  ;;  %v188_v7 = vld [vmem:[%s249_s1 + $0x8] sm:$0xff]   ;;  %v189_v8 = vld [vmem:[%s249_s1] sm:$0xff]  }
   0x4   :  { %v190_v9 = vld [vmem:[%s250_s0] sm:$0xff]  }
   0x5   :  { %v141_v10 = vld [vmem:[%s251_s2] ss:$0 sm:$0xff] }
   0x6   :  { %163 = vmatpush3.bf16.msra.mxu0 %v183_v2 }
   0x7   :  { %164 = vmatprep.subr.bf16.mxu0 %v191_v0 }
   0xa   :  { %165 = vmatpush3.bf16.msra.mxu0 %v184_v3 }
   0xb   :  { %166 = vmatprep.subr.bf16.mxu0 %v191_v0 }
   0xe   :  { %167 = vmatpush3.bf16.msra.mxu0 %v185_v4 }
   0xf   :  { %168 = vmatprep.subr.bf16.mxu0 %v191_v0 }
  0x12   :  { %169 = vmatpush3.bf16.msra.mxu0 %v186_v5 }
  0x13   :  { %170 = vmatprep.subr.bf16.mxu0 %v191_v0 }
  0x16   :  { %171 = vmatpush3.bf16.msra.mxu0 %v187_v6 }
  0x17   :  { %172 = vmatprep.subr.bf16.mxu0 %v191_v0 }
  0x1a   :  { %173 = vmatpush3.bf16.msra.mxu0 %v188_v7 }
  0x1b   :  { %174 = vmatprep.subr.bf16.mxu0 %v191_v0 }
  0x1e   :  { %175 = vmatpush3.bf16.msra.mxu0 %v189_v8 }
  0x21   :  { %177 = vmatmul.mubr.bf16.vlgmr.msra.gmra.mxu0 %v190_v9 }
  0xe1   :  { %v128_v11 = vpop.f32.mrf.mxu0 }
  0xe2   :  { %v129_v12 = vadd.f32 %v141_v10, %v128_v11 }
  0xe3   :  { %v178_v13 = vpop.f32.mrf.mxu0 }
  0xe4   :  { %135 = vst [vmem:[%s252_s3] sm:$0xff] %v129_v12 }
  0xe5   :  { %v131_v14 = vpop.f32.mrf.mxu0 }
  0xe6   :  { %v132_v15 = vadd.f32 %v141_v10, %v131_v14 }
  0xe7   :  { %v179_v16 = vpop.f32.mrf.mxu0 }
  0xe8   :  { %136 = vst [vmem:[%s252_s3 + $0x8] sm:$0xff] %v132_v15 }

</bundles_post_ra>
